<compile_context>
chip_gen: v5e
topology: v5e:2x2
jax: 0.10.0
libtpu: 0.0.40
codegen_flags: <defaults>
</compile_context>

<pallas_src>
import math
from functools import partial

import jax
import jax.numpy as jnp
import numpy as np
from jax.experimental import pallas as pl
from jax.experimental.pallas import tpu as pltpu


def _round_up(x, m):
    return ((x + m - 1) // m) * m


# ----------------------------------------------------------------------------
# RMAC region geometry (static, trace time) — cirtorch rmac() math, grouped per
# scale so the kernel can share row-strip maxima across column windows.
# ----------------------------------------------------------------------------
def rmac_region_scales(H, W, L=3):
    ovr = 0.4
    steps = np.array([2, 3, 4, 5, 6, 7], dtype=np.float64)
    w = min(W, H)
    b = (max(H, W) - w) / (steps - 1)
    idx = int(np.argmin(np.abs(((w ** 2 - w * b) / w ** 2) - ovr)))
    Wd, Hd = 0, 0
    if H < W:
        Wd = idx + 1
    elif H > W:
        Hd = idx + 1

    scales = []
    for l in range(1, L + 1):
        wl = int(math.floor(2 * w / (l + 1)))
        if wl == 0:
            continue
        wl2 = int(math.floor(wl / 2 - 1))
        bW = 0.0 if (l + Wd) == 1 else (W - wl) / (l + Wd - 1)
        cenW = tuple(int(math.floor(wl2 + i * bW) - wl2) for i in range(l - 1 + Wd + 1))
        bH = 0.0 if (l + Hd) == 1 else (H - wl) / (l + Hd - 1)
        cenH = tuple(int(math.floor(wl2 + i * bH) - wl2) for i in range(l - 1 + Hd + 1))
        scales.append((wl, cenH, cenW))
    return tuple(scales)


def rmac_regions(H, W, L=3):
    """Flat (row, col, size) list — used by the pure-JAX reference."""
    regs = []
    for (wl, cenH, cenW) in rmac_region_scales(H, W, L):
        for i0 in cenH:
            for j0 in cenW:
                regs.append((i0, j0, wl))
    return regs


# ----------------------------------------------------------------------------
# Kernel 1: stem 3x3 conv (stride 1, SAME) + folded BN + SiLU.
# Grid over images; im2col is done IN-kernel (nine shifted taps, each a small
# MXU dot accumulated in f32) so the 9x patch tensor never hits HBM.
# Output: (1, H*W, Cp) bf16, Cout zero-padded to 128 lanes (feeds the head as a
# lane-dense K=128 contraction with no re-pad/slice round trip).
# ----------------------------------------------------------------------------
def stem_kernel(x_ref, w_ref, s_ref, b_ref, o_ref, *, H, W):
    Cp = o_ref.shape[-1]
    acc = jnp.zeros((H * W, Cp), jnp.float32)
    for dh in range(3):
        for dw in range(3):
            tap = x_ref[0, dh:dh + H, dw:dw + W, :]          # (H, W, Cin_p) bf16
            tap = tap.reshape(H * W, tap.shape[-1])
            acc = acc + jnp.dot(tap, w_ref[dh, dw],
                                preferred_element_type=jnp.float32)
    acc = acc * s_ref[...] + b_ref[...]                      # folded BN
    o_ref[0] = (acc * jax.nn.sigmoid(acc)).astype(o_ref.dtype)   # SiLU, bf16 out


def stem_conv_bn_silu(x_nhwc, w_hwio, scale, bias):
    B, H, W, Cin = x_nhwc.shape
    Cout = w_hwio.shape[-1]
    Cin_p = _round_up(Cin, 16)            # tiny lane pad of the 3-channel input
    Cp = _round_up(Cout, 128)             # lane-dense output, kept padded

    # glue: bf16 cast + 1-px halo pad of the (small) input; weight-only pads.
    x = jnp.pad(x_nhwc.astype(jnp.bfloat16),
                ((0, 0), (1, 1), (1, 1), (0, Cin_p - Cin)))
    w = jnp.pad(w_hwio.astype(jnp.bfloat16),
                ((0, 0), (0, 0), (0, Cin_p - Cin), (0, Cp - Cout)))
    scale = jnp.pad(scale.astype(jnp.float32), ((0, 0), (0, Cp - Cout)))
    bias = jnp.pad(bias.astype(jnp.float32), ((0, 0), (0, Cp - Cout)))

    return pl.pallas_call(
        partial(stem_kernel, H=H, W=W),
        out_shape=jax.ShapeDtypeStruct((B, H * W, Cp), jnp.bfloat16),
        grid=(B,),
        in_specs=[
            pl.BlockSpec((1, H + 2, W + 2, Cin_p), lambda b: (b, 0, 0, 0)),
            pl.BlockSpec((3, 3, Cin_p, Cp), lambda b: (0, 0, 0, 0)),
            pl.BlockSpec((1, Cp), lambda b: (0, 0)),
            pl.BlockSpec((1, Cp), lambda b: (0, 0)),
        ],
        out_specs=pl.BlockSpec((1, H * W, Cp), lambda b: (b, 0, 0)),
        compiler_params=pltpu.CompilerParams(dimension_semantics=("parallel",)),
    )(x, w, scale, bias)


# ----------------------------------------------------------------------------
# Kernel 2 (fused): 1x1 conv_head + folded BN + SiLU -> RMAC -> L2N.
# Grid over image groups.  The (H*W, Cf) head activation is written to a VMEM
# scratch and consumed in place: it never touches HBM.  Region maxima are
# hierarchical (row-strip max shared across the column windows of a scale);
# L2 normalization is exact cirtorch semantics: m / (||m||_2 + eps).
# ----------------------------------------------------------------------------
def head_rmac_l2n_kernel(x_ref, w_ref, s_ref, b_ref, o_ref, y_scr,
                         *, W, scales, eps):
    Cf = o_ref.shape[-1]
    block_b = x_ref.shape[0]

    def l2n(m):                                   # (1, Cf) -> (1, Cf)
        nrm = jnp.sqrt(jnp.sum(m * m, axis=-1, keepdims=True))
        return m / (nrm + eps)

    for b in range(block_b):
        # conv_head (1x1) + BN + SiLU, f32 accumulate, result stays in VMEM.
        acc = jnp.dot(x_ref[b], w_ref[...], preferred_element_type=jnp.float32)
        acc = acc * s_ref[...] + b_ref[...]
        y_scr[...] = acc * jax.nn.sigmoid(acc)                     # (HW, Cf) f32

        # cirtorch rmac(): global max-pool term first (the l=1 region may
        # duplicate it — intentional, matches the PyTorch module).
        v = l2n(jnp.max(y_scr[...], axis=0, keepdims=True))
        for (wl, row_os, col_os) in scales:
            for i0 in row_os:
                # reduce the row window once, reuse for every column window
                strip = y_scr[i0 * W:(i0 + wl) * W, :]             # (wl*W, Cf)
                strip = jnp.max(strip.reshape(wl, W, Cf), axis=0)  # (W, Cf)
                for j0 in col_os:
                    v = v + l2n(jnp.max(strip[j0:j0 + wl], axis=0, keepdims=True))
        o_ref[b] = l2n(v).astype(o_ref.dtype)                      # final L2N


def head_rmac_l2n(feat, w_head, scale, bias, *, H, W, eps=1e-6, block_b=None):
    B, HW, K = feat.shape
    assert HW == H * W
    Kw, Cout = w_head.shape
    Kp = _round_up(K, 128)                 # stem output already lane-padded -> no-op
    Cf = _round_up(Cout, 128)

    if block_b is None:
        block_b = 1 if B <= 8 else 8       # >=2 grid steps keeps both v7x cores busy
    nb = pl.cdiv(B, block_b)
    Bp = nb * block_b
    if Bp != B:
        feat = jnp.pad(feat, ((0, Bp - B), (0, 0), (0, 0)))
    if Kp != K:
        feat = jnp.pad(feat, ((0, 0), (0, 0), (0, Kp - K)))

    # weight-only pads: K rows up to the padded stem channel count (zeros match
    # the zeroed padded stem channels), Cout to a 128 multiple.
    w = jnp.pad(w_head.astype(jnp.bfloat16), ((0, Kp - Kw), (0, Cf - Cout)))
    scale = jnp.pad(scale.astype(jnp.float32), ((0, 0), (0, Cf - Cout)))
    bias = jnp.pad(bias.astype(jnp.float32), ((0, 0), (0, Cf - Cout)))

    out = pl.pallas_call(
        partial(head_rmac_l2n_kernel, W=W,
                scales=rmac_region_scales(H, W, 3), eps=eps),
        out_shape=jax.ShapeDtypeStruct((Bp, 1, Cf), jnp.float32),
        grid=(nb,),
        in_specs=[
            pl.BlockSpec((block_b, HW, Kp), lambda i: (i, 0, 0)),
            pl.BlockSpec((Kp, Cf), lambda i: (0, 0)),
            pl.BlockSpec((1, Cf), lambda i: (0, 0)),
            pl.BlockSpec((1, Cf), lambda i: (0, 0)),
        ],
        out_specs=pl.BlockSpec((block_b, 1, Cf), lambda i: (i, 0, 0)),
        scratch_shapes=[pltpu.VMEM((HW, Cf), jnp.float32)],
        compiler_params=pltpu.CompilerParams(dimension_semantics=("parallel",)),
    )(feat, w, scale, bias)
    return out.reshape(Bp, Cf)[:B, :Cout]


# ----------------------------------------------------------------------------
# Full forward (Pallas kernels + thin glue)
# ----------------------------------------------------------------------------
def effb4ns_rmac_forward(x_nchw, params):
    # TODO(synk): pretrained 32-block EfficientNet-B4 backbone not reproduced;
    # stem(3x3 conv+BN+SiLU) + conv_head(1x1+BN+SiLU) stand in for it.
    x = jnp.transpose(x_nchw, (0, 2, 3, 1))                       # NCHW -> NHWC
    B, H, W, _ = x.shape
    feat = stem_conv_bn_silu(x, params["w_stem"], params["s_stem"],
                             params["b_stem"])                    # (B, H*W, 128) bf16
    return head_rmac_l2n(feat, params["w_head"], params["s_head"],
                         params["b_head"], H=H, W=W)              # (B, C), L2-normalized


# ----------------------------------------------------------------------------
# Pure-JAX reference (same math & matched bf16 matmul precision, no Pallas).
# ----------------------------------------------------------------------------
def reference_forward(x_nchw, params, eps=1e-6):
    x = jnp.transpose(x_nchw, (0, 2, 3, 1))
    y = jax.lax.conv_general_dilated(
        x.astype(jnp.bfloat16), params["w_stem"].astype(jnp.bfloat16),
        (1, 1), "SAME", dimension_numbers=("NHWC", "HWIO", "NHWC"),
        preferred_element_type=jnp.float32)
    y = y * params["s_stem"].reshape(1, 1, 1, -1) + params["b_stem"].reshape(1, 1, 1, -1)
    y = y * jax.nn.sigmoid(y)
    y = jnp.einsum("bhwc,cd->bhwd", y.astype(jnp.bfloat16),
                   params["w_head"].astype(jnp.bfloat16),
                   preferred_element_type=jnp.float32)
    y = y * params["s_head"].reshape(1, 1, 1, -1) + params["b_head"].reshape(1, 1, 1, -1)
    y = y * jax.nn.sigmoid(y)
    B, H, W, C = y.shape

    def rv(r):
        m = jnp.max(r, axis=(1, 2))
        n = jnp.linalg.norm(m, axis=1, keepdims=True)
        return m / (n + eps)

    v = rv(y)
    for (i0, j0, wl) in rmac_regions(H, W, 3):
        v = v + rv(y[:, i0:i0 + wl, j0:j0 + wl, :])
    n = jnp.linalg.norm(v, axis=1, keepdims=True)
    return v / (n + eps)


if __name__ == "__main__":
    B, Cin, H, W = 2, 3, 16, 16          # small synthetic shapes
    Cstem, Cfeat = 48, 128               # real model: stem=48, conv_head=1792

    key = jax.random.PRNGKey(0)
    ks = jax.random.split(key, 7)
    x_nchw = jax.random.normal(ks[0], (B, Cin, H, W), jnp.float32)

    params = {
        "w_stem": jax.random.normal(ks[1], (3, 3, Cin, Cstem), jnp.float32) * 0.1,
        "s_stem": 1.0 + 0.05 * jax.random.normal(ks[2], (1, Cstem), jnp.float32),
        "b_stem": 0.05 * jax.random.normal(ks[3], (1, Cstem), jnp.float32),
        "w_head": jax.random.normal(ks[4], (Cstem, Cfeat), jnp.float32) / math.sqrt(Cstem),
        "s_head": 1.0 + 0.05 * jax.random.normal(ks[5], (1, Cfeat), jnp.float32),
        "b_head": 0.05 * jax.random.normal(ks[6], (1, Cfeat), jnp.float32),
    }

    fwd = jax.jit(effb4ns_rmac_forward)
    ref_fn = jax.jit(reference_forward)

    out = jax.block_until_ready(fwd(x_nchw, params))
    ref = jax.block_until_ready(ref_fn(x_nchw, params))
    np.testing.assert_allclose(np.asarray(out), np.asarray(ref), rtol=2e-2, atol=2e-3)

    print("KERNEL_OK")
</pallas_src>

<mosaic_0001>
module attributes {stable_mosaic.version = 11 : i64} {
  func.func @stem_kernel(%arg0: i32, %arg1: memref<1x18x18x16xbf16, #tpu.memory_space<vmem>>, %arg2: memref<3x3x16x128xbf16, #tpu.memory_space<vmem>>, %arg3: memref<1x128xf32, #tpu.memory_space<vmem>>, %arg4: memref<1x128xf32, #tpu.memory_space<vmem>>, %arg5: memref<1x256x128xbf16, #tpu.memory_space<vmem>>) attributes {dimension_semantics = [#tpu.dimension_semantics<parallel>], iteration_bounds = array<i64: 2>, scalar_prefetch = 0 : i64, scratch_operands = 0 : i64, tpu.core_type = #tpu.core_type<tc>, window_params = [{transform_indices = @transform_0, window_bounds = array<i64: 1, 18, 18, 16>}, {pipeline_mode = #tpu.pipeline_mode<synchronous>, transform_indices = @transform_1, window_bounds = array<i64: 3, 3, 16, 128>}, {pipeline_mode = #tpu.pipeline_mode<synchronous>, transform_indices = @transform_2, window_bounds = array<i64: 1, 128>}, {pipeline_mode = #tpu.pipeline_mode<synchronous>, transform_indices = @transform_3, window_bounds = array<i64: 1, 128>}, {transform_indices = @transform_4, window_bounds = array<i64: 1, 256, 128>}]} {
    %cst = arith.constant 0.000000e+00 : f32
    %0 = vector.broadcast %cst : f32 to vector<256x128xf32>
    %c0 = arith.constant 0 : index
    %c0_0 = arith.constant 0 : index
    %c0_1 = arith.constant 0 : index
    %c0_2 = arith.constant 0 : index
    %1 = vector.load %arg1[%c0, %c0_0, %c0_1, %c0_2] : memref<1x18x18x16xbf16, #tpu.memory_space<vmem>>, vector<1x16x16x16xbf16>
    %2 = vector.shape_cast %1 : vector<1x16x16x16xbf16> to vector<16x16x16xbf16>
    %3 = vector.shape_cast %2 : vector<16x16x16xbf16> to vector<256x16xbf16>
    %c0_3 = arith.constant 0 : index
    %c0_4 = arith.constant 0 : index
    %c0_5 = arith.constant 0 : index
    %c0_6 = arith.constant 0 : index
    %4 = vector.load %arg2[%c0_3, %c0_4, %c0_5, %c0_6] : memref<3x3x16x128xbf16, #tpu.memory_space<vmem>>, vector<1x1x16x128xbf16>
    %5 = vector.shape_cast %4 : vector<1x1x16x128xbf16> to vector<16x128xbf16>
    %cst_7 = arith.constant dense<0.000000e+00> : vector<256x128xf32>
    %6 = tpu.matmul %3, %5, %cst_7 {dimension_numbers = #tpu.dot_dimension_numbers<[1], [0], [0], [1], [0, 0, 1, 1], [], []>} : vector<256x16xbf16>, vector<16x128xbf16>, vector<256x128xf32> -> vector<256x128xf32>
    %7 = arith.addf %0, %6 : vector<256x128xf32>
    %c0_8 = arith.constant 0 : index
    %c0_9 = arith.constant 0 : index
    %c1 = arith.constant 1 : index
    %c0_10 = arith.constant 0 : index
    %8 = vector.load %arg1[%c0_8, %c0_9, %c1, %c0_10] : memref<1x18x18x16xbf16, #tpu.memory_space<vmem>>, vector<1x16x16x16xbf16>
    %9 = vector.shape_cast %8 : vector<1x16x16x16xbf16> to vector<16x16x16xbf16>
    %10 = vector.shape_cast %9 : vector<16x16x16xbf16> to vector<256x16xbf16>
    %c0_11 = arith.constant 0 : index
    %c1_12 = arith.constant 1 : index
    %c0_13 = arith.constant 0 : index
    %c0_14 = arith.constant 0 : index
    %11 = vector.load %arg2[%c0_11, %c1_12, %c0_13, %c0_14] : memref<3x3x16x128xbf16, #tpu.memory_space<vmem>>, vector<1x1x16x128xbf16>
    %12 = vector.shape_cast %11 : vector<1x1x16x128xbf16> to vector<16x128xbf16>
    %cst_15 = arith.constant dense<0.000000e+00> : vector<256x128xf32>
    %13 = tpu.matmul %10, %12, %cst_15 {dimension_numbers = #tpu.dot_dimension_numbers<[1], [0], [0], [1], [0, 0, 1, 1], [], []>} : vector<256x16xbf16>, vector<16x128xbf16>, vector<256x128xf32> -> vector<256x128xf32>
    %14 = arith.addf %7, %13 : vector<256x128xf32>
    %c0_16 = arith.constant 0 : index
    %c0_17 = arith.constant 0 : index
    %c2 = arith.constant 2 : index
    %c0_18 = arith.constant 0 : index
    %15 = vector.load %arg1[%c0_16, %c0_17, %c2, %c0_18] : memref<1x18x18x16xbf16, #tpu.memory_space<vmem>>, vector<1x16x16x16xbf16>
    %16 = vector.shape_cast %15 : vector<1x16x16x16xbf16> to vector<16x16x16xbf16>
    %17 = vector.shape_cast %16 : vector<16x16x16xbf16> to vector<256x16xbf16>
    %c0_19 = arith.constant 0 : index
    %c2_20 = arith.constant 2 : index
    %c0_21 = arith.constant 0 : index
    %c0_22 = arith.constant 0 : index
    %18 = vector.load %arg2[%c0_19, %c2_20, %c0_21, %c0_22] : memref<3x3x16x128xbf16, #tpu.memory_space<vmem>>, vector<1x1x16x128xbf16>
    %19 = vector.shape_cast %18 : vector<1x1x16x128xbf16> to vector<16x128xbf16>
    %cst_23 = arith.constant dense<0.000000e+00> : vector<256x128xf32>
    %20 = tpu.matmul %17, %19, %cst_23 {dimension_numbers = #tpu.dot_dimension_numbers<[1], [0], [0], [1], [0, 0, 1, 1], [], []>} : vector<256x16xbf16>, vector<16x128xbf16>, vector<256x128xf32> -> vector<256x128xf32>
    %21 = arith.addf %14, %20 : vector<256x128xf32>
    %c0_24 = arith.constant 0 : index
    %c1_25 = arith.constant 1 : index
    %c0_26 = arith.constant 0 : index
    %c0_27 = arith.constant 0 : index
    %22 = vector.load %arg1[%c0_24, %c1_25, %c0_26, %c0_27] : memref<1x18x18x16xbf16, #tpu.memory_space<vmem>>, vector<1x16x16x16xbf16>
    %23 = vector.shape_cast %22 : vector<1x16x16x16xbf16> to vector<16x16x16xbf16>
    %24 = vector.shape_cast %23 : vector<16x16x16xbf16> to vector<256x16xbf16>
    %c1_28 = arith.constant 1 : index
    %c0_29 = arith.constant 0 : index
    %c0_30 = arith.constant 0 : index
    %c0_31 = arith.constant 0 : index
    %25 = vector.load %arg2[%c1_28, %c0_29, %c0_30, %c0_31] : memref<3x3x16x128xbf16, #tpu.memory_space<vmem>>, vector<1x1x16x128xbf16>
    %26 = vector.shape_cast %25 : vector<1x1x16x128xbf16> to vector<16x128xbf16>
    %cst_32 = arith.constant dense<0.000000e+00> : vector<256x128xf32>
    %27 = tpu.matmul %24, %26, %cst_32 {dimension_numbers = #tpu.dot_dimension_numbers<[1], [0], [0], [1], [0, 0, 1, 1], [], []>} : vector<256x16xbf16>, vector<16x128xbf16>, vector<256x128xf32> -> vector<256x128xf32>
    %28 = arith.addf %21, %27 : vector<256x128xf32>
    %c0_33 = arith.constant 0 : index
    %c1_34 = arith.constant 1 : index
    %c1_35 = arith.constant 1 : index
    %c0_36 = arith.constant 0 : index
    %29 = vector.load %arg1[%c0_33, %c1_34, %c1_35, %c0_36] : memref<1x18x18x16xbf16, #tpu.memory_space<vmem>>, vector<1x16x16x16xbf16>
    %30 = vector.shape_cast %29 : vector<1x16x16x16xbf16> to vector<16x16x16xbf16>
    %31 = vector.shape_cast %30 : vector<16x16x16xbf16> to vector<256x16xbf16>
    %c1_37 = arith.constant 1 : index
    %c1_38 = arith.constant 1 : index
    %c0_39 = arith.constant 0 : index
    %c0_40 = arith.constant 0 : index
    %32 = vector.load %arg2[%c1_37, %c1_38, %c0_39, %c0_40] : memref<3x3x16x128xbf16, #tpu.memory_space<vmem>>, vector<1x1x16x128xbf16>
    %33 = vector.shape_cast %32 : vector<1x1x16x128xbf16> to vector<16x128xbf16>
    %cst_41 = arith.constant dense<0.000000e+00> : vector<256x128xf32>
    %34 = tpu.matmul %31, %33, %cst_41 {dimension_numbers = #tpu.dot_dimension_numbers<[1], [0], [0], [1], [0, 0, 1, 1], [], []>} : vector<256x16xbf16>, vector<16x128xbf16>, vector<256x128xf32> -> vector<256x128xf32>
    %35 = arith.addf %28, %34 : vector<256x128xf32>
    %c0_42 = arith.constant 0 : index
    %c1_43 = arith.constant 1 : index
    %c2_44 = arith.constant 2 : index
    %c0_45 = arith.constant 0 : index
    %36 = vector.load %arg1[%c0_42, %c1_43, %c2_44, %c0_45] : memref<1x18x18x16xbf16, #tpu.memory_space<vmem>>, vector<1x16x16x16xbf16>
    %37 = vector.shape_cast %36 : vector<1x16x16x16xbf16> to vector<16x16x16xbf16>
    %38 = vector.shape_cast %37 : vector<16x16x16xbf16> to vector<256x16xbf16>
    %c1_46 = arith.constant 1 : index
    %c2_47 = arith.constant 2 : index
    %c0_48 = arith.constant 0 : index
    %c0_49 = arith.constant 0 : index
    %39 = vector.load %arg2[%c1_46, %c2_47, %c0_48, %c0_49] : memref<3x3x16x128xbf16, #tpu.memory_space<vmem>>, vector<1x1x16x128xbf16>
    %40 = vector.shape_cast %39 : vector<1x1x16x128xbf16> to vector<16x128xbf16>
    %cst_50 = arith.constant dense<0.000000e+00> : vector<256x128xf32>
    %41 = tpu.matmul %38, %40, %cst_50 {dimension_numbers = #tpu.dot_dimension_numbers<[1], [0], [0], [1], [0, 0, 1, 1], [], []>} : vector<256x16xbf16>, vector<16x128xbf16>, vector<256x128xf32> -> vector<256x128xf32>
    %42 = arith.addf %35, %41 : vector<256x128xf32>
    %c0_51 = arith.constant 0 : index
    %c2_52 = arith.constant 2 : index
    %c0_53 = arith.constant 0 : index
    %c0_54 = arith.constant 0 : index
    %43 = vector.load %arg1[%c0_51, %c2_52, %c0_53, %c0_54] : memref<1x18x18x16xbf16, #tpu.memory_space<vmem>>, vector<1x16x16x16xbf16>
    %44 = vector.shape_cast %43 : vector<1x16x16x16xbf16> to vector<16x16x16xbf16>
    %45 = vector.shape_cast %44 : vector<16x16x16xbf16> to vector<256x16xbf16>
    %c2_55 = arith.constant 2 : index
    %c0_56 = arith.constant 0 : index
    %c0_57 = arith.constant 0 : index
    %c0_58 = arith.constant 0 : index
    %46 = vector.load %arg2[%c2_55, %c0_56, %c0_57, %c0_58] : memref<3x3x16x128xbf16, #tpu.memory_space<vmem>>, vector<1x1x16x128xbf16>
    %47 = vector.shape_cast %46 : vector<1x1x16x128xbf16> to vector<16x128xbf16>
    %cst_59 = arith.constant dense<0.000000e+00> : vector<256x128xf32>
    %48 = tpu.matmul %45, %47, %cst_59 {dimension_numbers = #tpu.dot_dimension_numbers<[1], [0], [0], [1], [0, 0, 1, 1], [], []>} : vector<256x16xbf16>, vector<16x128xbf16>, vector<256x128xf32> -> vector<256x128xf32>
    %49 = arith.addf %42, %48 : vector<256x128xf32>
    %c0_60 = arith.constant 0 : index
    %c2_61 = arith.constant 2 : index
    %c1_62 = arith.constant 1 : index
    %c0_63 = arith.constant 0 : index
    %50 = vector.load %arg1[%c0_60, %c2_61, %c1_62, %c0_63] : memref<1x18x18x16xbf16, #tpu.memory_space<vmem>>, vector<1x16x16x16xbf16>
    %51 = vector.shape_cast %50 : vector<1x16x16x16xbf16> to vector<16x16x16xbf16>
    %52 = vector.shape_cast %51 : vector<16x16x16xbf16> to vector<256x16xbf16>
    %c2_64 = arith.constant 2 : index
    %c1_65 = arith.constant 1 : index
    %c0_66 = arith.constant 0 : index
    %c0_67 = arith.constant 0 : index
    %53 = vector.load %arg2[%c2_64, %c1_65, %c0_66, %c0_67] : memref<3x3x16x128xbf16, #tpu.memory_space<vmem>>, vector<1x1x16x128xbf16>
    %54 = vector.shape_cast %53 : vector<1x1x16x128xbf16> to vector<16x128xbf16>
    %cst_68 = arith.constant dense<0.000000e+00> : vector<256x128xf32>
    %55 = tpu.matmul %52, %54, %cst_68 {dimension_numbers = #tpu.dot_dimension_numbers<[1], [0], [0], [1], [0, 0, 1, 1], [], []>} : vector<256x16xbf16>, vector<16x128xbf16>, vector<256x128xf32> -> vector<256x128xf32>
    %56 = arith.addf %49, %55 : vector<256x128xf32>
    %c0_69 = arith.constant 0 : index
    %c2_70 = arith.constant 2 : index
    %c2_71 = arith.constant 2 : index
    %c0_72 = arith.constant 0 : index
    %57 = vector.load %arg1[%c0_69, %c2_70, %c2_71, %c0_72] : memref<1x18x18x16xbf16, #tpu.memory_space<vmem>>, vector<1x16x16x16xbf16>
    %58 = vector.shape_cast %57 : vector<1x16x16x16xbf16> to vector<16x16x16xbf16>
    %59 = vector.shape_cast %58 : vector<16x16x16xbf16> to vector<256x16xbf16>
    %c2_73 = arith.constant 2 : index
    %c2_74 = arith.constant 2 : index
    %c0_75 = arith.constant 0 : index
    %c0_76 = arith.constant 0 : index
    %60 = vector.load %arg2[%c2_73, %c2_74, %c0_75, %c0_76] : memref<3x3x16x128xbf16, #tpu.memory_space<vmem>>, vector<1x1x16x128xbf16>
    %61 = vector.shape_cast %60 : vector<1x1x16x128xbf16> to vector<16x128xbf16>
    %cst_77 = arith.constant dense<0.000000e+00> : vector<256x128xf32>
    %62 = tpu.matmul %59, %61, %cst_77 {dimension_numbers = #tpu.dot_dimension_numbers<[1], [0], [0], [1], [0, 0, 1, 1], [], []>} : vector<256x16xbf16>, vector<16x128xbf16>, vector<256x128xf32> -> vector<256x128xf32>
    %63 = arith.addf %56, %62 : vector<256x128xf32>
    %c0_78 = arith.constant 0 : index
    %c0_79 = arith.constant 0 : index
    %64 = vector.load %arg3[%c0_78, %c0_79] : memref<1x128xf32, #tpu.memory_space<vmem>>, vector<1x128xf32>
    %65 = vector.broadcast %64 : vector<1x128xf32> to vector<256x128xf32>
    %66 = arith.mulf %63, %65 : vector<256x128xf32>
    %c0_80 = arith.constant 0 : index
    %c0_81 = arith.constant 0 : index
    %67 = vector.load %arg4[%c0_80, %c0_81] : memref<1x128xf32, #tpu.memory_space<vmem>>, vector<1x128xf32>
    %68 = vector.broadcast %67 : vector<1x128xf32> to vector<256x128xf32>
    %69 = arith.addf %66, %68 : vector<256x128xf32>
    %70 = arith.negf %69 : vector<256x128xf32>
    %71 = math.exp %70 : vector<256x128xf32>
    %cst_82 = arith.constant 1.000000e+00 : f32
    %72 = vector.broadcast %cst_82 : f32 to vector<256x128xf32>
    %73 = arith.addf %72, %71 : vector<256x128xf32>
    %74 = arith.divf %72, %73 : vector<256x128xf32>
    %75 = arith.mulf %69, %74 : vector<256x128xf32>
    %76 = arith.truncf %75 : vector<256x128xf32> to vector<256x128xbf16>
    %c0_83 = arith.constant 0 : index
    %c0_84 = arith.constant 0 : index
    %c0_85 = arith.constant 0 : index
    %77 = vector.load %arg5[%c0_83, %c0_84, %c0_85] : memref<1x256x128xbf16, #tpu.memory_space<vmem>>, vector<1x256x128xbf16>
    %78 = vector.shape_cast %77 : vector<1x256x128xbf16> to vector<256x128xbf16>
    %79 = vector.shape_cast %76 : vector<256x128xbf16> to vector<1x256x128xbf16>
    tpu.vector_store %arg5[%c0_83, %c0_84, %c0_85], %79 {strides = array<i32>} : memref<1x256x128xbf16, #tpu.memory_space<vmem>>, vector<1x256x128xbf16>,
    return
  }
  func.func @transform_0(%arg0: i32) -> (i32, i32, i32, i32) {
    %c0_i32 = arith.constant 0 : i32
    %c0_i32_0 = arith.constant 0 : i32
    %c0_i32_1 = arith.constant 0 : i32
    %c0_i32_2 = arith.constant 0 : i32
    return %arg0, %c0_i32, %c0_i32_0, %c0_i32_1 : i32, i32, i32, i32
  }
  func.func @transform_1(%arg0: i32) -> (i32, i32, i32, i32) {
    %c0_i32 = arith.constant 0 : i32
    %c0_i32_0 = arith.constant 0 : i32
    %c0_i32_1 = arith.constant 0 : i32
    %c0_i32_2 = arith.constant 0 : i32
    %c0_i32_3 = arith.constant 0 : i32
    return %c0_i32, %c0_i32_0, %c0_i32_1, %c0_i32_2 : i32, i32, i32, i32
  }
  func.func @transform_2(%arg0: i32) -> (i32, i32) {
    %c0_i32 = arith.constant 0 : i32
    %c0_i32_0 = arith.constant 0 : i32
    %c0_i32_1 = arith.constant 0 : i32
    return %c0_i32, %c0_i32_0 : i32, i32
  }
  func.func @transform_3(%arg0: i32) -> (i32, i32) {
    %c0_i32 = arith.constant 0 : i32
    %c0_i32_0 = arith.constant 0 : i32
    %c0_i32_1 = arith.constant 0 : i32
    return %c0_i32, %c0_i32_0 : i32, i32
  }
  func.func @transform_4(%arg0: i32) -> (i32, i32, i32) {
    %c0_i32 = arith.constant 0 : i32
    %c0_i32_0 = arith.constant 0 : i32
    %c0_i32_1 = arith.constant 0 : i32
    return %arg0, %c0_i32, %c0_i32_0 : i32, i32, i32
  }
}

module attributes {stable_mosaic.version = 11 : i64} {
  func.func @head_rmac_l2n_kernel(%arg0: i32, %arg1: memref<1x256x128xbf16, #tpu.memory_space<vmem>>, %arg2: memref<128x128xbf16, #tpu.memory_space<vmem>>, %arg3: memref<1x128xf32, #tpu.memory_space<vmem>>, %arg4: memref<1x128xf32, #tpu.memory_space<vmem>>, %arg5: memref<1x1x128xf32, #tpu.memory_space<vmem>>, %arg6: memref<256x128xf32, #tpu.memory_space<vmem>>) attributes {dimension_semantics = [#tpu.dimension_semantics<parallel>], iteration_bounds = array<i64: 2>, scalar_prefetch = 0 : i64, scratch_operands = 1 : i64, tpu.core_type = #tpu.core_type<tc>, window_params = [{transform_indices = @transform_0, window_bounds = array<i64: 1, 256, 128>}, {pipeline_mode = #tpu.pipeline_mode<synchronous>, transform_indices = @transform_1, window_bounds = array<i64: 128, 128>}, {pipeline_mode = #tpu.pipeline_mode<synchronous>, transform_indices = @transform_2, window_bounds = array<i64: 1, 128>}, {pipeline_mode = #tpu.pipeline_mode<synchronous>, transform_indices = @transform_3, window_bounds = array<i64: 1, 128>}, {transform_indices = @transform_4, window_bounds = array<i64: 1, 1, 128>}]} {
    %c0 = arith.constant 0 : index
    %c0_0 = arith.constant 0 : index
    %c0_1 = arith.constant 0 : index
    %0 = vector.load %arg1[%c0, %c0_0, %c0_1] : memref<1x256x128xbf16, #tpu.memory_space<vmem>>, vector<1x256x128xbf16>
    %1 = vector.shape_cast %0 : vector<1x256x128xbf16> to vector<256x128xbf16>
    %c0_2 = arith.constant 0 : index
    %c0_3 = arith.constant 0 : index
    %2 = vector.load %arg2[%c0_2, %c0_3] : memref<128x128xbf16, #tpu.memory_space<vmem>>, vector<128x128xbf16>
    %cst = arith.constant dense<0.000000e+00> : vector<256x128xf32>
    %3 = tpu.matmul %1, %2, %cst {dimension_numbers = #tpu.dot_dimension_numbers<[1], [0], [0], [1], [0, 0, 1, 1], [], []>} : vector<256x128xbf16>, vector<128x128xbf16>, vector<256x128xf32> -> vector<256x128xf32>
    %c0_4 = arith.constant 0 : index
    %c0_5 = arith.constant 0 : index
    %4 = vector.load %arg3[%c0_4, %c0_5] : memref<1x128xf32, #tpu.memory_space<vmem>>, vector<1x128xf32>
    %5 = vector.broadcast %4 : vector<1x128xf32> to vector<256x128xf32>
    %6 = arith.mulf %3, %5 : vector<256x128xf32>
    %c0_6 = arith.constant 0 : index
    %c0_7 = arith.constant 0 : index
    %7 = vector.load %arg4[%c0_6, %c0_7] : memref<1x128xf32, #tpu.memory_space<vmem>>, vector<1x128xf32>
    %8 = vector.broadcast %7 : vector<1x128xf32> to vector<256x128xf32>
    %9 = arith.addf %6, %8 : vector<256x128xf32>
    %10 = arith.negf %9 : vector<256x128xf32>
    %11 = math.exp %10 : vector<256x128xf32>
    %cst_8 = arith.constant 1.000000e+00 : f32
    %12 = vector.broadcast %cst_8 : f32 to vector<256x128xf32>
    %13 = arith.addf %12, %11 : vector<256x128xf32>
    %14 = arith.divf %12, %13 : vector<256x128xf32>
    %15 = arith.mulf %9, %14 : vector<256x128xf32>
    %c0_9 = arith.constant 0 : index
    %c0_10 = arith.constant 0 : index
    %16 = vector.load %arg6[%c0_9, %c0_10] : memref<256x128xf32, #tpu.memory_space<vmem>>, vector<256x128xf32>
    tpu.vector_store %arg6[%c0_9, %c0_10], %15 {strides = array<i32>} : memref<256x128xf32, #tpu.memory_space<vmem>>, vector<256x128xf32>,
    %c0_11 = arith.constant 0 : index
    %c0_12 = arith.constant 0 : index
    %17 = vector.load %arg6[%c0_11, %c0_12] : memref<256x128xf32, #tpu.memory_space<vmem>>, vector<256x128xf32>
    %cst_13 = arith.constant dense<0xFF800000> : vector<128xf32>
    %18 = vector.multi_reduction <maximumf>, %17, %cst_13 [0] : vector<256x128xf32> to vector<128xf32>
    %19 = vector.shape_cast %18 : vector<128xf32> to vector<1x128xf32>
    %20 = arith.mulf %19, %19 : vector<1x128xf32>
    %cst_14 = arith.constant dense<0.000000e+00> : vector<1xf32>
    %21 = vector.multi_reduction <add>, %20, %cst_14 [1] : vector<1x128xf32> to vector<1xf32>
    %22 = vector.shape_cast %21 : vector<1xf32> to vector<1x1xf32>
    %23 = math.sqrt %22 : vector<1x1xf32>
    %cst_15 = arith.constant 9.99999997E-7 : f32
    %24 = vector.broadcast %cst_15 : f32 to vector<1x1xf32>
    %25 = arith.addf %23, %24 : vector<1x1xf32>
    %26 = vector.broadcast %25 : vector<1x1xf32> to vector<1x128xf32>
    %27 = arith.divf %19, %26 : vector<1x128xf32>
    %c0_16 = arith.constant 0 : index
    %c0_17 = arith.constant 0 : index
    %28 = vector.load %arg6[%c0_16, %c0_17] : memref<256x128xf32, #tpu.memory_space<vmem>>, vector<256x128xf32>
    %29 = vector.shape_cast %28 : vector<256x128xf32> to vector<16x16x128xf32>
    %cst_18 = arith.constant dense<0xFF800000> : vector<16x128xf32>
    %30 = vector.multi_reduction <maximumf>, %29, %cst_18 [0] : vector<16x16x128xf32> to vector<16x128xf32>
    %cst_19 = arith.constant dense<0xFF800000> : vector<128xf32>
    %31 = vector.multi_reduction <maximumf>, %30, %cst_19 [0] : vector<16x128xf32> to vector<128xf32>
    %32 = vector.shape_cast %31 : vector<128xf32> to vector<1x128xf32>
    %33 = arith.mulf %32, %32 : vector<1x128xf32>
    %cst_20 = arith.constant dense<0.000000e+00> : vector<1xf32>
    %34 = vector.multi_reduction <add>, %33, %cst_20 [1] : vector<1x128xf32> to vector<1xf32>
    %35 = vector.shape_cast %34 : vector<1xf32> to vector<1x1xf32>
    %36 = math.sqrt %35 : vector<1x1xf32>
    %cst_21 = arith.constant 9.99999997E-7 : f32
    %37 = vector.broadcast %cst_21 : f32 to vector<1x1xf32>
    %38 = arith.addf %36, %37 : vector<1x1xf32>
    %39 = vector.broadcast %38 : vector<1x1xf32> to vector<1x128xf32>
    %40 = arith.divf %32, %39 : vector<1x128xf32>
    %41 = arith.addf %27, %40 : vector<1x128xf32>
    %c0_22 = arith.constant 0 : index
    %c0_23 = arith.constant 0 : index
    %42 = vector.load %arg6[%c0_22, %c0_23] : memref<256x128xf32, #tpu.memory_space<vmem>>, vector<160x128xf32>
    %43 = vector.shape_cast %42 : vector<160x128xf32> to vector<10x16x128xf32>
    %cst_24 = arith.constant dense<0xFF800000> : vector<16x128xf32>
    %44 = vector.multi_reduction <maximumf>, %43, %cst_24 [0] : vector<10x16x128xf32> to vector<16x128xf32>
    %45 = vector.extract_strided_slice %44 {offsets = [0, 0], sizes = [10, 128], strides = [1, 1]} : vector<16x128xf32> to vector<10x128xf32>
    %cst_25 = arith.constant dense<0xFF800000> : vector<128xf32>
    %46 = vector.multi_reduction <maximumf>, %45, %cst_25 [0] : vector<10x128xf32> to vector<128xf32>
    %47 = vector.shape_cast %46 : vector<128xf32> to vector<1x128xf32>
    %48 = arith.mulf %47, %47 : vector<1x128xf32>
    %cst_26 = arith.constant dense<0.000000e+00> : vector<1xf32>
    %49 = vector.multi_reduction <add>, %48, %cst_26 [1] : vector<1x128xf32> to vector<1xf32>
    %50 = vector.shape_cast %49 : vector<1xf32> to vector<1x1xf32>
    %51 = math.sqrt %50 : vector<1x1xf32>
    %cst_27 = arith.constant 9.99999997E-7 : f32
    %52 = vector.broadcast %cst_27 : f32 to vector<1x1xf32>
    %53 = arith.addf %51, %52 : vector<1x1xf32>
    %54 = vector.broadcast %53 : vector<1x1xf32> to vector<1x128xf32>
    %55 = arith.divf %47, %54 : vector<1x128xf32>
    %56 = arith.addf %41, %55 : vector<1x128xf32>
    %57 = vector.extract_strided_slice %44 {offsets = [6, 0], sizes = [10, 128], strides = [1, 1]} : vector<16x128xf32> to vector<10x128xf32>
    %cst_28 = arith.constant dense<0xFF800000> : vector<128xf32>
    %58 = vector.multi_reduction <maximumf>, %57, %cst_28 [0] : vector<10x128xf32> to vector<128xf32>
    %59 = vector.shape_cast %58 : vector<128xf32> to vector<1x128xf32>
    %60 = arith.mulf %59, %59 : vector<1x128xf32>
    %cst_29 = arith.constant dense<0.000000e+00> : vector<1xf32>
    %61 = vector.multi_reduction <add>, %60, %cst_29 [1] : vector<1x128xf32> to vector<1xf32>
    %62 = vector.shape_cast %61 : vector<1xf32> to vector<1x1xf32>
    %63 = math.sqrt %62 : vector<1x1xf32>
    %cst_30 = arith.constant 9.99999997E-7 : f32
    %64 = vector.broadcast %cst_30 : f32 to vector<1x1xf32>
    %65 = arith.addf %63, %64 : vector<1x1xf32>
    %66 = vector.broadcast %65 : vector<1x1xf32> to vector<1x128xf32>
    %67 = arith.divf %59, %66 : vector<1x128xf32>
    %68 = arith.addf %56, %67 : vector<1x128xf32>
    %c96 = arith.constant 96 : index
    %c0_31 = arith.constant 0 : index
    %69 = vector.load %arg6[%c96, %c0_31] : memref<256x128xf32, #tpu.memory_space<vmem>>, vector<160x128xf32>
    %70 = vector.shape_cast %69 : vector<160x128xf32> to vector<10x16x128xf32>
    %cst_32 = arith.constant dense<0xFF800000> : vector<16x128xf32>
    %71 = vector.multi_reduction <maximumf>, %70, %cst_32 [0] : vector<10x16x128xf32> to vector<16x128xf32>
    %72 = vector.extract_strided_slice %71 {offsets = [0, 0], sizes = [10, 128], strides = [1, 1]} : vector<16x128xf32> to vector<10x128xf32>
    %cst_33 = arith.constant dense<0xFF800000> : vector<128xf32>
    %73 = vector.multi_reduction <maximumf>, %72, %cst_33 [0] : vector<10x128xf32> to vector<128xf32>
    %74 = vector.shape_cast %73 : vector<128xf32> to vector<1x128xf32>
    %75 = arith.mulf %74, %74 : vector<1x128xf32>
    %cst_34 = arith.constant dense<0.000000e+00> : vector<1xf32>
    %76 = vector.multi_reduction <add>, %75, %cst_34 [1] : vector<1x128xf32> to vector<1xf32>
    %77 = vector.shape_cast %76 : vector<1xf32> to vector<1x1xf32>
    %78 = math.sqrt %77 : vector<1x1xf32>
    %cst_35 = arith.constant 9.99999997E-7 : f32
    %79 = vector.broadcast %cst_35 : f32 to vector<1x1xf32>
    %80 = arith.addf %78, %79 : vector<1x1xf32>
    %81 = vector.broadcast %80 : vector<1x1xf32> to vector<1x128xf32>
    %82 = arith.divf %74, %81 : vector<1x128xf32>
    %83 = arith.addf %68, %82 : vector<1x128xf32>
    %84 = vector.extract_strided_slice %71 {offsets = [6, 0], sizes = [10, 128], strides = [1, 1]} : vector<16x128xf32> to vector<10x128xf32>
    %cst_36 = arith.constant dense<0xFF800000> : vector<128xf32>
    %85 = vector.multi_reduction <maximumf>, %84, %cst_36 [0] : vector<10x128xf32> to vector<128xf32>
    %86 = vector.shape_cast %85 : vector<128xf32> to vector<1x128xf32>
    %87 = arith.mulf %86, %86 : vector<1x128xf32>
    %cst_37 = arith.constant dense<0.000000e+00> : vector<1xf32>
    %88 = vector.multi_reduction <add>, %87, %cst_37 [1] : vector<1x128xf32> to vector<1xf32>
    %89 = vector.shape_cast %88 : vector<1xf32> to vector<1x1xf32>
    %90 = math.sqrt %89 : vector<1x1xf32>
    %cst_38 = arith.constant 9.99999997E-7 : f32
    %91 = vector.broadcast %cst_38 : f32 to vector<1x1xf32>
    %92 = arith.addf %90, %91 : vector<1x1xf32>
    %93 = vector.broadcast %92 : vector<1x1xf32> to vector<1x128xf32>
    %94 = arith.divf %86, %93 : vector<1x128xf32>
    %95 = arith.addf %83, %94 : vector<1x128xf32>
    %c0_39 = arith.constant 0 : index
    %c0_40 = arith.constant 0 : index
    %96 = vector.load %arg6[%c0_39, %c0_40] : memref<256x128xf32, #tpu.memory_space<vmem>>, vector<128x128xf32>
    %97 = vector.shape_cast %96 : vector<128x128xf32> to vector<8x16x128xf32>
    %cst_41 = arith.constant dense<0xFF800000> : vector<16x128xf32>
    %98 = vector.multi_reduction <maximumf>, %97, %cst_41 [0] : vector<8x16x128xf32> to vector<16x128xf32>
    %99 = vector.extract_strided_slice %98 {offsets = [0, 0], sizes = [8, 128], strides = [1, 1]} : vector<16x128xf32> to vector<8x128xf32>
    %cst_42 = arith.constant dense<0xFF800000> : vector<128xf32>
    %100 = vector.multi_reduction <maximumf>, %99, %cst_42 [0] : vector<8x128xf32> to vector<128xf32>
    %101 = vector.shape_cast %100 : vector<128xf32> to vector<1x128xf32>
    %102 = arith.mulf %101, %101 : vector<1x128xf32>
    %cst_43 = arith.constant dense<0.000000e+00> : vector<1xf32>
    %103 = vector.multi_reduction <add>, %102, %cst_43 [1] : vector<1x128xf32> to vector<1xf32>
    %104 = vector.shape_cast %103 : vector<1xf32> to vector<1x1xf32>
    %105 = math.sqrt %104 : vector<1x1xf32>
    %cst_44 = arith.constant 9.99999997E-7 : f32
    %106 = vector.broadcast %cst_44 : f32 to vector<1x1xf32>
    %107 = arith.addf %105, %106 : vector<1x1xf32>
    %108 = vector.broadcast %107 : vector<1x1xf32> to vector<1x128xf32>
    %109 = arith.divf %101, %108 : vector<1x128xf32>
    %110 = arith.addf %95, %109 : vector<1x128xf32>
    %111 = vector.extract_strided_slice %98 {offsets = [4, 0], sizes = [8, 128], strides = [1, 1]} : vector<16x128xf32> to vector<8x128xf32>
    %cst_45 = arith.constant dense<0xFF800000> : vector<128xf32>
    %112 = vector.multi_reduction <maximumf>, %111, %cst_45 [0] : vector<8x128xf32> to vector<128xf32>
    %113 = vector.shape_cast %112 : vector<128xf32> to vector<1x128xf32>
    %114 = arith.mulf %113, %113 : vector<1x128xf32>
    %cst_46 = arith.constant dense<0.000000e+00> : vector<1xf32>
    %115 = vector.multi_reduction <add>, %114, %cst_46 [1] : vector<1x128xf32> to vector<1xf32>
    %116 = vector.shape_cast %115 : vector<1xf32> to vector<1x1xf32>
    %117 = math.sqrt %116 : vector<1x1xf32>
    %cst_47 = arith.constant 9.99999997E-7 : f32
    %118 = vector.broadcast %cst_47 : f32 to vector<1x1xf32>
    %119 = arith.addf %117, %118 : vector<1x1xf32>
    %120 = vector.broadcast %119 : vector<1x1xf32> to vector<1x128xf32>
    %121 = arith.divf %113, %120 : vector<1x128xf32>
    %122 = arith.addf %110, %121 : vector<1x128xf32>
    %123 = vector.extract_strided_slice %98 {offsets = [8, 0], sizes = [8, 128], strides = [1, 1]} : vector<16x128xf32> to vector<8x128xf32>
    %cst_48 = arith.constant dense<0xFF800000> : vector<128xf32>
    %124 = vector.multi_reduction <maximumf>, %123, %cst_48 [0] : vector<8x128xf32> to vector<128xf32>
    %125 = vector.shape_cast %124 : vector<128xf32> to vector<1x128xf32>
    %126 = arith.mulf %125, %125 : vector<1x128xf32>
    %cst_49 = arith.constant dense<0.000000e+00> : vector<1xf32>
    %127 = vector.multi_reduction <add>, %126, %cst_49 [1] : vector<1x128xf32> to vector<1xf32>
    %128 = vector.shape_cast %127 : vector<1xf32> to vector<1x1xf32>
    %129 = math.sqrt %128 : vector<1x1xf32>
    %cst_50 = arith.constant 9.99999997E-7 : f32
    %130 = vector.broadcast %cst_50 : f32 to vector<1x1xf32>
    %131 = arith.addf %129, %130 : vector<1x1xf32>
    %132 = vector.broadcast %131 : vector<1x1xf32> to vector<1x128xf32>
    %133 = arith.divf %125, %132 : vector<1x128xf32>
    %134 = arith.addf %122, %133 : vector<1x128xf32>
    %c64 = arith.constant 64 : index
    %c0_51 = arith.constant 0 : index
    %135 = vector.load %arg6[%c64, %c0_51] : memref<256x128xf32, #tpu.memory_space<vmem>>, vector<128x128xf32>
    %136 = vector.shape_cast %135 : vector<128x128xf32> to vector<8x16x128xf32>
    %cst_52 = arith.constant dense<0xFF800000> : vector<16x128xf32>
    %137 = vector.multi_reduction <maximumf>, %136, %cst_52 [0] : vector<8x16x128xf32> to vector<16x128xf32>
    %138 = vector.extract_strided_slice %137 {offsets = [0, 0], sizes = [8, 128], strides = [1, 1]} : vector<16x128xf32> to vector<8x128xf32>
    %cst_53 = arith.constant dense<0xFF800000> : vector<128xf32>
    %139 = vector.multi_reduction <maximumf>, %138, %cst_53 [0] : vector<8x128xf32> to vector<128xf32>
    %140 = vector.shape_cast %139 : vector<128xf32> to vector<1x128xf32>
    %141 = arith.mulf %140, %140 : vector<1x128xf32>
    %cst_54 = arith.constant dense<0.000000e+00> : vector<1xf32>
    %142 = vector.multi_reduction <add>, %141, %cst_54 [1] : vector<1x128xf32> to vector<1xf32>
    %143 = vector.shape_cast %142 : vector<1xf32> to vector<1x1xf32>
    %144 = math.sqrt %143 : vector<1x1xf32>
    %cst_55 = arith.constant 9.99999997E-7 : f32
    %145 = vector.broadcast %cst_55 : f32 to vector<1x1xf32>
    %146 = arith.addf %144, %145 : vector<1x1xf32>
    %147 = vector.broadcast %146 : vector<1x1xf32> to vector<1x128xf32>
    %148 = arith.divf %140, %147 : vector<1x128xf32>
    %149 = arith.addf %134, %148 : vector<1x128xf32>
    %150 = vector.extract_strided_slice %137 {offsets = [4, 0], sizes = [8, 128], strides = [1, 1]} : vector<16x128xf32> to vector<8x128xf32>
    %cst_56 = arith.constant dense<0xFF800000> : vector<128xf32>
    %151 = vector.multi_reduction <maximumf>, %150, %cst_56 [0] : vector<8x128xf32> to vector<128xf32>
    %152 = vector.shape_cast %151 : vector<128xf32> to vector<1x128xf32>
    %153 = arith.mulf %152, %152 : vector<1x128xf32>
    %cst_57 = arith.constant dense<0.000000e+00> : vector<1xf32>
    %154 = vector.multi_reduction <add>, %153, %cst_57 [1] : vector<1x128xf32> to vector<1xf32>
    %155 = vector.shape_cast %154 : vector<1xf32> to vector<1x1xf32>
    %156 = math.sqrt %155 : vector<1x1xf32>
    %cst_58 = arith.constant 9.99999997E-7 : f32
    %157 = vector.broadcast %cst_58 : f32 to vector<1x1xf32>
    %158 = arith.addf %156, %157 : vector<1x1xf32>
    %159 = vector.broadcast %158 : vector<1x1xf32> to vector<1x128xf32>
    %160 = arith.divf %152, %159 : vector<1x128xf32>
    %161 = arith.addf %149, %160 : vector<1x128xf32>
    %162 = vector.extract_strided_slice %137 {offsets = [8, 0], sizes = [8, 128], strides = [1, 1]} : vector<16x128xf32> to vector<8x128xf32>
    %cst_59 = arith.constant dense<0xFF800000> : vector<128xf32>
    %163 = vector.multi_reduction <maximumf>, %162, %cst_59 [0] : vector<8x128xf32> to vector<128xf32>
    %164 = vector.shape_cast %163 : vector<128xf32> to vector<1x128xf32>
    %165 = arith.mulf %164, %164 : vector<1x128xf32>
    %cst_60 = arith.constant dense<0.000000e+00> : vector<1xf32>
    %166 = vector.multi_reduction <add>, %165, %cst_60 [1] : vector<1x128xf32> to vector<1xf32>
    %167 = vector.shape_cast %166 : vector<1xf32> to vector<1x1xf32>
    %168 = math.sqrt %167 : vector<1x1xf32>
    %cst_61 = arith.constant 9.99999997E-7 : f32
    %169 = vector.broadcast %cst_61 : f32 to vector<1x1xf32>
    %170 = arith.addf %168, %169 : vector<1x1xf32>
    %171 = vector.broadcast %170 : vector<1x1xf32> to vector<1x128xf32>
    %172 = arith.divf %164, %171 : vector<1x128xf32>
    %173 = arith.addf %161, %172 : vector<1x128xf32>
    %c128 = arith.constant 128 : index
    %c0_62 = arith.constant 0 : index
    %174 = vector.load %arg6[%c128, %c0_62] : memref<256x128xf32, #tpu.memory_space<vmem>>, vector<128x128xf32>
    %175 = vector.shape_cast %174 : vector<128x128xf32> to vector<8x16x128xf32>
    %cst_63 = arith.constant dense<0xFF800000> : vector<16x128xf32>
    %176 = vector.multi_reduction <maximumf>, %175, %cst_63 [0] : vector<8x16x128xf32> to vector<16x128xf32>
    %177 = vector.extract_strided_slice %176 {offsets = [0, 0], sizes = [8, 128], strides = [1, 1]} : vector<16x128xf32> to vector<8x128xf32>
    %cst_64 = arith.constant dense<0xFF800000> : vector<128xf32>
    %178 = vector.multi_reduction <maximumf>, %177, %cst_64 [0] : vector<8x128xf32> to vector<128xf32>
    %179 = vector.shape_cast %178 : vector<128xf32> to vector<1x128xf32>
    %180 = arith.mulf %179, %179 : vector<1x128xf32>
    %cst_65 = arith.constant dense<0.000000e+00> : vector<1xf32>
    %181 = vector.multi_reduction <add>, %180, %cst_65 [1] : vector<1x128xf32> to vector<1xf32>
    %182 = vector.shape_cast %181 : vector<1xf32> to vector<1x1xf32>
    %183 = math.sqrt %182 : vector<1x1xf32>
    %cst_66 = arith.constant 9.99999997E-7 : f32
    %184 = vector.broadcast %cst_66 : f32 to vector<1x1xf32>
    %185 = arith.addf %183, %184 : vector<1x1xf32>
    %186 = vector.broadcast %185 : vector<1x1xf32> to vector<1x128xf32>
    %187 = arith.divf %179, %186 : vector<1x128xf32>
    %188 = arith.addf %173, %187 : vector<1x128xf32>
    %189 = vector.extract_strided_slice %176 {offsets = [4, 0], sizes = [8, 128], strides = [1, 1]} : vector<16x128xf32> to vector<8x128xf32>
    %cst_67 = arith.constant dense<0xFF800000> : vector<128xf32>
    %190 = vector.multi_reduction <maximumf>, %189, %cst_67 [0] : vector<8x128xf32> to vector<128xf32>
    %191 = vector.shape_cast %190 : vector<128xf32> to vector<1x128xf32>
    %192 = arith.mulf %191, %191 : vector<1x128xf32>
    %cst_68 = arith.constant dense<0.000000e+00> : vector<1xf32>
    %193 = vector.multi_reduction <add>, %192, %cst_68 [1] : vector<1x128xf32> to vector<1xf32>
    %194 = vector.shape_cast %193 : vector<1xf32> to vector<1x1xf32>
    %195 = math.sqrt %194 : vector<1x1xf32>
    %cst_69 = arith.constant 9.99999997E-7 : f32
    %196 = vector.broadcast %cst_69 : f32 to vector<1x1xf32>
    %197 = arith.addf %195, %196 : vector<1x1xf32>
    %198 = vector.broadcast %197 : vector<1x1xf32> to vector<1x128xf32>
    %199 = arith.divf %191, %198 : vector<1x128xf32>
    %200 = arith.addf %188, %199 : vector<1x128xf32>
    %201 = vector.extract_strided_slice %176 {offsets = [8, 0], sizes = [8, 128], strides = [1, 1]} : vector<16x128xf32> to vector<8x128xf32>
    %cst_70 = arith.constant dense<0xFF800000> : vector<128xf32>
    %202 = vector.multi_reduction <maximumf>, %201, %cst_70 [0] : vector<8x128xf32> to vector<128xf32>
    %203 = vector.shape_cast %202 : vector<128xf32> to vector<1x128xf32>
    %204 = arith.mulf %203, %203 : vector<1x128xf32>
    %cst_71 = arith.constant dense<0.000000e+00> : vector<1xf32>
    %205 = vector.multi_reduction <add>, %204, %cst_71 [1] : vector<1x128xf32> to vector<1xf32>
    %206 = vector.shape_cast %205 : vector<1xf32> to vector<1x1xf32>
    %207 = math.sqrt %206 : vector<1x1xf32>
    %cst_72 = arith.constant 9.99999997E-7 : f32
    %208 = vector.broadcast %cst_72 : f32 to vector<1x1xf32>
    %209 = arith.addf %207, %208 : vector<1x1xf32>
    %210 = vector.broadcast %209 : vector<1x1xf32> to vector<1x128xf32>
    %211 = arith.divf %203, %210 : vector<1x128xf32>
    %212 = arith.addf %200, %211 : vector<1x128xf32>
    %213 = arith.mulf %212, %212 : vector<1x128xf32>
    %cst_73 = arith.constant dense<0.000000e+00> : vector<1xf32>
    %214 = vector.multi_reduction <add>, %213, %cst_73 [1] : vector<1x128xf32> to vector<1xf32>
    %215 = vector.shape_cast %214 : vector<1xf32> to vector<1x1xf32>
    %216 = math.sqrt %215 : vector<1x1xf32>
    %cst_74 = arith.constant 9.99999997E-7 : f32
    %217 = vector.broadcast %cst_74 : f32 to vector<1x1xf32>
    %218 = arith.addf %216, %217 : vector<1x1xf32>
    %219 = vector.broadcast %218 : vector<1x1xf32> to vector<1x128xf32>
    %220 = arith.divf %212, %219 : vector<1x128xf32>
    %c0_75 = arith.constant 0 : index
    %c0_76 = arith.constant 0 : index
    %c0_77 = arith.constant 0 : index
    %221 = vector.load %arg5[%c0_75, %c0_76, %c0_77] : memref<1x1x128xf32, #tpu.memory_space<vmem>>, vector<1x1x128xf32>
    %222 = vector.shape_cast %221 : vector<1x1x128xf32> to vector<1x128xf32>
    %223 = vector.shape_cast %220 : vector<1x128xf32> to vector<1x1x128xf32>
    tpu.vector_store %arg5[%c0_75, %c0_76, %c0_77], %223 {strides = array<i32>} : memref<1x1x128xf32, #tpu.memory_space<vmem>>, vector<1x1x128xf32>,
    return
  }
  func.func @transform_0(%arg0: i32) -> (i32, i32, i32) {
    %c0_i32 = arith.constant 0 : i32
    %c0_i32_0 = arith.constant 0 : i32
    %c0_i32_1 = arith.constant 0 : i32
    return %arg0, %c0_i32, %c0_i32_0 : i32, i32, i32
  }
  func.func @transform_1(%arg0: i32) -> (i32, i32) {
    %c0_i32 = arith.constant 0 : i32
    %c0_i32_0 = arith.constant 0 : i32
    %c0_i32_1 = arith.constant 0 : i32
    return %c0_i32, %c0_i32_0 : i32, i32
  }
  func.func @transform_2(%arg0: i32) -> (i32, i32) {
    %c0_i32 = arith.constant 0 : i32
    %c0_i32_0 = arith.constant 0 : i32
    %c0_i32_1 = arith.constant 0 : i32
    return %c0_i32, %c0_i32_0 : i32, i32
  }
  func.func @transform_3(%arg0: i32) -> (i32, i32) {
    %c0_i32 = arith.constant 0 : i32
    %c0_i32_0 = arith.constant 0 : i32
    %c0_i32_1 = arith.constant 0 : i32
    return %c0_i32, %c0_i32_0 : i32, i32
  }
  func.func @transform_4(%arg0: i32) -> (i32, i32, i32) {
    %c0_i32 = arith.constant 0 : i32
    %c0_i32_0 = arith.constant 0 : i32
    %c0_i32_1 = arith.constant 0 : i32
    return %arg0, %c0_i32, %c0_i32_0 : i32, i32, i32
  }
}

</mosaic_0001>

<bundles_post_ra>
// kernel: effb4ns_rmac_forward.3
= control target key start
LH: loop header
LB: loop body
LE: loop exit
PB: predicated region body
PF: predicated region fallthrough
CT: control target
= control target key end

     0   :  { %9 = vsyncpa [#allocation4], 0  ;;  %s4488_s0 = inlined_call_operand.vmem [shape: bf16[2,256,128], index: 0, kind: input, shape index: {}]   ;;  %s4489_s1 = inlined_call_operand.vmem [shape: bf16[128,128], index: 1, kind: input, shape index: {}]   ;;  %s4490_s2 = inlined_call_operand.vmem [shape: f32[1,128], index: 2, kind: input, shape index: {}]   ;;  %s4491_s3 = inlined_call_operand.vmem [shape: f32[1,128], index: 3, kind: input, shape index: {}]   ;;  %s4492_s4 = inlined_call_operand.hbm [shape: f32[2,1,128], index: 4, kind: output, shape index: {}]  }
   0x1   :  { %11 = vsyncpa [#allocation4 + $0x1], 0  ;;  %s2575_s15 = smov 0   ;;  %s2577_s16 = smov 0  }
   0x2   :  { %s2579_s17 = smov 0   ;;  %s2581_s18 = smov 0  }
   0x3 LB: > { %s2596_s19 = sadd.s32 4294967295, %s2548_s18   ;;  %s2066_s20 = sadd.s32 4294967294, %s2548_s18   ;;  %s2548_s18 = sphi %s2581_s18, %s4617_s18   ;;  %s2544_s17 = sphi %s2579_s17, %s4616_s17   ;;  %s2540_s16 = sphi %s2577_s16, %s4615_s16   ;;  %s2536_s15 = sphi %s2575_s15, %s4614_s15  }
   0x4   : > { %s2600_s21 = sadd.s32 1, %s2548_s18   ;;  %s113_s22 = sadd.s32 1, %s2544_s17 }
   0x5   : > { %s110_s23 = ssub.s32 %s2548_s18, %s2600_s21  ;;  %p123_p0 = scmp.ne.s32.totalorder %s2544_s17, %s2540_s16 }
   0x6   : > { %p111_p1 = scmp.eq.s32.totalorder %s110_s23, 0  ;;  %p124_p2 = scmp.eq.s32.totalorder %s2596_s19, 1 }
   0x7   : > { %p129_p3 = scmp.ne.s32.totalorder %s2540_s16, %s2536_s15  ;;  %p130_p4 = scmp.eq.s32.totalorder %s2066_s20, 1 }
   0x8   : > { %s2611_s24 = scalar_select %p111_p1, %s2544_s17, %s113_s22  }
   0x9   : > { %p2613_p5 = por %p124_p2, %p123_p0  ;;  %p2617_p6 = por %p130_p4, %p129_p3 }
   0xa   : > { %p2069_p7 = scmp.ge.s32.totalorder %s2548_s18, 1  ;;  %p165_p8 = scmp.lt.s32.totalorder %s2548_s18, 3 }
   0xc   : > { %p166_p9 = pnand %p2069_p7, %p165_p8 }
   0xd   : > { %p190_p10 = scmp.lt.s32.totalorder (!%p166_p9), %s2596_s19, 1  ;;  %s2506_s7 = scalar_lea.hbm (!%p166_p9), %s4492_s4, 2 }
   0xe   : > { %169 = sbr.rel (%p166_p9) target bundleno = 773 (0x305), region = 36 }
  0x13   : > { %v2226_v0 = vld [vmem:[%s4489_s1 + $0x38] sm:$0xff]  ;;  %v2225_v1 = vld [vmem:[%s4489_s1 + $0x30] sm:$0xff]  ;;  %v2224_v2 = vld [vmem:[%s4489_s1 + $0x28] sm:$0xff]  ;;  %s191_s13 = scalar_select %p190_p10, %s2596_s19, 1 }
  0x14   : > { %387 = vmatpush.bf16.msra.mxu0 %v2226_v0  ;;  %2227 = vmatpush.bf16.msra.mxu1 %v2226_v0  ;;  %v2223_v3 = vld [vmem:[%s4489_s1 + $0x20] sm:$0xff]  ;;  %v2222_v4 = vld [vmem:[%s4489_s1 + $0x18] sm:$0xff]  ;;  %v2221_v5 = vld [vmem:[%s4489_s1 + $0x10] sm:$0xff] }
  0x15   : > { %2228 = vmatpush.bf16.msra.mxu2 %v2226_v0  ;;  %2229 = vmatpush.bf16.msra.mxu3 %v2226_v0  ;;  %v2220_v6 = vld [vmem:[%s4489_s1 + $0x8] sm:$0xff]  ;;  %s2202_s22 = sshll.u32 %s191_s13, 7  ;;  %v2219_v7 = vld [vmem:[%s4489_s1] sm:$0xff]  ;;  %s188_s13 = sand.u32 1, %s2540_s16  }
  0x16   : > { %s2652_s30 = scalar_lea.vmem %s4488_s0, %s2202_s22  ;;  %v2673_v24 = vld [vmem:[%s4490_s2] ss:$0 sm:$0xff]  ;;  %s2007_s22 = scalar_lea.hbm %s4492_s4, %s2596_s19 }
  0x17   : > { %v2203_v8 = vld [vmem:[%s2652_s30] sm:$0xff]  ;;  %v2204_v12 = vld [vmem:[%s2652_s30 + $0x8] sm:$0xff]  ;;  %v2205_v16 = vld [vmem:[%s2652_s30 + $0x10] sm:$0xff]  ;;  %s189_s23 = scalar_lea.vmem [#allocation3], %s188_s13  ;;  %s2011_s28 = sshll.u32 %s2007_s22, 4  ;;  %s2012_s28 = int_to_ptr.hbm [resolvable:$true] %s2011_s28 }
  0x18   : > { %388 = vmatpush.bf16.msra.mxu0 %v2225_v1  ;;  %2230 = vmatpush.bf16.msra.mxu1 %v2225_v1  ;;  %v2207_v9 = vld [vmem:[%s2652_s30 + $0x20] sm:$0xff]  ;;  %v2208_v13 = vld [vmem:[%s2652_s30 + $0x28] sm:$0xff]  ;;  %v2209_v17 = vld [vmem:[%s2652_s30 + $0x30] sm:$0xff]  ;;  %s2009_s27 = sshll.u32 %s189_s23, 4  ;;  %s1999_s29 = scalar_lea.sflag [#allocation4], %s188_s13  ;;  %s2010_s27 = int_to_ptr.vmem [resolvable:$true] %s2009_s27 }
  0x19   : > { %2231 = vmatpush.bf16.msra.mxu2 %v2225_v1  ;;  %2232 = vmatpush.bf16.msra.mxu3 %v2225_v1  ;;  %v2211_v10 = vld [vmem:[%s2652_s30 + $0x40] sm:$0xff]  ;;  %v2212_v14 = vld [vmem:[%s2652_s30 + $0x48] sm:$0xff]  ;;  %v2213_v18 = vld [vmem:[%s2652_s30 + $0x50] sm:$0xff] }
  0x1a   : > { %v2215_v11 = vld [vmem:[%s2652_s30 + $0x60] sm:$0xff]  ;;  %v2216_v15 = vld [vmem:[%s2652_s30 + $0x68] sm:$0xff]  ;;  %v2217_v19 = vld [vmem:[%s2652_s30 + $0x70] sm:$0xff] }
  0x1b   : > { %v2206_v20 = vld [vmem:[%s2652_s30 + $0x18] sm:$0xff]  ;;  %v2678_v25 = vld [vmem:[%s4491_s3] ss:$0 sm:$0xff] }
  0x1c   : > { %389 = vmatpush.bf16.msra.mxu0 %v2224_v2  ;;  %2233 = vmatpush.bf16.msra.mxu1 %v2224_v2  ;;  %v2210_v21 = vld [vmem:[%s2652_s30 + $0x38] sm:$0xff] }
  0x1d   : > { %2234 = vmatpush.bf16.msra.mxu2 %v2224_v2  ;;  %2235 = vmatpush.bf16.msra.mxu3 %v2224_v2  ;;  %v2214_v22 = vld [vmem:[%s2652_s30 + $0x58] sm:$0xff] }
  0x1e   : > { %v2218_v23 = vld [vmem:[%s2652_s30 + $0x78] sm:$0xff]  ;;  %s2500_s30 = sshra.s32 %s2012_s28, 4  ;;  %s2501_s30 = int_to_ptr.hbm [resolvable:$true] %s2500_s30 }
  0x1f   : > { %s2502_s5 = scalar_lea.hbm %s2501_s30, 1  ;;  %p2507_p0 = scmp.lt.s32.totalorder %s2501_s30, %s4492_s4 }
  0x20   : > { %390 = vmatpush.bf16.msra.mxu0 %v2223_v3  ;;  %2236 = vmatpush.bf16.msra.mxu1 %v2223_v3  ;;  %p2503_p11 = scmp.ne.s32.totalorder %s2501_s30, %s2502_s5  ;;  %p2508_p1 = scmp.lt.s32.totalorder %s2506_s7, %s2502_s5 }
  0x21   : > { %2237 = vmatpush.bf16.msra.mxu2 %v2223_v3  ;;  %2238 = vmatpush.bf16.msra.mxu3 %v2223_v3 }
  0x22   : > { %p2504_p12 = pnand %p2503_p11, %p2613_p5  ;;  %p2509_p2 = por %p2508_p1, %p2507_p0 }
  0x24   : > { %391 = vmatpush.bf16.msra.mxu0 %v2222_v4  ;;  %2239 = vmatpush.bf16.msra.mxu1 %v2222_v4  ;;  %p2505_p13 = pneg %p2504_p12 }
  0x25   : > { %2240 = vmatpush.bf16.msra.mxu2 %v2222_v4  ;;  %2241 = vmatpush.bf16.msra.mxu3 %v2222_v4 }
  0x26   : > { %p2510_p3 = pnand %p2509_p2, %p2505_p13 }
  0x28   : > { %392 = vmatpush.bf16.msra.mxu0 %v2221_v5  ;;  %2242 = vmatpush.bf16.msra.mxu1 %v2221_v5 }
  0x29   : > { %2243 = vmatpush.bf16.msra.mxu2 %v2221_v5  ;;  %2244 = vmatpush.bf16.msra.mxu3 %v2221_v5 }
  0x2c   : > { %393 = vmatpush.bf16.msra.mxu0 %v2220_v6  ;;  %2245 = vmatpush.bf16.msra.mxu1 %v2220_v6 }
  0x2d   : > { %2246 = vmatpush.bf16.msra.mxu2 %v2220_v6  ;;  %2247 = vmatpush.bf16.msra.mxu3 %v2220_v6 }
  0x30   : > { %394 = vmatpush.bf16.msra.mxu0 %v2219_v7  ;;  %2248 = vmatpush.bf16.msra.mxu1 %v2219_v7 }
  0x31   : > { %2249 = vmatpush.bf16.msra.mxu2 %v2219_v7  ;;  %2250 = vmatpush.bf16.msra.mxu3 %v2219_v7 }
  0x33   : > { %395 = vmatmul.bf16.vlgmr.msra.gmra.mxu0 %v2203_v8  ;;  %415 = vmatmul.bf16.vlgmr.msra.gmra.mxu1 %v2207_v9 }
  0x34   : > { %435 = vmatmul.bf16.vlgmr.msra.gmra.mxu2 %v2211_v10  ;;  %455 = vmatmul.bf16.vlgmr.msra.gmra.mxu3 %v2215_v11 }
  0x43   : > { %400 = vmatmul.bf16.gmra.mxu0 %v2204_v12  ;;  %420 = vmatmul.bf16.gmra.mxu1 %v2208_v13 }
  0x44   : > { %440 = vmatmul.bf16.gmra.mxu2 %v2212_v14  ;;  %460 = vmatmul.bf16.gmra.mxu3 %v2216_v15 }
  0x53   : > { %405 = vmatmul.bf16.gmra.mxu0 %v2205_v16  ;;  %425 = vmatmul.bf16.gmra.mxu1 %v2209_v17 }
  0x54   : > { %445 = vmatmul.bf16.gmra.mxu2 %v2213_v18  ;;  %465 = vmatmul.bf16.gmra.mxu3 %v2217_v19 }
  0x63   : > { %410 = vmatmul.bf16.gmra.mxu0 %v2206_v20  ;;  %430 = vmatmul.bf16.gmra.mxu1 %v2210_v21 }
  0x64   : > { %450 = vmatmul.bf16.gmra.mxu2 %v2214_v22  ;;  %470 = vmatmul.bf16.gmra.mxu3 %v2218_v23 }
  0xb0   : > { %v396_v26 = vpop.f32.mrf.mxu0  ;;  %v416_v27 = vpop.f32.mrf.mxu1 }
  0xb1   : > { %v480_v28 = vmul.f32 %v2673_v24, %v396_v26  ;;  %v488_v29 = vmul.f32 %v2673_v24, %v416_v27 }
  0xb3   : > { %v2683_v30 = vadd.f32 %v2678_v25, %v480_v28  ;;  %v2686_v31 = vadd.f32 %v2678_v25, %v488_v29 }
  0xb5   : > { %v2168_v32 = vmul.f32 -1.442695, %v2683_v30  ;;  %v2176_v33 = vmul.f32 -1.442695, %v2686_v31 }
  0xb7   : > { %2292 = vpow2.f32 %v2168_v32  ;;  %v436_v34 = vpop.f32.mrf.mxu2  ;;  %v456_v35 = vpop.f32.mrf.mxu3 }
  0xb8   : > { %2294 = vpow2.f32 %v2176_v33  ;;  %v496_v36 = vmul.f32 %v2673_v24, %v436_v34  ;;  %v504_v37 = vmul.f32 %v2673_v24, %v456_v35  ;;  %v398_v38 = vpop.f32.mrf.mxu0  ;;  %v418_v39 = vpop.f32.mrf.mxu1 }
  0xb9   : > { %v481_v40 = vmul.f32 %v2673_v24, %v398_v38  ;;  %v489_v41 = vmul.f32 %v2673_v24, %v418_v39 }
  0xba   : > { %v2695_v42 = vadd.f32 %v2678_v25, %v496_v36  ;;  %v2698_v43 = vadd.f32 %v2678_v25, %v504_v37 }
  0xbb   : > { %v2701_v44 = vadd.f32 %v2678_v25, %v481_v40  ;;  %v2706_v48 = vadd.f32 %v2678_v25, %v489_v41 }
  0xbc   : > { %v2184_v45 = vmul.f32 -1.442695, %v2695_v42  ;;  %v2192_v46 = vmul.f32 -1.442695, %v2698_v43 }
  0xbd   : > { %v2293_v47 = vpop.eup %2292  ;;  %v2169_v51 = vmul.f32 -1.442695, %v2701_v44  ;;  %v2177_v54 = vmul.f32 -1.442695, %v2706_v48 }
  0xbe   : > { %v2295_v49 = vpop.eup %2294  ;;  %v2708_v50 = vadd.f32 1.0, %v2293_v47  ;;  %2296 = vpow2.f32 %v2184_v45 }
  0xbf   : > { %v2711_v52 = vadd.f32 1.0, %v2295_v49  ;;  %2298 = vpow2.f32 %v2192_v46  ;;  %v438_v53 = vpop.f32.mrf.mxu2  ;;  %v458_v56 = vpop.f32.mrf.mxu3 }
  0xc0   : > { %2300 = vrcp.f32 %v2708_v50  ;;  %v497_v55 = vmul.f32 %v2673_v24, %v438_v53  ;;  %v505_v62 = vmul.f32 %v2673_v24, %v458_v56  ;;  %v401_v5 = vpop.f32.mrf.mxu0  ;;  %v421_v16 = vpop.f32.mrf.mxu1  ;;  %v685_v17 = vand.u32 2147483647, %v2708_v50 }
  0xc1   : > { %2302 = vrcp.f32 %v2711_v52  ;;  %v482_v10 = vmul.f32 %v2673_v24, %v401_v5  ;;  %v687_v19 = vand.u32 2147483648, %v2708_v50  ;;  %v805_v20 = vand.u32 2147483647, %v2711_v52 }
  0xc2   : > { %2304 = vpow2.f32 %v2169_v51  ;;  %v2718_v58 = vadd.f32 %v2678_v25, %v497_v55  ;;  %v2734_v4 = vadd.f32 %v2678_v25, %v505_v62  ;;  %v807_v21 = vand.u32 2147483648, %v2711_v52 }
  0xc3   : > { %2306 = vpow2.f32 %v2177_v54  ;;  %v2756_v22 = vadd.f32 %v2678_v25, %v482_v10  ;;  %v490_v27 = vmul.f32 %v2673_v24, %v421_v16  ;;  %vm681_vm1 = vweird.f32 %v2708_v50 }
  0xc4   : > { %v2297_v57 = vpop.eup %2296  ;;  %v2185_v3 = vmul.f32 -1.442695, %v2718_v58  ;;  %v2193_v15 = vmul.f32 -1.442695, %v2734_v4  ;;  %vm801_vm2 = vweird.f32 %v2711_v52  ;;  %vm2773_vm3 = vcmp.eq.f32.partialorder %v685_v17, 8.507059e+37 }
  0xc5   : > { %v2299_v59 = vpop.eup %2298  ;;  %v2720_v60 = vadd.f32 1.0, %v2297_v57  ;;  %v688_v36 = vor.u32 1.1754944e-38, %v687_v19  ;;  %v2170_v38 = vmul.f32 -1.442695, %v2756_v22  ;;  %vm2785_vm5 = vcmp.eq.f32.partialorder %v805_v20, 8.507059e+37 }
  0xc6   : > { %v2722_v61 = vpop.eup %2300  ;;  %v2729_v1 = vadd.f32 1.0, %v2299_v59  ;;  %v808_v41 = vor.u32 1.1754944e-38, %v807_v21  ;;  %v2790_v46 = vadd.f32 %v2678_v25, %v490_v27 }
  0xc7   : > { %v2725_v63 = vpop.eup %2302  ;;  %v677_v0 = vmul.f32 %v2722_v61, %v2708_v50  ;;  %2308 = vrcp.f32 %v2720_v60  ;;  %vm682_vm0 = vweird.f32 %v2722_v61  ;;  %v927_v37 = vand.u32 2147483648, %v2720_v60  ;;  %v441_v56 = vpop.f32.mrf.mxu2 }
  0xc8   : > { %v2305_v2 = vpop.eup %2304  ;;  %v797_v8 = vmul.f32 %v2725_v63, %v2711_v52  ;;  %2310 = vrcp.f32 %v2729_v1  ;;  %vm2781_vm4 = vmor %vm681_vm1, %vm682_vm0  ;;  %vm802_vm6 = vweird.f32 %v2725_v63  ;;  %vm921_vm7 = vweird.f32 %v2720_v60 }
  0xc9   : > { %v2307_v6 = vpop.eup %2306  ;;  %v678_v7 = vsub.f32 1.0, %v677_v0  ;;  %v2739_v9 = vadd.f32 1.0, %v2305_v2  ;;  %2312 = vpow2.f32 %v2185_v3  ;;  %v925_v51 = vand.u32 2147483647, %v2720_v60  ;;  %vm2815_vm9 = vmor %vm801_vm2, %vm802_vm6 }
  0xca   : > { %v2742_v11 = vadd.f32 1.0, %v2307_v6  ;;  %v798_v14 = vsub.f32 1.0, %v797_v8  ;;  %v1047_v54 = vand.u32 2147483648, %v2729_v1  ;;  %v2805_v59 = vor.u32 1.1754944e-38, %v927_v37  ;;  %v461_v6 = vpop.f32.mrf.mxu3 }
  0xcb   : > { %v679_v13 = vmul.f32 %v2722_v61, %v678_v7  ;;  %2314 = vrcp.f32 %v2739_v9  ;;  %vm1041_vm8 = vweird.f32 %v2729_v1  ;;  %v702_v3 = vand.u32 2147483648, %v2739_v9  ;;  %v403_v7 = vpop.f32.mrf.mxu0 }
  0xcc   : > { %2316 = vrcp.f32 %v2742_v11  ;;  %v799_v29 = vmul.f32 %v2725_v63, %v798_v14  ;;  %v2178_v52 = vmul.f32 -1.442695, %v2790_v46  ;;  %v700_v17 = vand.u32 2147483647, %v2739_v9 }
  0xcd   : > { %v2744_v12 = vpop.eup %2308  ;;  %v680_v28 = vadd.f32 %v2722_v61, %v679_v13  ;;  %2318 = vpow2.f32 %v2193_v15  ;;  %v498_v13 = vmul.f32 %v2673_v24, %v441_v56  ;;  %v1048_v15 = vor.u32 1.1754944e-38, %v1047_v54 }
  0xce   : > { %v2750_v18 = vpop.eup %2310  ;;  %v917_v26 = vmul.f32 %v2744_v12, %v2720_v60  ;;  %v800_v49 = vadd.f32 %v2725_v63, %v799_v29  ;;  %vm922_vm10 = vweird.f32 %v2744_v12  ;;  %vm2835_vm11 = vcmp.eq.f32.partialorder %v925_v51, 8.507059e+37 }
  0xcf   : > { %v2313_v23 = vpop.eup %2312  ;;  %v1037_v33 = vmul.f32 %v2750_v18, %v2729_v1  ;;  %v684_v47 = vsel %vm2781_vm4, %v2722_v61, %v680_v28  ;;  %v1045_v61 = vand.u32 2147483647, %v2729_v1  ;;  %v483_v21 = vmul.f32 %v2673_v24, %v403_v7  ;;  %v423_v28 = vpop.f32.mrf.mxu1  ;;  %vm2869_vm15 = vmor %vm921_vm7, %vm922_vm10 }
  0xd0   : > { %v2765_v32 = vadd.f32 1.0, %v2313_v23  ;;  %v918_v45 = vsub.f32 1.0, %v917_v26  ;;  %v689_v62 = vsel %vm2773_vm3, %v688_v36, %v684_v47  ;;  %v804_v8 = vsel %vm2815_vm9, %v2725_v63, %v800_v49 }
  0xd1   : > { %v2771_v34 = vpop.eup %2314  ;;  %v1038_v53 = vsub.f32 1.0, %v1037_v33  ;;  %v506_v63 = vmul.f32 %v2673_v24, %v461_v6  ;;  %v2843_v23 = vmul.f32 %v689_v62, %v2683_v30  ;;  %v809_v26 = vsel %vm2785_vm5, %v808_v41, %v804_v8  ;;  %v443_v8 = vpop.f32.mrf.mxu2 }
  0xd2   : > { %2320 = vrcp.f32 %v2765_v32  ;;  %v2798_v50 = vpop.eup %2316  ;;  %v692_v55 = vmul.f32 %v2771_v34, %v2739_v9  ;;  %v919_v2 = vmul.f32 %v2744_v12, %v918_v45  ;;  %vm1042_vm12 = vweird.f32 %v2750_v18 }
  0xd3   : > { %v2319_v57 = vpop.eup %2318  ;;  %2322 = vpow2.f32 %v2170_v38  ;;  %v812_v10 = vmul.f32 %v2798_v50, %v2742_v11  ;;  %v1039_v14 = vmul.f32 %v2750_v18, %v1038_v53  ;;  %vm2849_vm13 = vcmp.eq.f32.partialorder %v1045_v61, 8.507059e+37  ;;  %vm2896_vm1 = vmor %vm1041_vm8, %vm1042_vm12 }
  0xd4   : > { %v2821_v5 = vadd.f32 1.0, %v2319_v57  ;;  %v693_v16 = vsub.f32 1.0, %v692_v55  ;;  %v920_v27 = vadd.f32 %v2744_v12, %v919_v2  ;;  %vm696_vm14 = vweird.f32 %v2739_v9 }
  0xd5   : > { %v2854_v35 = vor.u32 1.1754944e-38, %v702_v3  ;;  %v813_v36 = vsub.f32 1.0, %v812_v10  ;;  %v2857_v30 = vadd.f32 %v2678_v25, %v498_v13  ;;  %v1040_v37 = vadd.f32 %v2750_v18, %v1039_v14 }
  0xd6   : > { %2324 = vrcp.f32 %v2821_v5  ;;  %v694_v38 = vmul.f32 %v2771_v34, %v693_v16  ;;  %vm816_vm0 = vweird.f32 %v2742_v11  ;;  %v2876_v47 = vadd.f32 %v2678_v25, %v506_v63 }
  0xd7   : > { %2326 = vpow2.f32 %v2178_v52  ;;  %v2186_v45 = vmul.f32 -1.442695, %v2857_v30  ;;  %v2879_v49 = vadd.f32 %v2678_v25, %v483_v21  ;;  %v491_v51 = vmul.f32 %v2673_v24, %v423_v28 }
  0xd8   : > { %v2832_v19 = vpop.eup %2320  ;;  %v2883_v53 = vmul.f32 %v809_v26, %v2686_v31  ;;  %v924_v60 = vsel %vm2869_vm15, %v2744_v12, %v920_v27  ;;  %v820_v54 = vand.u32 2147483647, %v2742_v11  ;;  %vm2900_vm2 = vcmp.eq.f32.partialorder %v700_v17, 8.507059e+37 }
  0xd9   : > { %v2323_v29 = vpop.eup %2322  ;;  %v932_v39 = vmul.f32 %v2832_v19, %v2765_v32  ;;  %v814_v12 = vmul.f32 %v2798_v50, %v813_v36  ;;  %v2194_v57 = vmul.f32 -1.442695, %v2876_v47  ;;  %v2171_v61 = vmul.f32 -1.442695, %v2879_v49 }
  0xda   : > { %v2863_v40 = vadd.f32 1.0, %v2323_v29  ;;  %v1044_v62 = vsel %vm2896_vm1, %v2750_v18, %v1040_v37  ;;  %v695_v1 = vadd.f32 %v2771_v34, %v694_v38  ;;  %vm697_vm3 = vweird.f32 %v2771_v34 }
  0xdb   : > { %v822_v0 = vand.u32 2147483648, %v2742_v11  ;;  %v933_v3 = vsub.f32 1.0, %v932_v39  ;;  %v2916_v7 = vadd.f32 %v2678_v25, %v491_v51  ;;  %v929_v18 = vsel %vm2835_vm11, %v2805_v59, %v924_v60  ;;  %vm2939_vm6 = vmor %vm696_vm14, %vm697_vm3  ;;  %v463_v39 = vpop.f32.mrf.mxu3 }
  0xdc   : > { %2328 = vrcp.f32 %v2863_v40  ;;  %v2890_v55 = vpop.eup %2324  ;;  %vm2921_vm4 = vcmp.eq.f32.partialorder %v820_v54, 8.507059e+37  ;;  %v815_v13 = vadd.f32 %v2798_v50, %v814_v12  ;;  %vm817_vm5 = vweird.f32 %v2798_v50 }
  0xdd   : > { %2330 = vpow2.f32 %v2186_v45  ;;  %v2327_v2 = vpop.eup %2326  ;;  %v1052_v6 = vmul.f32 %v2890_v55, %v2821_v5  ;;  %v942_v14 = vand.u32 2147483648, %v2765_v32  ;;  %v2179_v16 = vmul.f32 -1.442695, %v2916_v7  ;;  %vm2957_vm7 = vmor %vm816_vm0, %vm817_vm5 }
  0xde   : > { %2332 = vpow2.f32 %v2194_v57  ;;  %v2925_v52 = vadd.f32 1.0, %v2327_v2  ;;  %v1049_v59 = vsel %vm2849_vm13, %v1048_v15, %v1044_v62  ;;  %v940_v63 = vand.u32 2147483647, %v2765_v32 }
  0xdf   : > { %2334 = vpow2.f32 %v2171_v61  ;;  %v499_v21 = vmul.f32 %v2673_v24, %v443_v8  ;;  %v699_v27 = vsel %vm2939_vm6, %v2771_v34, %v695_v1  ;;  %v823_v15 = vor.u32 1.1754944e-38, %v822_v0 }
  0xe0   : > { %2336 = vrcp.f32 %v2925_v52  ;;  %v934_v28 = vmul.f32 %v2832_v19, %v933_v3  ;;  %v1053_v29 = vsub.f32 1.0, %v1052_v6  ;;  %v2951_v9 = vmul.f32 %v929_v18, %v2695_v42 }
  0xe1   : > { %vm936_vm8 = vweird.f32 %v2765_v32  ;;  %v2967_v38 = vmul.f32 %v1049_v59, %v2698_v43  ;;  %v819_v42 = vsel %vm2957_vm7, %v2798_v50, %v815_v13  ;;  %v943_v11 = vor.u32 1.1754944e-38, %v942_v14 }
  0xe2   : > { %v2931_v17 = vpop.eup %2328  ;;  %2338 = vpow2.f32 %v2179_v16  ;;  %v704_v45 = vsel %vm2900_vm2, %v2854_v35, %v699_v27  ;;  %vm2975_vm9 = vcmp.eq.f32.partialorder %v940_v63, 8.507059e+37  ;;  %v1060_v60 = vand.u32 2147483647, %v2821_v5  ;;  %v406_v35 = vpop.f32.mrf.mxu0 }
  0xe3   : > { %v2331_v26 = vpop.eup %2330  ;;  %v707_v34 = vmul.f32 %v2931_v17, %v2863_v40  ;;  %v2982_v43 = vadd.f32 %v2678_v25, %v499_v21  ;;  %v935_v50 = vadd.f32 %v2832_v19, %v934_v28  ;;  %vm937_vm10 = vweird.f32 %v2832_v19 }
  0xe4   : > { %v2964_v36 = vadd.f32 1.0, %v2331_v26  ;;  %v2333_v37 = vpop.eup %2332  ;;  %v1054_v54 = vmul.f32 %v2890_v55, %v1053_v29  ;;  %v824_v12 = vsel %vm2921_vm4, %v823_v15, %v819_v42  ;;  %v507_v62 = vmul.f32 %v2673_v24, %v463_v39  ;;  %vm3005_vm12 = vmor %vm936_vm8, %vm937_vm10 }
  0xe5   : > { %v2335_v41 = vpop.eup %2334  ;;  %v2987_v56 = vadd.f32 1.0, %v2333_v37  ;;  %v708_v57 = vsub.f32 1.0, %v707_v34  ;;  %v2997_v1 = vmul.f32 %v704_v45, %v2701_v44  ;;  %vm1056_vm11 = vweird.f32 %v2821_v5 }
  0xe6   : > { %2340 = vrcp.f32 %v2964_v36  ;;  %v2989_v31 = vpop.eup %2336  ;;  %v2993_v61 = vadd.f32 1.0, %v2335_v41  ;;  %v1062_v0 = vand.u32 2147483648, %v2821_v5  ;;  %vm3009_vm13 = vcmp.eq.f32.partialorder %v1060_v60, 8.507059e+37  ;;  %v426_v60 = vpop.f32.mrf.mxu1 }
  0xe7   : > { %v827_v2 = vmul.f32 %v2989_v31, %v2925_v52  ;;  %2342 = vrcp.f32 %v2987_v56  ;;  %v2187_v44 = vmul.f32 -1.442695, %v2982_v43  ;;  %v484_v8 = vmul.f32 %v2673_v24, %v406_v35 }
  0xe8   : > { %v2339_v18 = vpop.eup %2338  ;;  %v3017_v10 = vmul.f32 %v824_v12, %v2706_v48  ;;  %v939_v32 = vsel %vm3005_vm12, %v2832_v19, %v935_v50  ;;  %v1055_v13 = vadd.f32 %v2890_v55, %v1054_v54  ;;  %vm1057_vm14 = vweird.f32 %v2890_v55 }
  0xe9   : > { %v709_v16 = vmul.f32 %v2931_v17, %v708_v57  ;;  %v828_v59 = vsub.f32 1.0, %v827_v2  ;;  %2344 = vrcp.f32 %v2993_v61  ;;  %v3029_v20 = vadd.f32 %v2678_v25, %v507_v62  ;;  %vm3046_vm0 = vmor %vm1056_vm11, %vm1057_vm14 }
  0xea   : > { %v1063_v48 = vor.u32 1.1754944e-38, %v1062_v0  ;;  %v715_v63 = vand.u32 2147483647, %v2863_v40  ;;  %v717_v21 = vand.u32 2147483648, %v2863_v40  ;;  %vm711_vm15 = vweird.f32 %v2863_v40  ;;  %v446_v0 = vpop.f32.mrf.mxu2 }
  0xeb   : > { %v837_v26 = vand.u32 2147483648, %v2925_v52  ;;  %2346 = vpow2.f32 %v2187_v44  ;;  %v3038_v27 = vadd.f32 %v2678_v25, %v484_v8  ;;  %v944_v15 = vsel %vm2975_vm9, %v943_v11, %v939_v32 }
  0xec   : > { %v3024_v14 = vpop.eup %2340  ;;  %vm712_vm1 = vweird.f32 %v2931_v17  ;;  %v835_v29 = vand.u32 2147483647, %v2925_v52  ;;  %v3052_v33 = vadd.f32 1.0, %v2339_v18  ;;  %v1059_v37 = vsel %vm3046_vm0, %v2890_v55, %v1055_v13 }
  0xed   : > { %v947_v19 = vmul.f32 %v3024_v14, %v2964_v36  ;;  %v3054_v34 = vpop.eup %2342  ;;  %v710_v42 = vadd.f32 %v2931_v17, %v709_v16  ;;  %v829_v5 = vmul.f32 %v2989_v31, %v828_v59  ;;  %v2195_v11 = vmul.f32 -1.442695, %v3029_v20  ;;  %vm3081_vm4 = vmor %vm711_vm15, %vm712_vm1 }
  0xee   : > { %vm3062_vm2 = vcmp.eq.f32.partialorder %v715_v63, 8.507059e+37  ;;  %v718_v41 = vor.u32 1.1754944e-38, %v717_v21  ;;  %v1067_v51 = vmul.f32 %v3054_v34, %v2987_v56  ;;  %v3071_v55 = vmul.f32 %v944_v15, %v2718_v58 }
  0xef   : > { %v948_v45 = vsub.f32 1.0, %v947_v19  ;;  %v3068_v50 = vpop.eup %2344  ;;  %vm831_vm3 = vweird.f32 %v2925_v52  ;;  %v838_v54 = vor.u32 1.1754944e-38, %v837_v26  ;;  %v2172_v35 = vmul.f32 -1.442695, %v3038_v27 }
  0xf0   : > { %v1064_v12 = vsel %vm3009_vm13, %v1063_v48, %v1059_v37  ;;  %vm832_vm5 = vweird.f32 %v2989_v31  ;;  %vm3086_vm6 = vcmp.eq.f32.partialorder %v835_v29, 8.507059e+37  ;;  %v955_v62 = vand.u32 2147483647, %v2964_v36 }
  0xf1   : > { %2348 = vrcp.f32 %v3052_v33  ;;  %v2347_v2 = vpop.eup %2346  ;;  %v714_v40 = vsel %vm3081_vm4, %v2931_v17, %v710_v42  ;;  %v830_v3 = vadd.f32 %v2989_v31, %v829_v5  ;;  %v492_v6 = vmul.f32 %v2673_v24, %v426_v60  ;;  %vm3114_vm7 = vmor %vm831_vm3, %vm832_vm5  ;;  %v466_v60 = vpop.f32.mrf.mxu3 }
  0xf2   : > { %2350 = vpow2.f32 %v2195_v11  ;;  %v949_v44 = vmul.f32 %v3024_v14, %v948_v45  ;;  %v1068_v8 = vsub.f32 1.0, %v1067_v51  ;;  %v722_v18 = vmul.f32 %v3068_v50, %v2993_v61 }
  0xf3   : > { %v3100_v32 = vadd.f32 1.0, %v2347_v2  ;;  %v957_v13 = vand.u32 2147483648, %v2964_v36  ;;  %2352 = vpow2.f32 %v2172_v35  ;;  %v3104_v16 = vadd.f32 %v2678_v25, %v492_v6  ;;  %v408_v35 = vpop.f32.mrf.mxu0 }
  0xf4   : > { %v500_v17 = vmul.f32 %v2673_v24, %v446_v0  ;;  %v3108_v59 = vmul.f32 %v1064_v12, %v2734_v4  ;;  %vm951_vm8 = vweird.f32 %v2964_v36  ;;  %v1075_v63 = vand.u32 2147483647, %v2987_v56 }
  0xf5   : > { %v1077_v21 = vand.u32 2147483648, %v2987_v56  ;;  %v719_v19 = vsel %vm3062_vm2, %v718_v41, %v714_v40  ;;  %v834_v4 = vsel %vm3114_vm7, %v2989_v31, %v830_v3  ;;  %vm952_vm9 = vweird.f32 %v3024_v14 }
  0xf6   : > { %2354 = vrcp.f32 %v3100_v32  ;;  %v950_v26 = vadd.f32 %v3024_v14, %v949_v44  ;;  %v1069_v15 = vmul.f32 %v3054_v34, %v1068_v8  ;;  %v723_v28 = vsub.f32 1.0, %v722_v18  ;;  %vm3157_vm14 = vmor %vm951_vm8, %vm952_vm9  ;;  %v428_v18 = vpop.f32.mrf.mxu1 }
  0xf7   : > { %v3128_v52 = vpop.eup %2348  ;;  %v2180_v29 = vmul.f32 -1.442695, %v3104_v16  ;;  %vm3133_vm10 = vcmp.eq.f32.partialorder %v955_v62, 8.507059e+37  ;;  %v958_v5 = vor.u32 1.1754944e-38, %v957_v13  ;;  %vm1071_vm11 = vweird.f32 %v2987_v56 }
  0xf8   : > { %v2351_v37 = vpop.eup %2350  ;;  %v3139_v31 = vadd.f32 %v2678_v25, %v500_v17  ;;  %v3142_v11 = vmul.f32 %v719_v19, %v2756_v22  ;;  %vm3144_vm12 = vcmp.eq.f32.partialorder %v1075_v63, 8.507059e+37  ;;  %v1078_v41 = vor.u32 1.1754944e-38, %v1077_v21 }
  0xf9   : > { %vm726_vm13 = vweird.f32 %v2993_v61  ;;  %v730_v45 = vand.u32 2147483647, %v2993_v61  ;;  %v732_v51 = vand.u32 2147483648, %v2993_v61  ;;  %v2353_v12 = vpop.eup %2352  ;;  %v839_v57 = vsel %vm3086_vm6, %v838_v54, %v834_v4 }
  0xfa   : > { %vm1072_vm15 = vweird.f32 %v3054_v34  ;;  %v3162_v62 = vadd.f32 1.0, %v2351_v37  ;;  %2356 = vpow2.f32 %v2180_v29  ;;  %v954_v0 = vsel %vm3157_vm14, %v3024_v14, %v950_v26 }
  0xfb   : > { %v1070_v58 = vadd.f32 %v3054_v34, %v1069_v15  ;;  %v724_v54 = vmul.f32 %v3068_v50, %v723_v28  ;;  %v3169_v2 = vadd.f32 1.0, %v2353_v12  ;;  %v2188_v40 = vmul.f32 -1.442695, %v3139_v31  ;;  %vm3191_vm1 = vmor %vm1071_vm11, %vm1072_vm15 }
  0xfc   : > { %v3171_v36 = vpop.eup %2354  ;;  %2358 = vrcp.f32 %v3162_v62  ;;  %v508_v3 = vmul.f32 %v2673_v24, %v466_v60  ;;  %v485_v6 = vmul.f32 %v2673_v24, %v408_v35  ;;  %vm3177_vm0 = vcmp.eq.f32.partialorder %v730_v45, 8.507059e+37 }
  0xfd   : > { %v842_v14 = vmul.f32 %v3128_v52, %v3052_v33  ;;  %v852_v8 = vand.u32 2147483648, %v3052_v33  ;;  %2360 = vrcp.f32 %v3169_v2  ;;  %v959_v13 = vsel %vm3133_vm10, %v958_v5, %v954_v0  ;;  %v448_v5 = vpop.f32.mrf.mxu2 }
  0xfe   : > { %vm727_vm2 = vweird.f32 %v3068_v50  ;;  %v733_v48 = vor.u32 1.1754944e-38, %v732_v51  ;;  %v850_v63 = vand.u32 2147483647, %v3052_v33  ;;  %v3198_v21 = vmul.f32 %v839_v57, %v2790_v46 }
  0xff   : > { %v1074_v19 = vsel %vm3191_vm1, %v3054_v34, %v1070_v58  ;;  %v725_v4 = vadd.f32 %v3068_v50, %v724_v54  ;;  %v962_v56 = vmul.f32 %v3171_v36, %v3100_v32  ;;  %2362 = vpow2.f32 %v2188_v40  ;;  %vm3228_vm3 = vmor %vm726_vm13, %vm727_vm2 }
 0x100   : > { %v2357_v26 = vpop.eup %2356  ;;  %v3207_v15 = vadd.f32 %v2678_v25, %v508_v3  ;;  %v3210_v28 = vadd.f32 %v2678_v25, %v485_v6  ;;  %v493_v46 = vmul.f32 %v2673_v24, %v428_v18  ;;  %v3214_v29 = vmul.f32 %v959_v13, %v2857_v30 }
 0x101   : > { %v843_v37 = vsub.f32 1.0, %v842_v14  ;;  %v3216_v34 = vor.u32 1.1754944e-38, %v852_v8  ;;  %v3218_v42 = vadd.f32 1.0, %v2357_v26  ;;  %v1079_v51 = vsel %vm3144_vm12, %v1078_v41, %v1074_v19 }
 0x102   : > { %v3220_v45 = vpop.eup %2358  ;;  %vm847_vm4 = vweird.f32 %v3128_v52  ;;  %v2196_v30 = vmul.f32 -1.442695, %v3207_v15  ;;  %v2173_v35 = vmul.f32 -1.442695, %v3210_v28  ;;  %v729_v39 = vsel %vm3228_vm3, %v3068_v50, %v725_v4 }
 0x103   : > { %v2361_v12 = vpop.eup %2360  ;;  %v963_v41 = vsub.f32 1.0, %v962_v56  ;;  %v1082_v57 = vmul.f32 %v3220_v45, %v3162_v62  ;;  %2364 = vrcp.f32 %v3218_v42  ;;  %vm846_vm5 = vweird.f32 %v3052_v33 }
 0x104   : > { %v970_v61 = vand.u32 2147483647, %v3100_v32  ;;  %v737_v22 = vmul.f32 %v2361_v12, %v3169_v2  ;;  %v3245_v0 = vadd.f32 %v2678_v25, %v493_v46  ;;  %v501_v58 = vmul.f32 %v2673_v24, %v448_v5  ;;  %vm3290_vm14 = vmor %vm846_vm5, %vm847_vm4 }
 0x105   : > { %v3249_v54 = vmul.f32 %v1079_v51, %v2876_v47  ;;  %v844_v50 = vmul.f32 %v3128_v52, %v843_v37  ;;  %vm966_vm6 = vweird.f32 %v3100_v32  ;;  %v972_v40 = vand.u32 2147483648, %v3100_v32  ;;  %v2363_v3 = vpop.eup %2362 }
 0x106   : > { %2366 = vpow2.f32 %v2196_v30  ;;  %v734_v6 = vsel %vm3177_vm0, %v733_v48, %v729_v39  ;;  %v738_v14 = vsub.f32 1.0, %v737_v22  ;;  %v745_v8 = vand.u32 2147483647, %v3169_v2 }
 0x107   : > { %2368 = vpow2.f32 %v2173_v35  ;;  %v964_v18 = vmul.f32 %v3171_v36, %v963_v41  ;;  %v1083_v13 = vsub.f32 1.0, %v1082_v57  ;;  %v747_v47 = vand.u32 2147483648, %v3169_v2  ;;  %v468_v41 = vpop.f32.mrf.mxu3 }
 0x108   : > { %v3259_v17 = vadd.f32 1.0, %v2363_v3  ;;  %v739_v19 = vmul.f32 %v2361_v12, %v738_v14  ;;  %vm742_vm7 = vweird.f32 %v2361_v12  ;;  %v2181_v4 = vmul.f32 -1.442695, %v3245_v0 }
 0x109   : > { %v3263_v56 = vadd.f32 %v2678_v25, %v501_v58  ;;  %v3265_v44 = vpop.eup %2364  ;;  %v845_v48 = vadd.f32 %v3128_v52, %v844_v50  ;;  %v973_v26 = vor.u32 1.1754944e-38, %v972_v40  ;;  %v1090_v46 = vand.u32 2147483647, %v3162_v62 }
 0x10a   : > { %2370 = vrcp.f32 %v3259_v17  ;;  %vm3270_vm8 = vcmp.eq.f32.partialorder %v850_v63, 8.507059e+37  ;;  %vm967_vm9 = vweird.f32 %v3171_v36  ;;  %vm3275_vm10 = vcmp.eq.f32.partialorder %v970_v61, 8.507059e+37 }
 0x10b   : > { %v740_v51 = vadd.f32 %v2361_v12, %v739_v19  ;;  %vm741_vm11 = vweird.f32 %v3169_v2  ;;  %v857_v60 = vmul.f32 %v3265_v44, %v3218_v42  ;;  %v965_v35 = vadd.f32 %v3171_v36, %v964_v18  ;;  %vm3306_vm15 = vmor %vm966_vm6, %vm967_vm9 }
 0x10c   : > { %v2367_v30 = vpop.eup %2366  ;;  %v1084_v63 = vmul.f32 %v3220_v45, %v1083_v13  ;;  %vm743_vm12 = vmor %vm741_vm11, %vm742_vm7  ;;  %v748_v39 = vor.u32 1.1754944e-38, %v747_v47  ;;  %2372 = vpow2.f32 %v2181_v4  ;;  %vm746_vm13 = vcmp.eq.f32.partialorder %v745_v8, 8.507059e+37 }
 0x10d   : > { %v2369_v57 = vpop.eup %2368  ;;  %v744_v61 = vsel %vm743_vm12, %v2361_v12, %v740_v51  ;;  %v858_v22 = vsub.f32 1.0, %v857_v60  ;;  %v2189_v58 = vmul.f32 -1.442695, %v3263_v56  ;;  %v1092_v50 = vand.u32 2147483648, %v3162_v62 }
 0x10e   : > { %v749_v40 = vsel %vm746_vm13, %v748_v39, %v744_v61  ;;  %v3295_v3 = vadd.f32 1.0, %v2367_v30  ;;  %v3297_v14 = vadd.f32 1.0, %v2369_v57  ;;  %v849_v12 = vsel %vm3290_vm14, %v3128_v52, %v845_v48  ;;  %v411_v61 = vpop.f32.mrf.mxu0 }
 0x10f   : > { %vm1087_vm0 = vweird.f32 %v3220_v45  ;;  %v859_v8 = vmul.f32 %v3265_v44, %v858_v22  ;;  %v509_v18 = vmul.f32 %v2673_v24, %v468_v41  ;;  %v969_v52 = vsel %vm3306_vm15, %v3171_v36, %v965_v35 }
 0x110   : > { %v3313_v13 = vpop.eup %2370  ;;  %v1085_v47 = vadd.f32 %v3220_v45, %v1084_v63  ;;  %vm862_vm1 = vweird.f32 %v3265_v44  ;;  %2374 = vrcp.f32 %v3295_v3  ;;  %v1160_v32 = vmul.f32 %v749_v40, %v3038_v27 }
 0x111   : > { %v860_v19 = vadd.f32 %v3265_v44, %v859_v8  ;;  %v977_v4 = vmul.f32 %v3313_v13, %v3259_v17  ;;  %2376 = vpow2.f32 %v2189_v58  ;;  %v3326_v51 = vmul.f32 %v734_v6, %v2879_v49 }
 0x112   : > { %v2373_v48 = vpop.eup %2372  ;;  %vm1086_vm2 = vweird.f32 %v3162_v62  ;;  %v867_v36 = vand.u32 2147483648, %v3218_v42  ;;  %2378 = vrcp.f32 %v3297_v14  ;;  %vm861_vm4 = vweird.f32 %v3218_v42 }
 0x113   : > { %vm3333_vm3 = vmor %vm1086_vm2, %vm1087_vm0  ;;  %v865_v60 = vand.u32 2147483647, %v3218_v42  ;;  %v978_v30 = vsub.f32 1.0, %v977_v4  ;;  %v3340_v49 = vadd.f32 %v2678_v25, %v509_v18  ;;  %v854_v62 = vsel %vm3270_vm8, %v3216_v34, %v849_v12 }
 0x114   : > { %v974_v6 = vsel %vm3275_vm10, %v973_v26, %v969_v52  ;;  %vm3347_vm5 = vcmp.eq.f32.partialorder %v1090_v46, 8.507059e+37  ;;  %vm3353_vm6 = vmor %vm861_vm4, %vm862_vm1  ;;  %v3357_v42 = vadd.f32 1.0, %v2373_v48  ;;  %v1089_v37 = vsel %vm3333_vm3, %v3220_v45, %v1085_v47 }
 0x115   : > { %v1093_v34 = vor.u32 1.1754944e-38, %v1092_v50  ;;  %v1252_v5 = vmax.f32 %v2843_v23, %v1160_v32  ;;  %v864_v26 = vsel %vm3353_vm6, %v3265_v44, %v860_v19  ;;  %v868_v39 = vor.u32 1.1754944e-38, %v867_v36 }
 0x116   : > { %v3366_v46 = vpop.eup %2374  ;;  %v979_v41 = vmul.f32 %v3313_v13, %v978_v30  ;;  %v985_v57 = vand.u32 2147483647, %v3259_v17  ;;  %2380 = vrcp.f32 %v3357_v42  ;;  %v3372_v45 = vmul.f32 %v854_v62, %v2916_v7 }
 0x117   : > { %v2377_v22 = vpop.eup %2376  ;;  %v3375_v23 = vmul.f32 %v974_v6, %v2982_v43  ;;  %vm866_vm7 = vcmp.eq.f32.partialorder %v865_v60, 8.507059e+37  ;;  %v2197_v44 = vmul.f32 -1.442695, %v3340_v49  ;;  %v1094_v2 = vsel %vm3347_vm5, %v1093_v34, %v1089_v37 }
 0x118   : > { %v2379_v58 = vpop.eup %2378  ;;  %v869_v50 = vsel %vm866_vm7, %v868_v39, %v864_v26  ;;  %vm981_vm8 = vweird.f32 %v3259_v17  ;;  %v987_v40 = vand.u32 2147483648, %v3259_v17  ;;  %v1256_v12 = vmax.f32 %v1252_v5, %v2883_v53  ;;  %v431_v5 = vpop.f32.mrf.mxu1 }
 0x119   : > { %v1097_v7 = vmul.f32 %v3366_v46, %v3295_v3  ;;  %v752_v43 = vmul.f32 %v2379_v58, %v3297_v14  ;;  %v486_v33 = vmul.f32 %v2673_v24, %v411_v61  ;;  %v980_v8 = vadd.f32 %v3313_v13, %v979_v41  ;;  %v451_v26 = vpop.f32.mrf.mxu2 }
 0x11a   : > { %vm982_vm9 = vweird.f32 %v3313_v13  ;;  %vm3389_vm10 = vcmp.eq.f32.partialorder %v985_v57, 8.507059e+37  ;;  %v1107_v52 = vand.u32 2147483648, %v3295_v3  ;;  %v3395_v47 = vmul.f32 %v869_v50, %v3104_v16 }
 0x11b   : > { %v753_v32 = vsub.f32 1.0, %v752_v43  ;;  %v3397_v19 = vadd.f32 1.0, %v2377_v22  ;;  %2382 = vpow2.f32 %v2197_v44  ;;  %v3402_v24 = vmul.f32 %v1094_v2, %v3029_v20  ;;  %vm3411_vm11 = vmor %vm981_vm8, %vm982_vm9 }
 0x11c   : > { %v3399_v4 = vpop.eup %2380  ;;  %v988_v48 = vor.u32 1.1754944e-38, %v987_v40  ;;  %v760_v36 = vand.u32 2147483647, %v3297_v14  ;;  %v762_v27 = vand.u32 2147483648, %v3297_v14  ;;  %v3407_v60 = vmax.f32 %v1256_v12, %v3395_v47 }
 0x11d   : > { %v1098_v30 = vsub.f32 1.0, %v1097_v7  ;;  %vm1101_vm12 = vweird.f32 %v3295_v3  ;;  %v3417_v20 = vadd.f32 %v2678_v25, %v486_v33  ;;  %v984_v62 = vsel %vm3411_vm11, %v3313_v13, %v980_v8  ;;  %v3455_v7 = vld [vmem:[%s4490_s2] ss:$0 sm:$0xff]  ;;  %v471_v25 = vpop.f32.mrf.mxu3 }
 0x11e   : > { %v754_v6 = vmul.f32 %v2379_v58, %v753_v32  ;;  %vm757_vm13 = vweird.f32 %v2379_v58  ;;  %v872_v35 = vmul.f32 %v3399_v4, %v3357_v42  ;;  %v1105_v17 = vand.u32 2147483647, %v3295_v3 }
 0x11f   : > { %v3425_v63 = vor.u32 1.1754944e-38, %v1107_v52  ;;  %vm756_vm14 = vweird.f32 %v3297_v14  ;;  %2384 = vrcp.f32 %v3397_v19  ;;  %vm3429_vm15 = vcmp.eq.f32.partialorder %v760_v36, 8.507059e+37 }
 0x120   : > { %v755_v37 = vadd.f32 %v2379_v58, %v754_v6  ;;  %v763_v34 = vor.u32 1.1754944e-38, %v762_v27  ;;  %v873_v13 = vsub.f32 1.0, %v872_v35  ;;  %v989_v41 = vsel %vm3389_vm10, %v988_v48, %v984_v62  ;;  %vm758_vm0 = vmor %vm756_vm14, %vm757_vm13 }
 0x121   : > { %v2383_v39 = vpop.eup %2382  ;;  %v1099_v57 = vmul.f32 %v3366_v46, %v1098_v30  ;;  %v880_v14 = vand.u32 2147483647, %v3357_v42  ;;  %v2174_v61 = vmul.f32 -1.442695, %v3417_v20  ;;  %v3441_v22 = vmax.f32 %v3407_v60, %v2951_v9 }
 0x122   : > { %v759_v44 = vsel %vm758_vm0, %v2379_v58, %v755_v37  ;;  %v874_v2 = vmul.f32 %v3399_v4, %v873_v13  ;;  %v3444_v50 = vadd.f32 1.0, %v2383_v39  ;;  %vm3446_vm1 = vcmp.eq.f32.partialorder %v1105_v17, 8.507059e+37 }
 0x123   : > { %v764_v12 = vsel %vm3429_vm15, %v763_v34, %v759_v44  ;;  %2386 = vpow2.f32 %v2174_v61  ;;  %v494_v43 = vmul.f32 %v3455_v7, %v431_v5  ;;  %v502_v58 = vmul.f32 %v3455_v7, %v451_v26  ;;  %v413_v34 = vpop.f32.mrf.mxu0 }
 0x124   : > { %v1704_v33 = vmax.f32 %v2883_v53, %v3395_v47  ;;  %v3462_v8 = vmul.f32 %v989_v41, %v3139_v31  ;;  %vm876_vm2 = vweird.f32 %v3357_v42  ;;  %v882_v18 = vand.u32 2147483648, %v3357_v42 }
 0x125   : > { %v3466_v52 = vpop.eup %2384  ;;  %v1100_v32 = vadd.f32 %v3366_v46, %v1099_v57  ;;  %vm1102_vm3 = vweird.f32 %v3366_v46  ;;  %v1161_v48 = vmul.f32 %v764_v12, %v3210_v28  ;;  %2388 = vrcp.f32 %v3444_v50  ;;  %v3487_v28 = vld [vmem:[%s4491_s3] ss:$0 sm:$0xff] }
 0x126   : > { %v1481_v53 = vmax.f32 %v3395_v47, %v2951_v9  ;;  %v875_v31 = vadd.f32 %v3399_v4, %v874_v2  ;;  %vm877_vm4 = vweird.f32 %v3399_v4  ;;  %v992_v36 = vmul.f32 %v3466_v52, %v3397_v19  ;;  %vm3501_vm6 = vmor %vm1101_vm12, %vm1102_vm3 }
 0x127   : > { %v1268_v27 = vmax.f32 %v3441_v22, %v3462_v8  ;;  %vm3480_vm5 = vcmp.eq.f32.partialorder %v880_v14, 8.507059e+37  ;;  %v3490_v47 = vadd.f32 %v3487_v28, %v494_v43  ;;  %v3493_v30 = vadd.f32 %v3487_v28, %v502_v58  ;;  %vm3515_vm7 = vmor %vm876_vm2, %vm877_vm4  ;;  %v433_v43 = vpop.f32.mrf.mxu1 }
 0x128   : > { %v3496_v62 = vmax.f32 %v1704_v33, %v2951_v9  ;;  %v1483_v6 = vmax.f32 %v1481_v53, %v3462_v8  ;;  %v883_v17 = vor.u32 1.1754944e-38, %v882_v18  ;;  %v993_v37 = vsub.f32 1.0, %v992_v36 }
 0x129   : > { %v2387_v13 = vpop.eup %2386  ;;  %v1835_v5 = vmax.f32 %v2951_v9, %v3462_v8  ;;  %v1104_v26 = vsel %vm3501_vm6, %v3366_v46, %v1100_v32  ;;  %v1253_v39 = vmax.f32 %v2997_v1, %v1161_v48  ;;  %v2182_v41 = vmul.f32 -1.442695, %v3490_v47 }
 0x12a   : > { %v879_v9 = vsel %vm3515_vm7, %v3399_v4, %v875_v31  ;;  %v994_v57 = vmul.f32 %v3466_v52, %v993_v37  ;;  %v3524_v14 = vadd.f32 1.0, %v2387_v13  ;;  %v2190_v1 = vmul.f32 -1.442695, %v3493_v30 }
 0x12b   : > { %v3527_v46 = vpop.eup %2388  ;;  %v1272_v42 = vmax.f32 %v1268_v27, %v2967_v38  ;;  %2390 = vpow2.f32 %v2182_v41  ;;  %v510_v61 = vmul.f32 %v3455_v7, %v471_v25  ;;  %v487_v44 = vmul.f32 %v3455_v7, %v413_v34 }
 0x12c   : > { %v1109_v2 = vsel %vm3446_vm1, %v3425_v63, %v1104_v26  ;;  %v1485_v4 = vmax.f32 %v1483_v6, %v2967_v38  ;;  %v1000_v12 = vand.u32 2147483647, %v3397_v19  ;;  %2392 = vrcp.f32 %v3524_v14 }
 0x12d   : > { %v3539_v58 = vmax.f32 %v1835_v5, %v2967_v38  ;;  %v884_v33 = vsel %vm3480_vm5, %v883_v17, %v879_v9  ;;  %vm997_vm8 = vweird.f32 %v3466_v52  ;;  %v1002_v18 = vand.u32 2147483648, %v3397_v19 }
 0x12e   : > { %v1257_v40 = vmax.f32 %v1253_v39, %v3017_v10  ;;  %v995_v63 = vadd.f32 %v3466_v52, %v994_v57  ;;  %v1112_v32 = vmul.f32 %v3527_v46, %v3444_v50  ;;  %2394 = vpow2.f32 %v2190_v1 }
 0x12f   : > { %v3550_v48 = vmul.f32 %v1109_v2, %v3207_v15  ;;  %v3553_v38 = vadd.f32 %v3487_v28, %v510_v61  ;;  %v3556_v53 = vadd.f32 %v3487_v28, %v487_v44  ;;  %v495_v31 = vmul.f32 %v3455_v7, %v433_v43 }
 0x130   : > { %v1708_v36 = vmax.f32 %v3496_v62, %v3462_v8  ;;  %v1169_v27 = vmul.f32 %v884_v33, %v3245_v0  ;;  %vm996_vm9 = vweird.f32 %v3397_v19  ;;  %vm3563_vm10 = vcmp.eq.f32.partialorder %v1000_v12, 8.507059e+37 }
 0x131   : > { %v2391_v15 = vpop.eup %2390  ;;  %v3568_v6 = vmax.f32 %v1272_v42, %v3550_v48  ;;  %v3571_v35 = vmax.f32 %v1485_v4, %v3550_v48  ;;  %vm3575_vm11 = vmor %vm996_vm9, %vm997_vm8  ;;  %v1003_v0 = vor.u32 1.1754944e-38, %v1002_v18  ;;  %v2198_v19 = vmul.f32 -1.442695, %v3553_v38  ;;  %v453_v18 = vpop.f32.mrf.mxu2 }
 0x132   : > { %v2393_v37 = vpop.eup %2392  ;;  %v1839_v25 = vmax.f32 %v3539_v58, %v3550_v48  ;;  %v3582_v34 = vmax.f32 %v1257_v40, %v1169_v27  ;;  %v999_v13 = vsel %vm3575_vm11, %v3466_v52, %v995_v63  ;;  %v1113_v5 = vsub.f32 1.0, %v1112_v32  ;;  %v473_v40 = vpop.f32.mrf.mxu3 }
 0x133   : > { %v767_v26 = vmul.f32 %v2393_v37, %v3524_v14  ;;  %v3588_v39 = vadd.f32 1.0, %v2391_v15  ;;  %v2175_v3 = vmul.f32 -1.442695, %v3556_v53  ;;  %v3592_v41 = vadd.f32 %v3487_v28, %v495_v31 }
 0x134   : > { %v2395_v9 = vpop.eup %2394  ;;  %v1711_v57 = vmax.f32 %v3017_v10, %v1169_v27  ;;  %v1120_v1 = vand.u32 2147483647, %v3444_v50  ;;  %v1122_v42 = vand.u32 2147483648, %v3444_v50  ;;  %2396 = vpow2.f32 %v2198_v19 }
 0x135   : > { %v1004_v52 = vsel %vm3563_vm10, %v1003_v0, %v999_v13  ;;  %vm1116_vm12 = vweird.f32 %v3444_v50  ;;  %v768_v61 = vsub.f32 1.0, %v767_v26  ;;  %v775_v44 = vand.u32 2147483647, %v3524_v14 }
 0x136   : > { %2398 = vrcp.f32 %v3588_v39  ;;  %v3604_v2 = vmax.f32 %v3582_v34, %v3071_v55  ;;  %v1114_v10 = vmul.f32 %v3527_v46, %v1113_v5  ;;  %v777_v4 = vand.u32 2147483648, %v3524_v14 }
 0x137   : > { %v3608_v12 = vadd.f32 1.0, %v2395_v9  ;;  %v769_v43 = vmul.f32 %v2393_v37, %v768_v61  ;;  %vm772_vm13 = vweird.f32 %v2393_v37  ;;  %2400 = vpow2.f32 %v2175_v3 }
 0x138   : > { %v2183_v33 = vmul.f32 -1.442695, %v3592_v41  ;;  %v1490_v63 = vmax.f32 %v1169_v27, %v3071_v55  ;;  %v3613_v32 = vmul.f32 %v1004_v52, %v3263_v56  ;;  %vm1117_vm14 = vweird.f32 %v3527_v46 }
 0x139   : > { %2402 = vrcp.f32 %v3608_v12  ;;  %v3618_v31 = vmax.f32 %v1711_v57, %v3071_v55  ;;  %v770_v16 = vadd.f32 %v2393_v37, %v769_v43  ;;  %vm771_vm15 = vweird.f32 %v3524_v14  ;;  %vm3646_vm3 = vmor %vm1116_vm12, %vm1117_vm14 }
 0x13a   : > { %vm776_vm0 = vcmp.eq.f32.partialorder %v775_v44, 8.507059e+37  ;;  %v2397_v15 = vpop.eup %2396  ;;  %vm773_vm1 = vmor %vm771_vm15, %vm772_vm13  ;;  %v778_v17 = vor.u32 1.1754944e-38, %v777_v4  ;;  %2404 = vpow2.f32 %v2183_v33  ;;  %v503_v27 = vmul.f32 %v3455_v7, %v453_v18 }
 0x13b   : > { %v511_v56 = vmul.f32 %v3455_v7, %v473_v40  ;;  %v1269_v19 = vmax.f32 %v3604_v2, %v3613_v32  ;;  %v1115_v13 = vadd.f32 %v3527_v46, %v1114_v10  ;;  %vm3626_vm2 = vcmp.eq.f32.partialorder %v1120_v1, 8.507059e+37 }
 0x13c   : > { %v2399_v0 = vpop.eup %2398  ;;  %v774_v14 = vsel %vm773_vm1, %v2393_v37, %v770_v16  ;;  %v3630_v26 = vadd.f32 1.0, %v2397_v15  ;;  %v3633_v3 = vmax.f32 %v1490_v63, %v3613_v32  ;;  %v1123_v9 = vor.u32 1.1754944e-38, %v1122_v42 }
 0x13d   : > { %v779_v57 = vsel %vm776_vm0, %v778_v17, %v774_v14  ;;  %v887_v7 = vmul.f32 %v2399_v0, %v3588_v39  ;;  %v2401_v52 = vpop.eup %2400  ;;  %v1715_v61 = vmax.f32 %v3618_v31, %v3613_v32  ;;  %v1842_v1 = vmax.f32 %v3071_v55, %v3613_v32 }
 0x13e   : > { %v897_v44 = vand.u32 2147483648, %v3588_v39  ;;  %2406 = vrcp.f32 %v3630_v26  ;;  %v1162_v10 = vmul.f32 %v779_v57, %v3417_v20  ;;  %v3651_v43 = vadd.f32 1.0, %v2401_v52 }
 0x13f   : > { %v2403_v37 = vpop.eup %2402  ;;  %v888_v4 = vsub.f32 1.0, %v887_v7  ;;  %v3654_v55 = vadd.f32 %v3487_v28, %v503_v27  ;;  %v1119_v33 = vsel %vm3646_vm3, %v3527_v46, %v1115_v13  ;;  %v3660_v18 = vmax.f32 %v1269_v19, %v3108_v59 }
 0x140   : > { %v1007_v50 = vmul.f32 %v2403_v37, %v3608_v12  ;;  %v3664_v40 = vadd.f32 %v3487_v28, %v511_v56  ;;  %v2405_v63 = vpop.eup %2404  ;;  %vm892_vm4 = vweird.f32 %v2399_v0  ;;  %v895_v16 = vand.u32 2147483647, %v3588_v39 }
 0x141   : > { %v889_v20 = vmul.f32 %v2399_v0, %v888_v4  ;;  %2408 = vrcp.f32 %v3651_v43  ;;  %vm891_vm5 = vweird.f32 %v3588_v39  ;;  %v898_v15 = vor.u32 1.1754944e-38, %v897_v44 }
 0x142   : > { %v1008_v17 = vsub.f32 1.0, %v1007_v50  ;;  %v1017_v46 = vand.u32 2147483648, %v3608_v12  ;;  %v1254_v27 = vmax.f32 %v3142_v11, %v1162_v10  ;;  %v3671_v13 = vadd.f32 1.0, %v2405_v63  ;;  %vm893_vm6 = vmor %vm891_vm5, %vm892_vm4 }
 0x143   : > { %v890_v19 = vadd.f32 %v2399_v0, %v889_v20  ;;  %v2191_v28 = vmul.f32 -1.442695, %v3654_v55  ;;  %vm1012_vm7 = vweird.f32 %v2403_v37  ;;  %v1015_v57 = vand.u32 2147483647, %v3608_v12 }
 0x144   : > { %v3674_v56 = vpop.eup %2406  ;;  %v1009_v14 = vmul.f32 %v2403_v37, %v1008_v17  ;;  %v2199_v39 = vmul.f32 -1.442695, %v3664_v40  ;;  %v1124_v7 = vsel %vm3626_vm2, %v1123_v9, %v1119_v33  ;;  %vm896_vm8 = vcmp.eq.f32.partialorder %v895_v16, 8.507059e+37 }
 0x145   : > { %v894_v52 = vsel %vm893_vm6, %v2399_v0, %v890_v19  ;;  %v1127_v11 = vmul.f32 %v3674_v56, %v3630_v26  ;;  %vm1011_vm9 = vweird.f32 %v3608_v12  ;;  %2410 = vrcp.f32 %v3671_v13 }
 0x146   : > { %v899_v44 = vsel %vm896_vm8, %v898_v15, %v894_v52  ;;  %v1010_v42 = vadd.f32 %v2403_v37, %v1009_v14  ;;  %v1258_v4 = vmax.f32 %v1254_v27, %v3198_v21  ;;  %vm1013_vm10 = vmor %vm1011_vm9, %vm1012_vm7  ;;  %v1018_v50 = vor.u32 1.1754944e-38, %v1017_v46 }
 0x147   : > { %v2409_v10 = vpop.eup %2408  ;;  %v1128_v63 = vsub.f32 1.0, %v1127_v11  ;;  %2412 = vpow2.f32 %v2191_v28  ;;  %vm1016_vm11 = vcmp.eq.f32.partialorder %v1015_v57, 8.507059e+37  ;;  %v1494_v9 = vmax.f32 %v3633_v3, %v3108_v59 }
 0x148   : > { %v1014_v5 = vsel %vm1013_vm10, %v2403_v37, %v1010_v42  ;;  %v782_v0 = vmul.f32 %v2409_v10, %v3651_v43  ;;  %2414 = vpow2.f32 %v2199_v39  ;;  %v3689_v33 = vmax.f32 %v1842_v1, %v3108_v59 }
 0x149   : > { %v1170_v12 = vmul.f32 %v899_v44, %v3490_v47  ;;  %v1019_v20 = vsel %vm1016_vm11, %v1018_v50, %v1014_v5  ;;  %v1129_v16 = vmul.f32 %v3674_v56, %v1128_v63  ;;  %v790_v17 = vand.u32 2147483647, %v3651_v43 }
 0x14a   : > { %v783_v15 = vsub.f32 1.0, %v782_v0  ;;  %v792_v37 = vand.u32 2147483648, %v3651_v43  ;;  %v3696_v46 = vmul.f32 %v1124_v7, %v3340_v49  ;;  %vm1131_vm12 = vweird.f32 %v3630_v26 }
 0x14b   : > { %v1262_v27 = vmax.f32 %v1258_v4, %v1170_v12  ;;  %v1135_v3 = vand.u32 2147483647, %v3630_v26  ;;  %v2411_v59 = vpop.eup %2410  ;;  %v3701_v1 = vmul.f32 %v1019_v20, %v3493_v30  ;;  %v1137_v47 = vand.u32 2147483648, %v3630_v26 }
 0x14c   : > { %v784_v19 = vmul.f32 %v2409_v10, %v783_v15  ;;  %vm787_vm13 = vweird.f32 %v2409_v10  ;;  %v1130_v14 = vadd.f32 %v3674_v56, %v1129_v16  ;;  %vm1132_vm14 = vweird.f32 %v3674_v56 }
 0x14d   : > { %v2413_v28 = vpop.eup %2412  ;;  %vm786_vm15 = vweird.f32 %v3651_v43  ;;  %v902_v49 = vmul.f32 %v2411_v59, %v3671_v13  ;;  %v1482_v39 = vmax.f32 %v1170_v12, %v3214_v29  ;;  %vm791_vm0 = vcmp.eq.f32.partialorder %v790_v17, 8.507059e+37  ;;  %vm3715_vm2 = vmor %vm1131_vm12, %vm1132_vm14 }
 0x14e   : > { %v2415_v57 = vpop.eup %2414  ;;  %v785_v7 = vadd.f32 %v2409_v10, %v784_v19  ;;  %v793_v30 = vor.u32 1.1754944e-38, %v792_v37  ;;  %v1266_v52 = vmax.f32 %v1262_v27, %v3214_v29  ;;  %vm788_vm1 = vmor %vm786_vm15, %vm787_vm13  ;;  %v910_v44 = vand.u32 2147483647, %v3671_v13 }
 0x14f   : > { %v903_v11 = vsub.f32 1.0, %v902_v49  ;;  %v912_v42 = vand.u32 2147483648, %v3671_v13  ;;  %v1484_v4 = vmax.f32 %v1482_v39, %v3701_v1  ;;  %vm907_vm3 = vweird.f32 %v2411_v59 }
 0x150   : > { %v789_v50 = vsel %vm788_vm1, %v2409_v10, %v785_v7  ;;  %v3719_v63 = vadd.f32 1.0, %v2413_v28  ;;  %v1134_v5 = vsel %vm3715_vm2, %v3674_v56, %v1130_v14  ;;  %v3724_v16 = vadd.f32 1.0, %v2415_v57 }
 0x151   : > { %v794_v0 = vsel %vm791_vm0, %v793_v30, %v789_v50  ;;  %v904_v20 = vmul.f32 %v2411_v59, %v903_v11  ;;  %v3728_v15 = vmax.f32 %v3660_v18, %v3696_v46  ;;  %v1705_v26 = vmax.f32 %v3198_v21, %v1170_v12 }
 0x152   : > { %v1138_v17 = vor.u32 1.1754944e-38, %v1137_v47  ;;  %v1163_v10 = vmul.f32 %v794_v0, %v3556_v53  ;;  %vm1136_vm4 = vcmp.eq.f32.partialorder %v1135_v3, 8.507059e+37  ;;  %vm906_vm5 = vweird.f32 %v3671_v13 }
 0x153   : > { %v905_v37 = vadd.f32 %v2411_v59, %v904_v20  ;;  %2416 = vrcp.f32 %v3719_v63  ;;  %v1270_v56 = vmax.f32 %v1266_v52, %v3701_v1  ;;  %vm908_vm6 = vmor %vm906_vm5, %vm907_vm3  ;;  %v913_v18 = vor.u32 1.1754944e-38, %v912_v42 }
 0x154   : > { %v1139_v19 = vsel %vm1136_vm4, %v1138_v17, %v1134_v5  ;;  %v1255_v28 = vmax.f32 %v3326_v51, %v1163_v10  ;;  %v1486_v14 = vmax.f32 %v1484_v4, %v3249_v54  ;;  %vm911_vm7 = vcmp.eq.f32.partialorder %v910_v44, 8.507059e+37 }
 0x155   : > { %v909_v21 = vsel %vm908_vm6, %v2411_v59, %v905_v37  ;;  %2418 = vrcp.f32 %v3724_v16  ;;  %v3740_v53 = vmax.f32 %v1494_v9, %v3696_v46  ;;  %v3743_v13 = vmax.f32 %v1705_v26, %v3214_v29 }
 0x156   : > { %v1259_v12 = vmax.f32 %v1255_v28, %v3372_v45  ;;  %v914_v3 = vsel %vm911_vm7, %v913_v18, %v909_v21  ;;  %v1846_v51 = vmax.f32 %v3689_v33, %v3696_v46  ;;  %v3749_v47 = vmul.f32 %v1139_v19, %v3553_v38 }
 0x157   : > { %v3752_v59 = vmul.f32 %v914_v3, %v3592_v41  ;;  %v1030_v49 = vand.u32 2147483647, %v3719_v63  ;;  %v3756_v9 = vmax.f32 %v3407_v60, %v1262_v27  ;;  %v1709_v57 = vmax.f32 %v3743_v13, %v3701_v1 }
 0x158   : > { %v1836_v39 = vmax.f32 %v3214_v29, %v3701_v1  ;;  %v1274_v7 = vmax.f32 %v1270_v56, %v3249_v54  ;;  %v1488_v38 = vmax.f32 %v1486_v14, %v3749_v47  ;;  %v1389_v41 = vmax.f32 %v3441_v22, %v1266_v52 }
 0x159   : > { %v2417_v30 = vpop.eup %2416  ;;  %v1263_v11 = vmax.f32 %v1259_v12, %v3752_v59  ;;  %vm1440_vm8 = vcmask 1047558   ;;  %vm1026_vm9 = vweird.f32 %v3719_v63  ;;  %v1032_v60 = vand.u32 2147483648, %v3719_v63 }
 0x15a   : > { %v1022_v44 = vmul.f32 %v2417_v30, %v3719_v63  ;;  %vm1621_vm10 = vcmask 1043456   ;;  %vm3773_vm11 = vcmp.eq.f32.partialorder %v1030_v49, 8.507059e+37  ;;  %vm1619_vm12 = vcmask 1047556  }
 0x15b   : > { %v2419_v27 = vpop.eup %2418  ;;  %v1267_v29 = vmax.f32 %v1263_v11, %v3375_v23  ;;  %v3771_v42 = vmax.f32 %v3582_v34, %v1263_v11  ;;  %v1150_v43 = vand.u32 2147483647, %v3724_v16  ;;  %vm1399_vm13 = vcmask 1041408  }
 0x15c   : > { %v1023_v22 = vsub.f32 1.0, %v1022_v44  ;;  %v1142_v52 = vmul.f32 %v2419_v27, %v3724_v16  ;;  %v1152_v50 = vand.u32 2147483648, %v3724_v16  ;;  %v1441_v0 = vsel %vm1440_vm8, %v1389_v41, -inf }
 0x15d   : > { %v1398_v5 = vmax.f32 %v3604_v2, %v1267_v29  ;;  %v1622_v34 = vsel %vm1621_vm10, %v3771_v42, -inf  ;;  %vm1027_vm14 = vweird.f32 %v2417_v30  ;;  %v1620_v17 = vsel %vm1619_vm12, %v3756_v9, -inf }
 0x15e   : > { %v1024_v20 = vmul.f32 %v2417_v30, %v1023_v22  ;;  %v1143_v26 = vsub.f32 1.0, %v1142_v52  ;;  %v1712_v10 = vmax.f32 %v3372_v45, %v3752_v59  ;;  %v1623_v19 = vmax.f32 %v1620_v17, %v1622_v34  ;;  %vm1028_vm0 = vmor %vm1026_vm9, %vm1027_vm14 }
 0x15f   : > { %v1442_v37 = vmax.f32 %v1441_v0, %v1398_v5  ;;  %v1400_v56 = vsel %vm1399_vm13, %v1398_v5, -inf  ;;  %vm1147_vm15 = vweird.f32 %v2419_v27  ;;  %v1033_v14 = vor.u32 1.1754944e-38, %v1032_v60 }
 0x160   : > { %v1025_v28 = vadd.f32 %v2417_v30, %v1024_v20  ;;  %v1144_v2 = vmul.f32 %v2419_v27, %v1143_v26  ;;  %v1401_v18 = vmax.f32 %v1389_v41, %v1400_v56  ;;  %vm1146_vm1 = vweird.f32 %v3724_v16 }
 0x161   : > { %vm3792_vm2 = vcmp.eq.f32.partialorder %v1150_v43, 8.507059e+37  ;;  %v1443_v12 = vrot.slane %v1442_v37, 4  ;;  %v1491_v45 = vmax.f32 %v3752_v59, %v3375_v23  ;;  %vm1148_vm3 = vmor %vm1146_vm1, %vm1147_vm15  ;;  %v1153_v63 = vor.u32 1.1754944e-38, %v1152_v50 }
 0x162   : > { %v1029_v3 = vsel %vm1028_vm0, %v2417_v30, %v1025_v28  ;;  %v1145_v49 = vadd.f32 %v2419_v27, %v1144_v2  ;;  %v1402_v11 = vrot.slane %v1401_v18, 4  ;;  %v1624_v60 = vrot.slane %v1623_v19, 4 }
 0x163   : > { %v1034_v41 = vsel %vm3773_vm11, %v1033_v14, %v1029_v3  ;;  %v1444_v44 = vmax.f32 %v1442_v37, %v1443_v12  ;;  %v1714_v16 = vmax.f32 %v1712_v10, %v3375_v23  ;;  %v1278_v5 = vmax.f32 %v1274_v7, %v3749_v47 }
 0x164   : > { %v1179_v22 = vmul.f32 %v1034_v41, %v3654_v55  ;;  %v1149_v52 = vsel %vm1148_vm3, %v2419_v27, %v1145_v49  ;;  %v1403_v43 = vmax.f32 %v1401_v18, %v1402_v11  ;;  %v1838_v59 = vmax.f32 %v1836_v39, %v3249_v54 }
 0x165   : > { %v1154_v30 = vsel %vm3792_vm2, %v1153_v63, %v1149_v52  ;;  %v1445_v0 = vrot.slane %v1444_v44, 2  ;;  %v1489_v17 = vmax.f32 %v3571_v35, %v1488_v38  ;;  %v1625_v55 = vmax.f32 %v1623_v19, %v1624_v60 }
 0x166   : > { %v1271_v4 = vmax.f32 %v1267_v29, %v1179_v22  ;;  %v1493_v34 = vmax.f32 %v1491_v45, %v1179_v22  ;;  %v1716_v20 = vmax.f32 %v1714_v16, %v1179_v22  ;;  %v1843_v50 = vmax.f32 %v3375_v23, %v1179_v22 }
 0x167   : > { %v1446_v26 = vmax.f32 %v1444_v44, %v1445_v0  ;;  %v1404_v10 = vrot.slane %v1403_v43, 2  ;;  %v1187_v27 = vmul.f32 %v1154_v30, %v3664_v40  ;;  %v3818_v23 = vmax.f32 %v1708_v36, %v1709_v57 }
 0x168   : > { %v1275_v7 = vmax.f32 %v1271_v4, %v3402_v24  ;;  %v1495_v54 = vmax.f32 %v1493_v34, %v3402_v24  ;;  %v1845_v39 = vmax.f32 %v1843_v50, %v3402_v24  ;;  %v3823_v35 = vmax.f32 %v1715_v61, %v1716_v20 }
 0x169   : > { %v1447_v40 = vrot.slane %v1446_v26, 1  ;;  %v1405_v38 = vmax.f32 %v1403_v43, %v1404_v10  ;;  %v1840_v29 = vmax.f32 %v1838_v59, %v3749_v47  ;;  %v1280_v24 = vmax.f32 %v3568_v6, %v3728_v15 }
 0x16a   : > { %v1279_v37 = vmax.f32 %v1275_v7, %v1187_v27  ;;  %v1497_v56 = vmax.f32 %v1495_v54, %v1187_v27  ;;  %v1320_v1 = vmax.f32 %v3568_v6, %v1278_v5  ;;  %v1847_v13 = vmax.f32 %v1845_v39, %v1187_v27 }
 0x16b   : > { %v3829_v8 = vmax.f32 %v1446_v26, %v1447_v40  ;;  %v1626_v62 = vrot.slane %v1625_v55, 2  ;;  %v1539_v31 = vsel %vm1440_vm8, %v1489_v17, -inf  ;;  %v1406_v57 = vrot.slane %v1405_v38, 1 }
 0x16c   : > { %v1321_v36 = vmax.f32 %v3728_v15, %v1279_v37  ;;  %v1498_v32 = vmax.f32 %v3740_v53, %v1497_v56  ;;  %v1281_v61 = vmax.f32 %v1278_v5, %v1279_v37  ;;  %v1756_v19 = vsel %vm1619_vm12, %v3818_v23, -inf }
 0x16d   : > { %v1449_v47 = vmul.f32 %v3829_v8, %v3829_v8  ;;  %v1757_v6 = vsel %vm1621_vm10, %v3823_v35, -inf  ;;  %v3844_v53 = vmax.f32 %v1846_v51, %v1847_v13  ;;  %v1627_v21 = vmax.f32 %v1625_v55, %v1626_v62 }
 0x16e   : > { %v1540_v28 = vmax.f32 %v1539_v31, %v1498_v32  ;;  %v1282_v2 = vmax.f32 %v1280_v24, %v1281_v61  ;;  %v1499_v18 = vsel %vm1399_vm13, %v1498_v32, -inf  ;;  %v1322_v15 = vmax.f32 %v1320_v1, %v1321_v36 }
 0x16f   : > { %1450 = vadd.xlane.f32.xlu1 %v1449_v47  ;;  %v1500_v14 = vmax.f32 %v1489_v17, %v1499_v18  ;;  %v1758_v12 = vmax.f32 %v1756_v19, %v1757_v6  ;;  %v3849_v45 = vmax.f32 %v1839_v25, %v1840_v29  ;;  %v3851_v41 = vmax.f32 %v1405_v38, %v1406_v57 }
 0x170   : > { %v1541_v3 = vrot.slane %v1540_v28, 4  ;;  %v1283_v49 = vrot.slane %v1282_v2, 4  ;;  %v1323_v11 = vrot.slane %v1322_v15, 4  ;;  %v1581_v44 = vrot.slane %v3756_v9, 4 }
 0x171   : > { %v1501_v63 = vrot.slane %v1500_v14, 4  ;;  %v1759_v33 = vrot.slane %v1758_v12, 4  ;;  %v1662_v16 = vrot.slane %v3771_v42, 4  ;;  %v1628_v52 = vrot.slane %v1627_v21, 1 }
 0x172   : > { %v1542_v46 = vmax.f32 %v1540_v28, %v1541_v3  ;;  %v1284_v51 = vmax.f32 %v1282_v2, %v1283_v49  ;;  %v1324_v60 = vmax.f32 %v1322_v15, %v1323_v11  ;;  %v1888_v58 = vsel %vm1621_vm10, %v3844_v53, -inf }
 0x173   : > { %v1502_v22 = vmax.f32 %v1500_v14, %v1501_v63  ;;  %v1760_v43 = vmax.f32 %v1758_v12, %v1759_v33  ;;  %v1887_v59 = vsel %vm1619_vm12, %v3849_v45, -inf  ;;  %v1408_v30 = vmul.f32 %v3851_v41, %v3851_v41 }
 0x174   : > { %v1543_v48 = vrot.slane %v1542_v46, 2  ;;  %v1285_v25 = vrot.slane %v1284_v51, 2  ;;  %v1325_v5 = vrot.slane %v1324_v60, 2  ;;  %v1889_v34 = vmax.f32 %v1887_v59, %v1888_v58 }
 0x175   : > { %v1503_v0 = vrot.slane %v1502_v22, 2  ;;  %v1761_v4 = vrot.slane %v1760_v43, 2  ;;  %v1663_v26 = vmax.f32 %v3771_v42, %v1662_v16  ;;  %v1582_v17 = vmax.f32 %v3756_v9, %v1581_v44 }
 0x176   : > { %v1544_v20 = vmax.f32 %v1542_v46, %v1543_v48  ;;  %v1286_v50 = vmax.f32 %v1284_v51, %v1285_v25  ;;  %v1890_v10 = vrot.slane %v1889_v34, 4  ;;  %v1326_v54 = vmax.f32 %v1324_v60, %v1325_v5 }
 0x177   : > { %1409 = vadd.xlane.f32.xlu1 %v1408_v30  ;;  %v1504_v7 = vmax.f32 %v1502_v22, %v1503_v0  ;;  %v3863_v39 = vmax.f32 %v1627_v21, %v1628_v52  ;;  %v1762_v40 = vmax.f32 %v1760_v43, %v1761_v4  ;;  %v1664_v56 = vrot.slane %v1663_v26, 2 }
 0x178   : > { %v1545_v55 = vrot.slane %v1544_v20, 1  ;;  %v1287_v27 = vrot.slane %v1286_v50, 1  ;;  %v1891_v38 = vmax.f32 %v1889_v34, %v1890_v10  ;;  %v1583_v24 = vrot.slane %v1582_v17, 2 }
 0x179   : > { %v1797_v1 = vrot.slane %v3823_v35, 4  ;;  %v1718_v42 = vrot.slane %v3818_v23, 4  ;;  %v1505_v62 = vrot.slane %v1504_v7, 1  ;;  %v1327_v36 = vrot.slane %v1326_v54, 1 }
 0x17a   : > { %v3865_v29 = vmax.f32 %v1544_v20, %v1545_v55  ;;  %v3867_v37 = vmax.f32 %v1286_v50, %v1287_v27  ;;  %v1630_v32 = vmul.f32 %v3863_v39, %v3863_v39  ;;  %v1763_v31 = vrot.slane %v1762_v40, 1 }
 0x17b   : > { %v1892_v61 = vrot.slane %v1891_v38, 2  ;;  %v1665_v47 = vmax.f32 %v1663_v26, %v1664_v56  ;;  %v1584_v57 = vmax.f32 %v1582_v17, %v1583_v24  ;;  %v1798_v19 = vmax.f32 %v3823_v35, %v1797_v1 }
 0x17c   : > { %v1547_v9 = vmul.f32 %v3865_v29, %v3865_v29  ;;  %v1289_v13 = vmul.f32 %v3867_v37, %v3867_v37  ;;  %v1719_v6 = vmax.f32 %v3818_v23, %v1718_v42  ;;  %v3879_v28 = vmax.f32 %v1504_v7, %v1505_v62 }
 0x17d   : > { %v3881_v2 = vmax.f32 %v1326_v54, %v1327_v36  ;;  %v3883_v18 = vmax.f32 %v1762_v40, %v1763_v31  ;;  %v1893_v15 = vmax.f32 %v1891_v38, %v1892_v61  ;;  %v1666_v14 = vrot.slane %v1665_v47, 1 }
 0x17e   : > { %1548 = vadd.xlane.f32.xlu2 %v1547_v9  ;;  %1290 = vadd.xlane.f32.xlu0 %v1289_v13  ;;  %v1585_v21 = vrot.slane %v1584_v57, 1  ;;  %v1799_v12 = vrot.slane %v1798_v19, 2  ;;  %v1720_v3 = vrot.slane %v1719_v6, 2  ;;  %v1507_v49 = vmul.f32 %v3879_v28, %v3879_v28 }
 0x17f   : > { %1631 = vadd.xlane.f32.xlu1 %v1630_v32  ;;  %v1329_v11 = vmul.f32 %v3881_v2, %v3881_v2  ;;  %v1928_v35 = vrot.slane %v3844_v53, 4  ;;  %v1849_v23 = vrot.slane %v3849_v45, 4  ;;  %v1765_v63 = vmul.f32 %v3883_v18, %v3883_v18 }
 0x180   : > { %v1894_v44 = vrot.slane %v1893_v15, 1  ;;  %v3893_v33 = vmax.f32 %v1665_v47, %v1666_v14  ;;  %v3895_v46 = vmax.f32 %v1584_v57, %v1585_v21  ;;  %v1800_v51 = vmax.f32 %v1798_v19, %v1799_v12 }
 0x181   : > { %v1721_v60 = vmax.f32 %v1719_v6, %v1720_v3  ;;  %v1929_v16 = vmax.f32 %v3844_v53, %v1928_v35  ;;  %v1850_v22 = vmax.f32 %v3849_v45, %v1849_v23 }
 0x182   : > { %v3899_v52 = vmax.f32 %v1893_v15, %v1894_v44  ;;  %v1668_v43 = vmul.f32 %v3893_v33, %v3893_v33  ;;  %v1587_v58 = vmul.f32 %v3895_v46, %v3895_v46  ;;  %v1801_v48 = vrot.slane %v1800_v51, 1 }
 0x183   : > { %v1722_v25 = vrot.slane %v1721_v60, 1  ;;  %v1930_v5 = vrot.slane %v1929_v16, 2  ;;  %v1851_v59 = vrot.slane %v1850_v22, 2 }
 0x184   : > { %v1896_v30 = vmul.f32 %v3899_v52, %v3899_v52  ;;  %v3907_v53 = vmax.f32 %v1800_v51, %v1801_v48 }
 0x185   : > { %v3909_v45 = vmax.f32 %v1721_v60, %v1722_v25  ;;  %v1931_v0 = vmax.f32 %v1929_v16, %v1930_v5  ;;  %v1852_v4 = vmax.f32 %v1850_v22, %v1851_v59 }
 0x186   : > { %1508 = vadd.xlane.f32.xlu2 %v1507_v49  ;;  %1330 = vadd.xlane.f32.xlu0 %v1329_v11  ;;  %v1803_v34 = vmul.f32 %v3907_v53, %v3907_v53 }
 0x187   : > { %1766 = vadd.xlane.f32.xlu1 %v1765_v63  ;;  %v1724_v20 = vmul.f32 %v3909_v45, %v3909_v45  ;;  %v1932_v50 = vrot.slane %v1931_v0, 1  ;;  %v1853_v26 = vrot.slane %v1852_v4, 1 }
 0x189   : > { %v3915_v17 = vmax.f32 %v1931_v0, %v1932_v50  ;;  %v3917_v10 = vmax.f32 %v1852_v4, %v1853_v26 }
 0x18b   : > { %v1934_v55 = vmul.f32 %v3915_v17, %v3915_v17  ;;  %v1855_v27 = vmul.f32 %v3917_v10, %v3917_v10 }
 0x18e   : > { %1669 = vadd.xlane.f32.xlu2 %v1668_v43  ;;  %1588 = vadd.xlane.f32.xlu0 %v1587_v58 }
 0x18f   : > { %1897 = vadd.xlane.f32.xlu1 %v1896_v30 }
 0x196   : > { %1804 = vadd.xlane.f32.xlu2 %v1803_v34  ;;  %1725 = vadd.xlane.f32.xlu0 %v1724_v20 }
 0x19e   : > { %1935 = vadd.xlane.f32.xlu2 %v1934_v55  ;;  %1856 = vadd.xlane.f32.xlu0 %v1855_v27 }
 0x1e2   : > { %v1451_v7 = vpop.xlane.xlu1 %1450 }
 0x1e3   : > { %2420 = vrsqrt.f32 %v1451_v7  ;;  %vm1459_vm4 = vcmp.eq.f32.partialorder %v1451_v7, inf  ;;  %v1462_v61 = vand.u32 2147483648, %v1451_v7  ;;  %vm1461_vm5 = vcmp.eq.f32.partialorder %v1451_v7, 0.0 }
 0x1e9   : > { %v2421_v54 = vpop.eup %2420 }
 0x1ea   : > { %v1453_v40 = vmul.f32 %v2421_v54, %v1451_v7  ;;  %v1410_v56 = vpop.xlane.xlu1 %1409 }
 0x1eb   : > { %2422 = vrsqrt.f32 %v1410_v56  ;;  %vm1418_vm6 = vcmp.eq.f32.partialorder %v1410_v56, inf  ;;  %vm1420_vm8 = vcmp.eq.f32.partialorder %v1410_v56, 0.0  ;;  %v1421_v48 = vand.u32 2147483648, %v1410_v56 }
 0x1ec   : > { %v1454_v38 = vmul.f32 %v2421_v54, %v1453_v40 }
 0x1ee   : > { %v1455_v24 = vmul.f32 0.5, %v1454_v38 }
 0x1f0   : > { %v1456_v1 = vsub.f32 1.5, %v1455_v24 }
 0x1f1   : > { %v3923_v42 = vpop.xlane.xlu2 %1548  ;;  %v3925_v9 = vpop.xlane.xlu0 %1290 }
 0x1f2   : > { %v1457_v13 = vmul.f32 %v2421_v54, %v1456_v1  ;;  %2424 = vrsqrt.f32 %v3923_v42  ;;  %v2423_v62 = vpop.eup %2422  ;;  %v3929_v31 = vpop.xlane.xlu1 %1631  ;;  %vm1557_vm7 = vcmp.eq.f32.partialorder %v3923_v42, inf  ;;  %vm1559_vm9 = vcmp.eq.f32.partialorder %v3923_v42, 0.0 }
 0x1f3   : > { %2426 = vrsqrt.f32 %v3925_v9  ;;  %v1412_v32 = vmul.f32 %v2423_v62, %v1410_v56  ;;  %v1560_v30 = vand.u32 2147483648, %v3923_v42  ;;  %vm1299_vm10 = vcmp.eq.f32.partialorder %v3925_v9, inf }
 0x1f4   : > { %v1458_v36 = vmul.f32 %v1457_v13, %v1451_v7  ;;  %2428 = vrsqrt.f32 %v3929_v31  ;;  %vm1301_vm11 = vcmp.eq.f32.partialorder %v3925_v9, 0.0  ;;  %vm1640_vm12 = vcmp.eq.f32.partialorder %v3929_v31, inf }
 0x1f5   : > { %v1413_v57 = vmul.f32 %v2423_v62, %v1412_v32  ;;  %vm1642_vm13 = vcmp.eq.f32.partialorder %v3929_v31, 0.0 }
 0x1f6   : > { %v1460_v47 = vsel %vm1459_vm4, %v1451_v7, %v1458_v36 }
 0x1f7   : > { %v1463_v19 = vsel %vm1461_vm5, %v1462_v61, %v1460_v47  ;;  %v1414_v15 = vmul.f32 0.5, %v1413_v57 }
 0x1f8   : > { %v2425_v6 = vpop.eup %2424  ;;  %v3935_v3 = vadd.f32 1e-06, %v1463_v19 }
 0x1f9   : > { %v2427_v14 = vpop.eup %2426  ;;  %v1551_v21 = vmul.f32 %v2425_v6, %v3923_v42  ;;  %v3933_v12 = vpop.xlane.xlu2 %1508  ;;  %v1415_v63 = vsub.f32 1.5, %v1414_v15 }
 0x1fa   : > { %v3937_v49 = vpop.xlane.xlu0 %1330  ;;  %v2429_v11 = vpop.eup %2428  ;;  %v1293_v23 = vmul.f32 %v2427_v14, %v3925_v9  ;;  %2430 = vrsqrt.f32 %v3933_v12  ;;  %vm1517_vm14 = vcmp.eq.f32.partialorder %v3933_v12, inf  ;;  %vm1519_vm15 = vcmp.eq.f32.partialorder %v3933_v12, 0.0 }
 0x1fb   : > { %v1552_v35 = vmul.f32 %v2425_v6, %v1551_v21  ;;  %v1416_v60 = vmul.f32 %v2423_v62, %v1415_v63  ;;  %2432 = vrsqrt.f32 %v3937_v49  ;;  %v1634_v16 = vmul.f32 %v2429_v11, %v3929_v31 }
 0x1fc   : > { %v1294_v51 = vmul.f32 %v2427_v14, %v1293_v23  ;;  %2434 = vrcp.f32 %v3935_v3  ;;  %v1302_v62 = vand.u32 2147483648, %v3925_v9  ;;  %vm1339_vm0 = vcmp.eq.f32.partialorder %v3937_v49, inf }
 0x1fd   : > { %v1553_v44 = vmul.f32 0.5, %v1552_v35  ;;  %v1417_v58 = vmul.f32 %v1416_v60, %v1410_v56  ;;  %v1635_v25 = vmul.f32 %v2429_v11, %v1634_v16  ;;  %v3988_v16 = vpop.xlane.xlu1 %1766  ;;  %vm1341_vm1 = vcmp.eq.f32.partialorder %v3937_v49, 0.0 }
 0x1fe   : > { %v1295_v43 = vmul.f32 0.5, %v1294_v51 }
 0x1ff   : > { %v1554_v22 = vsub.f32 1.5, %v1553_v44  ;;  %v1419_v34 = vsel %vm1418_vm6, %v1410_v56, %v1417_v58  ;;  %v1636_v50 = vmul.f32 0.5, %v1635_v25  ;;  %v1476_v56 = vand.u32 2147483648, %v3935_v3 }
 0x200   : > { %v2431_v5 = vpop.eup %2430  ;;  %v1296_v0 = vsub.f32 1.5, %v1295_v43  ;;  %v1422_v7 = vsel %vm1420_vm8, %v1421_v48, %v1419_v34 }
 0x201   : > { %v1555_v59 = vmul.f32 %v2425_v6, %v1554_v22  ;;  %v3947_v4 = vpop.xlane.xlu2 %1669  ;;  %v1511_v20 = vmul.f32 %v2431_v5, %v3933_v12  ;;  %v2433_v26 = vpop.eup %2432  ;;  %v3957_v40 = vadd.f32 1e-06, %v1422_v7  ;;  %v1637_v36 = vsub.f32 1.5, %v1636_v50 }
 0x202   : > { %2436 = vrsqrt.f32 %v3947_v4  ;;  %v1297_v27 = vmul.f32 %v2427_v14, %v1296_v0  ;;  %v3954_v54 = vpop.eup %2434  ;;  %v1333_v24 = vmul.f32 %v2433_v26, %v3937_v49  ;;  %v1643_v14 = vand.u32 2147483648, %v3929_v31  ;;  %v3996_v25 = vpop.xlane.xlu0 %1588 }
 0x203   : > { %v1556_v55 = vmul.f32 %v1555_v59, %v3923_v42  ;;  %v1512_v38 = vmul.f32 %v2431_v5, %v1511_v20  ;;  %2438 = vrcp.f32 %v3957_v40  ;;  %v1466_v61 = vmul.f32 %v3954_v54, %v3935_v3 }
 0x204   : > { %v1298_v13 = vmul.f32 %v1297_v27, %v3925_v9  ;;  %v1334_v15 = vmul.f32 %v2433_v26, %v1333_v24  ;;  %v1638_v23 = vmul.f32 %v2429_v11, %v1637_v36  ;;  %v3985_v63 = vor.u32 1.1754944e-38, %v1476_v56 }
 0x205   : > { %v1558_v1 = vsel %vm1557_vm7, %v3923_v42, %v1556_v55  ;;  %v1513_v6 = vmul.f32 0.5, %v1512_v38  ;;  %v1435_v7 = vand.u32 2147483648, %v3957_v40  ;;  %vm1678_vm2 = vcmp.eq.f32.partialorder %v3947_v4, inf }
 0x206   : > { %v1561_v32 = vsel %vm1559_vm9, %v1560_v30, %v1558_v1  ;;  %v1300_v57 = vsel %vm1299_vm10, %v3925_v9, %v1298_v13  ;;  %v1335_v51 = vmul.f32 0.5, %v1334_v15  ;;  %v1467_v9 = vsub.f32 1.0, %v1466_v61 }
 0x207   : > { %v3972_v47 = vadd.f32 1e-06, %v1561_v32  ;;  %v1303_v42 = vsel %vm1301_vm11, %v1302_v62, %v1300_v57  ;;  %v1514_v44 = vsub.f32 1.5, %v1513_v6  ;;  %v1639_v11 = vmul.f32 %v1638_v23, %v3929_v31 }
 0x208   : > { %v2437_v19 = vpop.eup %2436  ;;  %v3983_v35 = vadd.f32 1e-06, %v1303_v42  ;;  %v1336_v58 = vsub.f32 1.5, %v1335_v51  ;;  %v1520_v30 = vand.u32 2147483648, %v3933_v12  ;;  %v1468_v55 = vmul.f32 %v3954_v54, %v1467_v9 }
 0x209   : > { %2440 = vrcp.f32 %v3972_v47  ;;  %v1672_v60 = vmul.f32 %v2437_v19, %v3947_v4  ;;  %v3993_v22 = vpop.eup %2438  ;;  %v1515_v43 = vmul.f32 %v2431_v5, %v1514_v44  ;;  %v1641_v5 = vsel %vm1640_vm12, %v3929_v31, %v1639_v11  ;;  %v4046_v51 = vpop.xlane.xlu2 %1804 }
 0x20a   : > { %2442 = vrcp.f32 %v3983_v35  ;;  %v1425_v59 = vmul.f32 %v3993_v22, %v3957_v40  ;;  %v1337_v34 = vmul.f32 %v2433_v26, %v1336_v58  ;;  %v1644_v27 = vsel %vm1642_vm13, %v1643_v14, %v1641_v5  ;;  %v4068_v5 = vpop.xlane.xlu0 %1725 }
 0x20b   : > { %v1673_v48 = vmul.f32 %v2437_v19, %v1672_v60  ;;  %2444 = vrsqrt.f32 %v3988_v16  ;;  %v1516_v0 = vmul.f32 %v1515_v43, %v3933_v12  ;;  %v4019_v24 = vadd.f32 1e-06, %v1644_v27 }
 0x20c   : > { %2446 = vrsqrt.f32 %v3996_v25  ;;  %v1338_v38 = vmul.f32 %v1337_v34, %v3937_v49  ;;  %v1342_v31 = vand.u32 2147483648, %v3937_v49  ;;  %v1426_v61 = vsub.f32 1.0, %v1425_v59 }
 0x20d   : > { %v1674_v20 = vmul.f32 0.5, %v1673_v48  ;;  %v1518_v26 = vsel %vm1517_vm14, %v3933_v12, %v1516_v0  ;;  %2448 = vrcp.f32 %v4019_v24  ;;  %v4041_v15 = vadd.f32 %v3954_v54, %v1468_v55 }
 0x20e   : > { %v1521_v13 = vsel %vm1519_vm15, %v1520_v30, %v1518_v26  ;;  %v1340_v12 = vsel %vm1339_vm0, %v3937_v49, %v1338_v38  ;;  %v1433_v23 = vand.u32 2147483647, %v3957_v40  ;;  %v4044_v44 = vor.u32 1.1754944e-38, %v1435_v7 }
 0x20f   : > { %v4007_v50 = vpop.eup %2440  ;;  %v1675_v62 = vsub.f32 1.5, %v1674_v20  ;;  %v4031_v57 = vadd.f32 1e-06, %v1521_v13  ;;  %v1316_v9 = vand.u32 2147483648, %v3983_v35  ;;  %v1427_v11 = vmul.f32 %v3993_v22, %v1426_v61 }
 0x210   : > { %v4021_v1 = vpop.eup %2442  ;;  %v1564_v56 = vmul.f32 %v4007_v50, %v3972_v47  ;;  %vm1310_vm3 = vweird.f32 %v3983_v35  ;;  %vm1680_vm4 = vcmp.eq.f32.partialorder %v3947_v4, 0.0  ;;  %v1681_v49 = vand.u32 2147483648, %v3947_v4 }
 0x211   : > { %v1306_v32 = vmul.f32 %v4021_v1, %v3983_v35  ;;  %v4033_v42 = vpop.eup %2444  ;;  %v1676_v6 = vmul.f32 %v2437_v19, %v1675_v62  ;;  %2450 = vrcp.f32 %v4031_v57  ;;  %v1343_v19 = vsel %vm1341_vm1, %v1342_v31, %v1340_v12 }
 0x212   : > { %v2447_v60 = vpop.eup %2446  ;;  %v1565_v58 = vsub.f32 1.0, %v1564_v56  ;;  %v4054_v48 = vadd.f32 1e-06, %v1343_v19  ;;  %v1769_v34 = vmul.f32 %v4033_v42, %v3988_v16  ;;  %2452 = vrsqrt.f32 %v4046_v51 }
 0x213   : > { %v1307_v14 = vsub.f32 1.0, %v1306_v32  ;;  %v1677_v43 = vmul.f32 %v1676_v6, %v3947_v4  ;;  %v1591_v59 = vmul.f32 %v2447_v60, %v3996_v25  ;;  %v4070_v20 = vpop.eup %2448  ;;  %v1314_v55 = vand.u32 2147483647, %v3983_v35 }
 0x214   : > { %2454 = vrcp.f32 %v4054_v48  ;;  %v4073_v27 = vor.u32 1.1754944e-38, %v1316_v9  ;;  %v1770_v26 = vmul.f32 %v4033_v42, %v1769_v34  ;;  %v4077_v38 = vmul.f32 %v4007_v50, %v1565_v58 }
 0x215   : > { %v1308_v30 = vmul.f32 %v4021_v1, %v1307_v14  ;;  %v1679_v0 = vsel %vm1678_vm2, %v3947_v4, %v1677_v43  ;;  %v1592_v7 = vmul.f32 %v2447_v60, %v1591_v59  ;;  %vm1311_vm5 = vweird.f32 %v4021_v1 }
 0x216   : > { %v4081_v13 = vadd.f32 %v3993_v22, %v1427_v11  ;;  %v1682_v4 = vsel %vm1680_vm4, %v1681_v49, %v1679_v0  ;;  %vm1597_vm6 = vcmp.eq.f32.partialorder %v3996_v25, inf  ;;  %v1356_v56 = vand.u32 2147483648, %v4054_v48  ;;  %v4102_v11 = vpop.xlane.xlu1 %1897  ;;  %vm4110_vm10 = vmor %vm1310_vm3, %vm1311_vm5 }
 0x217   : > { %v4084_v31 = vpop.eup %2450  ;;  %v4087_v62 = vadd.f32 %v4021_v1, %v1308_v30  ;;  %v1593_v32 = vmul.f32 0.5, %v1592_v7  ;;  %v1771_v61 = vmul.f32 0.5, %v1770_v26  ;;  %vm1775_vm7 = vcmp.eq.f32.partialorder %v3988_v16, inf }
 0x218   : > { %v1354_v6 = vand.u32 2147483647, %v4054_v48  ;;  %v4095_v14 = vmul.f32 %v4070_v20, %v4019_v24  ;;  %vm1599_vm8 = vcmp.eq.f32.partialorder %v3996_v25, 0.0  ;;  %vm1777_vm9 = vcmp.eq.f32.partialorder %v3988_v16, 0.0  ;;  %v2453_v9 = vpop.eup %2452 }
 0x219   : > { %v4099_v19 = vadd.f32 1e-06, %v1682_v4  ;;  %v1594_v43 = vsub.f32 1.5, %v1593_v32  ;;  %v1772_v58 = vsub.f32 1.5, %v1771_v61  ;;  %2456 = vrsqrt.f32 %v4068_v5  ;;  %v4126_v32 = vpop.xlane.xlu2 %1935 }
 0x21a   : > { %v4104_v59 = vpop.eup %2454  ;;  %v1524_v0 = vmul.f32 %v4084_v31, %v4031_v57  ;;  %vm1350_vm11 = vweird.f32 %v4054_v48  ;;  %v1600_v34 = vand.u32 2147483648, %v3996_v25  ;;  %v1807_v49 = vmul.f32 %v2453_v9, %v4046_v51 }
 0x21b   : > { %v1313_v7 = vsel %vm4110_vm10, %v4021_v1, %v4087_v62  ;;  %vm1430_vm12 = vweird.f32 %v3993_v22  ;;  %v1346_v35 = vmul.f32 %v4104_v59, %v4054_v48  ;;  %v1357_v26 = vor.u32 1.1754944e-38, %v1356_v56 }
 0x21c   : > { %v1595_v4 = vmul.f32 %v2447_v60, %v1594_v43  ;;  %vm4128_vm13 = vcmp.eq.f32.partialorder %v1314_v55, 8.507059e+37  ;;  %vm4132_vm14 = vcmp.eq.f32.partialorder %v1354_v6, 8.507059e+37  ;;  %v1773_v1 = vmul.f32 %v4033_v42, %v1772_v58  ;;  %v4148_v58 = vpop.xlane.xlu0 %1856 }
 0x21d   : > { %v1808_v62 = vmul.f32 %v2453_v9, %v1807_v49  ;;  %2458 = vrsqrt.f32 %v4102_v11  ;;  %vm1471_vm15 = vweird.f32 %v3954_v54  ;;  %vm1429_vm0 = vweird.f32 %v3957_v40 }
 0x21e   : > { %v1347_v60 = vsub.f32 1.0, %v1346_v35  ;;  %2460 = vrcp.f32 %v4099_v19  ;;  %v1596_v55 = vmul.f32 %v1595_v4, %v3996_v25  ;;  %vm1813_vm1 = vcmp.eq.f32.partialorder %v4046_v51, inf }
 0x21f   : > { %v1816_v56 = vand.u32 2147483648, %v4046_v51  ;;  %v1525_v6 = vsub.f32 1.0, %v1524_v0  ;;  %v1774_v43 = vmul.f32 %v1773_v1, %v3988_v16  ;;  %v1809_v42 = vmul.f32 0.5, %v1808_v62  ;;  %v2457_v49 = vpop.eup %2456 }
 0x220   : > { %vm1815_vm2 = vcmp.eq.f32.partialorder %v4046_v51, 0.0  ;;  %2462 = vrsqrt.f32 %v4126_v32  ;;  %vm1470_vm3 = vweird.f32 %v3935_v3  ;;  %v1348_v35 = vmul.f32 %v4104_v59, %v1347_v60 }
 0x221   : > { %vm1351_vm4 = vweird.f32 %v4104_v59  ;;  %v1598_v0 = vsel %vm1597_vm6, %v3996_v25, %v1596_v55  ;;  %vm4159_vm5 = vcmp.eq.f32.partialorder %v1433_v23, 8.507059e+37  ;;  %v1776_v60 = vsel %vm1775_vm7, %v3988_v16, %v1774_v43 }
 0x222   : > { %v1601_v62 = vsel %vm1599_vm8, %v1600_v34, %v1598_v0  ;;  %v1810_v30 = vsub.f32 1.5, %v1809_v42  ;;  %v1728_v21 = vmul.f32 %v2457_v49, %v4068_v5  ;;  %v1349_v55 = vadd.f32 %v4104_v59, %v1348_v35  ;;  %vm4182_vm6 = vmor %vm1350_vm11, %vm1351_vm4 }
 0x223   : > { %v4170_v36 = vadd.f32 1e-06, %v1601_v62  ;;  %v4597_v4 = vand.u32 2147483648, %v3988_v16  ;;  %2464 = vrsqrt.f32 %v4148_v58  ;;  %v2459_v25 = vpop.eup %2458  ;;  %v4178_v34 = vmul.f32 %v4084_v31, %v1525_v6 }
 0x224   : > { %v1811_v35 = vmul.f32 %v2453_v9, %v1810_v30  ;;  %v1729_v0 = vmul.f32 %v2457_v49, %v1728_v21  ;;  %v4188_v62 = vpop.eup %2460  ;;  %v1353_v16 = vsel %vm4182_vm6, %v4104_v59, %v1349_v55  ;;  %vm1734_vm7 = vcmp.eq.f32.partialorder %v4068_v5, inf }
 0x225   : > { %v1779_v23 = vsel %vm1777_vm9, %v4597_v4, %v1776_v60  ;;  %2466 = vrcp.f32 %v4170_v36  ;;  %v1900_v48 = vmul.f32 %v2459_v25, %v4102_v11  ;;  %v1909_v6 = vand.u32 2147483648, %v4102_v11  ;;  %vm4211_vm9 = vmor %vm1429_vm0, %vm1430_vm12 }
 0x226   : > { %v4186_v42 = vadd.f32 1e-06, %v1779_v23  ;;  %v2463_v4 = vpop.eup %2462  ;;  %v1812_v9 = vmul.f32 %v1811_v35, %v4046_v51  ;;  %v1730_v21 = vmul.f32 0.5, %v1729_v0  ;;  %vm1736_vm8 = vcmp.eq.f32.partialorder %v4068_v5, 0.0 }
 0x227   : > { %v1947_v30 = vand.u32 2147483648, %v4126_v32  ;;  %v1901_v60 = vmul.f32 %v2459_v25, %v1900_v48  ;;  %v1938_v59 = vmul.f32 %v2463_v4, %v4126_v32  ;;  %v1318_v55 = vsel %vm4128_vm13, %v4073_v27, %v1313_v7  ;;  %vm4233_vm13 = vmor %vm1470_vm3, %vm1471_vm15 }
 0x228   : > { %2468 = vrcp.f32 %v4186_v42  ;;  %v1358_v23 = vsel %vm4132_vm14, %v1357_v26, %v1353_v16  ;;  %v1814_v35 = vsel %vm1813_vm1, %v4046_v51, %v1812_v9  ;;  %v1731_v0 = vsub.f32 1.5, %v1730_v21 }
 0x229   : > { %vm1906_vm10 = vcmp.eq.f32.partialorder %v4102_v11, inf  ;;  %v1319_v27 = vmul.f32 %v1318_v55, %v3867_v37  ;;  %v1359_v12 = vmul.f32 %v1358_v23, %v3881_v2  ;;  %v2465_v7 = vpop.eup %2464  ;;  %vm1528_vm11 = vweird.f32 %v4031_v57 }
 0x22a   : > { %v1817_v40 = vsel %vm1815_vm2, %v1816_v56, %v1814_v35  ;;  %v1902_v26 = vmul.f32 0.5, %v1901_v60  ;;  %vm1908_vm12 = vcmp.eq.f32.partialorder %v4102_v11, 0.0  ;;  %v1939_v61 = vmul.f32 %v2463_v4, %v1938_v59 }
 0x22b   : > { %v1432_v16 = vsel %vm4211_vm9, %v3993_v22, %v4081_v13  ;;  %v4237_v2 = vadd.f32 1e-06, %v1817_v40  ;;  %v1732_v51 = vmul.f32 %v2457_v49, %v1731_v0  ;;  %vm1944_vm14 = vcmp.eq.f32.partialorder %v4126_v32, inf  ;;  %v4241_v9 = vpop.eup %2466 }
 0x22c   : > { %v1859_v56 = vmul.f32 %v2465_v7, %v4148_v58  ;;  %v1360_v48 = vadd.f32 %v1359_v12, %v1319_v27  ;;  %v1903_v21 = vsub.f32 1.5, %v1902_v26  ;;  %v1940_v22 = vmul.f32 0.5, %v1939_v61 }
 0x22d   : > { %vm1946_vm0 = vcmp.eq.f32.partialorder %v4126_v32, 0.0  ;;  %v1437_v13 = vsel %vm4159_vm5, %v4044_v44, %v1432_v16  ;;  %v1473_v49 = vsel %vm4233_vm13, %v3954_v54, %v4041_v15  ;;  %v1604_v59 = vmul.f32 %v4241_v9, %v4170_v36 }
 0x22e   : > { %v4251_v60 = vpop.eup %2468  ;;  %v1733_v55 = vmul.f32 %v1732_v51, %v4068_v5  ;;  %v1860_v23 = vmul.f32 %v2465_v7, %v1859_v56  ;;  %v1868_v43 = vand.u32 2147483648, %v4148_v58  ;;  %v1904_v35 = vmul.f32 %v2459_v25, %v1903_v21 }
 0x22f   : > { %v1941_v0 = vsub.f32 1.5, %v1940_v22  ;;  %vm1865_vm15 = vcmp.eq.f32.partialorder %v4148_v58, inf  ;;  %v1438_v44 = vmul.f32 %v1437_v13, %v3851_v41  ;;  %v4604_v1 = vand.u32 2147483647, %v3935_v3 }
 0x230   : > { %2470 = vrcp.f32 %v4237_v2  ;;  %v1735_v54 = vsel %vm1734_vm7, %v4068_v5, %v1733_v55  ;;  %v1861_v15 = vmul.f32 0.5, %v1860_v23  ;;  %vm1867_vm2 = vcmp.eq.f32.partialorder %v4148_v58, 0.0 }
 0x231   : > { %vm1475_vm1 = vcmp.eq.f32.partialorder %v4604_v1, 8.507059e+37  ;;  %v4605_v25 = vand.u32 2147483648, %v4068_v5  ;;  %v1905_v41 = vmul.f32 %v1904_v35, %v4102_v11  ;;  %v1942_v3 = vmul.f32 %v2463_v4, %v1941_v0 }
 0x232   : > { %v1478_v27 = vsel %vm1475_vm1, %v3985_v63, %v1473_v49  ;;  %v1439_v40 = vadd.f32 %v1438_v44, %v1360_v48  ;;  %v1862_v61 = vsub.f32 1.5, %v1861_v15  ;;  %v1527_v37 = vadd.f32 %v4084_v31, %v4178_v34 }
 0x233   : > { %v1738_v12 = vsel %vm1736_vm8, %v4605_v25, %v1735_v54  ;;  %v1479_v16 = vmul.f32 %v1478_v27, %v3829_v8  ;;  %v1907_v63 = vsel %vm1906_vm10, %v4102_v11, %v1905_v41  ;;  %v1943_v51 = vmul.f32 %v1942_v3, %v4126_v32 }
 0x234   : > { %v4272_v26 = vadd.f32 1e-06, %v1738_v12  ;;  %vm1529_vm3 = vweird.f32 %v4084_v31  ;;  %v1532_v5 = vand.u32 2147483647, %v4031_v57  ;;  %v1605_v4 = vsub.f32 1.0, %v1604_v59 }
 0x235   : > { %v1910_v8 = vsel %vm1908_vm12, %v1909_v6, %v1907_v63  ;;  %v1863_v56 = vmul.f32 %v2465_v7, %v1862_v61  ;;  %vm4290_vm4 = vmor %vm1528_vm11, %vm1529_vm3  ;;  %v1945_v21 = vsel %vm1944_vm14, %v4126_v32, %v1943_v51  ;;  %v1480_v22 = vadd.f32 %v1479_v16, %v1439_v40 }
 0x236   : > { %2472 = vrcp.f32 %v4272_v26  ;;  %v4294_v48 = vadd.f32 1e-06, %v1910_v8  ;;  %v1531_v13 = vsel %vm4290_vm4, %v4084_v31, %v1527_v37  ;;  %v4302_v11 = vpop.eup %2470  ;;  %v1948_v6 = vsel %vm1946_vm0, %v1947_v30, %v1945_v21 }
 0x237   : > { %v1864_v7 = vmul.f32 %v1863_v56, %v4148_v58  ;;  %v4608_v49 = vand.u32 2147483648, %v4031_v57  ;;  %v1567_v55 = vadd.f32 %v4007_v50, %v4077_v38  ;;  %v4313_v23 = vadd.f32 1e-06, %v1948_v6 }
 0x238   : > { %vm1533_vm5 = vcmp.eq.f32.partialorder %v1532_v5, 8.507059e+37  ;;  %vm1568_vm6 = vweird.f32 %v3972_v47  ;;  %vm1569_vm7 = vweird.f32 %v4007_v50  ;;  %v1572_v57 = vand.u32 2147483647, %v3972_v47 }
 0x239   : > { %v1535_v59 = vor.u32 1.1754944e-38, %v4608_v49  ;;  %v1866_v31 = vsel %vm1865_vm15, %v4148_v58, %v1864_v7  ;;  %vm4320_vm8 = vmor %vm1568_vm6, %vm1569_vm7  ;;  %v1574_v38 = vand.u32 2147483648, %v3972_v47  ;;  %2474 = vrcp.f32 %v4294_v48 }
 0x23a   : > { %v1869_v35 = vsel %vm1867_vm2, %v1868_v43, %v1866_v31  ;;  %v1571_v44 = vsel %vm4320_vm8, %v4007_v50, %v1567_v55  ;;  %2476 = vrcp.f32 %v4313_v23  ;;  %v1606_v47 = vmul.f32 %v4241_v9, %v1605_v4 }
 0x23b   : > { %v1536_v32 = vsel %vm1533_vm5, %v1535_v59, %v1531_v13  ;;  %v4336_v54 = vadd.f32 1e-06, %v1869_v35  ;;  %v1575_v15 = vor.u32 1.1754944e-38, %v1574_v38  ;;  %vm1573_vm9 = vcmp.eq.f32.partialorder %v1572_v57, 8.507059e+37 }
 0x23c   : > { %v1537_v0 = vmul.f32 %v1536_v32, %v3879_v28  ;;  %v4333_v1 = vpop.eup %2472  ;;  %vm1609_vm10 = vweird.f32 %v4241_v9  ;;  %v1612_v58 = vand.u32 2147483647, %v4170_v36  ;;  %v1607_v43 = vadd.f32 %v4241_v9, %v1606_v47 }
 0x23d   : > { %v1576_v28 = vsel %vm1573_vm9, %v1575_v15, %v1571_v44  ;;  %vm1608_vm11 = vweird.f32 %v4170_v36  ;;  %v1614_v50 = vand.u32 2147483648, %v4170_v36  ;;  %v4613_v41 = vsub.f32 1.0, %v4095_v14 }
 0x23e   : > { %v1538_v27 = vadd.f32 %v1537_v0, %v1480_v22  ;;  %v1577_v25 = vmul.f32 %v1576_v28, %v3865_v29  ;;  %vm4345_vm12 = vmor %vm1608_vm11, %vm1609_vm10  ;;  %vm1613_vm13 = vcmp.eq.f32.partialorder %v1612_v58, 8.507059e+37  ;;  %vm1651_vm14 = vweird.f32 %v4019_v24 }
 0x23f   : > { %v1649_v3 = vmul.f32 %v4070_v20, %v4613_v41  ;;  %v1611_v40 = vsel %vm4345_vm12, %v4241_v9, %v1607_v43  ;;  %v1615_v61 = vor.u32 1.1754944e-38, %v1614_v50  ;;  %vm1652_vm0 = vweird.f32 %v4070_v20  ;;  %v4358_v36 = vpop.eup %2474 }
 0x240   : > { %v1655_v29 = vand.u32 2147483647, %v4019_v24  ;;  %v1578_v16 = vadd.f32 %v1577_v25, %v1538_v27  ;;  %v1657_v14 = vand.u32 2147483648, %v4019_v24  ;;  %v1685_v63 = vmul.f32 %v4188_v62, %v4099_v19  ;;  %v4364_v51 = vpop.eup %2476  ;;  %vm1653_vm15 = vmor %vm1651_vm14, %vm1652_vm0 }
 0x241   : > { %v1650_v37 = vadd.f32 %v4070_v20, %v1649_v3  ;;  %2478 = vrcp.f32 %v4336_v54  ;;  %v1616_v9 = vsel %vm1613_vm13, %v1615_v61, %v1611_v40  ;;  %v1693_v34 = vand.u32 2147483647, %v4099_v19 }
 0x242   : > { %v1617_v5 = vmul.f32 %v1616_v9, %v3895_v46  ;;  %v1658_v8 = vor.u32 1.1754944e-38, %v1657_v14  ;;  %v1686_v56 = vsub.f32 1.0, %v1685_v63  ;;  %vm1656_vm1 = vcmp.eq.f32.partialorder %v1655_v29, 8.507059e+37 }
 0x243   : > { %v1654_v4 = vsel %vm1653_vm15, %v4070_v20, %v1650_v37  ;;  %v1695_v24 = vand.u32 2147483648, %v4099_v19  ;;  %v1741_v21 = vmul.f32 %v4333_v1, %v4272_v26  ;;  %vm1690_vm2 = vweird.f32 %v4188_v62 }
 0x244   : > { %v1618_v22 = vadd.f32 %v1617_v5, %v1578_v16  ;;  %v1659_v13 = vsel %vm1656_vm1, %v1658_v8, %v1654_v4  ;;  %v1687_v6 = vmul.f32 %v4188_v62, %v1686_v56  ;;  %vm1689_vm3 = vweird.f32 %v4099_v19 }
 0x245   : > { %v1742_v46 = vsub.f32 1.0, %v1741_v21  ;;  %vm1745_vm4 = vweird.f32 %v4272_v26  ;;  %vm1746_vm5 = vweird.f32 %v4333_v1  ;;  %v1660_v20 = vmul.f32 %v1659_v13, %v3863_v39  ;;  %vm1691_vm6 = vmor %vm1689_vm3, %vm1690_vm2 }
 0x246   : > { %v1688_v7 = vadd.f32 %v4188_v62, %v1687_v6  ;;  %v1751_v49 = vand.u32 2147483648, %v4272_v26  ;;  %v1782_v59 = vmul.f32 %v4251_v60, %v4186_v42  ;;  %vm1694_vm7 = vcmp.eq.f32.partialorder %v1693_v34, 8.507059e+37  ;;  %vm1747_vm9 = vmor %vm1745_vm4, %vm1746_vm5 }
 0x247   : > { %v4383_v55 = vpop.eup %2478  ;;  %v1696_v31 = vor.u32 1.1754944e-38, %v1695_v24  ;;  %v1743_v19 = vmul.f32 %v4333_v1, %v1742_v46  ;;  %v1749_v32 = vand.u32 2147483647, %v4272_v26  ;;  %v1661_v30 = vadd.f32 %v1660_v20, %v1618_v22 }
 0x248   : > { %v1692_v57 = vsel %vm1691_vm6, %v4188_v62, %v1688_v7  ;;  %v1783_v39 = vsub.f32 1.0, %v1782_v59  ;;  %vm1787_vm8 = vweird.f32 %v4251_v60  ;;  %v1790_v0 = vand.u32 2147483647, %v4186_v42 }
 0x249   : > { %v1697_v38 = vsel %vm1694_vm7, %v1696_v31, %v1692_v57  ;;  %v1744_v35 = vadd.f32 %v4333_v1, %v1743_v19  ;;  %v1792_v44 = vand.u32 2147483648, %v4186_v42  ;;  %v1752_v47 = vor.u32 1.1754944e-38, %v1751_v49 }
 0x24a   : > { %v1698_v15 = vmul.f32 %v1697_v38, %v3893_v33  ;;  %v1784_v62 = vmul.f32 %v4251_v60, %v1783_v39  ;;  %v1820_v27 = vmul.f32 %v4302_v11, %v4237_v2  ;;  %vm1750_vm10 = vcmp.eq.f32.partialorder %v1749_v32, 8.507059e+37 }
 0x24b   : > { %v1748_v58 = vsel %vm1747_vm9, %v4333_v1, %v1744_v35  ;;  %vm1786_vm11 = vweird.f32 %v4186_v42  ;;  %vm1791_vm12 = vcmp.eq.f32.partialorder %v1790_v0, 8.507059e+37  ;;  %v1793_v25 = vor.u32 1.1754944e-38, %v1792_v44 }
 0x24c   : > { %v1699_v28 = vadd.f32 %v1698_v15, %v1661_v30  ;;  %v1753_v43 = vsel %vm1750_vm10, %v1752_v47, %v1748_v58  ;;  %v1785_v33 = vadd.f32 %v4251_v60, %v1784_v62  ;;  %v1821_v50 = vsub.f32 1.0, %v1820_v27  ;;  %vm1788_vm13 = vmor %vm1786_vm11, %vm1787_vm8 }
 0x24d   : > { %v1754_v26 = vmul.f32 %v1753_v43, %v3909_v45  ;;  %v1830_v12 = vand.u32 2147483648, %v4237_v2  ;;  %v1872_v1 = vmul.f32 %v4383_v55, %v4336_v54  ;;  %vm1825_vm14 = vweird.f32 %v4302_v11 }
 0x24e   : > { %v1789_v41 = vsel %vm1788_vm13, %v4251_v60, %v1785_v33  ;;  %v1822_v42 = vmul.f32 %v4302_v11, %v1821_v50  ;;  %v1828_v3 = vand.u32 2147483647, %v4237_v2  ;;  %vm1824_vm0 = vweird.f32 %v4237_v2 }
 0x24f   : > { %v1755_v40 = vadd.f32 %v1754_v26, %v1699_v28  ;;  %v1794_v61 = vsel %vm1791_vm12, %v1793_v25, %v1789_v41  ;;  %v1873_v29 = vsub.f32 1.0, %v1872_v1  ;;  %vm1876_vm15 = vweird.f32 %v4336_v54  ;;  %vm1826_vm2 = vmor %vm1824_vm0, %vm1825_vm14 }
 0x250   : > { %v1823_v45 = vadd.f32 %v4302_v11, %v1822_v42  ;;  %vm1877_vm1 = vweird.f32 %v4383_v55  ;;  %v1795_v16 = vmul.f32 %v1794_v61, %v3883_v18  ;;  %v1831_v60 = vor.u32 1.1754944e-38, %v1830_v12 }
 0x251   : > { %v1882_v37 = vand.u32 2147483648, %v4336_v54  ;;  %v1913_v14 = vmul.f32 %v4358_v36, %v4294_v48  ;;  %vm1829_vm3 = vcmp.eq.f32.partialorder %v1828_v3, 8.507059e+37  ;;  %v1874_v2 = vmul.f32 %v4383_v55, %v1873_v29  ;;  %vm1878_vm6 = vmor %vm1876_vm15, %vm1877_vm1 }
 0x252   : > { %v1827_v63 = vsel %vm1826_vm2, %v4302_v11, %v1823_v45  ;;  %v1880_v9 = vand.u32 2147483647, %v4336_v54  ;;  %v1796_v5 = vadd.f32 %v1795_v16, %v1755_v40  ;;  %vm1917_vm4 = vweird.f32 %v4294_v48 }
 0x253   : > { %v1832_v4 = vsel %vm1829_vm3, %v1831_v60, %v1827_v63  ;;  %v1914_v8 = vsub.f32 1.0, %v1913_v14  ;;  %v1875_v18 = vadd.f32 %v4383_v55, %v1874_v2  ;;  %vm1918_vm5 = vweird.f32 %v4358_v36 }
 0x254   : > { %v1923_v56 = vand.u32 2147483648, %v4294_v48  ;;  %v1951_v34 = vmul.f32 %v4364_v51, %v4313_v23  ;;  %v1833_v11 = vmul.f32 %v1832_v4, %v3907_v53  ;;  %v1883_v24 = vor.u32 1.1754944e-38, %v1882_v37  ;;  %vm1919_vm9 = vmor %vm1917_vm4, %vm1918_vm5 }
 0x255   : > { %v1915_v21 = vmul.f32 %v4358_v36, %v1914_v8  ;;  %v1921_v22 = vand.u32 2147483647, %v4294_v48  ;;  %v1879_v13 = vsel %vm1878_vm6, %v4383_v55, %v1875_v18  ;;  %vm1881_vm7 = vcmp.eq.f32.partialorder %v1880_v9, 8.507059e+37 }
 0x256   : > { %v1952_v6 = vsub.f32 1.0, %v1951_v34  ;;  %vm1956_vm8 = vweird.f32 %v4364_v51  ;;  %v1834_v46 = vadd.f32 %v1833_v11, %v1796_v5  ;;  %v1884_v20 = vsel %vm1881_vm7, %v1883_v24, %v1879_v13 }
 0x257   : > { %v1916_v53 = vadd.f32 %v4358_v36, %v1915_v21  ;;  %v1961_v7 = vand.u32 2147483648, %v4313_v23  ;;  %v1885_v54 = vmul.f32 %v1884_v20, %v3917_v10  ;;  %v1924_v49 = vor.u32 1.1754944e-38, %v1923_v56 }
 0x258   : > { %v1953_v59 = vmul.f32 %v4364_v51, %v1952_v6  ;;  %v1959_v55 = vand.u32 2147483647, %v4313_v23  ;;  %vm1922_vm10 = vcmp.eq.f32.partialorder %v1921_v22, 8.507059e+37  ;;  %vm1955_vm11 = vweird.f32 %v4313_v23 }
 0x259   : > { %v1920_v31 = vsel %vm1919_vm9, %v4358_v36, %v1916_v53  ;;  %v1886_v19 = vadd.f32 %v1885_v54, %v1834_v46  ;;  %vm1957_vm12 = vmor %vm1955_vm11, %vm1956_vm8  ;;  %v1962_v48 = vor.u32 1.1754944e-38, %v1961_v7 }
 0x25a   : > { %v1925_v32 = vsel %vm1922_vm10, %v1924_v49, %v1920_v31  ;;  %v1954_v30 = vadd.f32 %v4364_v51, %v1953_v59  ;;  %vm1960_vm13 = vcmp.eq.f32.partialorder %v1959_v55, 8.507059e+37 }
 0x25b   : > { %v1926_v10 = vmul.f32 %v1925_v32, %v3899_v52 }
 0x25c   : > { %v1958_v57 = vsel %vm1957_vm12, %v4364_v51, %v1954_v30 }
 0x25d   : > { %v1927_v39 = vadd.f32 %v1926_v10, %v1886_v19  ;;  %v1963_v38 = vsel %vm1960_vm13, %v1962_v48, %v1958_v57 }
 0x25e   : > { %v1964_v36 = vmul.f32 %v1963_v38, %v3915_v17 }
 0x260   : > { %v1965_v35 = vadd.f32 %v1964_v36, %v1927_v39 }
 0x262   : > { %v1966_v0 = vmul.f32 %v1965_v35, %v1965_v35 }
 0x264   : > { %1967 = vadd.xlane.f32.xlu0 %v1966_v0 }
 0x2d7   : > { %v1968_v44 = vpop.xlane.xlu0 %1967 }
 0x2d8   : > { %2480 = vrsqrt.f32 %v1968_v44  ;;  %vm1976_vm14 = vcmp.eq.f32.partialorder %v1968_v44, inf  ;;  %v1979_v51 = vand.u32 2147483648, %v1968_v44  ;;  %vm1978_vm0 = vcmp.eq.f32.partialorder %v1968_v44, 0.0 }
 0x2de   : > { %v2481_v15 = vpop.eup %2480 }
 0x2df   : > { %v1970_v23 = vmul.f32 %v2481_v15, %v1968_v44 }
 0x2e1   : > { %v1971_v52 = vmul.f32 %v2481_v15, %v1970_v23 }
 0x2e3   : > { %v1972_v47 = vmul.f32 0.5, %v1971_v52 }
 0x2e5   : > { %v1973_v62 = vsub.f32 1.5, %v1972_v47 }
 0x2e7   : > { %v1974_v27 = vmul.f32 %v2481_v15, %v1973_v62 }
 0x2e9   : > { %v1975_v58 = vmul.f32 %v1974_v27, %v1968_v44 }
 0x2eb   : > { %v1977_v28 = vsel %vm1976_vm14, %v1968_v44, %v1975_v58 }
 0x2ec   : > { %v1980_v43 = vsel %vm1978_vm0, %v1979_v51, %v1977_v28 }
 0x2ed   : > { %v1981_v17 = vadd.f32 1e-06, %v1980_v43 }
 0x2ef   : > { %2482 = vrcp.f32 %v1981_v17  ;;  %v1993_v25 = vand.u32 2147483648, %v1981_v17  ;;  %v1991_v1 = vand.u32 2147483647, %v1981_v17  ;;  %vm1987_vm1 = vweird.f32 %v1981_v17 }
 0x2f1   : > { %v1994_v42 = vor.u32 1.1754944e-38, %v1993_v25  ;;  %vm1992_vm3 = vcmp.eq.f32.partialorder %v1991_v1, 8.507059e+37 }
 0x2f5   : > { %v2483_v33 = vpop.eup %2482 }
 0x2f6   : > { %v1983_v50 = vmul.f32 %v2483_v33, %v1981_v17  ;;  %vm1988_vm15 = vweird.f32 %v2483_v33 }
 0x2f7   : > { %vm1989_vm2 = vmor %vm1987_vm1, %vm1988_vm15 }
 0x2f8   : > { %v1984_v26 = vsub.f32 1.0, %v1983_v50 }
 0x2fa   : > { %v1985_v12 = vmul.f32 %v2483_v33, %v1984_v26 }
 0x2fc   : > { %v1986_v41 = vadd.f32 %v2483_v33, %v1985_v12 }
 0x2fe   : > { %v1990_v3 = vsel %vm1989_vm2, %v2483_v33, %v1986_v41 }
 0x2ff   : > { %v1995_v40 = vsel %vm1992_vm3, %v1994_v42, %v1990_v3 }
 0x300   : > { %v1996_v61 = vmul.f32 %v1995_v40, %v1965_v35 }
 0x302   : > { %1997 = vst [vmem:[%s189_s23] sm:$0x1] %v1996_v61 }
 0x303   : > { %2513 = shalt.err (!%p2510_p3)
}
 0x304   : > { %2251 = dma.vmem_to_hbm [thread:$0]  (%p2613_p5), %s2010_s27, 16, %s2012_s28, %s1999_s29  }
 0x305 PF: > { %p2257_p4 = scmp.ge.s32.totalorder %s2548_s18, 2  ;;  %s2023_s10 = sand.u32 1, %s2536_s15  }
 0x306   : > { %s2024_s11 = scalar_lea.sflag [#allocation4], %s2023_s10 }
 0x307   : > { %p2254_p7 = pnand %p2257_p4, %p2617_p6 }
 0x309   : > { %p2255_p8 = pneg %p2254_p7 }
 0x30b   : > { %2531 = dma.done.wait (%p2255_p8), %s2024_s11, 16  }
 0x30c   : > { %2533 = vsyncadd (%p2255_p8), %s2024_s11, 4294967280  ;;  %p14_p9 = scmp.ge.s32.totalorder %s2600_s21, 4   ;;  %s4614_s15 = smov %s2540_s16 }
 0x30d   : > { %s4615_s16 = smov %s2544_s17  ;;  %s4616_s17 = smov %s2611_s24 }
 0x30e   : > { %s4617_s18 = smov %s2600_s21  ;;  %16 = sbr.rel (!%p14_p9) target bundleno = 3 (0x3), region = 71 }
 0x313   :  { %2029 = vsyncpa [#allocation4], 1 }
 0x314   :  { %2031 = vsyncpa [#allocation4 + $0x1], 1 }

// kernel: effb4ns_rmac_forward.2
= control target key start
LH: loop header
LB: loop body
LE: loop exit
PB: predicated region body
PF: predicated region fallthrough
CT: control target
= control target key end

     0   :  { %s6028_s15 = smov 0   ;;  %s8053_s0 = inlined_call_operand.vmem [shape: bf16[2,18,18,16], index: 0, kind: input, shape index: {}]   ;;  %s8054_s1 = inlined_call_operand.vmem [shape: bf16[3,3,16,128], index: 1, kind: input, shape index: {}]   ;;  %s8055_s2 = inlined_call_operand.vmem [shape: f32[1,128], index: 2, kind: input, shape index: {}]   ;;  %s8056_s3 = inlined_call_operand.vmem [shape: f32[1,128], index: 3, kind: input, shape index: {}]   ;;  %s8057_s4 = inlined_call_operand.vmem [shape: bf16[2,256,128], index: 4, kind: output, shape index: {}]  }
   0x1 LB: > { %s4976_s16 = sadd.s32 4294967295, %s6001_s15   ;;  %p4980_p0 = scmp.ge.s32.totalorder %s6001_s15, 1  ;;  %s6001_s15 = sphi %s6028_s15, %s14_s15  }
   0x2   : > { %p162_p1 = scmp.lt.s32.totalorder %s6001_s15, 3 }
   0x4   : > { %p163_p2 = pnand %p4980_p0, %p162_p1 }
   0x6   : > { %166 = sbr.rel (%p163_p2) target bundleno = 813 (0x32d), region = 36 }
   0xb   : > { %v5664_v0 = vld [vmem:[%s8054_s1 + $0x8] sm:$0xff]  ;;  %p188_p3 = scmp.lt.s32.totalorder %s4976_s16, 1  ;;  %v5665_v1 = vld [vmem:[%s8054_s1 + $0x10] sm:$0xff]  ;;  %v5682_v2 = vld [vmem:[%s8054_s1 + $0x18] sm:$0xff]  ;;  %vm249_vm0 = vsmask.f32 3328 }
   0xc   : > { %5799 = vmatpush.bf16.msra.mxu1 %v5664_v0  ;;  %5800 = vmatpush.bf16.msra.mxu2 %v5664_v0  ;;  %v5663_v3 = vld [vmem:[%s8054_s1] sm:$0xff]  ;;  %vm250_vm1 = vsmask.f32 7440  ;;  %vm693_vm3 = vcmask 130048   ;;  %vm1102_vm4 = vcmask 1042432   ;;  %vm1103_vm5 = vcmask 1046532  }
   0xd   : > { %s8135_s16 = smov (!%p188_p3, %s4976_s16), 1  ;;  %5801 = vmatpush.bf16.msra.mxu3 %v5664_v0  ;;  %749 = vmatpush.bf16.msra.mxu0 %v5664_v0  ;;  %v5683_v4 = vld [vmem:[%s8054_s1 + $0x20] sm:$0xff]  ;;  %vm6069_vm2 = vmor %vm249_vm0, %vm250_vm1 }
   0xe   : > { %s5802_s27 = smul.u32 216, %s8135_s16  ;;  %vm6252_vm6 = vmor %vm1102_vm4, %vm1103_vm5  ;;  %s5646_s19 = sshll.u32 %s8135_s16, 7 }
   0xf   : > { %s7325_s21 = scalar_lea.vmem %s8057_s4, %s5646_s19 }
  0x10   : > { %1329 = vmatpush.bf16.msrb.mxu2 %v5665_v1  ;;  %972 = vmatpush.bf16.msrb.mxu1 %v5663_v3  ;;  %s6057_s30 = scalar_lea.vmem %s8053_s0, %s5802_s27 }
  0x11   : > { %1620 = vmatpush.bf16.msrb.mxu3 %v5682_v2  ;;  %2278 = vmatpush.bf16.msrb.mxu0 %v5683_v4  ;;  %v207_v5 = vld [vmem:[%s6057_s30 + $0x30] sm:$0xf]  ;;  %v208_v6 = vld [vmem:[%s6057_s30 + $0x34] sm:$0xf]  ;;  %v237_v7 = vld [vmem:[%s6057_s30 + $0x38] sm:$0x1] }
  0x12   : > { %v349_v8 = vshrl.u32 %v207_v5, 16  ;;  %v352_v9 = vshll.u32 %v207_v5, 16  ;;  %v358_v10 = vshll.u32 %v208_v6, 16  ;;  %v362_v11 = vshrl.u32 %v208_v6, 16  ;;  %v215_v12 = vld [vmem:[%s6057_s30 + $0x60] sm:$0xf] }
  0x13   : > { %v368_v13 = vshll.u32 %v237_v7, 16  ;;  %v216_v14 = vld [vmem:[%s6057_s30 + $0x64] sm:$0xf]  ;;  %v241_v15 = vld [vmem:[%s6057_s30 + $0x68] sm:$0x1]  ;;  %v445_v16 = vshrl.u32 %v215_v12, 16 }
  0x14   : > { %v351_v17 = vrot.slane %v349_v8, 4  ;;  %v354_v18 = vrot.slane %v352_v9, 5  ;;  %v360_v19 = vrot.slane %v358_v10, 5  ;;  %v364_v20 = vrot.slane %v362_v11, 4  ;;  %v223_v21 = vld [vmem:[%s6057_s30 + $0x90] sm:$0xf] }
  0x15   : > { %v370_v22 = vrot.slane %v368_v13, 5  ;;  %v447_v23 = vrot.slane %v445_v16, 4  ;;  %v448_v24 = vshll.u32 %v215_v12, 16  ;;  %v454_v25 = vshll.u32 %v216_v14, 16  ;;  %v224_v30 = vld [vmem:[%s6057_s30 + $0x94] sm:$0xf] }
  0x16   : > { %v355_v26 = vor.u32 %v354_v18, %v351_v17  ;;  %v365_v27 = vor.u32 %v364_v20, %v360_v19  ;;  %v458_v28 = vshrl.u32 %v216_v14, 16  ;;  %v464_v29 = vshll.u32 %v241_v15, 16  ;;  %v245_v40 = vld [vmem:[%s6057_s30 + $0x98] sm:$0x1]  ;;  %v199_v56 = vld [vmem:[%s6057_s30] sm:$0xf] }
  0x17   : > { %v450_v32 = vrot.slane %v448_v24, 5  ;;  %v456_v33 = vrot.slane %v454_v25, 5  ;;  %v541_v34 = vshrl.u32 %v223_v21, 16  ;;  %v544_v42 = vshll.u32 %v223_v21, 16  ;;  %v6082_v60 = vld [vmem:[%s6057_s30 + $0x4] sm:$0xf] }
  0x18   : > { %v356_v35 = vrot.slane %v355_v26, 4  ;;  %v366_v36 = vrot.slane %v365_v27, 4  ;;  %v460_v37 = vrot.slane %v458_v28, 4  ;;  %v466_v38 = vrot.slane %v464_v29, 5  ;;  %v6085_v61 = vld [vmem:[%s6057_s30 + $0x8] sm:$0x1] }
  0x19   : > { %v451_v39 = vor.u32 %v450_v32, %v447_v23  ;;  %v543_v41 = vrot.slane %v541_v34, 4  ;;  %v550_v43 = vshll.u32 %v224_v30, 16  ;;  %v554_v47 = vshrl.u32 %v224_v30, 16  ;;  %v209_v14 = vld [vmem:[%s6057_s30 + $0x3c] sm:$0xf] }
  0x1a   : > { %v361_v44 = vsel %vm6069_vm2, %v356_v35, %v360_v19  ;;  %v371_v45 = vsel %vm6069_vm2, %v366_v36, %v370_v22  ;;  %v461_v46 = vor.u32 %v460_v37, %v456_v33  ;;  %v546_v51 = vrot.slane %v544_v42, 5  ;;  %v6097_v15 = vld [vmem:[%s6057_s30 + $0x40] sm:$0xf]  ;;  %v6102_v20 = vld [vmem:[%s6057_s30 + $0x44] sm:$0x1] }
  0x1b   : > { %v647_v48 = vunpack.c.l.b16 %v361_v44  ;;  %v648_v49 = vunpack.c.l.b16 %v371_v45  ;;  %v452_v50 = vrot.slane %v451_v39, 4  ;;  %v552_v53 = vrot.slane %v550_v43, 5  ;;  %v217_v28 = vld [vmem:[%s6057_s30 + $0x6c] sm:$0xf]  ;;  %v242_v42 = vld [vmem:[%s6057_s30 + $0x74] sm:$0x1] }
  0x1c   : > { %v462_v52 = vrot.slane %v461_v46, 4  ;;  %v556_v54 = vrot.slane %v554_v47, 4  ;;  %v560_v55 = vshll.u32 %v245_v40, 16  ;;  %v547_v59 = vor.u32 %v546_v51, %v543_v41 }
  0x1d   : > { %v675_v57 = vpack.c.b16 %v648_v49, %v647_v48  ;;  %v457_v58 = vsel %vm6069_vm2, %v452_v50, %v456_v33  ;;  %v253_v4 = vshrl.u32 %v199_v56, 16  ;;  %v256_v5 = vshll.u32 %v199_v56, 16  ;;  %v225_v56 = vld [vmem:[%s6057_s30 + $0x9c] sm:$0xf] }
  0x1e   : > { %v467_v62 = vsel %vm6069_vm2, %v462_v52, %v466_v38  ;;  %v655_v63 = vunpack.c.l.b16 %v457_v58  ;;  %v557_v0 = vor.u32 %v556_v54, %v552_v53  ;;  %v562_v1 = vrot.slane %v560_v55, 5  ;;  %v218_v38 = vld [vmem:[%s6057_s30 + $0x70] sm:$0xf] }
  0x1f   : > { %4994 = vmatmul.msk.bf16.vlgmr.msra.gmra.mxu1 %vm693_vm3, %v675_v57  ;;  %v656_v2 = vunpack.c.l.b16 %v467_v62  ;;  %v548_v3 = vrot.slane %v547_v59, 4  ;;  %v262_v7 = vshll.u32 %v6082_v60, 16  ;;  %v266_v8 = vshrl.u32 %v6082_v60, 16  ;;  %v226_v62 = vld [vmem:[%s6057_s30 + $0xa0] sm:$0xf] }
  0x20   : > { %v558_v6 = vrot.slane %v557_v0, 4  ;;  %v272_v9 = vshll.u32 %v6085_v61, 16  ;;  %v255_v12 = vrot.slane %v253_v4, 4  ;;  %v258_v13 = vrot.slane %v256_v5, 5 }
  0x21   : > { %v679_v10 = vpack.c.b16 %v656_v2, %v655_v63  ;;  %v553_v11 = vsel %vm6069_vm2, %v548_v3, %v552_v53  ;;  %v264_v18 = vrot.slane %v262_v7, 5  ;;  %v268_v19 = vrot.slane %v266_v8, 4  ;;  %v246_v3 = vld [vmem:[%s6057_s30 + $0xa4] sm:$0x1] }
  0x22   : > { %v563_v16 = vsel %vm6069_vm2, %v558_v6, %v562_v1  ;;  %v663_v17 = vunpack.c.l.b16 %v553_v11  ;;  %v259_v22 = vor.u32 %v258_v13, %v255_v12  ;;  %v274_v23 = vrot.slane %v272_v9, 5 }
  0x23   : > { %4998 = vmatmul.msk.bf16.vlgmr.msra.gmra.mxu2 %vm693_vm3, %v679_v10  ;;  %v664_v21 = vunpack.c.l.b16 %v563_v16  ;;  %v269_v24 = vor.u32 %v268_v19, %v264_v18  ;;  %v373_v25 = vshrl.u32 %v209_v14, 16  ;;  %v376_v26 = vshll.u32 %v209_v14, 16 }
  0x24   : > { %v382_v27 = vshll.u32 %v6097_v15, 16  ;;  %v260_v30 = vrot.slane %v259_v22, 4  ;;  %v386_v32 = vshrl.u32 %v6097_v15, 16  ;;  %v392_v33 = vshll.u32 %v6102_v20, 16 }
  0x25   : > { %v683_v29 = vpack.c.b16 %v664_v21, %v663_v17  ;;  %v270_v34 = vrot.slane %v269_v24, 4  ;;  %v375_v35 = vrot.slane %v373_v25, 4  ;;  %v378_v36 = vrot.slane %v376_v26, 5  ;;  %v201_v17 = vld [vmem:[%s6057_s30 + $0xc] sm:$0xf] }
  0x26   : > { %v384_v37 = vrot.slane %v382_v27, 5  ;;  %v265_v39 = vsel %vm6069_vm2, %v260_v30, %v264_v18  ;;  %v388_v40 = vrot.slane %v386_v32, 4  ;;  %v394_v41 = vrot.slane %v392_v33, 5  ;;  %v6131_v27 = vld [vmem:[%s6057_s30 + $0x14] sm:$0x1] }
  0x27   : > { %5002 = vmatmul.msk.bf16.vlgmr.msra.gmra.mxu3 %vm693_vm3, %v683_v29  ;;  %v469_v43 = vshrl.u32 %v217_v28, 16  ;;  %v275_v44 = vsel %vm6069_vm2, %v270_v34, %v274_v23  ;;  %v639_v45 = vunpack.c.l.b16 %v265_v39  ;;  %v379_v46 = vor.u32 %v378_v36, %v375_v35  ;;  %v6128_v23 = vld [vmem:[%s6057_s30 + $0x10] sm:$0xf] }
  0x28   : > { %v472_v47 = vshll.u32 %v217_v28, 16  ;;  %v640_v48 = vunpack.c.l.b16 %v275_v44  ;;  %v389_v49 = vor.u32 %v388_v40, %v384_v37  ;;  %v478_v51 = vshll.u32 %v218_v38, 16 }
  0x29   : > { %v471_v50 = vrot.slane %v469_v43, 4  ;;  %v380_v52 = vrot.slane %v379_v46, 4  ;;  %v482_v54 = vshrl.u32 %v218_v38, 16  ;;  %v488_v55 = vshll.u32 %v242_v42, 16  ;;  %v6141_v42 = vld [vmem:[%s6057_s30 + $0x4c] sm:$0xf] }
  0x2a   : > { %v474_v53 = vrot.slane %v472_v47, 5  ;;  %v671_v57 = vpack.c.b16 %v640_v48, %v639_v45  ;;  %v390_v58 = vrot.slane %v389_v49, 4  ;;  %v480_v59 = vrot.slane %v478_v51, 5  ;;  %v6146_v51 = vld [vmem:[%s6057_s30 + $0x50] sm:$0x1] }
  0x2b   : > { %v385_v63 = vsel %vm6069_vm2, %v380_v52, %v384_v37  ;;  %v484_v1 = vrot.slane %v482_v54, 4  ;;  %v490_v2 = vrot.slane %v488_v55, 5  ;;  %v565_v6 = vshrl.u32 %v225_v56, 16  ;;  %v211_v37 = vld [vmem:[%s6057_s30 + $0x48] sm:$0xf] }
  0x2c   : > { %v475_v0 = vor.u32 %v474_v53, %v471_v50  ;;  %4990 = vmatmul.msk.bf16.vlgmr.msra.gmra.mxu0 %vm693_vm3, %v671_v57  ;;  %v395_v4 = vsel %vm6069_vm2, %v390_v58, %v394_v41  ;;  %v649_v5 = vunpack.c.l.b16 %v385_v63  ;;  %v568_v7 = vshll.u32 %v225_v56, 16 }
  0x2d   : > { %v650_v8 = vunpack.c.l.b16 %v395_v4  ;;  %v485_v10 = vor.u32 %v484_v1, %v480_v59  ;;  %v574_v11 = vshll.u32 %v226_v62, 16  ;;  %v567_v12 = vrot.slane %v565_v6, 4 }
  0x2e   : > { %v476_v9 = vrot.slane %v475_v0, 4  ;;  %v570_v13 = vrot.slane %v568_v7, 5  ;;  %v578_v14 = vshrl.u32 %v226_v62, 16  ;;  %v584_v16 = vshll.u32 %v246_v3, 16  ;;  %v219_v62 = vld [vmem:[%s6057_s30 + $0x78] sm:$0xf] }
  0x2f   : > { %v676_v18 = vpack.c.b16 %v650_v8, %v649_v5  ;;  %v486_v21 = vrot.slane %v485_v10, 4  ;;  %v576_v22 = vrot.slane %v574_v11, 5  ;;  %v277_v30 = vshrl.u32 %v201_v17, 16  ;;  %v220_v3 = vld [vmem:[%s6057_s30 + $0x7c] sm:$0xf] }
  0x30   : > { %v481_v19 = vsel %vm6069_vm2, %v476_v9, %v480_v59  ;;  %v571_v25 = vor.u32 %v570_v13, %v567_v12  ;;  %v580_v26 = vrot.slane %v578_v14, 4  ;;  %v586_v29 = vrot.slane %v584_v16, 5  ;;  %v243_v11 = vld [vmem:[%s6057_s30 + $0x80] sm:$0x1] }
  0x31   : > { %v657_v24 = vunpack.c.l.b16 %v481_v19  ;;  %4995 = vmatmul.msk.bf16.gmra.mxu1 %vm693_vm3, %v676_v18  ;;  %v491_v28 = vsel %vm6069_vm2, %v486_v21, %v490_v2  ;;  %v280_v32 = vshll.u32 %v201_v17, 16  ;;  %v286_v36 = vshll.u32 %v6128_v23, 16 }
  0x32   : > { %v658_v33 = vunpack.c.l.b16 %v491_v28  ;;  %v572_v34 = vrot.slane %v571_v25, 4  ;;  %v581_v35 = vor.u32 %v580_v26, %v576_v22  ;;  %v279_v38 = vrot.slane %v277_v30, 4 }
  0x33   : > { %v282_v39 = vrot.slane %v280_v32, 5  ;;  %v290_v40 = vshrl.u32 %v6128_v23, 16  ;;  %v296_v41 = vshll.u32 %v6131_v27, 16  ;;  %v288_v46 = vrot.slane %v286_v36, 5 }
  0x34   : > { %v680_v43 = vpack.c.b16 %v658_v33, %v657_v24  ;;  %v577_v44 = vsel %vm6069_vm2, %v572_v34, %v576_v22  ;;  %v582_v45 = vrot.slane %v581_v35, 4  ;;  %v397_v53 = vshrl.u32 %v211_v37, 16  ;;  %v228_v34 = vld [vmem:[%s6057_s30 + $0xac] sm:$0xf]  ;;  %v247_v35 = vld [vmem:[%s6057_s30 + $0xb0] sm:$0x1] }
  0x35   : > { %v665_v47 = vunpack.c.l.b16 %v577_v44  ;;  %v283_v48 = vor.u32 %v282_v39, %v279_v38  ;;  %v292_v49 = vrot.slane %v290_v40, 4  ;;  %v298_v50 = vrot.slane %v296_v41, 5 }
  0x36   : > { %4999 = vmatmul.msk.bf16.gmra.mxu2 %vm693_vm3, %v680_v43  ;;  %v587_v52 = vsel %vm6069_vm2, %v582_v45, %v586_v29  ;;  %v400_v54 = vshll.u32 %v211_v37, 16  ;;  %v406_v55 = vshll.u32 %v6141_v42, 16  ;;  %v410_v59 = vshrl.u32 %v6141_v42, 16  ;;  %v227_v29 = vld [vmem:[%s6057_s30 + $0xa8] sm:$0xf] }
  0x37   : > { %v666_v56 = vunpack.c.l.b16 %v587_v52  ;;  %v284_v57 = vrot.slane %v283_v48, 4  ;;  %v293_v58 = vor.u32 %v292_v49, %v288_v46  ;;  %v399_v63 = vrot.slane %v397_v53, 4 }
  0x38   : > { %v402_v0 = vrot.slane %v400_v54, 5  ;;  %v408_v1 = vrot.slane %v406_v55, 5  ;;  %v416_v2 = vshll.u32 %v6146_v51, 16  ;;  %v412_v7 = vrot.slane %v410_v59, 4  ;;  %v203_v54 = vld [vmem:[%s6057_s30 + $0x18] sm:$0xf] }
  0x39   : > { %v684_v4 = vpack.c.b16 %v666_v56, %v665_v47  ;;  %v289_v5 = vsel %vm6069_vm2, %v284_v57, %v288_v46  ;;  %v294_v6 = vrot.slane %v293_v58, 4  ;;  %v493_v12 = vshrl.u32 %v219_v62, 16  ;;  %v6174_v58 = vld [vmem:[%s6057_s30 + $0x1c] sm:$0xf]  ;;  %v6177_v59 = vld [vmem:[%s6057_s30 + $0x20] sm:$0x1] }
  0x3a   : > { %v641_v8 = vunpack.c.l.b16 %v289_v5  ;;  %v403_v9 = vor.u32 %v402_v0, %v399_v63  ;;  %v418_v10 = vrot.slane %v416_v2, 5  ;;  %v413_v14 = vor.u32 %v412_v7, %v408_v1 }
  0x3b   : > { %5003 = vmatmul.msk.bf16.gmra.mxu3 %vm693_vm3, %v684_v4  ;;  %v299_v13 = vsel %vm6069_vm2, %v294_v6, %v298_v50  ;;  %v496_v16 = vshll.u32 %v219_v62, 16  ;;  %v502_v17 = vshll.u32 %v220_v3, 16  ;;  %v495_v21 = vrot.slane %v493_v12, 4 }
  0x3c   : > { %v642_v18 = vunpack.c.l.b16 %v299_v13  ;;  %v404_v19 = vrot.slane %v403_v9, 4  ;;  %v506_v22 = vshrl.u32 %v220_v3, 16  ;;  %v414_v24 = vrot.slane %v413_v14, 4 }
  0x3d   : > { %v498_v25 = vrot.slane %v496_v16, 5  ;;  %v504_v26 = vrot.slane %v502_v17, 5  ;;  %v512_v28 = vshll.u32 %v243_v11, 16  ;;  %v589_v43 = vshrl.u32 %v227_v29, 16  ;;  %v6187_v16 = vld [vmem:[%s6057_s30 + $0x58] sm:$0xf] }
  0x3e   : > { %v672_v30 = vpack.c.b16 %v642_v18, %v641_v8  ;;  %v409_v32 = vsel %vm6069_vm2, %v404_v19, %v408_v1  ;;  %v508_v33 = vrot.slane %v506_v22, 4  ;;  %v419_v36 = vsel %vm6069_vm2, %v414_v24, %v418_v10  ;;  %v213_v10 = vld [vmem:[%s6057_s30 + $0x54] sm:$0xf]  ;;  %v6192_v22 = vld [vmem:[%s6057_s30 + $0x5c] sm:$0x1] }
  0x3f   : > { %v651_v37 = vunpack.c.l.b16 %v409_v32  ;;  %v499_v38 = vor.u32 %v498_v25, %v495_v21  ;;  %v514_v39 = vrot.slane %v512_v28, 5  ;;  %v652_v40 = vunpack.c.l.b16 %v419_v36 }
  0x40   : > { %4991 = vmatmul.msk.bf16.gmra.mxu0 %vm693_vm3, %v672_v30  ;;  %v509_v41 = vor.u32 %v508_v33, %v504_v26  ;;  %v592_v44 = vshll.u32 %v227_v29, 16  ;;  %v598_v46 = vshll.u32 %v228_v34, 16  ;;  %v602_v47 = vshrl.u32 %v228_v34, 16  ;;  %v221_v34 = vld [vmem:[%s6057_s30 + $0x84] sm:$0xf] }
  0x41   : > { %v500_v45 = vrot.slane %v499_v38, 4  ;;  %v608_v48 = vshll.u32 %v247_v35, 16  ;;  %v677_v49 = vpack.c.b16 %v652_v40, %v651_v37  ;;  %v591_v52 = vrot.slane %v589_v43, 4 }
  0x42   : > { %v510_v50 = vrot.slane %v509_v41, 4  ;;  %v594_v53 = vrot.slane %v592_v44, 5  ;;  %v600_v56 = vrot.slane %v598_v46, 5  ;;  %v604_v57 = vrot.slane %v602_v47, 4  ;;  %v222_v44 = vld [vmem:[%s6057_s30 + $0x88] sm:$0xf] }
  0x43   : > { %v505_v55 = vsel %vm6069_vm2, %v500_v45, %v504_v26  ;;  %4996 = vmatmul.msk.bf16.gmra.mxu1 %vm693_vm3, %v677_v49  ;;  %v610_v1 = vrot.slane %v608_v48, 5  ;;  %v301_v4 = vshrl.u32 %v203_v54, 16  ;;  %v304_v5 = vshll.u32 %v203_v54, 16  ;;  %v244_v48 = vld [vmem:[%s6057_s30 + $0x8c] sm:$0x1] }
  0x44   : > { %v515_v62 = vsel %vm6069_vm2, %v510_v50, %v514_v39  ;;  %v659_v63 = vunpack.c.l.b16 %v505_v55  ;;  %v595_v0 = vor.u32 %v594_v53, %v591_v52  ;;  %v605_v3 = vor.u32 %v604_v57, %v600_v56 }
  0x45   : > { %v660_v2 = vunpack.c.l.b16 %v515_v62  ;;  %v310_v7 = vshll.u32 %v6174_v58, 16  ;;  %v314_v8 = vshrl.u32 %v6174_v58, 16  ;;  %v320_v9 = vshll.u32 %v6177_v59, 16 }
  0x46   : > { %v596_v6 = vrot.slane %v595_v0, 4  ;;  %v606_v12 = vrot.slane %v605_v3, 4  ;;  %v303_v13 = vrot.slane %v301_v4, 4  ;;  %v306_v14 = vrot.slane %v304_v5, 5  ;;  %v229_v3 = vld [vmem:[%s6057_s30 + $0xb4] sm:$0xf] }
  0x47   : > { %v681_v11 = vpack.c.b16 %v660_v2, %v659_v63  ;;  %v312_v18 = vrot.slane %v310_v7, 5  ;;  %v316_v19 = vrot.slane %v314_v8, 4  ;;  %v322_v21 = vrot.slane %v320_v9, 5  ;;  %v230_v7 = vld [vmem:[%s6057_s30 + $0xb8] sm:$0xf] }
  0x48   : > { %v601_v17 = vsel %vm6069_vm2, %v596_v6, %v600_v56  ;;  %v611_v24 = vsel %vm6069_vm2, %v606_v12, %v610_v1  ;;  %v307_v26 = vor.u32 %v306_v14, %v303_v13  ;;  %v421_v28 = vshrl.u32 %v213_v10, 16  ;;  %v248_v12 = vld [vmem:[%s6057_s30 + $0xbc] sm:$0x1]  ;;  %v5701_v13 = vld [vmem:[%s8054_s1 + $0x30] sm:$0xff] }
  0x49   : > { %5000 = vmatmul.msk.bf16.gmra.mxu2 %vm693_vm3, %v681_v11  ;;  %v667_v25 = vunpack.c.l.b16 %v601_v17  ;;  %v668_v29 = vunpack.c.l.b16 %v611_v24  ;;  %v317_v30 = vor.u32 %v316_v19, %v312_v18  ;;  %v424_v32 = vshll.u32 %v213_v10, 16 }
  0x4a   : > { %v430_v33 = vshll.u32 %v6187_v16, 16  ;;  %v308_v35 = vrot.slane %v307_v26, 4  ;;  %v423_v36 = vrot.slane %v421_v28, 4  ;;  %v434_v37 = vshrl.u32 %v6187_v16, 16  ;;  %2971 = vmatpush.bf16.msra.mxu2 %v5701_v13 }
  0x4b   : > { %v440_v38 = vshll.u32 %v6192_v22, 16  ;;  %v685_v39 = vpack.c.b16 %v668_v29, %v667_v25  ;;  %v318_v40 = vrot.slane %v317_v30, 4  ;;  %v426_v41 = vrot.slane %v424_v32, 5 }
  0x4c   : > { %v432_v43 = vrot.slane %v430_v33, 5  ;;  %v313_v45 = vsel %vm6069_vm2, %v308_v35, %v312_v18  ;;  %v436_v46 = vrot.slane %v434_v37, 4  ;;  %v517_v49 = vshrl.u32 %v221_v34, 16  ;;  %v205_v33 = vld [vmem:[%s6057_s30 + $0x24] sm:$0xf] }
  0x4d   : > { %v442_v47 = vrot.slane %v440_v38, 5  ;;  %5004 = vmatmul.msk.bf16.gmra.mxu3 %vm693_vm3, %v685_v39  ;;  %v323_v50 = vsel %vm6069_vm2, %v318_v40, %v322_v21  ;;  %v643_v52 = vunpack.c.l.b16 %v313_v45  ;;  %v427_v53 = vor.u32 %v426_v41, %v423_v36  ;;  %v6223_v38 = vld [vmem:[%s6057_s30 + $0x28] sm:$0xf]  ;;  %v6226_v39 = vld [vmem:[%s6057_s30 + $0x2c] sm:$0x1]  ;;  %v5702_v45 = vld [vmem:[%s8054_s1 + $0x38] sm:$0xff] }
  0x4e   : > { %v520_v54 = vshll.u32 %v221_v34, 16  ;;  %v644_v55 = vunpack.c.l.b16 %v323_v50  ;;  %v437_v56 = vor.u32 %v436_v46, %v432_v43  ;;  %v519_v57 = vrot.slane %v517_v49, 4  ;;  %v5684_v46 = vld [vmem:[%s8054_s1 + $0x28] sm:$0xff]  ;;  %3629 = vmatpush.bf16.msra.mxu3 %v5702_v45 }
  0x4f   : > { %v526_v62 = vshll.u32 %v222_v44, 16  ;;  %v428_v63 = vrot.slane %v427_v53, 4  ;;  %v530_v1 = vshrl.u32 %v222_v44, 16  ;;  %v536_v2 = vshll.u32 %v244_v48, 16  ;;  %2680 = vmatpush.bf16.msra.mxu1 %v5684_v46 }
  0x50   : > { %v522_v0 = vrot.slane %v520_v54, 5  ;;  %v673_v4 = vpack.c.b16 %v644_v55, %v643_v52  ;;  %v438_v5 = vrot.slane %v437_v56, 4  ;;  %v613_v18 = vshrl.u32 %v229_v3, 16 }
  0x51   : > { %v528_v6 = vrot.slane %v526_v62, 5  ;;  %v433_v8 = vsel %vm6069_vm2, %v428_v63, %v432_v43  ;;  %v532_v10 = vrot.slane %v530_v1, 4  ;;  %v538_v11 = vrot.slane %v536_v2, 5  ;;  %v1054_v1 = vld [vmem:[%s6057_s30] sm:$0xe] }
  0x52   : > { %v523_v9 = vor.u32 %v522_v0, %v519_v57  ;;  %4992 = vmatmul.msk.bf16.gmra.mxu0 %vm693_vm3, %v673_v4  ;;  %v443_v14 = vsel %vm6069_vm2, %v438_v5, %v442_v47  ;;  %v653_v17 = vunpack.c.l.b16 %v433_v8  ;;  %v616_v19 = vshll.u32 %v229_v3, 16  ;;  %v5703_v47 = vld [vmem:[%s8054_s1 + $0x40] sm:$0xff] }
  0x53   : > { %v654_v21 = vunpack.c.l.b16 %v443_v14  ;;  %v533_v25 = vor.u32 %v532_v10, %v528_v6  ;;  %v622_v26 = vshll.u32 %v230_v7, 16  ;;  %v615_v28 = vrot.slane %v613_v18, 4  ;;  %4031 = vmatpush.bf16.msra.mxu0 %v5703_v47  ;;  %v5246_v10 = vld [vmem:[%s6057_s30 + $0xc] sm:$0xf] }
  0x54   : > { %v524_v24 = vrot.slane %v523_v9, 4  ;;  %v618_v29 = vrot.slane %v616_v19, 5  ;;  %v626_v30 = vshrl.u32 %v230_v7, 16  ;;  %v632_v32 = vshll.u32 %v248_v12, 16 }
  0x55   : > { %v678_v34 = vpack.c.b16 %v654_v21, %v653_v17  ;;  %v534_v36 = vrot.slane %v533_v25, 4  ;;  %v624_v37 = vrot.slane %v622_v26, 5  ;;  %v1110_v40 = vrot.slane %v6085_v61, 5  ;;  %v5249_v61 = vld [vmem:[%s6057_s30 + $0x18] sm:$0xf] }
  0x56   : > { %v529_v35 = vsel %vm6069_vm2, %v524_v24, %v528_v6  ;;  %v619_v43 = vor.u32 %v618_v29, %v615_v28  ;;  %v628_v44 = vrot.slane %v626_v30, 4  ;;  %v634_v49 = vrot.slane %v632_v32, 5 }
  0x57   : > { %v661_v41 = vunpack.c.l.b16 %v529_v35  ;;  %4997 = vmatmul.msk.bf16.gmra.mxu1 %vm693_vm3, %v678_v34  ;;  %v539_v48 = vsel %vm6069_vm2, %v534_v36, %v538_v11  ;;  %v325_v50 = vshrl.u32 %v205_v33, 16  ;;  %v328_v52 = vshll.u32 %v205_v33, 16  ;;  %v5247_v11 = vld [vmem:[%s6057_s30 + $0x10] sm:$0xf] }
  0x58   : > { %v662_v53 = vunpack.c.l.b16 %v539_v48  ;;  %v620_v54 = vrot.slane %v619_v43, 4  ;;  %v629_v55 = vor.u32 %v628_v44, %v624_v37  ;;  %v334_v56 = vshll.u32 %v6223_v38, 16  ;;  %v5647_v48 = vld [vmem:[%s6057_s30] sm:$0xff] }
  0x59   : > { %v327_v57 = vrot.slane %v325_v50, 4  ;;  %v330_v62 = vrot.slane %v328_v52, 5  ;;  %v338_v63 = vshrl.u32 %v6223_v38, 16  ;;  %v344_v0 = vshll.u32 %v6226_v39, 16 }
  0x5a   : > { %v682_v2 = vpack.c.b16 %v662_v53, %v661_v41  ;;  %v625_v3 = vsel %vm6069_vm2, %v620_v54, %v624_v37  ;;  %v630_v4 = vrot.slane %v629_v55, 4  ;;  %v336_v5 = vrot.slane %v334_v56, 5  ;;  %v5248_v37 = vld [vmem:[%s6057_s30 + $0x14] sm:$0x1] }
  0x5b   : > { %v669_v6 = vunpack.c.l.b16 %v625_v3  ;;  %v331_v7 = vor.u32 %v330_v62, %v327_v57  ;;  %v340_v8 = vrot.slane %v338_v63, 4  ;;  %v346_v9 = vrot.slane %v344_v0, 5  ;;  %v5250_v63 = vld [vmem:[%s6057_s30 + $0x1c] sm:$0xf]  ;;  %v1055_v0 = vld [vmem:[%s6057_s30 + $0xc] sm:$0xe] }
  0x5c   : > { %5001 = vmatmul.msk.bf16.gmra.mxu2 %vm693_vm3, %v682_v2  ;;  %v635_v12 = vsel %vm6069_vm2, %v630_v4, %v634_v49  ;;  %v5090_v13 = vrot.slane %v1054_v1, 9  ;;  %v1107_v21 = vrot.slane %v6082_v60, 5  ;;  %v1783_v24 = vshrl.u32 %v5246_v10, 16 }
  0x5d   : > { %v670_v14 = vunpack.c.l.b16 %v635_v12  ;;  %v332_v17 = vrot.slane %v331_v7, 4  ;;  %v341_v18 = vor.u32 %v340_v8, %v336_v5  ;;  %v1786_v25 = vshll.u32 %v5246_v10, 16  ;;  %v5666_v7 = vld [vmem:[%s6057_s30 + $0xc] sm:$0xff] }
  0x5e   : > { %v1792_v26 = vshll.u32 %v5247_v11, 16  ;;  %v1796_v28 = vshrl.u32 %v5247_v11, 16  ;;  %v1108_v33 = vsel %vm6252_vm6, %v5090_v13, %v1107_v21  ;;  %v1109_v35 = vrot.slane %v1107_v21, 4 }
  0x5f   : > { %v686_v29 = vpack.c.b16 %v670_v14, %v669_v6  ;;  %v337_v30 = vsel %vm6069_vm2, %v332_v17, %v336_v5  ;;  %v342_v32 = vrot.slane %v341_v18, 4  ;;  %v1220_v36 = vunpack.c.l.b16 %v1108_v33  ;;  %v5251_v18 = vld [vmem:[%s6057_s30 + $0x20] sm:$0x1] }
  0x60   : > { %v645_v34 = vunpack.c.l.b16 %v337_v30  ;;  %v1785_v41 = vrot.slane %v1783_v24, 4  ;;  %v1788_v43 = vrot.slane %v1786_v25, 5  ;;  %v1794_v44 = vrot.slane %v1792_v26, 5 }
  0x61   : > { %5005 = vmatmul.msk.bf16.gmra.mxu3 %vm693_vm3, %v686_v29  ;;  %v347_v60 = vsel %vm6069_vm2, %v342_v32, %v346_v9  ;;  %v1798_v45 = vrot.slane %v1796_v28, 4  ;;  %v1111_v47 = vsel %vm6252_vm6, %v1109_v35, %v1110_v40  ;;  %v1802_v53 = vshll.u32 %v5248_v37, 16 }
  0x62   : > { %v646_v46 = vunpack.c.l.b16 %v347_v60  ;;  %v1221_v49 = vunpack.c.l.b16 %v1111_v47  ;;  %v1789_v50 = vor.u32 %v1788_v43, %v1785_v41  ;;  %v1114_v40 = vrot.slane %v6128_v23, 5  ;;  %v5253_v41 = vld [vmem:[%s6057_s30 + $0x28] sm:$0xf]  ;;  %v1056_v43 = vld [vmem:[%s6057_s30 + $0x18] sm:$0xe] }
  0x63   : > { %v1799_v52 = vor.u32 %v1798_v45, %v1794_v44  ;;  %v1804_v62 = vrot.slane %v1802_v53, 5  ;;  %v1807_v1 = vshrl.u32 %v5249_v61, 16  ;;  %v1810_v2 = vshll.u32 %v5249_v61, 16 }
  0x64   : > { %v674_v54 = vpack.c.b16 %v646_v46, %v645_v34  ;;  %v1252_v55 = vpack.c.b16 %v1221_v49, %v1220_v36  ;;  %v1790_v56 = vrot.slane %v1789_v50, 4  ;;  %v1816_v5 = vshll.u32 %v5250_v63, 16  ;;  %v5252_v36 = vld [vmem:[%s6057_s30 + $0x24] sm:$0xf]  ;;  %v5667_v50 = vld [vmem:[%s6057_s30 + $0x18] sm:$0xff] }
  0x65   : > { %v1800_v57 = vrot.slane %v1799_v52, 4  ;;  %v1820_v6 = vshrl.u32 %v5250_v63, 16  ;;  %v5091_v8 = vrot.slane %v1055_v0, 9  ;;  %v1116_v9 = vrot.slane %v1114_v40, 4  ;;  %v5254_v63 = vld [vmem:[%s6057_s30 + $0x2c] sm:$0x1] }
  0x66   : > { %4993 = vmatmul.msk.bf16.gmra.mxu0 %vm693_vm3, %v674_v54  ;;  %v1795_v3 = vsel %vm6069_vm2, %v1790_v56, %v1794_v44  ;;  %v1117_v23 = vrot.slane %v6131_v27, 5  ;;  %v1809_v12 = vrot.slane %v1807_v1, 4  ;;  %v1812_v13 = vrot.slane %v1810_v2, 5  ;;  %v5648_v27 = vld [vmem:[%s6057_s30 + $0xc] sm:$0xff] }
  0x67   : > { %5074 = vmatmul.msk.bf16.vlgmr.msrb.gmra.mxu1 %vm693_vm3, %v5647_v48  ;;  %v1805_v4 = vsel %vm6069_vm2, %v1800_v57, %v1804_v62  ;;  %v2169_v10 = vunpack.c.l.b16 %v1795_v3  ;;  %v1818_v14 = vrot.slane %v1816_v5, 5  ;;  %v1822_v17 = vrot.slane %v1820_v6, 4 }
  0x68   : > { %v2170_v11 = vunpack.c.l.b16 %v1805_v4  ;;  %v1115_v21 = vsel %vm6252_vm6, %v5091_v8, %v1114_v40  ;;  %v1118_v24 = vsel %vm6252_vm6, %v1116_v9, %v1117_v23  ;;  %v1813_v26 = vor.u32 %v1812_v13, %v1809_v12  ;;  %v5256_v8 = vld [vmem:[%s6057_s30 + $0x34] sm:$0xf]  ;;  %v1057_v13 = vld [vmem:[%s6057_s30 + $0x24] sm:$0xe] }
  0x69   : > { %v1823_v28 = vor.u32 %v1822_v17, %v1818_v14  ;;  %v1826_v29 = vshll.u32 %v5251_v18, 16  ;;  %v1222_v30 = vunpack.c.l.b16 %v1115_v21  ;;  %v1223_v32 = vunpack.c.l.b16 %v1118_v24 }
  0x6a   : > { %v2201_v25 = vpack.c.b16 %v2170_v11, %v2169_v10  ;;  %v1814_v33 = vrot.slane %v1813_v26, 4  ;;  %v1121_v60 = vrot.slane %v6174_v58, 5  ;;  %v1831_v44 = vshrl.u32 %v5252_v36, 16 }
  0x6b   : > { %v1824_v34 = vrot.slane %v1823_v28, 4  ;;  %v1828_v35 = vrot.slane %v1826_v29, 5  ;;  %v1253_v37 = vpack.c.b16 %v1223_v32, %v1222_v30  ;;  %v1834_v45 = vshll.u32 %v5252_v36, 16  ;;  %v5257_v36 = vld [vmem:[%s6057_s30 + $0x38] sm:$0x1] }
  0x6c   : > { %5112 = vmatmul.msk.bf16.vlgmr.msrb.gmra.mxu2 %vm693_vm3, %v1252_v55  ;;  %v1819_v46 = vsel %vm6069_vm2, %v1814_v33, %v1818_v14  ;;  %v1840_v48 = vshll.u32 %v5253_v41, 16  ;;  %v1844_v49 = vshrl.u32 %v5253_v41, 16  ;;  %v5092_v52 = vrot.slane %v1056_v43, 9 }
  0x6d   : > { %v1829_v47 = vsel %vm6069_vm2, %v1824_v34, %v1828_v35  ;;  %v1123_v53 = vrot.slane %v1121_v60, 4  ;;  %v1124_v58 = vrot.slane %v6177_v59, 5  ;;  %v2171_v54 = vunpack.c.l.b16 %v1819_v46  ;;  %v5649_v59 = vld [vmem:[%s6057_s30 + $0x18] sm:$0xff] }
  0x6e   : > { %v2172_v55 = vunpack.c.l.b16 %v1829_v47  ;;  %v1833_v56 = vrot.slane %v1831_v44, 4  ;;  %v1836_v57 = vrot.slane %v1834_v45, 5  ;;  %v1842_v62 = vrot.slane %v1840_v48, 5  ;;  %v5650_v45 = vld [vmem:[%s6057_s30 + $0x24] sm:$0xff] }
  0x6f   : > { %v1846_v61 = vrot.slane %v1844_v49, 4  ;;  %v1122_v40 = vsel %vm6252_vm6, %v5092_v52, %v1121_v60  ;;  %v1125_v0 = vsel %vm6252_vm6, %v1123_v53, %v1124_v58  ;;  %v1850_v4 = vshll.u32 %v5254_v63, 16  ;;  %v5258_v52 = vld [vmem:[%s6057_s30 + $0x3c] sm:$0xf]  ;;  %v5259_v53 = vld [vmem:[%s6057_s30 + $0x40] sm:$0xf] }
  0x70   : > { %v2202_v1 = vpack.c.b16 %v2172_v55, %v2171_v54  ;;  %v1837_v2 = vor.u32 %v1836_v57, %v1833_v56  ;;  %v1224_v5 = vunpack.c.l.b16 %v1122_v40  ;;  %v1225_v6 = vunpack.c.l.b16 %v1125_v0  ;;  %v5941_v56 = vld [vmem:[%s6057_s30 + $0x34] sm:$0xf] }
  0x71   : > { %5230 = vmatmul.msk.bf16.vlgmr.msrb.gmra.mxu3 %vm693_vm3, %v5666_v7  ;;  %v1847_v3 = vor.u32 %v1846_v61, %v1842_v62  ;;  %v5255_v7 = vld [vmem:[%s6057_s30 + $0x30] sm:$0xf]  ;;  %v1852_v10 = vrot.slane %v1850_v4, 5  ;;  %v1128_v12 = vrot.slane %v6223_v38, 5  ;;  %v1864_v18 = vshll.u32 %v5256_v8, 16  ;;  %v5668_v38 = vld [vmem:[%s6057_s30 + $0x24] sm:$0xff] }
  0x72   : > { %v1838_v9 = vrot.slane %v1837_v2, 4  ;;  %v1254_v11 = vpack.c.b16 %v1225_v6, %v1224_v5  ;;  %v1855_v14 = vshrl.u32 %v5255_v7, 16  ;;  %v1858_v17 = vshll.u32 %v5255_v7, 16  ;;  %v1058_v61 = vld [vmem:[%s6057_s30 + $0x30] sm:$0xe] }
  0x73   : > { %v1848_v23 = vrot.slane %v1847_v3, 4  ;;  %v1868_v21 = vshrl.u32 %v5256_v8, 16  ;;  %v1130_v26 = vrot.slane %v1128_v12, 4  ;;  %v1131_v28 = vrot.slane %v6226_v39, 5  ;;  %v5669_v2 = vld [vmem:[%s6057_s30 + $0x30] sm:$0xff] }
  0x74   : > { %v1843_v24 = vsel %vm6069_vm2, %v1838_v9, %v1842_v62  ;;  %v1857_v29 = vrot.slane %v1855_v14, 4  ;;  %v1860_v30 = vrot.slane %v1858_v17, 5  ;;  %v1866_v32 = vrot.slane %v1864_v18, 5  ;;  %v5942_v6 = vld [vmem:[%s6057_s30 + $0x38] sm:$0x1] }
  0x75   : > { %v1870_v33 = vrot.slane %v1868_v21, 4  ;;  %v2173_v34 = vunpack.c.l.b16 %v1843_v24  ;;  %v1132_v41 = vsel %vm6252_vm6, %v1130_v26, %v1131_v28  ;;  %v1874_v43 = vshll.u32 %v5257_v36, 16  ;;  %v5651_v24 = vld [vmem:[%s6057_s30 + $0x30] sm:$0xff] }
  0x76   : > { %5300 = vmatmul.msk.bf16.vlgmr.msrb.gmra.mxu0 %vm693_vm3, %v2201_v25  ;;  %v1853_v25 = vsel %vm6069_vm2, %v1848_v23, %v1852_v10  ;;  %v1861_v39 = vor.u32 %v1860_v30, %v1857_v29  ;;  %v1227_v47 = vunpack.c.l.b16 %v1132_v41  ;;  %v1135_v57 = vrot.slane %v5941_v56, 5 }
  0x77   : > { %5075 = vmatmul.msk.bf16.gmra.mxu1 %vm693_vm3, %v5648_v27  ;;  %v5093_v27 = vrot.slane %v1057_v13, 9  ;;  %v2174_v35 = vunpack.c.l.b16 %v1853_v25  ;;  %v1871_v60 = vor.u32 %v1870_v33, %v1866_v32  ;;  %v1879_v63 = vshrl.u32 %v5258_v52, 16 }
  0x78   : > { %v1862_v48 = vrot.slane %v1861_v39, 4  ;;  %v1882_v40 = vshll.u32 %v5258_v52, 16  ;;  %v1888_v0 = vshll.u32 %v5259_v53, 16  ;;  %v5094_v4 = vrot.slane %v1058_v61, 9  ;;  %v5263_v61 = vld [vmem:[%s6057_s30 + $0x50] sm:$0x1] }
  0x79   : > { %v2203_v44 = vpack.c.b16 %v2174_v35, %v2173_v34  ;;  %v1872_v49 = vrot.slane %v1871_v60, 4  ;;  %v1137_v5 = vrot.slane %v1135_v57, 4  ;;  %v1138_v7 = vrot.slane %v5942_v6, 5  ;;  %v5261_v34 = vld [vmem:[%s6057_s30 + $0x48] sm:$0xf] }
  0x7a   : > { %v1867_v54 = vsel %vm6069_vm2, %v1862_v48, %v1866_v32  ;;  %v1881_v8 = vrot.slane %v1879_v63, 4  ;;  %v1884_v9 = vrot.slane %v1882_v40, 5  ;;  %v1890_v23 = vrot.slane %v1888_v0, 5  ;;  %v5262_v35 = vld [vmem:[%s6057_s30 + $0x4c] sm:$0xf] }
  0x7b   : > { %v1139_v13 = vsel %vm6252_vm6, %v1137_v5, %v1138_v7  ;;  %v1059_v60 = vld [vmem:[%s6057_s30 + $0x3c] sm:$0xe]  ;;  %v5264_v7 = vld [vmem:[%s6057_s30 + $0x54] sm:$0xf] }
  0x7c   : > { %5113 = vmatmul.msk.bf16.gmra.mxu2 %vm693_vm3, %v1253_v37  ;;  %v1129_v37 = vsel %vm6252_vm6, %v5093_v27, %v1128_v12  ;;  %v1136_v12 = vsel %vm6252_vm6, %v5094_v4, %v1135_v57  ;;  %v1885_v17 = vor.u32 %v1884_v9, %v1881_v8  ;;  %v1229_v26 = vunpack.c.l.b16 %v1139_v13  ;;  %v5265_v8 = vld [vmem:[%s6057_s30 + $0x58] sm:$0xf] }
  0x7d   : > { %v1226_v46 = vunpack.c.l.b16 %v1129_v37  ;;  %v1228_v27 = vunpack.c.l.b16 %v1136_v12  ;;  %v1142_v37 = vrot.slane %v6097_v15, 5  ;;  %v1145_v15 = vrot.slane %v6102_v20, 5 }
  0x7e   : > { %v1922_v4 = vshll.u32 %v5263_v61, 16 }
  0x7f   : > { %v1255_v58 = vpack.c.b16 %v1227_v47, %v1226_v46  ;;  %v1256_v33 = vpack.c.b16 %v1229_v26, %v1228_v27  ;;  %v1916_v46 = vshrl.u32 %v5262_v35, 16  ;;  %v5670_v47 = vld [vmem:[%s6057_s30 + $0x3c] sm:$0xff]  ;;  %v1060_v27 = vld [vmem:[%s6057_s30 + $0x48] sm:$0xe] }
  0x81   : > { %5231 = vmatmul.msk.bf16.gmra.mxu3 %vm693_vm3, %v5667_v50  ;;  %v1876_v50 = vrot.slane %v1874_v43, 5  ;;  %v1903_v43 = vshrl.u32 %v5261_v34, 16  ;;  %v1918_v57 = vrot.slane %v1916_v46, 4 }
  0x83   : > { %v1877_v55 = vsel %vm6069_vm2, %v1872_v49, %v1876_v50  ;;  %v5095_v49 = vrot.slane %v1059_v60, 9  ;;  %v1144_v50 = vrot.slane %v1142_v37, 4 }
  0x84   : > { %v2176_v3 = vunpack.c.l.b16 %v1877_v55 }
  0x85   : > { %v1143_v63 = vsel %vm6252_vm6, %v5095_v49, %v1142_v37  ;;  %v1146_v40 = vsel %vm6252_vm6, %v1144_v50, %v1145_v15 }
  0x86   : > { %5301 = vmatmul.msk.bf16.gmra.mxu0 %vm693_vm3, %v2202_v1  ;;  %v1892_v1 = vshrl.u32 %v5259_v53, 16  ;;  %v1230_v5 = vunpack.c.l.b16 %v1143_v63  ;;  %v1231_v6 = vunpack.c.l.b16 %v1146_v40 }
  0x87   : > { %5076 = vmatmul.msk.bf16.gmra.mxu1 %vm693_vm3, %v5649_v59  ;;  %v2175_v59 = vunpack.c.l.b16 %v1867_v54  ;;  %v1905_v54 = vrot.slane %v1903_v43, 4 }
  0x88   : > { %v1894_v10 = vrot.slane %v1892_v1, 4  ;;  %v1257_v12 = vpack.c.b16 %v1231_v6, %v1230_v5  ;;  %v1156_v6 = vrot.slane %v6187_v16, 5  ;;  %v1159_v16 = vrot.slane %v6192_v22, 5 }
  0x89   : > { %v2204_v14 = vpack.c.b16 %v2176_v3, %v2175_v59  ;;  %v5652_v59 = vld [vmem:[%s6057_s30 + $0x3c] sm:$0xff] }
  0x8a   : > { %v1895_v18 = vor.u32 %v1894_v10, %v1890_v23 }
  0x8c   : > { %5114 = vmatmul.msk.bf16.gmra.mxu2 %vm693_vm3, %v1254_v11  ;;  %v5260_v11 = vld [vmem:[%s6057_s30 + $0x44] sm:$0x1]  ;;  %v1896_v29 = vrot.slane %v1895_v18, 4  ;;  %v1936_v18 = vshll.u32 %v5265_v8, 16 }
  0x8d   : > { %v1898_v21 = vshll.u32 %v5260_v11, 16  ;;  %v1924_v11 = vrot.slane %v1922_v4, 5 }
  0x8f   : > { %v1900_v30 = vrot.slane %v1898_v21, 5  ;;  %v1149_v21 = vrot.slane %v6141_v42, 5  ;;  %v5096_v42 = vrot.slane %v1060_v27, 9  ;;  %v1158_v27 = vrot.slane %v1156_v6, 4 }
  0x91   : > { %5232 = vmatmul.msk.bf16.gmra.mxu3 %vm693_vm3, %v5668_v38  ;;  %v1886_v38 = vrot.slane %v1885_v17, 4  ;;  %v1901_v39 = vsel %vm6069_vm2, %v1896_v29, %v1900_v30  ;;  %v1930_v17 = vshll.u32 %v5264_v7, 16  ;;  %v1150_v50 = vsel %vm6252_vm6, %v5096_v42, %v1149_v21 }
  0x92   : > { %v2178_v53 = vunpack.c.l.b16 %v1901_v39  ;;  %v1152_v39 = vrot.slane %v6146_v51, 5 }
  0x93   : > { %v1891_v41 = vsel %vm6069_vm2, %v1886_v38, %v1890_v23 }
  0x94   : > { %v2177_v52 = vunpack.c.l.b16 %v1891_v41  ;;  %v1151_v41 = vrot.slane %v1149_v21, 4 }
  0x96   : > { %5302 = vmatmul.msk.bf16.gmra.mxu0 %vm693_vm3, %v2203_v44  ;;  %v1906_v44 = vshll.u32 %v5261_v34, 16  ;;  %v2205_v20 = vpack.c.b16 %v2178_v53, %v2177_v52  ;;  %v1938_v34 = vrot.slane %v1936_v18, 5  ;;  %v1153_v15 = vsel %vm6252_vm6, %v1151_v41, %v1152_v39  ;;  %v5672_v18 = vld [vmem:[%s6057_s30 + $0x54] sm:$0xff] }
  0x97   : > { %5077 = vmatmul.msk.bf16.gmra.mxu1 %vm693_vm3, %v5650_v45  ;;  %v1912_v45 = vshll.u32 %v5262_v35, 16  ;;  %v5671_v35 = vld [vmem:[%s6057_s30 + $0x48] sm:$0xff]  ;;  %v1160_v39 = vsel %vm6252_vm6, %v1158_v27, %v1159_v16 }
  0x98   : > { %v1908_v55 = vrot.slane %v1906_v44, 5 }
  0x99   : > { %v1914_v56 = vrot.slane %v1912_v45, 5  ;;  %v5266_v45 = vld [vmem:[%s6057_s30 + $0x5c] sm:$0x1] }
  0x9a   : > { %v1946_v52 = vshll.u32 %v5266_v45, 16  ;;  %v5654_v45 = vld [vmem:[%s6057_s30 + $0x54] sm:$0xff] }
  0x9b   : > { %v1919_v3 = vor.u32 %v1918_v57, %v1914_v56 }
  0x9c   : > { %v6339_v62 = vpop.f32.mrf.mxu1  ;;  %5115 = vmatmul.msk.bf16.gmra.mxu2 %vm693_vm3, %v1255_v58  ;;  %v1948_v40 = vrot.slane %v1946_v52, 5 }
  0x9d   : > { %v1920_v10 = vrot.slane %v1919_v3, 4 }
  0x9f   : > { %v1925_v38 = vsel %vm6069_vm2, %v1920_v10, %v1924_v11 }
  0xa0   : > { %v2180_v44 = vunpack.c.l.b16 %v1925_v38 }
  0xa1   : > { %5233 = vmatmul.msk.bf16.gmra.mxu3 %vm693_vm3, %v5669_v2  ;;  %v1909_v2 = vor.u32 %v1908_v55, %v1905_v54  ;;  %v5653_v54 = vld [vmem:[%s6057_s30 + $0x48] sm:$0xff]  ;;  %v1232_v55 = vunpack.c.l.b16 %v1150_v50 }
  0xa3   : > { %v1910_v23 = vrot.slane %v1909_v2, 4  ;;  %v5268_v2 = vld [vmem:[%s6057_s30 + $0x64] sm:$0xf] }
  0xa4   : > { %v6352_v25 = vpop.f32.mrf.mxu1  ;;  %v1960_v11 = vshll.u32 %v5268_v2, 16 }
  0xa5   : > { %v1915_v26 = vsel %vm6069_vm2, %v1910_v23, %v1914_v56  ;;  %v1233_v56 = vunpack.c.l.b16 %v1153_v15  ;;  %v1235_v15 = vunpack.c.l.b16 %v1160_v39 }
  0xa6   : > { %v6354_v28 = vpop.f32.mrf.mxu2  ;;  %5303 = vmatmul.msk.bf16.gmra.mxu0 %vm693_vm3, %v2204_v14  ;;  %v1927_v14 = vshrl.u32 %v5264_v7, 16  ;;  %v2179_v43 = vunpack.c.l.b16 %v1915_v26 }
  0xa7   : > { %5078 = vmatmul.msk.bf16.gmra.mxu1 %vm693_vm3, %v5651_v24  ;;  %v1940_v24 = vshrl.u32 %v5265_v8, 16  ;;  %v1258_v3 = vpack.c.b16 %v1233_v56, %v1232_v55  ;;  %v1061_v8 = vld [vmem:[%s6057_s30 + $0x54] sm:$0xe]  ;;  %v5270_v56 = vld [vmem:[%s6057_s30 + $0x6c] sm:$0xf] }
  0xa8   : > { %v1929_v30 = vrot.slane %v1927_v14, 4  ;;  %v2206_v53 = vpack.c.b16 %v2180_v44, %v2179_v43 }
  0xa9   : > { %v6358_v32 = vpop.f32.mrf.mxu0  ;;  %v1942_v60 = vrot.slane %v1940_v24, 4  ;;  %v5097_v24 = vrot.slane %v1061_v8, 9  ;;  %v1978_v8 = vshll.u32 %v5270_v56, 16 }
  0xaa   : > { %v6362_v36 = vpop.f32.mrf.mxu3 }
  0xab   : > { %v1943_v51 = vor.u32 %v1942_v60, %v1938_v34  ;;  %v1157_v41 = vsel %vm6252_vm6, %v5097_v24, %v1156_v6  ;;  %v1975_v6 = vshrl.u32 %v5270_v56, 16 }
  0xac   : > { %5116 = vmatmul.msk.bf16.gmra.mxu2 %vm693_vm3, %v1256_v33  ;;  %v1932_v33 = vrot.slane %v1930_v17, 5  ;;  %v1234_v50 = vunpack.c.l.b16 %v1157_v41  ;;  %v5272_v41 = vld [vmem:[%s6057_s30 + $0x74] sm:$0x1] }
  0xad   : > { %v1944_v63 = vrot.slane %v1943_v51, 4 }
  0xae   : > { %v6372_v48 = vpop.f32.mrf.mxu1  ;;  %v6375_v58 = vpop.f32.mrf.mxu2  ;;  %v1259_v55 = vpack.c.b16 %v1235_v15, %v1234_v50  ;;  %v1994_v15 = vshll.u32 %v5272_v41, 16  ;;  %v5674_v41 = vld [vmem:[%s6057_s30 + $0x6c] sm:$0xff] }
  0xaf   : > { %v1949_v5 = vsel %vm6069_vm2, %v1944_v63, %v1948_v40  ;;  %v5943_v40 = vld [vmem:[%s6057_s30 + $0x64] sm:$0xf] }
  0xb0   : > { %v2182_v21 = vunpack.c.l.b16 %v1949_v5  ;;  %v1062_v5 = vld [vmem:[%s6057_s30 + $0x60] sm:$0xe] }
  0xb1   : > { %5234 = vmatmul.msk.bf16.gmra.mxu3 %vm693_vm3, %v5670_v47  ;;  %v6383_v0 = vpop.f32.mrf.mxu0  ;;  %v1933_v47 = vor.u32 %v1932_v33, %v1929_v30  ;;  %v1962_v30 = vrot.slane %v1960_v11, 5 }
  0xb2   : > { %v6385_v1 = vpop.f32.mrf.mxu3 }
  0xb3   : > { %v1934_v61 = vrot.slane %v1933_v47, 4 }
  0xb5   : > { %v1939_v4 = vsel %vm6069_vm2, %v1934_v61, %v1938_v34  ;;  %v5271_v61 = vld [vmem:[%s6057_s30 + $0x70] sm:$0xf] }
  0xb6   : > { %5304 = vmatmul.msk.bf16.gmra.mxu0 %vm693_vm3, %v2205_v20  ;;  %v6391_v9 = vpop.f32.mrf.mxu1  ;;  %v2181_v17 = vunpack.c.l.b16 %v1939_v4 }
  0xb7   : > { %5079 = vmatmul.msk.bf16.gmra.mxu1 %vm693_vm3, %v5652_v59  ;;  %v5267_v59 = vld [vmem:[%s6057_s30 + $0x60] sm:$0xf] }
  0xb8   : > { %v1951_v23 = vshrl.u32 %v5267_v59, 16  ;;  %v1954_v10 = vshll.u32 %v5267_v59, 16  ;;  %v2207_v60 = vpack.c.b16 %v2182_v21, %v2181_v17  ;;  %v1163_v59 = vrot.slane %v5943_v40, 5 }
  0xb9   : > { %v6394_v13 = vpop.f32.mrf.mxu2  ;;  %v5098_v21 = vrot.slane %v1062_v5, 9 }
  0xba   : > { %v1953_v26 = vrot.slane %v1951_v23, 4  ;;  %v1956_v38 = vrot.slane %v1954_v10, 5  ;;  %v1984_v23 = vshll.u32 %v5271_v61, 16  ;;  %v1988_v10 = vshrl.u32 %v5271_v61, 16 }
  0xbb   : > { %v1165_v24 = vrot.slane %v1163_v59, 4  ;;  %v1164_v39 = vsel %vm6252_vm6, %v5098_v21, %v1163_v59 }
  0xbc   : > { %5117 = vmatmul.msk.bf16.gmra.mxu2 %vm693_vm3, %v1257_v12  ;;  %v1964_v12 = vshrl.u32 %v5268_v2, 16  ;;  %v1957_v22 = vor.u32 %v1956_v38, %v1953_v26  ;;  %v1977_v38 = vrot.slane %v1975_v6, 4  ;;  %v5274_v6 = vld [vmem:[%s6057_s30 + $0x7c] sm:$0xf] }
  0xbd   : > { %v6402_v29 = vpop.f32.mrf.mxu0 }
  0xbe   : > { %v6406_v37 = vpop.f32.mrf.mxu3  ;;  %v1966_v33 = vrot.slane %v1964_v12, 4  ;;  %v1958_v52 = vrot.slane %v1957_v22, 4  ;;  %v5944_v12 = vld [vmem:[%s6057_s30 + $0x68] sm:$0x1] }
  0xbf   : > { %v1166_v17 = vrot.slane %v5944_v12, 5 }
  0xc0   : > { %v6410_v46 = vpop.f32.mrf.mxu1  ;;  %v1967_v43 = vor.u32 %v1966_v33, %v1962_v30  ;;  %v1986_v33 = vrot.slane %v1984_v23, 5 }
  0xc1   : > { %5235 = vmatmul.msk.bf16.gmra.mxu3 %vm693_vm3, %v5671_v35  ;;  %v6413_v49 = vpop.f32.mrf.mxu2  ;;  %v5269_v35 = vld [vmem:[%s6057_s30 + $0x68] sm:$0x1] }
  0xc2   : > { %v1970_v44 = vshll.u32 %v5269_v35, 16  ;;  %v1990_v35 = vrot.slane %v1988_v10, 4  ;;  %v1063_v10 = vld [vmem:[%s6057_s30 + $0x6c] sm:$0xe] }
  0xc4   : > { %v1991_v50 = vor.u32 %v1990_v35, %v1986_v33 }
  0xc5   : > { %v6420_v57 = vpop.f32.mrf.mxu0 }
  0xc6   : > { %5305 = vmatmul.msk.bf16.gmra.mxu0 %vm693_vm3, %v2206_v53  ;;  %v6423_v20 = vpop.f32.mrf.mxu3  ;;  %v1968_v53 = vrot.slane %v1967_v43, 4  ;;  %v1992_v59 = vrot.slane %v1991_v50, 4 }
  0xc7   : > { %5080 = vmatmul.msk.bf16.gmra.mxu1 %vm693_vm3, %v5653_v54  ;;  %v1972_v54 = vrot.slane %v1970_v44, 5  ;;  %v5655_v44 = vld [vmem:[%s6057_s30 + $0x60] sm:$0xff] }
  0xc8   : > { %v6433_v7 = vpop.f32.mrf.mxu1 }
  0xc9   : > { %v1973_v4 = vsel %vm6069_vm2, %v1968_v53, %v1972_v54  ;;  %v1236_v54 = vunpack.c.l.b16 %v1164_v39 }
  0xca   : > { %v2184_v16 = vunpack.c.l.b16 %v1973_v4  ;;  %v5273_v4 = vld [vmem:[%s6057_s30 + $0x78] sm:$0xf] }
  0xcb   : > { %v1999_v12 = vshrl.u32 %v5273_v4, 16 }
  0xcc   : > { %v6436_v14 = vpop.f32.mrf.mxu2  ;;  %5118 = vmatmul.msk.bf16.gmra.mxu2 %vm693_vm3, %v1258_v3  ;;  %v1963_v3 = vsel %vm6069_vm2, %v1958_v52, %v1962_v30  ;;  %v1980_v30 = vrot.slane %v1978_v8, 5  ;;  %v5945_v8 = vld [vmem:[%s6057_s30 + $0x70] sm:$0xf] }
  0xcd   : > { %v2183_v27 = vunpack.c.l.b16 %v1963_v3  ;;  %v1996_v3 = vrot.slane %v1994_v15, 5  ;;  %v1170_v23 = vrot.slane %v5945_v8, 5 }
  0xcf   : > { %v6441_v34 = vpop.f32.mrf.mxu0  ;;  %v2208_v22 = vpack.c.b16 %v2184_v16, %v2183_v27  ;;  %v1997_v21 = vsel %vm6069_vm2, %v1992_v59, %v1996_v3  ;;  %v2012_v27 = vshrl.u32 %v5274_v6, 16 }
  0xd0   : > { %v6444_v42 = vpop.f32.mrf.mxu3 }
  0xd1   : > { %5236 = vmatmul.msk.bf16.gmra.mxu3 %vm693_vm3, %v5672_v18  ;;  %v5673_v18 = vld [vmem:[%s6057_s30 + $0x60] sm:$0xff] }
  0xd4   : > { %v6452_v47 = vpop.f32.mrf.mxu1  ;;  %v6454_v51 = vpop.f32.mrf.mxu2 }
  0xd6   : > { %5306 = vmatmul.msk.bf16.gmra.mxu0 %vm693_vm3, %v2207_v60  ;;  %v1167_v60 = vsel %vm6252_vm6, %v1165_v24, %v1166_v17  ;;  %v2002_v17 = vshll.u32 %v5273_v4, 16  ;;  %v2008_v24 = vshll.u32 %v5274_v6, 16  ;;  %v5656_v6 = vld [vmem:[%s6057_s30 + $0x6c] sm:$0xff] }
  0xd7   : > { %5081 = vmatmul.msk.bf16.gmra.mxu1 %vm693_vm3, %v5654_v45  ;;  %v6460_v63 = vpop.f32.mrf.mxu0  ;;  %v1981_v45 = vor.u32 %v1980_v30, %v1977_v38  ;;  %v5946_v30 = vld [vmem:[%s6057_s30 + $0x74] sm:$0x1] }
  0xd8   : > { %v6463_v2 = vpop.f32.mrf.mxu3  ;;  %v1173_v35 = vrot.slane %v5946_v30, 5  ;;  %v2004_v50 = vrot.slane %v2002_v17, 5 }
  0xd9   : > { %v1982_v40 = vrot.slane %v1981_v45, 4  ;;  %v2001_v45 = vrot.slane %v1999_v12, 4 }
  0xdb   : > { %v2005_v4 = vor.u32 %v2004_v50, %v2001_v45  ;;  %v1064_v50 = vld [vmem:[%s6057_s30 + $0x78] sm:$0xe] }
  0xdc   : > { %5119 = vmatmul.msk.bf16.gmra.mxu2 %vm693_vm3, %v1259_v55  ;;  %v6471_v11 = vpop.f32.mrf.mxu1  ;;  %v1237_v55 = vunpack.c.l.b16 %v1167_v60  ;;  %v5099_v60 = vrot.slane %v1063_v10, 9 }
  0xde   : > { %v1260_v5 = vpack.c.b16 %v1237_v55, %v1236_v54  ;;  %v2014_v54 = vrot.slane %v2012_v27, 4  ;;  %v1171_v59 = vsel %vm6252_vm6, %v5099_v60, %v1170_v23 }
  0xdf   : > { %v6475_v26 = vpop.f32.mrf.mxu2 }
  0xe1   : > { %5237 = vmatmul.msk.bf16.gmra.mxu3 %vm693_vm3, %v5673_v18  ;;  %v1987_v18 = vsel %vm6069_vm2, %v1982_v40, %v1986_v33  ;;  %v5275_v40 = vld [vmem:[%s6057_s30 + $0x80] sm:$0x1] }
  0xe2   : > { %v2185_v33 = vunpack.c.l.b16 %v1987_v18  ;;  %v2018_v10 = vshll.u32 %v5275_v40, 16 }
  0xe3   : > { %v6483_v43 = vpop.f32.mrf.mxu0 }
  0xe4   : > { %v6486_v52 = vpop.f32.mrf.mxu3  ;;  %v974_v53 = vpop.f32.mrf.mxu1  ;;  %v2020_v30 = vrot.slane %v2018_v10, 5  ;;  %v5100_v10 = vrot.slane %v1064_v50, 9 }
  0xe5   : > { %v975_v56 = vadd.f32 %v974_v53, %v6358_v32  ;;  %v2010_v53 = vrot.slane %v2008_v24, 5  ;;  %v2006_v24 = vrot.slane %v2005_v4, 4 }
  0xe6   : > { %5307 = vmatmul.msk.bf16.gmra.mxu0 %vm693_vm3, %v2208_v22  ;;  %v1172_v22 = vrot.slane %v1170_v23, 4 }
  0xe7   : > { %v6490_v61 = vpop.f32.mrf.mxu2  ;;  %5082 = vmatmul.msk.bf16.gmra.mxu1 %vm693_vm3, %v5655_v44  ;;  %v2186_v44 = vunpack.c.l.b16 %v1997_v21  ;;  %v2015_v8 = vor.u32 %v2014_v54, %v2010_v53 }
  0xe9   : > { %v2209_v3 = vpack.c.b16 %v2186_v44, %v2185_v33  ;;  %v5277_v33 = vld [vmem:[%s6057_s30 + $0x88] sm:$0xf]  ;;  %v5947_v44 = vld [vmem:[%s6057_s30 + $0x7c] sm:$0xf] }
  0xea   : > { %v1177_v45 = vrot.slane %v5947_v44, 5 }
  0xeb   : > { %v6497_v32 = vpop.f32.mrf.mxu0 }
  0xec   : > { %v6503_v16 = vpop.f32.mrf.mxu3  ;;  %5120 = vmatmul.msk.bf16.gmra.mxu2 %vm693_vm3, %v1260_v5  ;;  %v976_v38 = vpop.f32.mrf.mxu1 }
  0xed   : > { %v977_v39 = vadd.f32 %v976_v38, %v6383_v0  ;;  %v1174_v0 = vsel %vm6252_vm6, %v1172_v22, %v1173_v35  ;;  %v2016_v38 = vrot.slane %v2015_v8, 4  ;;  %v5276_v35 = vld [vmem:[%s6057_s30 + $0x84] sm:$0xf]  ;;  %v5675_v8 = vld [vmem:[%s6057_s30 + $0x78] sm:$0xff] }
  0xee   : > { %v1239_v18 = vunpack.c.l.b16 %v1174_v0  ;;  %v2026_v40 = vshll.u32 %v5276_v35, 16  ;;  %v2036_v0 = vshrl.u32 %v5277_v33, 16 }
  0xef   : > { %v1331_v15 = vpop.f32.mrf.mxu2 }
  0xf0   : > { %v1411_v55 = vadd.f32 %v1331_v15, %v975_v56  ;;  %v1238_v56 = vunpack.c.l.b16 %v1171_v59  ;;  %v2023_v15 = vshrl.u32 %v5276_v35, 16  ;;  %v2032_v59 = vshll.u32 %v5277_v33, 16 }
  0xf1   : > { %5238 = vmatmul.msk.bf16.gmra.mxu3 %vm693_vm3, %v5674_v41 }
  0xf2   : > { %v1261_v22 = vpack.c.b16 %v1239_v18, %v1238_v56  ;;  %v2025_v18 = vrot.slane %v2023_v15, 4 }
  0xf3   : > { %v2280_v5 = vpop.f32.mrf.mxu0 }
  0xf4   : > { %v1622_v12 = vpop.f32.mrf.mxu3  ;;  %v979_v17 = vpop.f32.mrf.mxu1 }
  0xf5   : > { %v1702_v21 = vadd.f32 %v1622_v12, %v1411_v55  ;;  %v980_v23 = vadd.f32 %v979_v17, %v6402_v29  ;;  %v2011_v29 = vsel %vm6069_vm2, %v2006_v24, %v2010_v53  ;;  %v2021_v55 = vsel %vm6069_vm2, %v2016_v38, %v2020_v30 }
  0xf6   : > { %5308 = vmatmul.msk.bf16.gmra.mxu0 %vm693_vm3, %v2209_v3  ;;  %v5948_v3 = vld [vmem:[%s6057_s30 + $0x80] sm:$0x1]  ;;  %v1179_v12 = vrot.slane %v1177_v45, 4  ;;  %v2187_v17 = vunpack.c.l.b16 %v2011_v29  ;;  %v2188_v56 = vunpack.c.l.b16 %v2021_v55  ;;  %v2028_v24 = vrot.slane %v2026_v40, 5  ;;  %v5657_v29 = vld [vmem:[%s6057_s30 + $0x78] sm:$0xff] }
  0xf7   : > { %v1333_v27 = vpop.f32.mrf.mxu2  ;;  %5083 = vmatmul.msk.bf16.gmra.mxu1 %vm693_vm3, %v5656_v6  ;;  %v6520_v41 = vadd.f32 %v2280_v5, %v1702_v21  ;;  %v1180_v4 = vrot.slane %v5948_v3, 5  ;;  %v2038_v38 = vrot.slane %v2036_v0, 4 }
  0xf8   : > { %v1412_v60 = vadd.f32 %v1333_v27, %v977_v39  ;;  %v2034_v27 = vrot.slane %v2032_v59, 5  ;;  %v2210_v33 = vpack.c.b16 %v2188_v56, %v2187_v17  ;;  %v2029_v50 = vor.u32 %v2028_v24, %v2025_v18  ;;  %v5280_v17 = vld [vmem:[%s6057_s30 + $0x94] sm:$0xf]  ;;  %v5949_v56 = vld [vmem:[%s6057_s30 + $0x88] sm:$0xf] }
  0xf9   : > { %v1184_v18 = vrot.slane %v5949_v56, 5 }
  0xfa   : > { %v2039_v15 = vor.u32 %v2038_v38, %v2034_v27 }
  0xfb   : > { %v2282_v54 = vpop.f32.mrf.mxu0 }
  0xfc   : > { %v1624_v39 = vpop.f32.mrf.mxu3  ;;  %5121 = vmatmul.msk.bf16.gmra.mxu2 %vm693_vm3, %v1261_v22  ;;  %v981_v5 = vpop.f32.mrf.mxu1  ;;  %v5278_v22 = vld [vmem:[%s6057_s30 + $0x8c] sm:$0x1] }
  0xfd   : > { %v1703_v6 = vadd.f32 %v1624_v39, %v1412_v60  ;;  %v982_v53 = vadd.f32 %v981_v5, %v6420_v57  ;;  %v1178_v60 = vsel %vm6252_vm6, %v5100_v10, %v1177_v45  ;;  %v1181_v57 = vsel %vm6252_vm6, %v1179_v12, %v1180_v4 }
  0xfe   : > { %v2042_v55 = vshll.u32 %v5278_v22, 16  ;;  %v1241_v59 = vunpack.c.l.b16 %v1181_v57  ;;  %v2030_v4 = vrot.slane %v2029_v50, 4  ;;  %v2040_v39 = vrot.slane %v2039_v15, 4  ;;  %v5676_v15 = vld [vmem:[%s6057_s30 + $0x84] sm:$0xff] }
  0xff   : > { %v1336_v21 = vpop.f32.mrf.mxu2  ;;  %v6533_v30 = vadd.f32 %v2282_v54, %v1703_v6  ;;  %v5279_v6 = vld [vmem:[%s6057_s30 + $0x90] sm:$0xf]  ;;  %v2060_v57 = vshrl.u32 %v5280_v17, 16 }
 0x100   : > { %v1413_v35 = vadd.f32 %v1336_v21, %v980_v23  ;;  %v1240_v23 = vunpack.c.l.b16 %v1178_v60  ;;  %v2044_v5 = vrot.slane %v2042_v55, 5  ;;  %v1065_v21 = vld [vmem:[%s6057_s30 + $0x84] sm:$0xe]  ;;  %v2050_v24 = vshll.u32 %v5279_v6, 16 }
 0x101   : > { %5239 = vmatmul.msk.bf16.gmra.mxu3 %vm693_vm3, %v5675_v8  ;;  %v2056_v60 = vshll.u32 %v5280_v17, 16 }
 0x102   : > { %v1262_v12 = vpack.c.b16 %v1241_v59, %v1240_v23  ;;  %v2045_v22 = vsel %vm6069_vm2, %v2040_v39, %v2044_v5  ;;  %v2062_v39 = vrot.slane %v2060_v57, 4 }
 0x103   : > { %v2285_v44 = vpop.f32.mrf.mxu0 }
 0x104   : > { %v1627_v40 = vpop.f32.mrf.mxu3  ;;  %v984_v54 = vpop.f32.mrf.mxu1 }
 0x105   : > { %v1704_v0 = vadd.f32 %v1627_v40, %v1413_v35  ;;  %v985_v45 = vadd.f32 %v984_v54, %v6441_v34  ;;  %v2047_v34 = vshrl.u32 %v5279_v6, 16  ;;  %v2035_v35 = vsel %vm6069_vm2, %v2030_v4, %v2034_v27 }
 0x106   : > { %5309 = vmatmul.msk.bf16.gmra.mxu0 %vm693_vm3, %v2210_v33  ;;  %v5950_v33 = vld [vmem:[%s6057_s30 + $0x8c] sm:$0x1]  ;;  %v5101_v40 = vrot.slane %v1065_v21, 9  ;;  %v1186_v54 = vrot.slane %v1184_v18, 4  ;;  %v2189_v23 = vunpack.c.l.b16 %v2035_v35  ;;  %v2190_v27 = vunpack.c.l.b16 %v2045_v22 }
 0x107   : > { %v1338_v3 = vpop.f32.mrf.mxu2  ;;  %5084 = vmatmul.msk.bf16.gmra.mxu1 %vm693_vm3, %v5657_v29  ;;  %v6546_v8 = vadd.f32 %v2285_v44, %v1704_v0  ;;  %v1187_v44 = vrot.slane %v5950_v33, 5  ;;  %v2049_v59 = vrot.slane %v2047_v34, 4  ;;  %v2052_v0 = vrot.slane %v2050_v24, 5  ;;  %v5658_v34 = vld [vmem:[%s6057_s30 + $0x84] sm:$0xff] }
 0x108   : > { %v1414_v10 = vadd.f32 %v1338_v3, %v982_v53  ;;  %v2058_v4 = vrot.slane %v2056_v60, 5  ;;  %v2211_v17 = vpack.c.b16 %v2190_v27, %v2189_v23  ;;  %v5283_v23 = vld [vmem:[%s6057_s30 + $0xa0] sm:$0xf]  ;;  %v5951_v27 = vld [vmem:[%s6057_s30 + $0x94] sm:$0xf] }
 0x109   : > { %v2053_v56 = vor.u32 %v2052_v0, %v2049_v59  ;;  %v1191_v59 = vrot.slane %v5951_v27, 5  ;;  %v1066_v0 = vld [vmem:[%s6057_s30 + $0x90] sm:$0xe] }
 0x10a   : > { %v2063_v24 = vor.u32 %v2062_v39, %v2058_v4 }
 0x10b   : > { %v2287_v38 = vpop.f32.mrf.mxu0  ;;  %v2054_v33 = vrot.slane %v2053_v56, 4 }
 0x10c   : > { %v1629_v53 = vpop.f32.mrf.mxu3  ;;  %5122 = vmatmul.msk.bf16.gmra.mxu2 %vm693_vm3, %v1262_v12  ;;  %v986_v29 = vpop.f32.mrf.mxu1  ;;  %v5281_v12 = vld [vmem:[%s6057_s30 + $0x98] sm:$0x1] }
 0x10d   : > { %v1705_v50 = vadd.f32 %v1629_v53, %v1414_v10  ;;  %v987_v55 = vadd.f32 %v986_v29, %v6460_v63  ;;  %v1185_v10 = vsel %vm6252_vm6, %v5101_v40, %v1184_v18  ;;  %v1188_v63 = vsel %vm6252_vm6, %v1186_v54, %v1187_v44 }
 0x10e   : > { %v2066_v35 = vshll.u32 %v5281_v12, 16  ;;  %v1243_v60 = vunpack.c.l.b16 %v1188_v63  ;;  %v2064_v53 = vrot.slane %v2063_v24, 4  ;;  %v2084_v63 = vshrl.u32 %v5283_v23, 16  ;;  %v5677_v24 = vld [vmem:[%s6057_s30 + $0x90] sm:$0xff] }
 0x10f   : > { %v1341_v3 = vpop.f32.mrf.mxu2  ;;  %v6559_v5 = vadd.f32 %v2287_v38, %v1705_v50  ;;  %v5282_v50 = vld [vmem:[%s6057_s30 + $0x9c] sm:$0xf] }
 0x110   : > { %v1415_v6 = vadd.f32 %v1341_v3, %v985_v45  ;;  %v1242_v45 = vunpack.c.l.b16 %v1185_v10  ;;  %v2068_v29 = vrot.slane %v2066_v35, 5  ;;  %v2071_v3 = vshrl.u32 %v5282_v50, 16 }
 0x111   : > { %5240 = vmatmul.msk.bf16.gmra.mxu3 %vm693_vm3, %v5676_v15  ;;  %v2074_v12 = vshll.u32 %v5282_v50, 16  ;;  %v2080_v10 = vshll.u32 %v5283_v23, 16  ;;  %v5102_v35 = vrot.slane %v1066_v0, 9 }
 0x112   : > { %v1263_v54 = vpack.c.b16 %v1243_v60, %v1242_v45  ;;  %v2073_v60 = vrot.slane %v2071_v3, 4 }
 0x113   : > { %v2290_v21 = vpop.f32.mrf.mxu0 }
 0x114   : > { %v1632_v22 = vpop.f32.mrf.mxu3  ;;  %v989_v38 = vpop.f32.mrf.mxu1 }
 0x115   : > { %v1706_v57 = vadd.f32 %v1632_v22, %v1415_v6  ;;  %v990_v18 = vadd.f32 %v989_v38, %v6483_v43  ;;  %v2059_v43 = vsel %vm6069_vm2, %v2054_v33, %v2058_v4  ;;  %v2069_v6 = vsel %vm6069_vm2, %v2064_v53, %v2068_v29 }
 0x116   : > { %5310 = vmatmul.msk.bf16.gmra.mxu0 %vm693_vm3, %v2211_v17  ;;  %v5952_v17 = vld [vmem:[%s6057_s30 + $0x98] sm:$0x1]  ;;  %v1193_v22 = vrot.slane %v1191_v59, 4  ;;  %v2191_v38 = vunpack.c.l.b16 %v2059_v43  ;;  %v2192_v45 = vunpack.c.l.b16 %v2069_v6  ;;  %v2076_v33 = vrot.slane %v2074_v12, 5  ;;  %v5659_v43 = vld [vmem:[%s6057_s30 + $0x90] sm:$0xff] }
 0x117   : > { %v1343_v44 = vpop.f32.mrf.mxu2  ;;  %5085 = vmatmul.msk.bf16.gmra.mxu1 %vm693_vm3, %v5658_v34  ;;  %v6572_v15 = vadd.f32 %v2290_v21, %v1706_v57  ;;  %v1194_v56 = vrot.slane %v5952_v17, 5  ;;  %v2086_v53 = vrot.slane %v2084_v63, 4  ;;  %v5285_v17 = vld [vmem:[%s6057_s30 + $0xa8] sm:$0xf] }
 0x118   : > { %v1416_v40 = vadd.f32 %v1343_v44, %v987_v55  ;;  %v2082_v44 = vrot.slane %v2080_v10, 5  ;;  %v2212_v23 = vpack.c.b16 %v2192_v45, %v2191_v38  ;;  %v2077_v0 = vor.u32 %v2076_v33, %v2073_v60  ;;  %v5953_v45 = vld [vmem:[%s6057_s30 + $0xa0] sm:$0xf]  ;;  %v1067_v33 = vld [vmem:[%s6057_s30 + $0x9c] sm:$0xe] }
 0x119   : > { %v2095_v38 = vshrl.u32 %v5285_v17, 16  ;;  %v1198_v60 = vrot.slane %v5953_v45, 5 }
 0x11a   : > { %v2087_v3 = vor.u32 %v2086_v53, %v2082_v44 }
 0x11b   : > { %v2292_v39 = vpop.f32.mrf.mxu0 }
 0x11c   : > { %v1634_v55 = vpop.f32.mrf.mxu3  ;;  %5123 = vmatmul.msk.bf16.gmra.mxu2 %vm693_vm3, %v1263_v54  ;;  %v991_v21 = vpop.f32.mrf.mxu1  ;;  %v5284_v54 = vld [vmem:[%s6057_s30 + $0xa4] sm:$0x1] }
 0x11d   : > { %v1707_v34 = vadd.f32 %v1634_v55, %v1416_v40  ;;  %v992_v4 = vadd.f32 %v991_v21, %v6497_v32  ;;  %v1192_v32 = vsel %vm6252_vm6, %v5102_v35, %v1191_v59  ;;  %v1195_v40 = vsel %vm6252_vm6, %v1193_v22, %v1194_v56  ;;  %v5286_v22 = vld [vmem:[%s6057_s30 + $0xac] sm:$0xf] }
 0x11e   : > { %v2090_v6 = vshll.u32 %v5284_v54, 16  ;;  %v1245_v10 = vunpack.c.l.b16 %v1195_v40  ;;  %v2078_v56 = vrot.slane %v2077_v0, 4  ;;  %v2088_v55 = vrot.slane %v2087_v3, 4 }
 0x11f   : > { %v1346_v57 = vpop.f32.mrf.mxu2  ;;  %v6585_v29 = vadd.f32 %v2292_v39, %v1707_v34  ;;  %v2108_v40 = vshrl.u32 %v5286_v22, 16  ;;  %v2097_v0 = vrot.slane %v2095_v38, 4 }
 0x120   : > { %v1417_v50 = vadd.f32 %v1346_v57, %v990_v18  ;;  %v1244_v18 = vunpack.c.l.b16 %v1192_v32  ;;  %v2092_v21 = vrot.slane %v2090_v6, 5  ;;  %v2098_v57 = vshll.u32 %v5285_v17, 16  ;;  %v5678_v6 = vld [vmem:[%s6057_s30 + $0x9c] sm:$0xff] }
 0x121   : > { %5241 = vmatmul.msk.bf16.gmra.mxu3 %vm693_vm3, %v5677_v24  ;;  %v2104_v32 = vshll.u32 %v5286_v22, 16 }
 0x122   : > { %v1264_v35 = vpack.c.b16 %v1245_v10, %v1244_v18  ;;  %v2093_v54 = vsel %vm6069_vm2, %v2088_v55, %v2092_v21  ;;  %v1200_v18 = vrot.slane %v1198_v60, 4  ;;  %v2100_v10 = vrot.slane %v2098_v57, 5  ;;  %v5660_v57 = vld [vmem:[%s6057_s30 + $0x9c] sm:$0xff] }
 0x123   : > { %v2295_v27 = vpop.f32.mrf.mxu0  ;;  %v2194_v17 = vunpack.c.l.b16 %v2093_v54  ;;  %v2110_v55 = vrot.slane %v2108_v40, 4 }
 0x124   : > { %v1637_v39 = vpop.f32.mrf.mxu3  ;;  %v994_v12 = vpop.f32.mrf.mxu1  ;;  %v2101_v45 = vor.u32 %v2100_v10, %v2097_v0 }
 0x125   : > { %v1708_v63 = vadd.f32 %v1637_v39, %v1417_v50  ;;  %v2083_v50 = vsel %vm6069_vm2, %v2078_v56, %v2082_v44  ;;  %v5103_v39 = vrot.slane %v1067_v33, 9  ;;  %v995_v44 = vadd.f32 %v994_v12, %v6339_v62 }
 0x126   : > { %5311 = vmatmul.msk.bf16.gmra.mxu0 %vm693_vm3, %v2212_v23  ;;  %v5954_v23 = vld [vmem:[%s6057_s30 + $0xa4] sm:$0x1]  ;;  %v2106_v56 = vrot.slane %v2104_v32, 5 }
 0x127   : > { %v1348_v59 = vpop.f32.mrf.mxu2  ;;  %5086 = vmatmul.msk.bf16.gmra.mxu1 %vm693_vm3, %v5659_v43  ;;  %v6597_v34 = vadd.f32 %v2295_v27, %v1708_v63  ;;  %v1201_v27 = vrot.slane %v5954_v23, 5  ;;  %v2193_v63 = vunpack.c.l.b16 %v2083_v50 }
 0x128   : > { %v1418_v24 = vadd.f32 %v1348_v59, %v992_v4  ;;  %v2111_v33 = vor.u32 %v2110_v55, %v2106_v56 }
 0x129   : > { %v1202_v38 = vsel %vm6252_vm6, %v1200_v18, %v1201_v27  ;;  %v2213_v62 = vpack.c.b16 %v2194_v17, %v2193_v63 }
 0x12a   : > { %v1247_v40 = vunpack.c.l.b16 %v1202_v38  ;;  %v2112_v0 = vrot.slane %v2111_v33, 4 }
 0x12b   : > { %v2297_v53 = vpop.f32.mrf.mxu0 }
 0x12c   : > { %v1639_v4 = vpop.f32.mrf.mxu3  ;;  %5124 = vmatmul.msk.bf16.gmra.mxu2 %vm693_vm3, %v1264_v35  ;;  %v996_v43 = vpop.f32.mrf.mxu1  ;;  %v5287_v35 = vld [vmem:[%s6057_s30 + $0xb0] sm:$0x1] }
 0x12d   : > { %v1709_v3 = vadd.f32 %v1639_v4, %v1418_v24  ;;  %v1199_v24 = vsel %vm6252_vm6, %v5103_v39, %v1198_v60  ;;  %v2114_v50 = vshll.u32 %v5287_v35, 16  ;;  %v2102_v4 = vrot.slane %v2101_v45, 4  ;;  %v5289_v39 = vld [vmem:[%s6057_s30 + $0xb8] sm:$0xf]  ;;  %v5956_v45 = vld [vmem:[%s6057_s30 + $0xb0] sm:$0x1] }
 0x12e   : > { %v1246_v32 = vunpack.c.l.b16 %v1199_v24  ;;  %v997_v60 = vadd.f32 %v996_v43, %v6352_v25  ;;  %v1068_v25 = vld [vmem:[%s6057_s30 + $0xa8] sm:$0xe]  ;;  %v2128_v43 = vshll.u32 %v5289_v39, 16  ;;  %v2132_v35 = vshrl.u32 %v5289_v39, 16 }
 0x12f   : > { %v1351_v59 = vpop.f32.mrf.mxu2  ;;  %v6610_v21 = vadd.f32 %v2297_v53, %v1709_v3  ;;  %v5288_v3 = vld [vmem:[%s6057_s30 + $0xb4] sm:$0xf]  ;;  %v2107_v17 = vsel %vm6069_vm2, %v2102_v4, %v2106_v56 }
 0x130   : > { %v1419_v22 = vadd.f32 %v1351_v59, %v995_v44  ;;  %v1265_v44 = vpack.c.b16 %v1247_v40, %v1246_v32  ;;  %v2119_v63 = vshrl.u32 %v5288_v3, 16  ;;  %v5955_v59 = vld [vmem:[%s6057_s30 + $0xac] sm:$0xf]  ;;  %v5104_v32 = vrot.slane %v1068_v25, 9 }
 0x131   : > { %5242 = vmatmul.msk.bf16.gmra.mxu3 %vm693_vm3, %v5678_v6  ;;  %v2116_v6 = vrot.slane %v2114_v50, 5  ;;  %v1205_v55 = vrot.slane %v5955_v59, 5  ;;  %v5661_v25 = vld [vmem:[%s6057_s30 + $0xa8] sm:$0xff] }
 0x132   : > { %v2121_v56 = vrot.slane %v2119_v63, 4 }
 0x133   : > { %v2300_v12 = vpop.f32.mrf.mxu0  ;;  %v2117_v38 = vsel %vm6069_vm2, %v2112_v0, %v2116_v6  ;;  %v1207_v40 = vrot.slane %v1205_v55, 4  ;;  %v5290_v6 = vld [vmem:[%s6057_s30 + $0xbc] sm:$0x1] }
 0x134   : > { %v1642_v53 = vpop.f32.mrf.mxu3  ;;  %v999_v54 = vpop.f32.mrf.mxu1 }
 0x135   : > { %v1710_v23 = vadd.f32 %v1642_v53, %v1419_v22  ;;  %v2122_v22 = vshll.u32 %v5288_v3, 16  ;;  %v5679_v53 = vld [vmem:[%s6057_s30 + $0xa8] sm:$0xff]  ;;  %v1000_v4 = vadd.f32 %v999_v54, %v6372_v48  ;;  %v2196_v3 = vunpack.c.l.b16 %v2117_v38 }
 0x136   : > { %5312 = vmatmul.msk.bf16.gmra.mxu0 %vm693_vm3, %v2213_v62  ;;  %v1208_v62 = vrot.slane %v5956_v45, 5 }
 0x137   : > { %v1353_v27 = vpop.f32.mrf.mxu2  ;;  %5087 = vmatmul.msk.bf16.gmra.mxu1 %vm693_vm3, %v5660_v57  ;;  %v6624_v18 = vadd.f32 %v2300_v12, %v1710_v23  ;;  %v2195_v57 = vunpack.c.l.b16 %v2107_v17  ;;  %v2124_v23 = vrot.slane %v2122_v22, 5  ;;  %v2138_v17 = vshll.u32 %v5290_v6, 16 }
 0x138   : > { %v1420_v10 = vadd.f32 %v1353_v27, %v997_v60  ;;  %v2130_v60 = vrot.slane %v2128_v43, 5  ;;  %v2134_v27 = vrot.slane %v2132_v35, 4 }
 0x139   : > { %v2125_v63 = vor.u32 %v2124_v23, %v2121_v56  ;;  %v2214_v48 = vpack.c.b16 %v2196_v3, %v2195_v57  ;;  %v2140_v57 = vrot.slane %v2138_v17, 5  ;;  %v5957_v56 = vld [vmem:[%s6057_s30 + $0x10] sm:$0xf]  ;;  %v1069_v3 = vld [vmem:[%s6057_s30 + $0xb4] sm:$0xe] }
 0x13a   : > { %v2135_v54 = vor.u32 %v2134_v27, %v2130_v60  ;;  %v5958_v27 = vld [vmem:[%s6057_s30 + $0xb8] sm:$0xf] }
 0x13b   : > { %v2302_v24 = vpop.f32.mrf.mxu0 }
 0x13c   : > { %v1644_v12 = vpop.f32.mrf.mxu3  ;;  %5125 = vmatmul.msk.bf16.gmra.mxu2 %vm693_vm3, %v1265_v44  ;;  %v1001_v33 = vpop.f32.mrf.mxu1  ;;  %v1209_v44 = vsel %vm6252_vm6, %v1207_v40, %v1208_v62  ;;  %v5292_v40 = vld [vmem:[%s6057_s30 + $0xc4] sm:$0xf] }
 0x13d   : > { %v1711_v50 = vadd.f32 %v1644_v12, %v1420_v10  ;;  %v1206_v10 = vsel %vm6252_vm6, %v5104_v32, %v1205_v55  ;;  %v1249_v38 = vunpack.c.l.b16 %v1209_v44  ;;  %v2126_v55 = vrot.slane %v2125_v63, 4  ;;  %v5291_v32 = vld [vmem:[%s6057_s30 + $0xc0] sm:$0xf] }
 0x13e   : > { %v1002_v62 = vadd.f32 %v1001_v33, %v6391_v9  ;;  %v2136_v12 = vrot.slane %v2135_v54, 4  ;;  %v2152_v44 = vshll.u32 %v5292_v40, 16 }
 0x13f   : > { %v1356_v0 = vpop.f32.mrf.mxu2  ;;  %v6637_v39 = vadd.f32 %v2302_v24, %v1711_v50  ;;  %v1248_v24 = vunpack.c.l.b16 %v1206_v10  ;;  %v2458_v50 = vrot.slane %v5957_v56, 5  ;;  %v2131_v9 = vsel %vm6069_vm2, %v2126_v55, %v2130_v60  ;;  %v5316_v55 = vld [vmem:[%s6057_s30 + $0xc] sm:$0xe] }
 0x140   : > { %v1421_v59 = vadd.f32 %v1356_v0, %v1000_v4  ;;  %v1212_v0 = vrot.slane %v5958_v27, 5  ;;  %v2141_v33 = vsel %vm6069_vm2, %v2136_v12, %v2140_v57  ;;  %v2146_v10 = vshll.u32 %v5291_v32, 16  ;;  %v5680_v12 = vld [vmem:[%s6057_s30 + $0xb4] sm:$0xff] }
 0x141   : > { %5243 = vmatmul.msk.bf16.gmra.mxu3 %vm693_vm3, %v5679_v53  ;;  %v1266_v4 = vpack.c.b16 %v1249_v38, %v1248_v24  ;;  %v2460_v63 = vrot.slane %v2458_v50, 4  ;;  %v5960_v24 = vld [vmem:[%s6057_s30 + $0xbc] sm:$0x1]  ;;  %v2197_v57 = vunpack.c.l.b16 %v2131_v9  ;;  %v2198_v56 = vunpack.c.l.b16 %v2141_v33 }
 0x143   : > { %v2305_v22 = vpop.f32.mrf.mxu0 }
 0x144   : > { %v1647_v43 = vpop.f32.mrf.mxu3  ;;  %v1004_v35 = vpop.f32.mrf.mxu1 }
 0x145   : > { %v1712_v45 = vadd.f32 %v1647_v43, %v1421_v59  ;;  %v2143_v59 = vshrl.u32 %v5291_v32, 16  ;;  %v2156_v43 = vshrl.u32 %v5292_v40, 16  ;;  %v1005_v32 = vadd.f32 %v1004_v35, %v6410_v46  ;;  %v5293_v46 = vld [vmem:[%s6057_s30 + $0xc8] sm:$0x1] }
 0x146   : > { %5313 = vmatmul.msk.bf16.gmra.mxu0 %vm693_vm3, %v2214_v48  ;;  %v5959_v48 = vld [vmem:[%s6057_s30 + $0x14] sm:$0x1]  ;;  %v2154_v40 = vrot.slane %v2152_v44, 5 }
 0x147   : > { %v1358_v53 = vpop.f32.mrf.mxu2  ;;  %5088 = vmatmul.msk.bf16.gmra.mxu1 %vm693_vm3, %v5661_v25  ;;  %v6653_v6 = vadd.f32 %v2305_v22, %v1712_v45  ;;  %v2461_v54 = vrot.slane %v5959_v48, 5  ;;  %v5105_v25 = vrot.slane %v1069_v3, 9  ;;  %v1215_v22 = vrot.slane %v5960_v24, 5 }
 0x148   : > { %v1422_v23 = vadd.f32 %v1358_v53, %v1002_v62  ;;  %v1214_v45 = vrot.slane %v1212_v0, 4  ;;  %v5332_v53 = vrot.slane %v5316_v55, 9  ;;  %v2145_v27 = vrot.slane %v2143_v59, 4  ;;  %v5662_v55 = vld [vmem:[%s6057_s30 + $0xb4] sm:$0xff] }
 0x149   : > { %v2148_v3 = vrot.slane %v2146_v10, 5  ;;  %v1213_v24 = vsel %vm6252_vm6, %v5105_v25, %v1212_v0  ;;  %v2462_v9 = vsel %vm6252_vm6, %v2460_v63, %v2461_v54  ;;  %v5488_v10 = vld [vmem:[%s6057_s30 + $0x18] sm:$0xf]  ;;  %v2215_v0 = vpack.c.b16 %v2198_v56, %v2197_v57 }
 0x14a   : > { %v2572_v59 = vunpack.c.l.b16 %v2462_v9  ;;  %v1250_v63 = vunpack.c.l.b16 %v1213_v24  ;;  %v3137_v9 = vshll.u32 %v5488_v10, 16 }
 0x14b   : > { %v2307_v17 = vpop.f32.mrf.mxu0  ;;  %v2149_v44 = vor.u32 %v2148_v3, %v2145_v27 }
 0x14c   : > { %v1649_v38 = vpop.f32.mrf.mxu3  ;;  %5126 = vmatmul.msk.bf16.gmra.mxu2 %vm693_vm3, %v1266_v4  ;;  %v1006_v60 = vpop.f32.mrf.mxu1  ;;  %v2158_v4 = vrot.slane %v2156_v43, 4 }
 0x14d   : > { %v1713_v62 = vadd.f32 %v1649_v38, %v1422_v23  ;;  %v2459_v23 = vsel %vm6252_vm6, %v5332_v53, %v2458_v50  ;;  %v1216_v38 = vsel %vm6252_vm6, %v1214_v45, %v1215_v22  ;;  %v6682_v22 = vld [vmem:[%s6057_s30 + $0x1c] sm:$0xf]  ;;  %v1007_v57 = vadd.f32 %v1006_v60, %v6433_v7 }
 0x14e   : > { %v2571_v35 = vunpack.c.l.b16 %v2459_v23  ;;  %v1251_v54 = vunpack.c.l.b16 %v1216_v38  ;;  %v2159_v53 = vor.u32 %v2158_v4, %v2154_v40  ;;  %v3134_v23 = vshrl.u32 %v5488_v10, 16 }
 0x14f   : > { %v1361_v48 = vpop.f32.mrf.mxu2  ;;  %v6678_v43 = vadd.f32 %v2307_v17, %v1713_v62  ;;  %v2150_v56 = vrot.slane %v2149_v44, 4  ;;  %v3143_v17 = vshll.u32 %v6682_v22, 16  ;;  %v3147_v62 = vshrl.u32 %v6682_v22, 16  ;;  %v5490_v44 = vld [vmem:[%s6057_s30 + $0x20] sm:$0x1] }
 0x150   : > { %v1423_v33 = vadd.f32 %v1361_v48, %v1005_v32  ;;  %v6676_v25 = vpack.c.b16 %v2572_v59, %v2571_v35  ;;  %v2162_v32 = vshll.u32 %v5293_v46, 16  ;;  %v1267_v3 = vpack.c.b16 %v1251_v54, %v1250_v63 }
 0x151   : > { %5244 = vmatmul.msk.bf16.gmra.mxu3 %vm693_vm3, %v5680_v12  ;;  %v2160_v24 = vrot.slane %v2159_v53, 4  ;;  %v3136_v46 = vrot.slane %v3134_v23, 4  ;;  %v2155_v7 = vsel %vm6069_vm2, %v2150_v56, %v2154_v40  ;;  %v3145_v60 = vrot.slane %v3143_v17, 5 }
 0x152   : > { %v2164_v4 = vrot.slane %v2162_v32, 5  ;;  %v3149_v59 = vrot.slane %v3147_v62, 4  ;;  %v2199_v32 = vunpack.c.l.b16 %v2155_v7 }
 0x153   : > { %v2310_v50 = vpop.f32.mrf.mxu0 }
 0x154   : > { %v1652_v45 = vpop.f32.mrf.mxu3  ;;  %v1009_v48 = vpop.f32.mrf.mxu1  ;;  %v3150_v23 = vor.u32 %v3149_v59, %v3145_v60  ;;  %v5961_v59 = vld [vmem:[%s6057_s30 + $0x1c] sm:$0xf] }
 0x155   : > { %v1714_v12 = vadd.f32 %v1652_v45, %v1423_v33  ;;  %v3139_v33 = vrot.slane %v3137_v9, 5  ;;  %v1010_v45 = vadd.f32 %v1009_v48, %v6452_v47  ;;  %v3153_v9 = vshll.u32 %v5490_v44, 16  ;;  %v6706_v48 = vld [vmem:[%s6057_s30 + $0x28] sm:$0xf] }
 0x156   : > { %5314 = vmatmul.msk.bf16.gmra.mxu0 %vm693_vm3, %v2215_v0  ;;  %v2165_v0 = vsel %vm6069_vm2, %v2160_v24, %v2164_v4  ;;  %v3151_v62 = vrot.slane %v3150_v23, 4  ;;  %v5491_v24 = vld [vmem:[%s6057_s30 + $0x24] sm:$0xf]  ;;  %v3809_v47 = vrot.slane %v6682_v22, 5 }
 0x157   : > { %v1363_v27 = vpop.f32.mrf.mxu2  ;;  %5089 = vmatmul.msk.bf16.gmra.mxu1 %vm693_vm3, %v5662_v55  ;;  %v6689_v35 = vadd.f32 %v2310_v50, %v1714_v12  ;;  %v3140_v54 = vor.u32 %v3139_v33, %v3136_v46  ;;  %v5681_v50 = vld [vmem:[%s6057_s30 + $0xc0] sm:$0xff]  ;;  %v2200_v40 = vunpack.c.l.b16 %v2165_v0  ;;  %v2465_v0 = vrot.slane %v5961_v59, 5 }
 0x158   : > { %v1424_v38 = vadd.f32 %v1363_v27, %v1007_v57  ;;  %v3155_v27 = vrot.slane %v3153_v9, 5 }
 0x159   : > { %8062 = vst [vmem:[#allocation2_spill] sm:$0xff] %v6689_v35  ;;  %v3141_v56 = vrot.slane %v3140_v54, 4  ;;  %v2216_v17 = vpack.c.b16 %v2200_v40, %v2199_v32  ;;  %v3158_v32 = vshrl.u32 %v5491_v24, 16  ;;  %v3171_v40 = vshrl.u32 %v6706_v48, 16 }
 0x15b   : > { %v2312_v10 = vpop.f32.mrf.mxu0  ;;  %v3146_v7 = vsel %vm6069_vm2, %v3141_v56, %v3145_v60  ;;  %v5962_v60 = vld [vmem:[%s6057_s30 + $0x20] sm:$0x1] }
 0x15c   : > { %v1654_v55 = vpop.f32.mrf.mxu3  ;;  %5127 = vmatmul.msk.bf16.gmra.mxu2 %vm693_vm3, %v1267_v3  ;;  %v1011_v63 = vpop.f32.mrf.mxu1  ;;  %v5558_v3 = vld [vmem:[%s6057_s30 + $0x18] sm:$0xe]  ;;  %v2468_v23 = vrot.slane %v5962_v60, 5 }
 0x15d   : > { %v1715_v53 = vadd.f32 %v1654_v55, %v1424_v38  ;;  %v5574_v54 = vrot.slane %v5558_v3, 9  ;;  %v1012_v22 = vadd.f32 %v1011_v63, %v6471_v11  ;;  %v2467_v11 = vrot.slane %v2465_v0, 4 }
 0x15f   : > { %v1366_v12 = vpop.f32.mrf.mxu2  ;;  %v6702_v4 = vadd.f32 %v2312_v10, %v1715_v53  ;;  %v3161_v10 = vshll.u32 %v5491_v24, 16  ;;  %v3156_v53 = vsel %vm6069_vm2, %v3151_v62, %v3155_v27  ;;  %v3520_v62 = vunpack.c.l.b16 %v3146_v7 }
 0x160   : > { %v1425_v57 = vadd.f32 %v1366_v12, %v1010_v45  ;;  %v3167_v45 = vshll.u32 %v6706_v48, 16  ;;  %v3811_v12 = vrot.slane %v3809_v47, 4  ;;  %v3521_v27 = vunpack.c.l.b16 %v3156_v53 }
 0x161   : > { %5245 = vmatmul.msk.bf16.gmra.mxu3 %vm693_vm3, %v5681_v50  ;;  %8063 = vst [vmem:[#allocation3_spill] sm:$0xff] %v6702_v4  ;;  %v5317_v50 = vld [vmem:[%s6057_s30 + $0x18] sm:$0xe]  ;;  %v3160_v24 = vrot.slane %v3158_v32, 4  ;;  %v3810_v59 = vsel %vm6252_vm6, %v5574_v54, %v3809_v47  ;;  %v3173_v4 = vrot.slane %v3171_v40, 4 }
 0x162   : > { %v5333_v3 = vrot.slane %v5317_v50, 9  ;;  %v3169_v60 = vrot.slane %v3167_v45, 5  ;;  %v3552_v54 = vpack.c.b16 %v3521_v27, %v3520_v62  ;;  %v3922_v50 = vunpack.c.l.b16 %v3810_v59  ;;  %v5494_v62 = vld [vmem:[%s6057_s30 + $0x30] sm:$0xf] }
 0x163   : > { %v2315_v38 = vpop.f32.mrf.mxu0  ;;  %v3816_v27 = vrot.slane %v6706_v48, 5 }
 0x164   : > { %v1657_v46 = vpop.f32.mrf.mxu3  ;;  %v1014_v33 = vpop.f32.mrf.mxu1  ;;  %v2466_v7 = vsel %vm6252_vm6, %v5333_v3, %v2465_v0  ;;  %v3174_v45 = vor.u32 %v3173_v4, %v3169_v60 }
 0x165   : > { %v1716_v55 = vadd.f32 %v1657_v46, %v1425_v57  ;;  %v3812_v57 = vrot.slane %v5490_v44, 5  ;;  %v3163_v46 = vrot.slane %v3161_v10, 5  ;;  %v6729_v44 = vld [vmem:[%s6057_s30 + $0x2c] sm:$0x1]  ;;  %v1015_v10 = vadd.f32 %v1014_v33, %v6354_v28 }
 0x166   : > { %5315 = vmatmul.msk.bf16.gmra.mxu0 %vm693_vm3, %v2216_v17  ;;  %v5685_v17 = vld [vmem:[%s6057_s30 + $0x18] sm:$0xff]  ;;  %v3177_v40 = vshll.u32 %v6729_v44, 16  ;;  %v3175_v3 = vrot.slane %v3174_v45, 4  ;;  %v5964_v45 = vld [vmem:[%s6057_s30 + $0x2c] sm:$0x1] }
 0x167   : > { %v1368_v9 = vpop.f32.mrf.mxu2  ;;  %5354 = vmatmul.msk.bf16.vlgmr.msra.gmra.mxu1 %vm693_vm3, %v6676_v25  ;;  %v6722_v63 = vadd.f32 %v2315_v38, %v1716_v55  ;;  %v3813_v25 = vsel %vm6252_vm6, %v3811_v12, %v3812_v57  ;;  %v2469_v55 = vsel %vm6252_vm6, %v2467_v11, %v2468_v23  ;;  %v3164_v32 = vor.u32 %v3163_v46, %v3160_v24  ;;  %v6745_v24 = vld [vmem:[%s6057_s30 + $0x34] sm:$0xf] }
 0x168   : > { %v1426_v56 = vadd.f32 %v1368_v9, %v1012_v22  ;;  %v3923_v53 = vunpack.c.l.b16 %v3813_v25  ;;  %v2573_v12 = vunpack.c.l.b16 %v2466_v7  ;;  %v2574_v57 = vunpack.c.l.b16 %v2469_v55 }
 0x169   : > { %v3165_v23 = vrot.slane %v3164_v32, 4  ;;  %v3179_v11 = vrot.slane %v3177_v40, 5  ;;  %v2475_v40 = vrot.slane %v5964_v45, 5 }
 0x16a   : > { %v2604_v33 = vpack.c.b16 %v2574_v57, %v2573_v12  ;;  %v3819_v12 = vrot.slane %v6729_v44, 5  ;;  %v6768_v44 = vld [vmem:[%s6057_s30 + $0x38] sm:$0x1] }
 0x16b   : > { %v2317_v35 = vpop.f32.mrf.mxu0  ;;  %v3180_v32 = vsel %vm6069_vm2, %v3175_v3, %v3179_v11 }
 0x16c   : > { %v1659_v22 = vpop.f32.mrf.mxu3  ;;  %5472 = vmatmul.msk.bf16.vlgmr.msra.gmra.mxu2 %vm693_vm3, %v5685_v17  ;;  %v1016_v38 = vpop.f32.mrf.mxu1  ;;  %v3954_v17 = vpack.c.b16 %v3923_v53, %v3922_v50  ;;  %v5318_v50 = vld [vmem:[%s6057_s30 + $0x24] sm:$0xe]  ;;  %v3195_v53 = vshrl.u32 %v6745_v24, 16 }
 0x16d   : > { %v1717_v47 = vadd.f32 %v1659_v22, %v1426_v56  ;;  %v5559_v56 = vld [vmem:[%s6057_s30 + $0x24] sm:$0xe]  ;;  %v5963_v22 = vld [vmem:[%s6057_s30 + $0x28] sm:$0xf]  ;;  %v1017_v48 = vadd.f32 %v1016_v38, %v6375_v58 }
 0x16e   : > { %v5575_v25 = vrot.slane %v5559_v56, 9  ;;  %v2472_v7 = vrot.slane %v5963_v22, 5  ;;  %v3197_v22 = vrot.slane %v3195_v53, 4  ;;  %v3201_v53 = vshll.u32 %v6768_v44, 16 }
 0x16f   : > { %v1371_v9 = vpop.f32.mrf.mxu2  ;;  %v6741_v28 = vadd.f32 %v2317_v35, %v1717_v47  ;;  %v3182_v35 = vshrl.u32 %v5494_v62, 16  ;;  %v3185_v47 = vshll.u32 %v5494_v62, 16 }
 0x170   : > { %v1427_v0 = vadd.f32 %v1371_v9, %v1015_v10  ;;  %v3191_v10 = vshll.u32 %v6745_v24, 16  ;;  %v2474_v58 = vrot.slane %v2472_v7, 4  ;;  %v3817_v62 = vsel %vm6252_vm6, %v5575_v25, %v3816_v27 }
 0x171   : > { %5542 = vmatmul.msk.bf16.vlgmr.msra.gmra.mxu3 %vm693_vm3, %v3552_v54  ;;  %v3170_v54 = vsel %vm6069_vm2, %v3165_v23, %v3169_v60  ;;  %v3818_v60 = vrot.slane %v3816_v27, 4  ;;  %v5334_v23 = vrot.slane %v5318_v50, 9  ;;  %v3184_v3 = vrot.slane %v3182_v35, 4 }
 0x172   : > { %v3522_v56 = vunpack.c.l.b16 %v3170_v54  ;;  %v3187_v11 = vrot.slane %v3185_v47, 5  ;;  %v2476_v54 = vsel %vm6252_vm6, %v2474_v58, %v2475_v40  ;;  %v3924_v50 = vunpack.c.l.b16 %v3817_v62 }
 0x173   : > { %v2320_v4 = vpop.f32.mrf.mxu0  ;;  %v3820_v45 = vsel %vm6252_vm6, %v3818_v60, %v3819_v12  ;;  %v2576_v12 = vunpack.c.l.b16 %v2476_v54  ;;  %v3203_v58 = vrot.slane %v3201_v53, 5 }
 0x174   : > { %v1662_v46 = vpop.f32.mrf.mxu3  ;;  %v1019_v59 = vpop.f32.mrf.mxu1  ;;  %v3188_v35 = vor.u32 %v3187_v11, %v3184_v3  ;;  %v3823_v3 = vrot.slane %v6745_v24, 5  ;;  %v6784_v11 = vld [vmem:[%s6057_s30 + $0x40] sm:$0xf] }
 0x175   : > { %v1718_v55 = vadd.f32 %v1662_v46, %v1427_v0  ;;  %v5686_v0 = vld [vmem:[%s6057_s30 + $0x24] sm:$0xff]  ;;  %v3193_v46 = vrot.slane %v3191_v10, 5  ;;  %v1020_v47 = vadd.f32 %v1019_v59, %v6394_v13 }
 0x176   : > { %5596 = vmatmul.msk.bf16.vlgmr.msra.gmra.mxu0 %vm693_vm3, %v3954_v17  ;;  %v3523_v17 = vunpack.c.l.b16 %v3180_v32  ;;  %v3925_v32 = vunpack.c.l.b16 %v3820_v45  ;;  %v3189_v40 = vrot.slane %v3188_v35, 4 }
 0x177   : > { %v1373_v9 = vpop.f32.mrf.mxu2  ;;  %5355 = vmatmul.msk.bf16.gmra.mxu1 %vm693_vm3, %v2604_v33  ;;  %v6761_v38 = vadd.f32 %v2320_v4, %v1718_v55  ;;  %v2473_v55 = vsel %vm6252_vm6, %v5334_v23, %v2472_v7  ;;  %v3198_v10 = vor.u32 %v3197_v22, %v3193_v46 }
 0x178   : > { %v1428_v57 = vadd.f32 %v1373_v9, %v1017_v48  ;;  %v3553_v25 = vpack.c.b16 %v3523_v17, %v3522_v56  ;;  %v2575_v60 = vunpack.c.l.b16 %v2473_v55  ;;  %v5497_v56 = vld [vmem:[%s6057_s30 + $0x3c] sm:$0xf] }
 0x179   : > { %v3199_v23 = vrot.slane %v3198_v10, 4  ;;  %v5966_v10 = vld [vmem:[%s6057_s30 + $0x38] sm:$0x1] }
 0x17a   : > { %v2605_v17 = vpack.c.b16 %v2576_v12, %v2575_v60  ;;  %v2482_v53 = vrot.slane %v5966_v10, 5  ;;  %v3826_v60 = vrot.slane %v6768_v44, 5  ;;  %v6807_v44 = vld [vmem:[%s6057_s30 + $0x44] sm:$0x1] }
 0x17b   : > { %v2322_v33 = vpop.f32.mrf.mxu0  ;;  %v3204_v35 = vsel %vm6069_vm2, %v3199_v23, %v3203_v58 }
 0x17c   : > { %v1664_v48 = vpop.f32.mrf.mxu3  ;;  %5473 = vmatmul.msk.bf16.gmra.mxu2 %vm693_vm3, %v5686_v0  ;;  %v1021_v4 = vpop.f32.mrf.mxu1  ;;  %v3955_v0 = vpack.c.b16 %v3925_v32, %v3924_v50  ;;  %v5319_v50 = vld [vmem:[%s6057_s30 + $0x30] sm:$0xe]  ;;  %v3219_v32 = vshrl.u32 %v6784_v11, 16 }
 0x17d   : > { %v1719_v27 = vadd.f32 %v1664_v48, %v1428_v57  ;;  %v5560_v57 = vld [vmem:[%s6057_s30 + $0x30] sm:$0xe]  ;;  %v5965_v48 = vld [vmem:[%s6057_s30 + $0x34] sm:$0xf]  ;;  %v1022_v24 = vadd.f32 %v1021_v4, %v6413_v49 }
 0x17e   : > { %v5576_v45 = vrot.slane %v5560_v57, 9  ;;  %v2479_v55 = vrot.slane %v5965_v48, 5  ;;  %v3221_v48 = vrot.slane %v3219_v32, 4  ;;  %v3225_v32 = vshll.u32 %v6807_v44, 16 }
 0x17f   : > { %v1376_v9 = vpop.f32.mrf.mxu2  ;;  %v6780_v13 = vadd.f32 %v2322_v33, %v1719_v27  ;;  %v3206_v33 = vshrl.u32 %v5497_v56, 16  ;;  %v3209_v27 = vshll.u32 %v5497_v56, 16 }
 0x180   : > { %v1429_v7 = vadd.f32 %v1376_v9, %v1020_v47  ;;  %v3215_v47 = vshll.u32 %v6784_v11, 16  ;;  %v2481_v49 = vrot.slane %v2479_v55, 4  ;;  %v3824_v56 = vsel %vm6252_vm6, %v5576_v45, %v3823_v3 }
 0x181   : > { %5543 = vmatmul.msk.bf16.gmra.mxu3 %vm693_vm3, %v3553_v25  ;;  %v3194_v25 = vsel %vm6069_vm2, %v3189_v40, %v3193_v46  ;;  %v3825_v46 = vrot.slane %v3823_v3, 4  ;;  %v5335_v40 = vrot.slane %v5319_v50, 9  ;;  %v3208_v23 = vrot.slane %v3206_v33, 4 }
 0x182   : > { %v3524_v57 = vunpack.c.l.b16 %v3194_v25  ;;  %v3211_v58 = vrot.slane %v3209_v27, 5  ;;  %v2483_v25 = vsel %vm6252_vm6, %v2481_v49, %v2482_v53  ;;  %v3926_v50 = vunpack.c.l.b16 %v3824_v56 }
 0x183   : > { %v2325_v59 = vpop.f32.mrf.mxu0  ;;  %v3827_v10 = vsel %vm6252_vm6, %v3825_v46, %v3826_v60  ;;  %v2578_v60 = vunpack.c.l.b16 %v2483_v25  ;;  %v3227_v49 = vrot.slane %v3225_v32, 5 }
 0x184   : > { %v1667_v62 = vpop.f32.mrf.mxu3  ;;  %v1024_v22 = vpop.f32.mrf.mxu1  ;;  %v3212_v33 = vor.u32 %v3211_v58, %v3208_v23  ;;  %v3830_v23 = vrot.slane %v6784_v11, 5  ;;  %v6823_v58 = vld [vmem:[%s6057_s30 + $0x4c] sm:$0xf] }
 0x185   : > { %v1720_v54 = vadd.f32 %v1667_v62, %v1429_v7  ;;  %v5687_v7 = vld [vmem:[%s6057_s30 + $0x30] sm:$0xff]  ;;  %v3217_v62 = vrot.slane %v3215_v47, 5  ;;  %v1025_v27 = vadd.f32 %v1024_v22, %v6436_v14 }
 0x186   : > { %5597 = vmatmul.msk.bf16.gmra.mxu0 %vm693_vm3, %v3955_v0  ;;  %v3525_v0 = vunpack.c.l.b16 %v3204_v35  ;;  %v3927_v35 = vunpack.c.l.b16 %v3827_v10  ;;  %v3213_v53 = vrot.slane %v3212_v33, 4 }
 0x187   : > { %v1378_v9 = vpop.f32.mrf.mxu2  ;;  %5356 = vmatmul.msk.bf16.gmra.mxu1 %vm693_vm3, %v2605_v17  ;;  %v6800_v4 = vadd.f32 %v2325_v59, %v1720_v54  ;;  %v2480_v54 = vsel %vm6252_vm6, %v5335_v40, %v2479_v55  ;;  %v3222_v47 = vor.u32 %v3221_v48, %v3217_v62 }
 0x188   : > { %v1430_v12 = vadd.f32 %v1378_v9, %v1022_v24  ;;  %v3554_v45 = vpack.c.b16 %v3525_v0, %v3524_v57  ;;  %v2577_v46 = vunpack.c.l.b16 %v2480_v54  ;;  %v5500_v57 = vld [vmem:[%s6057_s30 + $0x48] sm:$0xf] }
 0x189   : > { %v3223_v40 = vrot.slane %v3222_v47, 4  ;;  %v5968_v47 = vld [vmem:[%s6057_s30 + $0x44] sm:$0x1] }
 0x18a   : > { %v2606_v0 = vpack.c.b16 %v2578_v60, %v2577_v46  ;;  %v2489_v32 = vrot.slane %v5968_v47, 5  ;;  %v3833_v46 = vrot.slane %v6807_v44, 5  ;;  %v6846_v44 = vld [vmem:[%s6057_s30 + $0x50] sm:$0x1] }
 0x18b   : > { %v2327_v17 = vpop.f32.mrf.mxu0  ;;  %v3228_v33 = vsel %vm6069_vm2, %v3223_v40, %v3227_v49 }
 0x18c   : > { %v1669_v24 = vpop.f32.mrf.mxu3  ;;  %5474 = vmatmul.msk.bf16.gmra.mxu2 %vm693_vm3, %v5687_v7  ;;  %v1026_v59 = vpop.f32.mrf.mxu1  ;;  %v3956_v7 = vpack.c.b16 %v3927_v35, %v3926_v50  ;;  %v5320_v50 = vld [vmem:[%s6057_s30 + $0x3c] sm:$0xe]  ;;  %v3243_v35 = vshrl.u32 %v6823_v58, 16 }
 0x18d   : > { %v1721_v3 = vadd.f32 %v1669_v24, %v1430_v12  ;;  %v5561_v12 = vld [vmem:[%s6057_s30 + $0x3c] sm:$0xe]  ;;  %v5967_v24 = vld [vmem:[%s6057_s30 + $0x40] sm:$0xf]  ;;  %v1027_v11 = vadd.f32 %v1026_v59, %v6454_v51 }
 0x18e   : > { %v5577_v10 = vrot.slane %v5561_v12, 9  ;;  %v2486_v54 = vrot.slane %v5967_v24, 5  ;;  %v3245_v24 = vrot.slane %v3243_v35, 4  ;;  %v3249_v35 = vshll.u32 %v6846_v44, 16 }
 0x18f   : > { %v1381_v9 = vpop.f32.mrf.mxu2  ;;  %v6819_v14 = vadd.f32 %v2327_v17, %v1721_v3  ;;  %v3230_v17 = vshrl.u32 %v5500_v57, 16  ;;  %v3233_v3 = vshll.u32 %v5500_v57, 16 }
 0x190   : > { %v1431_v55 = vadd.f32 %v1381_v9, %v1025_v27  ;;  %v3239_v27 = vshll.u32 %v6823_v58, 16  ;;  %v2488_v51 = vrot.slane %v2486_v54, 4  ;;  %v3831_v57 = vsel %vm6252_vm6, %v5577_v10, %v3830_v23 }
 0x191   : > { %5544 = vmatmul.msk.bf16.gmra.mxu3 %vm693_vm3, %v3554_v45  ;;  %v3218_v45 = vsel %vm6069_vm2, %v3213_v53, %v3217_v62  ;;  %v3832_v62 = vrot.slane %v3830_v23, 4  ;;  %v5336_v53 = vrot.slane %v5320_v50, 9  ;;  %v3232_v40 = vrot.slane %v3230_v17, 4 }
 0x192   : > { %v3526_v12 = vunpack.c.l.b16 %v3218_v45  ;;  %v3235_v49 = vrot.slane %v3233_v3, 5  ;;  %v2490_v45 = vsel %vm6252_vm6, %v2488_v51, %v2489_v32  ;;  %v3928_v50 = vunpack.c.l.b16 %v3831_v57 }
 0x193   : > { %v2330_v22 = vpop.f32.mrf.mxu0  ;;  %v3834_v47 = vsel %vm6252_vm6, %v3832_v62, %v3833_v46  ;;  %v2580_v46 = vunpack.c.l.b16 %v2490_v45  ;;  %v3251_v51 = vrot.slane %v3249_v35, 5 }
 0x194   : > { %v1672_v56 = vpop.f32.mrf.mxu3  ;;  %v1029_v48 = vpop.f32.mrf.mxu1  ;;  %v3236_v17 = vor.u32 %v3235_v49, %v3232_v40  ;;  %v3837_v40 = vrot.slane %v6823_v58, 5  ;;  %v6862_v49 = vld [vmem:[%s6057_s30 + $0x58] sm:$0xf] }
 0x195   : > { %v1722_v25 = vadd.f32 %v1672_v56, %v1431_v55  ;;  %v5688_v55 = vld [vmem:[%s6057_s30 + $0x3c] sm:$0xff]  ;;  %v3241_v56 = vrot.slane %v3239_v27, 5  ;;  %v1030_v3 = vadd.f32 %v1029_v48, %v6475_v26  ;;  %v3267_v35 = vshrl.u32 %v6862_v49, 16 }
 0x196   : > { %5598 = vmatmul.msk.bf16.gmra.mxu0 %vm693_vm3, %v3956_v7  ;;  %v3527_v7 = vunpack.c.l.b16 %v3228_v33  ;;  %v3929_v33 = vunpack.c.l.b16 %v3834_v47  ;;  %v3237_v32 = vrot.slane %v3236_v17, 4 }
 0x197   : > { %v1383_v9 = vpop.f32.mrf.mxu2  ;;  %5357 = vmatmul.msk.bf16.gmra.mxu1 %vm693_vm3, %v2606_v0  ;;  %v6839_v59 = vadd.f32 %v2330_v22, %v1722_v25  ;;  %v2487_v25 = vsel %vm6252_vm6, %v5336_v53, %v2486_v54  ;;  %v3246_v27 = vor.u32 %v3245_v24, %v3241_v56  ;;  %v5503_v54 = vld [vmem:[%s6057_s30 + $0x54] sm:$0xf] }
 0x198   : > { %v1432_v60 = vadd.f32 %v1383_v9, %v1027_v11  ;;  %v3555_v10 = vpack.c.b16 %v3527_v7, %v3526_v12  ;;  %v2579_v62 = vunpack.c.l.b16 %v2487_v25  ;;  %v5562_v12 = vld [vmem:[%s6057_s30 + $0x48] sm:$0xe]  ;;  %v3254_v57 = vshrl.u32 %v5503_v54, 16  ;;  %v5969_v25 = vld [vmem:[%s6057_s30 + $0x4c] sm:$0xf] }
 0x199   : > { %v3247_v53 = vrot.slane %v3246_v27, 4  ;;  %v3257_v24 = vshll.u32 %v5503_v54, 16  ;;  %v2493_v45 = vrot.slane %v5969_v25, 5  ;;  %v3263_v27 = vshll.u32 %v6862_v49, 16 }
 0x19a   : > { %v2607_v7 = vpack.c.b16 %v2580_v46, %v2579_v62  ;;  %v3839_v62 = vrot.slane %v3837_v40, 4  ;;  %v3256_v46 = vrot.slane %v3254_v57, 4  ;;  %v3269_v25 = vrot.slane %v3267_v35, 4 }
 0x19b   : > { %v2332_v0 = vpop.f32.mrf.mxu0 }
 0x19c   : > { %v1674_v11 = vpop.f32.mrf.mxu3  ;;  %5475 = vmatmul.msk.bf16.gmra.mxu2 %vm693_vm3, %v5688_v55  ;;  %v1031_v22 = vpop.f32.mrf.mxu1 }
 0x19d   : > { %v1723_v23 = vadd.f32 %v1674_v11, %v1432_v60  ;;  %v3957_v60 = vpack.c.b16 %v3929_v33, %v3928_v50  ;;  %v1032_v58 = vadd.f32 %v1031_v22, %v6490_v61  ;;  %v3252_v33 = vsel %vm6069_vm2, %v3247_v53, %v3251_v51 }
 0x19e   : > { %v2495_v61 = vrot.slane %v2493_v45, 4  ;;  %v3529_v51 = vunpack.c.l.b16 %v3252_v33 }
 0x19f   : > { %v1386_v9 = vpop.f32.mrf.mxu2  ;;  %v6858_v26 = vadd.f32 %v2332_v0, %v1723_v23  ;;  %v3242_v0 = vsel %vm6069_vm2, %v3237_v32, %v3241_v56  ;;  %v5578_v23 = vrot.slane %v5562_v12, 9  ;;  %v3840_v56 = vrot.slane %v6846_v44, 5  ;;  %v5689_v32 = vld [vmem:[%s6057_s30 + $0x48] sm:$0xff]  ;;  %v6885_v44 = vld [vmem:[%s6057_s30 + $0x5c] sm:$0x1] }
 0x1a0   : > { %v1433_v55 = vadd.f32 %v1386_v9, %v1030_v3  ;;  %v5321_v3 = vld [vmem:[%s6057_s30 + $0x48] sm:$0xe]  ;;  %v3528_v53 = vunpack.c.l.b16 %v3242_v0  ;;  %v3273_v35 = vshll.u32 %v6885_v44, 16 }
 0x1a1   : > { %5545 = vmatmul.msk.bf16.gmra.mxu3 %vm693_vm3, %v3555_v10  ;;  %v5970_v10 = vld [vmem:[%s6057_s30 + $0x50] sm:$0x1]  ;;  %v3838_v12 = vsel %vm6252_vm6, %v5578_v23, %v3837_v40 }
 0x1a2   : > { %v2496_v50 = vrot.slane %v5970_v10, 5  ;;  %v3841_v10 = vsel %vm6252_vm6, %v3839_v62, %v3840_v56  ;;  %v3556_v23 = vpack.c.b16 %v3529_v51, %v3528_v53 }
 0x1a3   : > { %v2335_v48 = vpop.f32.mrf.mxu0  ;;  %v3931_v33 = vunpack.c.l.b16 %v3841_v10 }
 0x1a4   : > { %v1677_v47 = vpop.f32.mrf.mxu3  ;;  %v1034_v11 = vpop.f32.mrf.mxu1  ;;  %v2497_v40 = vsel %vm6252_vm6, %v2495_v61, %v2496_v50  ;;  %v3844_v50 = vrot.slane %v6862_v49, 5  ;;  %v3847_v49 = vrot.slane %v6885_v44, 5 }
 0x1a5   : > { %v1724_v17 = vadd.f32 %v1677_v47, %v1433_v55  ;;  %v3259_v55 = vrot.slane %v3257_v24, 5  ;;  %v3265_v47 = vrot.slane %v3263_v27, 5  ;;  %v2582_v56 = vunpack.c.l.b16 %v2497_v40  ;;  %v5971_v40 = vld [vmem:[%s6057_s30 + $0x58] sm:$0xf] }
 0x1a6   : > { %5599 = vmatmul.msk.bf16.gmra.mxu0 %vm693_vm3, %v3957_v60  ;;  %v5337_v60 = vrot.slane %v5321_v3, 9  ;;  %v3930_v3 = vunpack.c.l.b16 %v3838_v12 }
 0x1a7   : > { %v1388_v9 = vpop.f32.mrf.mxu2  ;;  %5358 = vmatmul.msk.bf16.gmra.mxu1 %vm693_vm3, %v2607_v7  ;;  %v6878_v22 = vadd.f32 %v2335_v48, %v1724_v17  ;;  %v3260_v17 = vor.u32 %v3259_v55, %v3256_v46  ;;  %v3270_v27 = vor.u32 %v3269_v25, %v3265_v47 }
 0x1a8   : > { %v1434_v54 = vadd.f32 %v1388_v9, %v1032_v58  ;;  %v2494_v48 = vsel %vm6252_vm6, %v5337_v60, %v2493_v45  ;;  %v1035_v58 = vadd.f32 %v1034_v11, %v6362_v36  ;;  %v5563_v60 = vld [vmem:[%s6057_s30 + $0x54] sm:$0xe]  ;;  %v3958_v46 = vpack.c.b16 %v3931_v33, %v3930_v3  ;;  %v6899_v11 = vld [vmem:[%s6057_s30 + $0x64] sm:$0xf]  ;;  %v5972_v33 = vld [vmem:[%s6057_s30 + $0x5c] sm:$0x1] }
 0x1a9   : > { %8064 = vst [vmem:[#allocation4_spill] sm:$0xff] %v6878_v22  ;;  %v2581_v62 = vunpack.c.l.b16 %v2494_v48  ;;  %v3261_v45 = vrot.slane %v3260_v17, 4  ;;  %v5506_v22 = vld [vmem:[%s6057_s30 + $0x60] sm:$0xf]  ;;  %v3271_v55 = vrot.slane %v3270_v27, 4  ;;  %v3275_v36 = vrot.slane %v3273_v35, 5 }
 0x1aa   : > { %v5579_v51 = vrot.slane %v5563_v60, 9  ;;  %v3278_v12 = vshrl.u32 %v5506_v22, 16  ;;  %v3281_v25 = vshll.u32 %v5506_v22, 16  ;;  %v2500_v17 = vrot.slane %v5971_v40, 5 }
 0x1ab   : > { %v2337_v7 = vpop.f32.mrf.mxu0  ;;  %v2608_v53 = vpack.c.b16 %v2582_v56, %v2581_v62  ;;  %v3266_v48 = vsel %vm6069_vm2, %v3261_v45, %v3265_v47  ;;  %v3846_v3 = vrot.slane %v3844_v50, 4  ;;  %v2503_v27 = vrot.slane %v5972_v33, 5  ;;  %v5690_v45 = vld [vmem:[%s6057_s30 + $0x54] sm:$0xff]  ;;  %v5509_v33 = vld [vmem:[%s6057_s30 + $0x6c] sm:$0xf] }
 0x1ac   : > { %v1679_v57 = vpop.f32.mrf.mxu3  ;;  %5476 = vmatmul.msk.bf16.gmra.mxu2 %vm693_vm3, %v5689_v32  ;;  %v1036_v24 = vpop.f32.mrf.mxu1  ;;  %v3276_v47 = vsel %vm6069_vm2, %v3271_v55, %v3275_v36  ;;  %v3530_v35 = vunpack.c.l.b16 %v3266_v48  ;;  %v3280_v62 = vrot.slane %v3278_v12, 4  ;;  %v3283_v56 = vrot.slane %v3281_v25, 5 }
 0x1ad   : > { %v1725_v0 = vadd.f32 %v1679_v57, %v1434_v54  ;;  %v1037_v22 = vadd.f32 %v1036_v24, %v6385_v1  ;;  %v3531_v1 = vunpack.c.l.b16 %v3276_v47  ;;  %v3848_v24 = vsel %vm6252_vm6, %v3846_v3, %v3847_v49 }
 0x1ae   : > { %v3933_v12 = vunpack.c.l.b16 %v3848_v24  ;;  %v3284_v40 = vor.u32 %v3283_v56, %v3280_v62  ;;  %v5564_v62 = vld [vmem:[%s6057_s30 + $0x60] sm:$0xe]  ;;  %v3851_v56 = vrot.slane %v6899_v11, 5 }
 0x1af   : > { %v1391_v9 = vpop.f32.mrf.mxu2  ;;  %v6901_v54 = vadd.f32 %v2337_v7, %v1725_v0  ;;  %v5322_v7 = vld [vmem:[%s6057_s30 + $0x54] sm:$0xe]  ;;  %v3287_v0 = vshll.u32 %v6899_v11, 16  ;;  %v3557_v3 = vpack.c.b16 %v3531_v1, %v3530_v35 }
 0x1b0   : > { %v1435_v32 = vadd.f32 %v1391_v9, %v1035_v58  ;;  %v3291_v58 = vshrl.u32 %v6899_v11, 16  ;;  %v3845_v9 = vsel %vm6252_vm6, %v5579_v51, %v3844_v50  ;;  %v5338_v60 = vrot.slane %v5322_v7, 9 }
 0x1b1   : > { %5546 = vmatmul.msk.bf16.gmra.mxu3 %vm693_vm3, %v3556_v23  ;;  %v6923_v55 = vrot.slane %v3287_v0, 5  ;;  %v3932_v50 = vunpack.c.l.b16 %v3845_v9  ;;  %v6938_v9 = vld [vmem:[%s6057_s30 + $0x70] sm:$0xf] }
 0x1b2   : > { %v3293_v36 = vrot.slane %v3291_v58, 4 }
 0x1b3   : > { %v2340_v61 = vpop.f32.mrf.mxu0 }
 0x1b4   : > { %v1682_v10 = vpop.f32.mrf.mxu3  ;;  %v1039_v57 = vpop.f32.mrf.mxu1  ;;  %v3294_v7 = vor.u32 %v3293_v36, %v6923_v55 }
 0x1b5   : > { %v1726_v23 = vadd.f32 %v1682_v10, %v1435_v32  ;;  %v2502_v10 = vrot.slane %v2500_v17, 4  ;;  %v1040_v58 = vadd.f32 %v1039_v57, %v6406_v37  ;;  %v3311_v37 = vshll.u32 %v6938_v9, 16 }
 0x1b6   : > { %5600 = vmatmul.msk.bf16.gmra.mxu0 %vm693_vm3, %v3958_v46  ;;  %v3315_v57 = vshrl.u32 %v6938_v9, 16 }
 0x1b7   : > { %v1393_v44 = vpop.f32.mrf.mxu2  ;;  %5359 = vmatmul.msk.bf16.gmra.mxu1 %vm693_vm3, %v2608_v53  ;;  %v6919_v46 = vadd.f32 %v2340_v61, %v1726_v23  ;;  %v6926_v53 = vld [vmem:[%s6057_s30 + $0x68] sm:$0x1]  ;;  %v2501_v61 = vsel %vm6252_vm6, %v5338_v60, %v2500_v17  ;;  %v2504_v49 = vsel %vm6252_vm6, %v2502_v10, %v2503_v27  ;;  %v3959_v17 = vpack.c.b16 %v3933_v12, %v3932_v50 }
 0x1b8   : > { %v1436_v32 = vadd.f32 %v1393_v44, %v1037_v22  ;;  %v3297_v0 = vshll.u32 %v6926_v53, 16  ;;  %v2583_v47 = vunpack.c.l.b16 %v2501_v61  ;;  %v2584_v44 = vunpack.c.l.b16 %v2504_v49  ;;  %v5973_v49 = vld [vmem:[%s6057_s30 + $0x64] sm:$0xf] }
 0x1b9   : > { %8065 = vst [vmem:[#allocation5_spill] sm:$0xff] %v6919_v46  ;;  %v3285_v60 = vrot.slane %v3284_v40, 4  ;;  %v3295_v27 = vrot.slane %v3294_v7, 4  ;;  %v3305_v10 = vshll.u32 %v5509_v33, 16  ;;  %v5580_v61 = vrot.slane %v5564_v62, 9  ;;  %v5691_v62 = vld [vmem:[%s6057_s30 + $0x60] sm:$0xff] }
 0x1ba   : > { %v3299_v35 = vrot.slane %v3297_v0, 5  ;;  %v2609_v36 = vpack.c.b16 %v2584_v44, %v2583_v47  ;;  %v3854_v11 = vrot.slane %v6926_v53, 5  ;;  %v2507_v40 = vrot.slane %v5973_v49, 5  ;;  %v5323_v7 = vld [vmem:[%s6057_s30 + $0x60] sm:$0xe] }
 0x1bb   : > { %v2342_v48 = vpop.f32.mrf.mxu0  ;;  %v3290_v12 = vsel %vm6069_vm2, %v3285_v60, %v6923_v55  ;;  %v3313_v55 = vrot.slane %v3311_v37, 5  ;;  %v5974_v47 = vld [vmem:[%s6057_s30 + $0x68] sm:$0x1] }
 0x1bc   : > { %v1684_v51 = vpop.f32.mrf.mxu3  ;;  %5477 = vmatmul.msk.bf16.gmra.mxu2 %vm693_vm3, %v5690_v45  ;;  %v1041_v25 = vpop.f32.mrf.mxu1  ;;  %v2510_v53 = vrot.slane %v5974_v47, 5 }
 0x1bd   : > { %v1727_v23 = vadd.f32 %v1684_v51, %v1436_v32  ;;  %v3302_v32 = vshrl.u32 %v5509_v33, 16  ;;  %v3307_v33 = vrot.slane %v3305_v10, 5 }
 0x1bf   : > { %v1396_v22 = vpop.f32.mrf.mxu2  ;;  %v6945_v1 = vadd.f32 %v2342_v48, %v1727_v23  ;;  %v3300_v48 = vsel %vm6069_vm2, %v3295_v27, %v3299_v35  ;;  %v3853_v23 = vrot.slane %v3851_v56, 4  ;;  %v3304_v0 = vrot.slane %v3302_v32, 4 }
 0x1c0   : > { %v1437_v45 = vadd.f32 %v1396_v22, %v1040_v58  ;;  %v1042_v58 = vadd.f32 %v1041_v25, %v6423_v20  ;;  %v3317_v22 = vrot.slane %v3315_v57, 4  ;;  %v5339_v27 = vrot.slane %v5323_v7, 9 }
 0x1c1   : > { %5547 = vmatmul.msk.bf16.gmra.mxu3 %vm693_vm3, %v3557_v3  ;;  %8066 = vst [vmem:[#allocation6_spill] sm:$0xff] %v6945_v1  ;;  %v2509_v35 = vrot.slane %v2507_v40, 4  ;;  %v3532_v32 = vunpack.c.l.b16 %v3290_v12  ;;  %v3852_v20 = vsel %vm6252_vm6, %v5580_v61, %v3851_v56  ;;  %v3855_v25 = vsel %vm6252_vm6, %v3853_v23, %v3854_v11 }
 0x1c2   : > { %v3308_v10 = vor.u32 %v3307_v33, %v3304_v0  ;;  %v3318_v37 = vor.u32 %v3317_v22, %v3313_v55  ;;  %v3934_v11 = vunpack.c.l.b16 %v3852_v20 }
 0x1c3   : > { %v2345_v24 = vpop.f32.mrf.mxu0  ;;  %v2511_v56 = vsel %vm6252_vm6, %v2509_v35, %v2510_v53  ;;  %v3858_v53 = vrot.slane %v6938_v9, 5  ;;  %v5324_v9 = vld [vmem:[%s6057_s30 + $0x6c] sm:$0xe] }
 0x1c4   : > { %v1687_v50 = vpop.f32.mrf.mxu3  ;;  %v1044_v51 = vpop.f32.mrf.mxu1  ;;  %v3309_v23 = vrot.slane %v3308_v10, 4  ;;  %v3319_v0 = vrot.slane %v3318_v37, 4  ;;  %v2586_v47 = vunpack.c.l.b16 %v2511_v56 }
 0x1c5   : > { %v1728_v3 = vadd.f32 %v1687_v50, %v1437_v45  ;;  %v6960_v45 = vld [vmem:[%s6057_s30 + $0x74] sm:$0x1] }
 0x1c6   : > { %5601 = vmatmul.msk.bf16.gmra.mxu0 %vm693_vm3, %v3959_v17  ;;  %v3533_v17 = vunpack.c.l.b16 %v3300_v48  ;;  %v3321_v57 = vshll.u32 %v6960_v45, 16  ;;  %v1045_v48 = vadd.f32 %v1044_v51, %v6444_v42  ;;  %v3314_v42 = vsel %vm6069_vm2, %v3309_v23, %v3313_v55 }
 0x1c7   : > { %v1398_v44 = vpop.f32.mrf.mxu2  ;;  %5360 = vmatmul.msk.bf16.gmra.mxu1 %vm693_vm3, %v2609_v36  ;;  %v6963_v50 = vadd.f32 %v2345_v24, %v1728_v3  ;;  %v2508_v24 = vsel %vm6252_vm6, %v5339_v27, %v2507_v40  ;;  %v3935_v3 = vunpack.c.l.b16 %v3855_v25  ;;  %v3534_v56 = vunpack.c.l.b16 %v3314_v42  ;;  %v5515_v42 = vld [vmem:[%s6057_s30 + $0x84] sm:$0xf] }
 0x1c8   : > { %v1438_v60 = vadd.f32 %v1398_v44, %v1042_v58  ;;  %v3558_v61 = vpack.c.b16 %v3533_v17, %v3532_v32  ;;  %v3323_v58 = vrot.slane %v3321_v57, 5  ;;  %v2585_v22 = vunpack.c.l.b16 %v2508_v24  ;;  %v5512_v44 = vld [vmem:[%s6057_s30 + $0x78] sm:$0xf] }
 0x1c9   : > { %8067 = vst [vmem:[#allocation7_spill] sm:$0xff] %v6963_v50  ;;  %v6978_v50 = vld [vmem:[%s6057_s30 + $0x7c] sm:$0xf]  ;;  %v3960_v40 = vpack.c.b16 %v3935_v3, %v3934_v11  ;;  %v3326_v27 = vshrl.u32 %v5512_v44, 16  ;;  %v3329_v20 = vshll.u32 %v5512_v44, 16  ;;  %v3860_v3 = vrot.slane %v3858_v53, 4 }
 0x1ca   : > { %v3324_v51 = vsel %vm6069_vm2, %v3319_v0, %v3323_v58  ;;  %v2610_v17 = vpack.c.b16 %v2586_v47, %v2585_v22  ;;  %v3335_v25 = vshll.u32 %v6978_v50, 16  ;;  %v3339_v10 = vshrl.u32 %v6978_v50, 16 }
 0x1cb   : > { %v2347_v36 = vpop.f32.mrf.mxu0  ;;  %v3535_v11 = vunpack.c.l.b16 %v3324_v51  ;;  %v5340_v0 = vrot.slane %v5324_v9, 9  ;;  %v3331_v58 = vrot.slane %v3329_v20, 5 }
 0x1cc   : > { %v1689_v49 = vpop.f32.mrf.mxu3  ;;  %5478 = vmatmul.msk.bf16.gmra.mxu2 %vm693_vm3, %v5691_v62  ;;  %v1046_v7 = vpop.f32.mrf.mxu1  ;;  %v3341_v22 = vrot.slane %v3339_v10, 4 }
 0x1cd   : > { %v1729_v12 = vadd.f32 %v1689_v49, %v1438_v60  ;;  %v5565_v60 = vld [vmem:[%s6057_s30 + $0x6c] sm:$0xe]  ;;  %v5975_v49 = vld [vmem:[%s6057_s30 + $0x70] sm:$0xf] }
 0x1ce   : > { %v2514_v24 = vrot.slane %v5975_v49, 5 }
 0x1cf   : > { %v1401_v33 = vpop.f32.mrf.mxu2  ;;  %v6987_v35 = vadd.f32 %v2347_v36, %v1729_v12  ;;  %v3861_v36 = vrot.slane %v6960_v45, 5  ;;  %v1047_v12 = vadd.f32 %v1046_v7, %v6463_v2  ;;  %v5692_v45 = vld [vmem:[%s6057_s30 + $0x6c] sm:$0xff]  ;;  %v7004_v7 = vld [vmem:[%s6057_s30 + $0x80] sm:$0x1] }
 0x1d0   : > { %v1439_v62 = vadd.f32 %v1401_v33, %v1045_v48  ;;  %v3328_v48 = vrot.slane %v3326_v27, 4  ;;  %v6997_v33 = vrot.slane %v3335_v25, 5  ;;  %v2516_v44 = vrot.slane %v2514_v24, 4 }
 0x1d1   : > { %5548 = vmatmul.msk.bf16.gmra.mxu3 %vm693_vm3, %v3558_v61  ;;  %8068 = vst [vmem:[#allocation8_spill] sm:$0xff] %v6987_v35  ;;  %v5581_v61 = vrot.slane %v5565_v60, 9  ;;  %v7010_v60 = vld [vmem:[%s6057_s30 + $0x88] sm:$0xf]  ;;  %v3862_v20 = vsel %vm6252_vm6, %v3860_v3, %v3861_v36  ;;  %v2515_v9 = vsel %vm6252_vm6, %v5340_v0, %v2514_v24  ;;  %v3345_v49 = vshll.u32 %v7004_v7, 16 }
 0x1d2   : > { %v3332_v25 = vor.u32 %v3331_v58, %v3328_v48  ;;  %v3342_v10 = vor.u32 %v3341_v22, %v6997_v33  ;;  %v3359_v36 = vshll.u32 %v7010_v60, 16  ;;  %v3937_v48 = vunpack.c.l.b16 %v3862_v20  ;;  %v5517_v20 = vld [vmem:[%s6057_s30 + $0x8c] sm:$0x1] }
 0x1d3   : > { %v2350_v32 = vpop.f32.mrf.mxu0  ;;  %v3859_v51 = vsel %vm6252_vm6, %v5581_v61, %v3858_v53  ;;  %v3353_v61 = vshll.u32 %v5515_v42, 16  ;;  %v2587_v24 = vunpack.c.l.b16 %v2515_v9 }
 0x1d4   : > { %v1692_v37 = vpop.f32.mrf.mxu3  ;;  %v1049_v57 = vpop.f32.mrf.mxu1  ;;  %v3936_v3 = vunpack.c.l.b16 %v3859_v51  ;;  %v3333_v58 = vrot.slane %v3332_v25, 4 }
 0x1d5   : > { %v1730_v55 = vadd.f32 %v1692_v37, %v1439_v62  ;;  %v5976_v62 = vld [vmem:[%s6057_s30 + $0x74] sm:$0x1] }
 0x1d6   : > { %5602 = vmatmul.msk.bf16.gmra.mxu0 %vm693_vm3, %v3960_v40  ;;  %v2517_v40 = vrot.slane %v5976_v62, 5  ;;  %v5566_v62 = vld [vmem:[%s6057_s30 + $0x78] sm:$0xe]  ;;  %v3961_v51 = vpack.c.b16 %v3937_v48, %v3936_v3  ;;  %v3369_v3 = vshll.u32 %v5517_v20, 16 }
 0x1d7   : > { %v1403_v23 = vpop.f32.mrf.mxu2  ;;  %5361 = vmatmul.msk.bf16.gmra.mxu1 %vm693_vm3, %v2610_v17  ;;  %v7001_v2 = vadd.f32 %v2350_v32, %v1730_v55  ;;  %v3559_v17 = vpack.c.b16 %v3535_v11, %v3534_v56  ;;  %v3350_v55 = vshrl.u32 %v5515_v42, 16  ;;  %v1050_v11 = vadd.f32 %v1049_v57, %v6486_v52 }
 0x1d8   : > { %v1440_v47 = vadd.f32 %v1403_v23, %v1047_v12  ;;  %v2518_v53 = vsel %vm6252_vm6, %v2516_v44, %v2517_v40  ;;  %v3363_v12 = vshrl.u32 %v7010_v60, 16  ;;  %v3347_v44 = vrot.slane %v3345_v49, 5  ;;  %v5325_v49 = vld [vmem:[%s6057_s30 + $0x78] sm:$0xe] }
 0x1d9   : > { %8069 = vst [vmem:[#allocation9_spill] sm:$0xff] %v7001_v2  ;;  %v2588_v0 = vunpack.c.l.b16 %v2518_v53  ;;  %v3352_v40 = vrot.slane %v3350_v55, 4  ;;  %v3355_v42 = vrot.slane %v3353_v61, 5  ;;  %v7027_v52 = vrot.slane %v3359_v36, 5  ;;  %v5977_v36 = vld [vmem:[%s6057_s30 + $0x7c] sm:$0xf] }
 0x1da   : > { %v3365_v57 = vrot.slane %v3363_v12, 4  ;;  %v3868_v53 = vrot.slane %v7004_v7, 5 }
 0x1db   : > { %v2352_v27 = vpop.f32.mrf.mxu0  ;;  %v2611_v9 = vpack.c.b16 %v2588_v0, %v2587_v24  ;;  %v3356_v12 = vor.u32 %v3355_v42, %v3352_v40  ;;  %v5978_v42 = vld [vmem:[%s6057_s30 + $0x80] sm:$0x1] }
 0x1dc   : > { %v1694_v37 = vpop.f32.mrf.mxu3  ;;  %5479 = vmatmul.msk.bf16.gmra.mxu2 %vm693_vm3, %v5692_v45  ;;  %v1051_v32 = vpop.f32.mrf.mxu1  ;;  %v3343_v45 = vrot.slane %v3342_v10, 4  ;;  %v5582_v10 = vrot.slane %v5566_v62, 9  ;;  %v3366_v7 = vor.u32 %v3365_v57, %v7027_v52  ;;  %v5693_v62 = vld [vmem:[%s6057_s30 + $0x78] sm:$0xff]  ;;  %v2524_v57 = vrot.slane %v5978_v42, 5 }
 0x1dd   : > { %v1731_v56 = vadd.f32 %v1694_v37, %v1440_v47  ;;  %v3865_v47 = vrot.slane %v6978_v50, 5  ;;  %v1052_v48 = vadd.f32 %v1051_v32, %v6503_v16  ;;  %v3357_v32 = vrot.slane %v3356_v12, 4 }
 0x1de   : > { %v3348_v55 = vsel %vm6069_vm2, %v3343_v45, %v3347_v44  ;;  %v5567_v45 = vld [vmem:[%s6057_s30 + $0x84] sm:$0xe] }
 0x1df   : > { %v1406_v23 = vpop.f32.mrf.mxu2  ;;  %v7030_v37 = vadd.f32 %v2352_v27, %v1731_v56  ;;  %v3867_v61 = vrot.slane %v3865_v47, 4  ;;  %v2521_v27 = vrot.slane %v5977_v36, 5  ;;  %v7058_v36 = vld [vmem:[%s6057_s30 + $0x94] sm:$0xf] }
 0x1e0   : > { %v1441_v22 = vadd.f32 %v1406_v23, %v1050_v11  ;;  %v3872_v23 = vrot.slane %v7010_v60, 5 }
 0x1e1   : > { %5549 = vmatmul.msk.bf16.gmra.mxu3 %vm693_vm3, %v3559_v17  ;;  %8070 = vst [vmem:[#allocation10_spill] sm:$0xff] %v7030_v37  ;;  %v3338_v17 = vsel %vm6069_vm2, %v3333_v58, %v6997_v33  ;;  %v5341_v33 = vrot.slane %v5325_v49, 9  ;;  %v3537_v58 = vunpack.c.l.b16 %v3348_v55  ;;  %v2523_v40 = vrot.slane %v2521_v27, 4 }
 0x1e2   : > { %v3536_v0 = vunpack.c.l.b16 %v3338_v17  ;;  %v3869_v60 = vsel %vm6252_vm6, %v3867_v61, %v3868_v53  ;;  %v3371_v49 = vrot.slane %v3369_v3, 5  ;;  %v3875_v17 = vrot.slane %v5517_v20, 5 }
 0x1e3   : > { %v2355_v25 = vpop.f32.mrf.mxu0  ;;  %v3939_v53 = vunpack.c.l.b16 %v3869_v60  ;;  %v2525_v12 = vsel %vm6252_vm6, %v2523_v40, %v2524_v57  ;;  %v3362_v20 = vsel %vm6069_vm2, %v3357_v32, %v7027_v52 }
 0x1e4   : > { %v1697_v11 = vpop.f32.mrf.mxu3  ;;  %v2682_v50 = vpop.f32.mrf.mxu1  ;;  %v2590_v52 = vunpack.c.l.b16 %v2525_v12 }
 0x1e5   : > { %v1732_v56 = vadd.f32 %v1697_v11, %v1441_v22  ;;  %v3866_v22 = vsel %vm6252_vm6, %v5582_v10, %v3865_v47  ;;  %v2522_v11 = vsel %vm6252_vm6, %v5341_v33, %v2521_v27  ;;  %v5583_v47 = vrot.slane %v5567_v45, 9 }
 0x1e6   : > { %5603 = vmatmul.msk.bf16.gmra.mxu0 %vm693_vm3, %v3961_v51  ;;  %v5518_v51 = vld [vmem:[%s6057_s30 + $0x90] sm:$0xf]  ;;  %v3874_v10 = vrot.slane %v3872_v23, 4  ;;  %v2589_v27 = vunpack.c.l.b16 %v2522_v11  ;;  %v2762_v45 = vadd.f32 %v2682_v50, %v6520_v41  ;;  %v5979_v11 = vld [vmem:[%s6057_s30 + $0x88] sm:$0xf] }
 0x1e7   : > { %v1408_v24 = vpop.f32.mrf.mxu2  ;;  %5362 = vmatmul.msk.bf16.gmra.mxu1 %vm693_vm3, %v2611_v9  ;;  %v7051_v16 = vadd.f32 %v2355_v25, %v1732_v56  ;;  %v3367_v9 = vrot.slane %v3366_v7, 4  ;;  %v3560_v25 = vpack.c.b16 %v3537_v58, %v3536_v0  ;;  %v3938_v56 = vunpack.c.l.b16 %v3866_v22 }
 0x1e8   : > { %v1442_v44 = vadd.f32 %v1408_v24, %v1052_v48  ;;  %v3374_v48 = vshrl.u32 %v5518_v51, 16  ;;  %v3377_v24 = vshll.u32 %v5518_v51, 16  ;;  %v3873_v33 = vsel %vm6252_vm6, %v5583_v47, %v3872_v23 }
 0x1e9   : > { %8071 = vst [vmem:[#allocation11_spill] sm:$0xff] %v7051_v16  ;;  %v3372_v3 = vsel %vm6069_vm2, %v3367_v9, %v3371_v49  ;;  %v3876_v0 = vsel %vm6252_vm6, %v3874_v10, %v3875_v17  ;;  %v3383_v58 = vshll.u32 %v7058_v36, 16  ;;  %v3387_v22 = vshrl.u32 %v7058_v36, 16  ;;  %v5326_v49 = vld [vmem:[%s6057_s30 + $0x84] sm:$0xe] }
 0x1ea   : > { %v3379_v40 = vrot.slane %v3377_v24, 5  ;;  %v3962_v57 = vpack.c.b16 %v3939_v53, %v3938_v56  ;;  %v7075_v51 = vunpack.c.l.b16 %v3362_v20  ;;  %v7078_v60 = vunpack.c.l.b16 %v3372_v3  ;;  %v7083_v10 = vld [vmem:[%s6057_s30 + $0x98] sm:$0x1]  ;;  %v7092_v20 = vld [vmem:[%s8055_s2] ss:$0 sm:$0xff] }
 0x1eb   : > { %v2357_v55 = vpop.f32.mrf.mxu0  ;;  %v3940_v32 = vunpack.c.l.b16 %v3873_v33  ;;  %v3941_v9 = vunpack.c.l.b16 %v3876_v0  ;;  %v2528_v47 = vrot.slane %v5979_v11, 5  ;;  %v7085_v41 = vrot.slane %v3383_v58, 5  ;;  %v5980_v0 = vld [vmem:[%s6057_s30 + $0x8c] sm:$0x1] }
 0x1ec   : > { %v1699_v42 = vpop.f32.mrf.mxu3  ;;  %5480 = vmatmul.msk.bf16.gmra.mxu2 %vm693_vm3, %v5693_v62  ;;  %v2684_v61 = vpop.f32.mrf.mxu1  ;;  %v3376_v62 = vrot.slane %v3374_v48, 4  ;;  %v3389_v50 = vrot.slane %v3387_v22, 4  ;;  %v2612_v24 = vpack.c.b16 %v2590_v52, %v2589_v27  ;;  %v5342_v53 = vrot.slane %v5326_v49, 9 }
 0x1ed   : > { %v1733_v7 = vadd.f32 %v1699_v42, %v1442_v44  ;;  %v7096_v33 = vpack.c.b16 %v3941_v9, %v3940_v32  ;;  %v2530_v27 = vrot.slane %v2528_v47, 4  ;;  %v2531_v58 = vrot.slane %v5980_v0, 5  ;;  %v5568_v9 = vld [vmem:[%s6057_s30 + $0x90] sm:$0xe] }
 0x1ee   : > { %v3380_v42 = vor.u32 %v3379_v40, %v3376_v62  ;;  %v3390_v22 = vor.u32 %v3389_v50, %v7085_v41  ;;  %v7110_v62 = vld [vmem:[%s8056_s3] ss:$0 sm:$0xff]  ;;  %v2529_v32 = vsel %vm6252_vm6, %v5342_v53, %v2528_v47  ;;  %v3879_v49 = vrot.slane %v7058_v36, 5 }
 0x1ef   : > { %v2973_v44 = vpop.f32.mrf.mxu2  ;;  %v7087_v17 = vadd.f32 %v2357_v55, %v1733_v7  ;;  %v3393_v55 = vshll.u32 %v7083_v10, 16  ;;  %v2763_v7 = vadd.f32 %v2684_v61, %v6533_v30  ;;  %v5584_v16 = vrot.slane %v5568_v9, 9 }
 0x1f0   : > { %v3053_v23 = vadd.f32 %v2973_v44, %v2762_v45  ;;  %v5521_v45 = vld [vmem:[%s6057_s30 + $0x9c] sm:$0xf]  ;;  %v7105_v44 = vld [vmem:[%s6057_s30 + $0xa0] sm:$0xf]  ;;  %v3381_v30 = vrot.slane %v3380_v42, 4  ;;  %v3391_v42 = vrot.slane %v3390_v22, 4  ;;  %v2591_v22 = vunpack.c.l.b16 %v2529_v32 }
 0x1f1   : > { %5550 = vmatmul.msk.bf16.gmra.mxu3 %vm693_vm3, %v3560_v25  ;;  %8072 = vst [vmem:[#allocation12_spill] sm:$0xff] %v7087_v17  ;;  %v3398_v61 = vshrl.u32 %v5521_v45, 16  ;;  %v3407_v11 = vshll.u32 %v7105_v44, 16  ;;  %v3411_v50 = vshrl.u32 %v7105_v44, 16  ;;  %v3395_v0 = vrot.slane %v3393_v55, 5 }
 0x1f2   : > { %v2532_v17 = vsel %vm6252_vm6, %v2530_v27, %v2531_v58 }
 0x1f3   : > { %v4033_v48 = vpop.f32.mrf.mxu0  ;;  %v7124_v3 = vrot.slane %v3407_v11, 5  ;;  %v3413_v47 = vrot.slane %v3411_v50, 4  ;;  %v5327_v11 = vld [vmem:[%s6057_s30 + $0x90] sm:$0xe]  ;;  %v2592_v9 = vunpack.c.l.b16 %v2532_v17 }
 0x1f4   : > { %v3631_v25 = vpop.f32.mrf.mxu3  ;;  %v2687_v56 = vpop.f32.mrf.mxu1  ;;  %v5343_v32 = vrot.slane %v5327_v11, 9 }
 0x1f5   : > { %v3711_v12 = vadd.f32 %v3631_v25, %v3053_v23  ;;  %v5694_v23 = vld [vmem:[%s6057_s30 + $0x84] sm:$0xff]  ;;  %v3414_v2 = vor.u32 %v3413_v47, %v7124_v3  ;;  %v2764_v58 = vadd.f32 %v2687_v56, %v6546_v8  ;;  %v3880_v47 = vsel %vm6252_vm6, %v5584_v16, %v3879_v49  ;;  %v5569_v56 = vld [vmem:[%s6057_s30 + $0x9c] sm:$0xe] }
 0x1f6   : > { %5604 = vmatmul.msk.bf16.gmra.mxu0 %vm693_vm3, %v3962_v57  ;;  %v3401_v57 = vshll.u32 %v5521_v45, 16  ;;  %v7122_v45 = vld [vmem:[%s6057_s30 + $0xa4] sm:$0x1]  ;;  %v2613_v11 = vpack.c.b16 %v2592_v9, %v2591_v22 }
 0x1f7   : > { %v4113_v52 = vadd.f32 %v4033_v48, %v3711_v12  ;;  %v2975_v40 = vpop.f32.mrf.mxu2  ;;  %5363 = vmatmul.msk.bf16.gmra.mxu1 %vm693_vm3, %v2612_v24  ;;  %v3400_v24 = vrot.slane %v3398_v61, 4  ;;  %v3881_v61 = vrot.slane %v3879_v49, 4  ;;  %v3417_v27 = vshll.u32 %v7122_v45, 16 }
 0x1f8   : > { %v3054_v25 = vadd.f32 %v2975_v40, %v2763_v7  ;;  %v3403_v12 = vrot.slane %v3401_v57, 5  ;;  %v3882_v57 = vrot.slane %v7083_v10, 5  ;;  %v3886_v49 = vrot.slane %v7105_v44, 5 }
 0x1f9   : > { %v4149_v48 = vmul.f32 %v7092_v20, %v4113_v52  ;;  %v5981_v52 = vld [vmem:[%s6057_s30 + $0x94] sm:$0xf] }
 0x1fa   : > { %v2535_v7 = vrot.slane %v5981_v52, 5  ;;  %v3404_v50 = vor.u32 %v3403_v12, %v3400_v24  ;;  %v5982_v12 = vld [vmem:[%s6057_s30 + $0x98] sm:$0x1]  ;;  %v3883_v8 = vsel %vm6252_vm6, %v3881_v61, %v3882_v57  ;;  %v3889_v57 = vrot.slane %v7122_v45, 5 }
 0x1fb   : > { %v7127_v36 = vadd.f32 %v7110_v62, %v4149_v48  ;;  %v4035_v53 = vpop.f32.mrf.mxu0  ;;  %v2538_v35 = vrot.slane %v5982_v12, 5 }
 0x1fc   : > { %v3633_v40 = vpop.f32.mrf.mxu3  ;;  %5481 = vmatmul.msk.bf16.gmra.mxu2 %vm693_vm3, %v5694_v23  ;;  %v2689_v55 = vpop.f32.mrf.mxu1  ;;  %v3386_v23 = vsel %vm6069_vm2, %v3381_v30, %v7085_v41  ;;  %v2537_v24 = vrot.slane %v2535_v7, 4  ;;  %v3405_v17 = vrot.slane %v3404_v50, 4  ;;  %v2536_v16 = vsel %vm6252_vm6, %v5343_v32, %v2535_v7 }
 0x1fd   : > { %v5612_v48 = vmul.f32 -1.442695, %v7127_v36  ;;  %v3712_v37 = vadd.f32 %v3633_v40, %v3054_v25  ;;  %v3396_v25 = vsel %vm6069_vm2, %v3391_v42, %v3395_v0  ;;  %v3419_v40 = vrot.slane %v3417_v27, 5 }
 0x1fe   : > { %v7155_v42 = vunpack.c.l.b16 %v3386_v23  ;;  %v7166_v22 = vunpack.c.l.b16 %v3396_v25  ;;  %v3943_v27 = vunpack.c.l.b16 %v3883_v8  ;;  %v2765_v32 = vadd.f32 %v2689_v55, %v6559_v5  ;;  %v5695_v8 = vld [vmem:[%s6057_s30 + $0x90] sm:$0xff] }
 0x1ff   : > { %5813 = vpow2.f32 %v5612_v48  ;;  %v4114_v10 = vadd.f32 %v4035_v53, %v3712_v37  ;;  %v2978_v52 = vpop.f32.mrf.mxu2  ;;  %v8073_v37 = vpack.c.b16 %v7078_v60, %v7075_v51  ;;  %v3415_v53 = vrot.slane %v3414_v2, 4 }
 0x200   : > { %v3055_v30 = vadd.f32 %v2978_v52, %v2764_v58  ;;  %v2539_v51 = vsel %vm6252_vm6, %v2537_v24, %v2538_v35  ;;  %v5585_v60 = vrot.slane %v5569_v56, 9  ;;  %v3942_v48 = vunpack.c.l.b16 %v3880_v47  ;;  %v5524_v47 = vld [vmem:[%s6057_s30 + $0xa8] sm:$0xf] }
 0x201   : > { %v4150_v41 = vmul.f32 %v7092_v20, %v4114_v10  ;;  %5551 = vmatmul.msk.bf16.gmra.mxu3 %vm693_vm3, %v8073_v37  ;;  %v3888_v58 = vrot.slane %v3886_v49, 4  ;;  %v3410_v35 = vsel %vm6069_vm2, %v3405_v17, %v7124_v3  ;;  %v3420_v45 = vsel %vm6069_vm2, %v3415_v53, %v3419_v40 }
 0x202   : > { %v2593_v10 = vunpack.c.l.b16 %v2536_v16  ;;  %v2594_v52 = vunpack.c.l.b16 %v2539_v51  ;;  %v3887_v3 = vsel %vm6252_vm6, %v5585_v60, %v3886_v49  ;;  %v7189_v5 = vunpack.c.l.b16 %v3420_v45 }
 0x203   : > { %v7161_v0 = vadd.f32 %v7110_v62, %v4150_v41  ;;  %v4038_v61 = vpop.f32.mrf.mxu0  ;;  %v3890_v25 = vsel %vm6252_vm6, %v3888_v58, %v3889_v57  ;;  %v3944_v56 = vunpack.c.l.b16 %v3887_v3  ;;  %v3422_v37 = vshrl.u32 %v5524_v47, 16  ;;  %v5983_v58 = vld [vmem:[%s6057_s30 + $0xa0] sm:$0xf] }
 0x204   : > { %v3636_v2 = vpop.f32.mrf.mxu3  ;;  %v2692_v50 = vpop.f32.mrf.mxu1  ;;  %v3945_v41 = vunpack.c.l.b16 %v3890_v25  ;;  %v3964_v16 = vpack.c.b16 %v3943_v27, %v3942_v48  ;;  %v7197_v49 = vpack.c.b16 %v2594_v52, %v2593_v10 }
 0x205   : > { %v5814_v7 = vpop.eup %5813  ;;  %v5613_v44 = vmul.f32 -1.442695, %v7161_v0  ;;  %v3713_v9 = vadd.f32 %v3636_v2, %v3055_v30  ;;  %v3425_v30 = vshll.u32 %v5524_v47, 16  ;;  %v2766_v60 = vadd.f32 %v2692_v50, %v6572_v15  ;;  %v5328_v15 = vld [vmem:[%s6057_s30 + $0x9c] sm:$0xe] }
 0x206   : > { %v7174_v23 = vadd.f32 1.0, %v5814_v7  ;;  %5605 = vmatmul.msk.bf16.gmra.mxu0 %vm693_vm3, %v7096_v33  ;;  %v7187_v33 = vunpack.c.l.b16 %v3410_v35  ;;  %v2542_v7 = vrot.slane %v5983_v58, 5  ;;  %v7216_v35 = vpack.c.b16 %v3945_v41, %v3944_v56  ;;  %v5984_v41 = vld [vmem:[%s6057_s30 + $0xa4] sm:$0x1] }
 0x207   : > { %5815 = vpow2.f32 %v5613_v44  ;;  %v4115_v24 = vadd.f32 %v4038_v61, %v3713_v9  ;;  %v2980_v12 = vpop.f32.mrf.mxu2  ;;  %5364 = vmatmul.msk.bf16.gmra.mxu1 %vm693_vm3, %v2613_v11  ;;  %v3562_v11 = vpack.c.b16 %v7166_v22, %v7155_v42  ;;  %v7206_v44 = vld [vmem:[%s6057_s30 + $0xac] sm:$0xf]  ;;  %v3424_v45 = vrot.slane %v3422_v37, 4 }
 0x208   : > { %5817 = vrcp.f32 %v7174_v23  ;;  %v3056_v17 = vadd.f32 %v2980_v12, %v2765_v32  ;;  %v4354_v61 = vand.u32 2147483647, %v7174_v23  ;;  %vm4350_vm7 = vweird.f32 %v7174_v23  ;;  %v7221_v12 = vld [vmem:[%s6057_s30 + $0xb0] sm:$0x1] }
 0x209   : > { %v4151_v55 = vmul.f32 %v7092_v20, %v4115_v24  ;;  %v4356_v22 = vand.u32 2147483648, %v7174_v23  ;;  %v3427_v32 = vrot.slane %v3425_v30, 5  ;;  %v3431_v3 = vshll.u32 %v7206_v44, 16 }
 0x20a   : > { %v5344_v25 = vrot.slane %v5328_v15, 9  ;;  %v2544_v47 = vrot.slane %v2542_v7, 4  ;;  %v2545_v37 = vrot.slane %v5984_v41, 5  ;;  %vm7229_vm8 = vcmp.eq.f32.partialorder %v4354_v61, 8.507059e+37 }
 0x20b   : > { %v7193_v53 = vadd.f32 %v7110_v62, %v4151_v55  ;;  %v4040_v40 = vpop.f32.mrf.mxu0  ;;  %v3441_v58 = vshll.u32 %v7221_v12, 16 }
 0x20c   : > { %v3638_v51 = vpop.f32.mrf.mxu3  ;;  %5482 = vmatmul.msk.bf16.gmra.mxu2 %vm693_vm3, %v5695_v8  ;;  %v2694_v57 = vpop.f32.mrf.mxu1  ;;  %v3435_v8 = vshrl.u32 %v7206_v44, 16 }
 0x20d   : > { %v5816_v42 = vpop.eup %5815  ;;  %v5614_v48 = vmul.f32 -1.442695, %v7193_v53  ;;  %v3714_v27 = vadd.f32 %v3638_v51, %v3056_v17  ;;  %v3428_v51 = vor.u32 %v3427_v32, %v3424_v45 }
 0x20e   : > { %v7212_v50 = vpop.eup %5817  ;;  %v7214_v9 = vadd.f32 1.0, %v5816_v42  ;;  %v3437_v45 = vrot.slane %v3435_v8, 4 }
 0x20f   : > { %v4346_v10 = vmul.f32 %v7212_v50, %v7174_v23  ;;  %5819 = vpow2.f32 %v5614_v48  ;;  %v4116_v52 = vadd.f32 %v4040_v40, %v3714_v27  ;;  %v2983_v24 = vpop.f32.mrf.mxu2  ;;  %v4357_v40 = vor.u32 1.1754944e-38, %v4356_v22 }
 0x210   : > { %5821 = vrcp.f32 %v7214_v9  ;;  %v3057_v56 = vadd.f32 %v2983_v24, %v2766_v60  ;;  %vm4351_vm9 = vweird.f32 %v7212_v50  ;;  %v4369_v60 = vand.u32 2147483647, %v7214_v9 }
 0x211   : > { %v4347_v55 = vsub.f32 1.0, %v4346_v10  ;;  %v4152_v17 = vmul.f32 %v7092_v20, %v4116_v52  ;;  %5552 = vmatmul.msk.bf16.gmra.mxu3 %vm693_vm3, %v3562_v11  ;;  %v3433_v11 = vrot.slane %v3431_v3, 5  ;;  %v4371_v61 = vand.u32 2147483648, %v7214_v9  ;;  %vm7251_vm10 = vmor %vm4350_vm7, %vm4351_vm9 }
 0x212   : > { %v2543_v22 = vsel %vm6252_vm6, %v5344_v25, %v2542_v7  ;;  %v2546_v3 = vsel %vm6252_vm6, %v2544_v47, %v2545_v37  ;;  %vm4365_vm11 = vweird.f32 %v7214_v9  ;;  %v2767_v25 = vadd.f32 %v2694_v57, %v6585_v29  ;;  %v5696_v29 = vld [vmem:[%s6057_s30 + $0x9c] sm:$0xff] }
 0x213   : > { %v4348_v42 = vmul.f32 %v7212_v50, %v4347_v55  ;;  %v7237_v48 = vadd.f32 %v7110_v62, %v4152_v17  ;;  %v4043_v27 = vpop.f32.mrf.mxu0  ;;  %v3429_v8 = vrot.slane %v3428_v51, 4  ;;  %v3438_v37 = vor.u32 %v3437_v45, %v3433_v11 }
 0x214   : > { %v3641_v15 = vpop.f32.mrf.mxu3  ;;  %v2697_v10 = vpop.f32.mrf.mxu1  ;;  %vm7267_vm12 = vcmp.eq.f32.partialorder %v4369_v60, 8.507059e+37  ;;  %v2596_v57 = vunpack.c.l.b16 %v2546_v3 }
 0x215   : > { %v5820_v32 = vpop.eup %5819  ;;  %v4349_v52 = vadd.f32 %v7212_v50, %v4348_v42  ;;  %v5615_v24 = vmul.f32 -1.442695, %v7237_v48  ;;  %v3715_v55 = vadd.f32 %v3641_v15, %v3057_v56  ;;  %v5570_v42 = vld [vmem:[%s6057_s30 + $0xa8] sm:$0xe]  ;;  %v3439_v46 = vrot.slane %v3438_v37, 4 }
 0x216   : > { %v5822_v17 = vpop.eup %5821  ;;  %v7256_v7 = vadd.f32 1.0, %v5820_v32  ;;  %5606 = vmatmul.msk.bf16.gmra.mxu0 %vm693_vm3, %v3964_v16  ;;  %v2595_v16 = vunpack.c.l.b16 %v2543_v22  ;;  %v5586_v60 = vrot.slane %v5570_v42, 9 }
 0x217   : > { %v4353_v47 = vsel %vm7251_vm10, %v7212_v50, %v4349_v52  ;;  %v4361_v23 = vmul.f32 %v5822_v17, %v7214_v9  ;;  %5823 = vpow2.f32 %v5615_v24  ;;  %v2985_v56 = vpop.f32.mrf.mxu2  ;;  %5365 = vmatmul.msk.bf16.gmra.mxu1 %vm693_vm3, %v7197_v49  ;;  %v4372_v50 = vor.u32 1.1754944e-38, %v4371_v61 }
 0x218   : > { %5825 = vrcp.f32 %v7256_v7  ;;  %v4117_v32 = vadd.f32 %v4043_v27, %v3715_v55  ;;  %v3443_v52 = vrot.slane %v3441_v58, 5  ;;  %v4358_v24 = vsel %vm7229_vm8, %v4357_v40, %v4353_v47 }
 0x219   : > { %v4362_v51 = vsub.f32 1.0, %v4361_v23  ;;  %v3058_v41 = vadd.f32 %v2985_v56, %v2767_v25  ;;  %v3434_v49 = vsel %vm6069_vm2, %v3429_v8, %v3433_v11  ;;  %vm4366_vm13 = vweird.f32 %v5822_v17 }
 0x21a   : > { %v4153_v2 = vmul.f32 %v7092_v20, %v4117_v32  ;;  %v4384_v22 = vand.u32 2147483647, %v7256_v7  ;;  %v2768_v27 = vadd.f32 %v2697_v10, %v6597_v34  ;;  %v7281_v40 = vpack.c.b16 %v2596_v57, %v2595_v16  ;;  %vm4367_vm15 = vmor %vm4365_vm11, %vm4366_vm13 }
 0x21b   : > { %v4363_v45 = vmul.f32 %v5822_v17, %v4362_v51  ;;  %v4045_v1 = vpop.f32.mrf.mxu0  ;;  %v3893_v58 = vrot.slane %v7206_v44, 5  ;;  %v4825_v61 = vmul.f32 %v4358_v24, %v7127_v36  ;;  %vm4380_vm14 = vweird.f32 %v7256_v7 }
 0x21c   : > { %v3643_v3 = vpop.f32.mrf.mxu3  ;;  %5483 = vmatmul.msk.bf16.gmra.mxu2 %vm693_vm3, %v5696_v29  ;;  %v2699_v30 = vpop.f32.mrf.mxu1  ;;  %v4386_v25 = vand.u32 2147483648, %v7256_v7  ;;  %v7288_v8 = vadd.f32 %v7110_v62, %v4153_v2  ;;  %v7297_v47 = vunpack.c.l.b16 %v3434_v49  ;;  %v3444_v9 = vsel %vm6069_vm2, %v3439_v46, %v3443_v52  ;;  %v5329_v52 = vld [vmem:[%s6057_s30 + $0xa8] sm:$0xe] }
 0x21d   : > { %v5824_v11 = vpop.eup %5823  ;;  %v4364_v55 = vadd.f32 %v5822_v17, %v4363_v45  ;;  %v3716_v44 = vadd.f32 %v3643_v3, %v3058_v41  ;;  %v7301_v36 = vsel %vm6252_vm6, %v5586_v60, %v3893_v58  ;;  %v3895_v29 = vrot.slane %v3893_v58, 4  ;;  %v5985_v3 = vld [vmem:[%s6057_s30 + $0xac] sm:$0xf] }
 0x21e   : > { %v7290_v34 = vpop.eup %5825  ;;  %v7295_v10 = vadd.f32 1.0, %v5824_v11  ;;  %v5616_v56 = vmul.f32 -1.442695, %v7288_v8  ;;  %v3896_v16 = vrot.slane %v7221_v12, 5  ;;  %vm7314_vm0 = vcmp.eq.f32.partialorder %v4384_v22, 8.507059e+37 }
 0x21f   : > { %v4368_v23 = vsel %vm4367_vm15, %v5822_v17, %v4364_v55  ;;  %v4376_v2 = vmul.f32 %v7290_v34, %v7256_v7  ;;  %v2988_v37 = vpop.f32.mrf.mxu2  ;;  %v4387_v32 = vor.u32 1.1754944e-38, %v4386_v25  ;;  %v8082_v46 = vpack.c.b16 %v7189_v5, %v7187_v33  ;;  %v5527_v25 = vld [vmem:[%s6057_s30 + $0xb4] sm:$0xf] }
 0x220   : > { %v4373_v42 = vsel %vm7267_vm12, %v4372_v50, %v4368_v23  ;;  %5827 = vrcp.f32 %v7295_v10  ;;  %v4118_v12 = vadd.f32 %v4045_v1, %v3716_v44  ;;  %v7327_v15 = vunpack.c.l.b16 %v3444_v9  ;;  %v5986_v23 = vld [vmem:[%s6057_s30 + $0xb0] sm:$0x1] }
 0x221   : > { %v4826_v17 = vmul.f32 %v4373_v42, %v7161_v0  ;;  %v4377_v57 = vsub.f32 1.0, %v4376_v2  ;;  %5829 = vpow2.f32 %v5616_v56  ;;  %5553 = vmatmul.msk.bf16.gmra.mxu3 %vm693_vm3, %v8082_v46  ;;  %v3059_v0 = vadd.f32 %v2988_v37, %v2768_v27 }
 0x222   : > { %v3946_v50 = vunpack.c.l.b16 %v7301_v36  ;;  %vm4381_vm1 = vweird.f32 %v7290_v34  ;;  %v4399_v33 = vand.u32 2147483647, %v7295_v10  ;;  %v4154_v49 = vmul.f32 %v7092_v20, %v4118_v12 }
 0x223   : > { %v5707_v24 = vpack.c.bf16 %v4826_v17, %v4825_v61  ;;  %v4378_v41 = vmul.f32 %v7290_v34, %v4377_v57  ;;  %v4048_v5 = vpop.f32.mrf.mxu0  ;;  %v2769_v1 = vadd.f32 %v2699_v30, %v6610_v21  ;;  %v3897_v22 = vsel %vm6252_vm6, %v3895_v29, %v3896_v16  ;;  %vm7347_vm4 = vmor %vm4380_vm14, %vm4381_vm1  ;;  %v5697_v17 = vld [vmem:[%s6057_s30 + $0xa8] sm:$0xff] }
 0x224   : > { %v3646_v60 = vpop.f32.mrf.mxu3  ;;  %v2702_v45 = vpop.f32.mrf.mxu1  ;;  %v2549_v27 = vrot.slane %v5985_v3, 5  ;;  %v4401_v11 = vand.u32 2147483648, %v7295_v10  ;;  %v5345_v55 = vrot.slane %v5329_v52, 9  ;;  %vm4395_vm5 = vweird.f32 %v7295_v10 }
 0x225   : > { %5708 = vst [vmem:[%s7325_s21] sm:$0xff] %v5707_v24   ;;  %v4379_v58 = vadd.f32 %v7290_v34, %v4378_v41  ;;  %v3717_v61 = vadd.f32 %v3646_v60, %v3059_v0  ;;  %v7353_v30 = vadd.f32 %v7110_v62, %v4154_v49  ;;  %v3564_v36 = vpack.c.b16 %v7327_v15, %v7297_v47  ;;  %v7386_v49 = vld [vmem:[%s6057_s30 + $0xb8] sm:$0xf] }
 0x226   : > { %v5828_v44 = vpop.eup %5827  ;;  %5607 = vmatmul.msk.bf16.gmra.mxu0 %vm693_vm3, %v7216_v35  ;;  %v2552_v2 = vrot.slane %v5986_v23, 5  ;;  %vm7364_vm7 = vcmp.eq.f32.partialorder %v4399_v33, 8.507059e+37  ;;  %v2551_v35 = vrot.slane %v2549_v27, 4  ;;  %v3947_v57 = vunpack.c.l.b16 %v3897_v22 }
 0x227   : > { %v5830_v56 = vpop.eup %5829  ;;  %v4383_v7 = vsel %vm7347_vm4, %v7290_v34, %v4379_v58  ;;  %v4391_v37 = vmul.f32 %v5828_v44, %v7295_v10  ;;  %v4119_v42 = vadd.f32 %v4048_v5, %v3717_v61  ;;  %v2990_v29 = vpop.f32.mrf.mxu2  ;;  %5366 = vmatmul.msk.bf16.gmra.mxu1 %vm693_vm3, %v7281_v40  ;;  %v5617_v16 = vmul.f32 -1.442695, %v7353_v30 }
 0x228   : > { %v7370_v47 = vadd.f32 1.0, %v5830_v56  ;;  %v3446_v34 = vshrl.u32 %v5527_v25, 16  ;;  %v4402_v12 = vor.u32 1.1754944e-38, %v4401_v11  ;;  %v3060_v15 = vadd.f32 %v2990_v29, %v2769_v1 }
 0x229   : > { %v4392_v46 = vsub.f32 1.0, %v4391_v37  ;;  %v4155_v0 = vmul.f32 %v7092_v20, %v4119_v42  ;;  %v4388_v52 = vsel %vm7314_vm0, %v4387_v32, %v4383_v7  ;;  %vm4396_vm8 = vweird.f32 %v5828_v44 }
 0x22a   : > { %5831 = vrcp.f32 %v7370_v47  ;;  %v2550_v40 = vsel %vm6252_vm6, %v5345_v55, %v2549_v27  ;;  %v2553_v5 = vsel %vm6252_vm6, %v2551_v35, %v2552_v2  ;;  %v2770_v51 = vadd.f32 %v2702_v45, %v6624_v18  ;;  %vm4397_vm9 = vmor %vm4395_vm5, %vm4396_vm8 }
 0x22b   : > { %v4393_v24 = vmul.f32 %v5828_v44, %v4392_v46  ;;  %5833 = vpow2.f32 %v5617_v16  ;;  %v7381_v41 = vadd.f32 %v7110_v62, %v4155_v0  ;;  %v4050_v33 = vpop.f32.mrf.mxu0  ;;  %v3966_v32 = vpack.c.b16 %v3947_v57, %v3946_v50  ;;  %v7409_v16 = vld [vmem:[%s6057_s30 + $0xbc] sm:$0x1] }
 0x22c   : > { %v3648_v60 = vpop.f32.mrf.mxu3  ;;  %5484 = vmatmul.msk.bf16.gmra.mxu2 %vm693_vm3, %v5697_v17  ;;  %v2704_v1 = vpop.f32.mrf.mxu1  ;;  %v3448_v22 = vrot.slane %v3446_v34, 4  ;;  %v3449_v3 = vshll.u32 %v5527_v25, 16  ;;  %v4827_v27 = vmul.f32 %v4388_v52, %v7193_v53  ;;  %v2597_v55 = vunpack.c.l.b16 %v2550_v40  ;;  %v5330_v52 = vld [vmem:[%s6057_s30 + $0xb4] sm:$0xe] }
 0x22d   : > { %v4394_v58 = vadd.f32 %v5828_v44, %v4393_v24  ;;  %v5618_v11 = vmul.f32 -1.442695, %v7381_v41  ;;  %v3718_v61 = vadd.f32 %v3648_v60, %v3060_v15  ;;  %v2598_v21 = vunpack.c.l.b16 %v2553_v5 }
 0x22e   : > { %v3451_v23 = vrot.slane %v3449_v3, 5  ;;  %v3455_v18 = vshll.u32 %v7386_v49, 16  ;;  %v3459_v53 = vshrl.u32 %v7386_v49, 16  ;;  %vm4410_vm10 = vweird.f32 %v7370_v47 }
 0x22f   : > { %v4398_v45 = vsel %vm4397_vm9, %v5828_v44, %v4394_v58  ;;  %5835 = vpow2.f32 %v5618_v11  ;;  %v4120_v50 = vadd.f32 %v4050_v33, %v3718_v61  ;;  %v2993_v25 = vpop.f32.mrf.mxu2  ;;  %v4414_v10 = vand.u32 2147483647, %v7370_v47 }
 0x230   : > { %v7397_v2 = vpop.eup %5831  ;;  %v4403_v56 = vsel %vm7364_vm7, %v4402_v12, %v4398_v45  ;;  %v3452_v7 = vor.u32 %v3451_v23, %v3448_v22  ;;  %v3061_v35 = vadd.f32 %v2993_v25, %v2770_v51  ;;  %v4416_v9 = vand.u32 2147483648, %v7370_v47 }
 0x231   : > { %v5834_v37 = vpop.eup %5833  ;;  %v4828_v42 = vmul.f32 %v4403_v56, %v7237_v48  ;;  %v4406_v44 = vmul.f32 %v7397_v2, %v7370_v47  ;;  %v4156_v29 = vmul.f32 %v7092_v20, %v4120_v50  ;;  %5554 = vmatmul.msk.bf16.gmra.mxu3 %vm693_vm3, %v3564_v36  ;;  %v2616_v57 = vpack.c.b16 %v2598_v21, %v2597_v55 }
 0x232   : > { %v7412_v17 = vadd.f32 1.0, %v5834_v37  ;;  %v3457_v34 = vrot.slane %v3455_v18, 5  ;;  %v3461_v15 = vrot.slane %v3459_v53, 4  ;;  %vm7417_vm11 = vcmp.eq.f32.partialorder %v4414_v10, 8.507059e+37  ;;  %v5571_v18 = vld [vmem:[%s6057_s30 + $0xb4] sm:$0xe] }
 0x233   : > { %v5712_v46 = vpack.c.bf16 %v4828_v42, %v4827_v27  ;;  %v4407_v12 = vsub.f32 1.0, %v4406_v44  ;;  %v7415_v48 = vadd.f32 %v7110_v62, %v4156_v29  ;;  %v4053_v0 = vpop.f32.mrf.mxu0  ;;  %v3453_v24 = vrot.slane %v3452_v7, 4 }
 0x234   : > { %5837 = vrcp.f32 %v7412_v17  ;;  %v3651_v36 = vpop.f32.mrf.mxu3  ;;  %v2707_v40 = vpop.f32.mrf.mxu1  ;;  %v3465_v33 = vshll.u32 %v7409_v16, 16  ;;  %vm4411_vm12 = vweird.f32 %v7397_v2  ;;  %v4429_v3 = vand.u32 2147483647, %v7412_v17 }
 0x235   : > { %v5836_v5 = vpop.eup %5835  ;;  %5784 = vst [vmem:[%s7325_s21 + $0x8] sm:$0xff] %v5712_v46   ;;  %v4408_v60 = vmul.f32 %v7397_v2, %v4407_v12  ;;  %v5619_v51 = vmul.f32 -1.442695, %v7415_v48  ;;  %v3719_v22 = vadd.f32 %v3651_v36, %v3061_v35  ;;  %v4431_v27 = vand.u32 2147483648, %v7412_v17  ;;  %vm7440_vm13 = vmor %vm4410_vm10, %vm4411_vm12 }
 0x236   : > { %v7429_v58 = vadd.f32 1.0, %v5836_v5  ;;  %5608 = vmatmul.msk.bf16.gmra.mxu0 %vm693_vm3, %v3966_v32  ;;  %v2771_v11 = vadd.f32 %v2704_v1, %v6637_v39  ;;  %v3462_v23 = vor.u32 %v3461_v15, %v3457_v34  ;;  %v4417_v32 = vor.u32 1.1754944e-38, %v4416_v9  ;;  %v5698_v39 = vld [vmem:[%s6057_s30 + $0xb4] sm:$0xff] }
 0x237   : > { %v4409_v61 = vadd.f32 %v7397_v2, %v4408_v60  ;;  %5839 = vpow2.f32 %v5619_v51  ;;  %v4121_v55 = vadd.f32 %v4053_v0, %v3719_v22  ;;  %v2995_v21 = vpop.f32.mrf.mxu2  ;;  %5367 = vmatmul.msk.bf16.gmra.mxu1 %vm693_vm3, %v2616_v57  ;;  %v3458_v1 = vsel %vm6069_vm2, %v3453_v24, %v3457_v34 }
 0x238   : > { %5841 = vrcp.f32 %v7429_v58  ;;  %v3467_v50 = vrot.slane %v3465_v33, 5  ;;  %v3062_v56 = vadd.f32 %v2995_v21, %v2771_v11  ;;  %v3463_v47 = vrot.slane %v3462_v23, 4 }
 0x239   : > { %v4413_v25 = vsel %vm7440_vm13, %v7397_v2, %v4409_v61  ;;  %v4157_v53 = vmul.f32 %v7092_v20, %v4121_v55  ;;  %vm4425_vm14 = vweird.f32 %v7412_v17  ;;  %v4432_v7 = vor.u32 1.1754944e-38, %v4431_v27 }
 0x23a   : > { %v5838_v10 = vpop.eup %5837  ;;  %v2772_v37 = vadd.f32 %v2707_v40, %v6653_v6  ;;  %v5587_v42 = vrot.slane %v5571_v18, 9  ;;  %vm7455_vm15 = vcmp.eq.f32.partialorder %v4429_v3, 8.507059e+37  ;;  %v4444_v35 = vand.u32 2147483647, %v7429_v58 }
 0x23b   : > { %v4421_v44 = vmul.f32 %v5838_v10, %v7412_v17  ;;  %v4446_v2 = vand.u32 2147483648, %v7429_v58  ;;  %v7462_v9 = vadd.f32 %v7110_v62, %v4157_v53  ;;  %v4055_v57 = vpop.f32.mrf.mxu0  ;;  %v4418_v34 = vsel %vm7417_vm11, %v4417_v32, %v4413_v25 }
 0x23c   : > { %v3653_v6 = vpop.f32.mrf.mxu3  ;;  %5485 = vmatmul.msk.bf16.gmra.mxu2 %vm693_vm3, %v5698_v39  ;;  %v3468_v46 = vsel %vm6069_vm2, %v3463_v47, %v3467_v50  ;;  %v3546_v12 = vunpack.c.l.b16 %v3458_v1  ;;  %v3900_v0 = vrot.slane %v7386_v49, 5  ;;  %v2709_v15 = vpop.f32.mrf.mxu1  ;;  %vm4440_vm0 = vweird.f32 %v7429_v58 }
 0x23d   : > { %v5840_v36 = vpop.eup %5839  ;;  %v4422_v40 = vsub.f32 1.0, %v4421_v44  ;;  %v5620_v24 = vmul.f32 -1.442695, %v7462_v9  ;;  %v3720_v33 = vadd.f32 %v3653_v6, %v3062_v56  ;;  %v3547_v5 = vunpack.c.l.b16 %v3468_v46 }
 0x23e   : > { %v5842_v60 = vpop.eup %5841  ;;  %vm4426_vm1 = vweird.f32 %v5838_v10  ;;  %v7473_v51 = vadd.f32 1.0, %v5840_v36  ;;  %v3902_v22 = vrot.slane %v3900_v0, 4  ;;  %v3903_v3 = vrot.slane %v7409_v16, 5 }
 0x23f   : > { %v4423_v27 = vmul.f32 %v5838_v10, %v4422_v40  ;;  %v4436_v49 = vmul.f32 %v5842_v60, %v7429_v58  ;;  %vm7477_vm4 = vcmp.eq.f32.partialorder %v4444_v35, 8.507059e+37  ;;  %5843 = vpow2.f32 %v5620_v24  ;;  %v2998_v55 = vpop.f32.mrf.mxu2  ;;  %vm4427_vm5 = vmor %vm4425_vm14, %vm4426_vm1 }
 0x240   : > { %v3901_v61 = vsel %vm6252_vm6, %v5587_v42, %v3900_v0  ;;  %v4829_v21 = vmul.f32 %v4418_v34, %v7288_v8  ;;  %v4447_v23 = vor.u32 1.1754944e-38, %v4446_v2  ;;  %5845 = vrcp.f32 %v7473_v51 }
 0x241   : > { %v5346_v18 = vrot.slane %v5330_v52, 9  ;;  %v4424_v45 = vadd.f32 %v5838_v10, %v4423_v27  ;;  %v4437_v16 = vsub.f32 1.0, %v4436_v49  ;;  %v4122_v32 = vadd.f32 %v4055_v57, %v3720_v33  ;;  %v5988_v52 = vld [vmem:[%s6057_s30 + $0xbc] sm:$0x1] }
 0x242   : > { %v3565_v39 = vpack.c.b16 %v3547_v5, %v3546_v12  ;;  %vm4441_vm7 = vweird.f32 %v5842_v60  ;;  %v4459_v1 = vand.u32 2147483647, %v7473_v51  ;;  %v3904_v50 = vsel %vm6252_vm6, %v3902_v22, %v3903_v3  ;;  %v5699_v22 = vld [vmem:[%s6057_s30 + $0xc0] sm:$0xff] }
 0x243   : > { %v3948_v25 = vunpack.c.l.b16 %v3901_v61  ;;  %v4428_v8 = vsel %vm4427_vm5, %v5838_v10, %v4424_v45  ;;  %v4438_v53 = vmul.f32 %v5842_v60, %v4437_v16  ;;  %v4158_v56 = vmul.f32 %v7092_v20, %v4122_v32  ;;  %v4058_v47 = vpop.f32.mrf.mxu0  ;;  %vm4442_vm8 = vmor %vm4440_vm0, %vm4441_vm7  ;;  %v5530_v3 = vld [vmem:[%s6057_s30 + $0xc0] sm:$0xf]  ;;  %v7528_v45 = vld [vmem:[%s6057_s30 + $0xc4] sm:$0xf] }
 0x244   : > { %5555 = vmatmul.msk.bf16.gmra.mxu3 %vm693_vm3, %v3565_v39  ;;  %v3949_v42 = vunpack.c.l.b16 %v3904_v50  ;;  %v4433_v44 = vsel %vm7455_vm15, %v4432_v7, %v4428_v8  ;;  %v4461_v17 = vand.u32 2147483648, %v7473_v51  ;;  %v3063_v35 = vadd.f32 %v2998_v55, %v2772_v37  ;;  %v3656_v2 = vpop.f32.mrf.mxu3  ;;  %v7497_v34 = vpop.f32.mrf.mxu1 }
 0x245   : > { %v2773_v57 = vadd.f32 %v2709_v15, %v6678_v43  ;;  %v5844_v10 = vpop.eup %5843  ;;  %v4830_v6 = vmul.f32 %v4433_v44, %v7353_v30  ;;  %v4439_v46 = vadd.f32 %v5842_v60, %v4438_v53  ;;  %v7501_v12 = vadd.f32 %v7110_v62, %v4158_v56  ;;  %v5987_v30 = vld [vmem:[%s6057_s30 + $0xb8] sm:$0xf] }
 0x246   : > { %v3967_v0 = vpack.c.b16 %v3949_v42, %v3948_v25  ;;  %v5846_v36 = vpop.eup %5845  ;;  %vm4455_vm9 = vweird.f32 %v7473_v51  ;;  %v7507_v43 = vadd.f32 1.0, %v5844_v10  ;;  %v3721_v7 = vadd.f32 %v3656_v2, %v3063_v35 }
 0x247   : > { %v2556_v37 = vrot.slane %v5987_v30, 5  ;;  %v5717_v29 = vpack.c.bf16 %v4830_v6, %v4829_v21  ;;  %v4443_v15 = vsel %vm4442_vm8, %v5842_v60, %v4439_v46  ;;  %v4451_v40 = vmul.f32 %v5846_v36, %v7473_v51  ;;  %v3000_v58 = vpop.f32.mrf.mxu2 }
 0x248   : > { %vm7511_vm10 = vcmp.eq.f32.partialorder %v4459_v1, 8.507059e+37  ;;  %5609 = vmatmul.msk.bf16.gmra.mxu0 %vm693_vm3, %v3967_v0  ;;  %v4448_v33 = vsel %vm7477_vm4, %v4447_v23, %v4443_v15  ;;  %5847 = vrcp.f32 %v7507_v43  ;;  %v2559_v60 = vrot.slane %v5988_v52, 5  ;;  %v5532_v15 = vld [vmem:[%s6057_s30 + $0xc8] sm:$0x1] }
 0x249   : > { %v2557_v5 = vsel %vm6252_vm6, %v5346_v18, %v2556_v37  ;;  %5785 = vst [vmem:[%s7325_s21 + $0x10] sm:$0xff] %v5717_v29   ;;  %v4452_v27 = vsub.f32 1.0, %v4451_v40  ;;  %vm4456_vm11 = vweird.f32 %v5846_v36  ;;  %v4462_v49 = vor.u32 1.1754944e-38, %v4461_v17 }
 0x24a   : > { %v5621_v61 = vmul.f32 -1.442695, %v7501_v12  ;;  %v4474_v55 = vand.u32 2147483647, %v7507_v43  ;;  %v4123_v11 = vadd.f32 %v4058_v47, %v3721_v7  ;;  %v3064_v21 = vadd.f32 %v3000_v58, %v2773_v57  ;;  %vm4457_vm12 = vmor %vm4455_vm9, %vm4456_vm11 }
 0x24b   : > { %v2558_v23 = vrot.slane %v2556_v37, 4  ;;  %v4831_v16 = vmul.f32 %v4448_v33, %v7381_v41  ;;  %v4453_v18 = vmul.f32 %v5846_v36, %v4452_v27  ;;  %v4060_v32 = vpop.f32.mrf.mxu0  ;;  %v2599_v39 = vunpack.c.l.b16 %v2557_v5 }
 0x24c   : > { %5849 = vpow2.f32 %v5621_v61  ;;  %v4159_v1 = vmul.f32 %v7092_v20, %v4123_v11  ;;  %v3658_v50 = vpop.f32.mrf.mxu3  ;;  %5486 = vmatmul.msk.bf16.gmra.mxu2 %vm693_vm3, %v5699_v22  ;;  %v3470_v8 = vshrl.u32 %v5530_v3, 16  ;;  %v3473_v53 = vshll.u32 %v5530_v3, 16  ;;  %v7535_v56 = vpop.f32.mrf.mxu1 }
 0x24d   : > { %v2560_v25 = vsel %vm6252_vm6, %v2558_v23, %v2559_v60  ;;  %v4454_v47 = vadd.f32 %v5846_v36, %v4453_v18  ;;  %v3722_v42 = vadd.f32 %v3658_v50, %v3064_v21  ;;  %v3479_v41 = vshll.u32 %v7528_v45, 16  ;;  %v5572_v21 = vld [vmem:[%s6057_s30 + $0xc0] sm:$0xe] }
 0x24e   : > { %v2600_v44 = vunpack.c.l.b16 %v2560_v25  ;;  %v7538_v17 = vpop.eup %5847  ;;  %v7544_v35 = vadd.f32 %v7110_v62, %v4159_v1  ;;  %v3472_v2 = vrot.slane %v3470_v8, 4  ;;  %v3475_v57 = vrot.slane %v3473_v53, 5 }
 0x24f   : > { %v3483_v10 = vshrl.u32 %v7528_v45, 16  ;;  %v4458_v6 = vsel %vm4457_vm12, %v5846_v36, %v4454_v47  ;;  %v4466_v46 = vmul.f32 %v7538_v17, %v7507_v43  ;;  %v4476_v0 = vand.u32 2147483648, %v7507_v43  ;;  %v3003_v30 = vpop.f32.mrf.mxu2 }
 0x250   : > { %v4124_v7 = vadd.f32 %v4060_v32, %v3722_v42  ;;  %v4463_v37 = vsel %vm7511_vm10, %v4462_v49, %v4458_v6  ;;  %v5622_v51 = vmul.f32 -1.442695, %v7544_v35  ;;  %v2617_v29 = vpack.c.b16 %v2600_v44, %v2599_v39  ;;  %v5533_v44 = vld [vmem:[%s6057_s30 + $0xcc] sm:$0xf] }
 0x251   : > { %v3476_v40 = vor.u32 %v3475_v57, %v3472_v2  ;;  %v4832_v33 = vmul.f32 %v4463_v37, %v7415_v48  ;;  %v4467_v5 = vsub.f32 1.0, %v4466_v46  ;;  %v3481_v52 = vrot.slane %v3479_v41, 5  ;;  %v5700_v57 = vld [vmem:[%s6057_s30 + $0xcc] sm:$0xff] }
 0x252   : > { %v5850_v58 = vpop.eup %5849  ;;  %v4160_v36 = vmul.f32 %v7092_v20, %v4124_v7  ;;  %5851 = vpow2.f32 %v5622_v51  ;;  %5368 = vmatmul.msk.bf16.gmra.mxu1 %vm693_vm3, %v2617_v29  ;;  %v3485_v22 = vrot.slane %v3483_v10, 4  ;;  %v3489_v61 = vshll.u32 %v5532_v15, 16  ;;  %v8097_v20 = vld [vmem:[#allocation2_spill] sm:$0xff] }
 0x253   : > { %v7556_v60 = vadd.f32 1.0, %v5850_v58  ;;  %v3477_v24 = vrot.slane %v3476_v40, 4  ;;  %v5722_v3 = vpack.c.bf16 %v4832_v33, %v4831_v16  ;;  %v4468_v27 = vmul.f32 %v7538_v17, %v4467_v5  ;;  %v4063_v48 = vpop.f32.mrf.mxu0  ;;  %v8104_v5 = vld [vmem:[#allocation3_spill] sm:$0xff] }
 0x254   : > { %v7561_v49 = vadd.f32 %v7110_v62, %v4160_v36  ;;  %vm4471_vm13 = vweird.f32 %v7538_v17  ;;  %v2774_v11 = vadd.f32 %v7497_v34, %v8097_v20  ;;  %v3661_v23 = vpop.f32.mrf.mxu3  ;;  %v7568_v18 = vpop.f32.mrf.mxu1  ;;  %v3486_v39 = vor.u32 %v3485_v22, %v3481_v52 }
 0x255   : > { %5853 = vrcp.f32 %v7556_v60  ;;  %5786 = vst [vmem:[%s7325_s21 + $0x18] sm:$0xff] %v5722_v3   ;;  %v4469_v16 = vadd.f32 %v7538_v17, %v4468_v27  ;;  %v3482_v62 = vsel %vm6069_vm2, %v3477_v24, %v3481_v52  ;;  %vm4470_vm14 = vweird.f32 %v7507_v43 }
 0x256   : > { %v5623_v32 = vmul.f32 -1.442695, %v7561_v49  ;;  %vm7578_vm15 = vcmp.eq.f32.partialorder %v4474_v55, 8.507059e+37  ;;  %v4477_v1 = vor.u32 1.1754944e-38, %v4476_v0  ;;  %v3491_v50 = vrot.slane %v3489_v61, 5  ;;  %vm7585_vm0 = vmor %vm4470_vm14, %vm4471_vm13 }
 0x257   : > { %v4489_v25 = vand.u32 2147483647, %v7556_v60  ;;  %v3487_v8 = vrot.slane %v3486_v39, 4  ;;  %v5588_v53 = vrot.slane %v5572_v21, 9  ;;  %v3005_v47 = vpop.f32.mrf.mxu2  ;;  %v3548_v43 = vunpack.c.l.b16 %v3482_v62  ;;  %v7625_v39 = vld [vmem:[%s8055_s2] ss:$0 sm:$0xff] }
 0x258   : > { %5855 = vpow2.f32 %v5623_v32  ;;  %v5852_v42 = vpop.eup %5851  ;;  %v3907_v55 = vrot.slane %v7528_v45, 5  ;;  %v3910_v41 = vrot.slane %v5532_v15, 5  ;;  %v3065_v2 = vadd.f32 %v3003_v30, %v2774_v11 }
 0x259   : > { %v4473_v10 = vsel %vm7585_vm0, %v7538_v17, %v4469_v16  ;;  %v4491_v6 = vand.u32 2147483648, %v7556_v60  ;;  %v7595_v46 = vadd.f32 1.0, %v5852_v42  ;;  %v3492_v0 = vsel %vm6069_vm2, %v3487_v8, %v3491_v50  ;;  %v5331_v16 = vld [vmem:[%s6057_s30 + $0xc0] sm:$0xe] }
 0x25a   : > { %v3549_v37 = vunpack.c.l.b16 %v3492_v0  ;;  %v3908_v51 = vsel %vm6252_vm6, %v5588_v53, %v3907_v55  ;;  %v3909_v45 = vrot.slane %v3907_v55, 4  ;;  %v3723_v29 = vadd.f32 %v3661_v23, %v3065_v2  ;;  %v7640_v53 = vld [vmem:[%s8056_s3] ss:$0 sm:$0xff] }
 0x25b   : > { %v5854_v7 = vpop.eup %5853  ;;  %vm4485_vm1 = vweird.f32 %v7556_v60  ;;  %vm7603_vm4 = vcmp.eq.f32.partialorder %v4489_v25, 8.507059e+37  ;;  %5857 = vrcp.f32 %v7595_v46  ;;  %v4065_v15 = vpop.f32.mrf.mxu0  ;;  %v4478_v40 = vsel %vm7578_vm15, %v4477_v1, %v4473_v10 }
 0x25c   : > { %v4481_v30 = vmul.f32 %v5854_v7, %v7556_v60  ;;  %v3566_v58 = vpack.c.b16 %v3549_v37, %v3548_v43  ;;  %v3911_v33 = vsel %vm6252_vm6, %v3909_v45, %v3910_v41  ;;  %v2775_v36 = vadd.f32 %v7535_v56, %v8104_v5  ;;  %v3663_v52 = vpop.f32.mrf.mxu3  ;;  %5487 = vmatmul.msk.bf16.gmra.mxu2 %vm693_vm3, %v5700_v57  ;;  %v7620_v32 = vpop.f32.mrf.mxu1  ;;  %v5991_v37 = vld [vmem:[%s6057_s30 + $0xc4] sm:$0xf]  ;;  %v5534_v5 = vld [vmem:[%s6057_s30 + $0xd0] sm:$0xf] }
 0x25d   : > { %v3950_v3 = vunpack.c.l.b16 %v3908_v51  ;;  %v3951_v27 = vunpack.c.l.b16 %v3911_v33  ;;  %v4125_v61 = vadd.f32 %v4063_v48, %v3723_v29  ;;  %v4492_v20 = vor.u32 1.1754944e-38, %v4491_v6 }
 0x25e   : > { %v5856_v24 = vpop.eup %5855  ;;  %v4482_v22 = vsub.f32 1.0, %v4481_v30  ;;  %v4506_v11 = vand.u32 2147483648, %v7595_v46  ;;  %5556 = vmatmul.msk.bf16.gmra.mxu3 %vm693_vm3, %v3566_v58  ;;  %v3066_v23 = vadd.f32 %v3005_v47, %v2775_v36  ;;  %vm4486_vm5 = vweird.f32 %v5854_v7  ;;  %v5992_v30 = vld [vmem:[%s6057_s30 + $0xc8] sm:$0x1] }
 0x25f   : > { %v7616_v21 = vadd.f32 1.0, %v5856_v24  ;;  %v3968_v62 = vpack.c.b16 %v3951_v27, %v3950_v3  ;;  %v4161_v48 = vmul.f32 %v7625_v39, %v4125_v61  ;;  %v7628_v34 = vpop.f32.mrf.mxu2  ;;  %v4833_v1 = vmul.f32 %v4478_v40, %v7462_v9  ;;  %vm4487_vm8 = vmor %vm4485_vm1, %vm4486_vm5 }
 0x260   : > { %v4483_v56 = vmul.f32 %v5854_v7, %v4482_v22  ;;  %vm4500_vm7 = vweird.f32 %v7595_v46  ;;  %v4504_v50 = vand.u32 2147483647, %v7595_v46  ;;  %v3724_v9 = vadd.f32 %v3663_v52, %v3066_v23 }
 0x261   : > { %5859 = vrcp.f32 %v7616_v21  ;;  %v7634_v25 = vpop.eup %5857  ;;  %5610 = vmatmul.msk.bf16.gmra.mxu0 %vm693_vm3, %v3968_v62  ;;  %v7643_v47 = vadd.f32 %v7640_v53, %v4161_v48  ;;  %v5347_v42 = vrot.slane %v5331_v16, 9  ;;  %v4507_v55 = vor.u32 1.1754944e-38, %v4506_v11 }
 0x262   : > { %v4484_v8 = vadd.f32 %v5854_v7, %v4483_v56  ;;  %v4496_v43 = vmul.f32 %v7634_v25, %v7595_v46  ;;  %v4519_v41 = vand.u32 2147483647, %v7616_v21  ;;  %v4521_v2 = vand.u32 2147483648, %v7616_v21  ;;  %v5535_v56 = vld [vmem:[%s6057_s30 + $0xd4] sm:$0x1] }
 0x263   : > { %v5624_v10 = vmul.f32 -1.442695, %v7643_v47  ;;  %v4126_v6 = vadd.f32 %v4065_v15, %v3724_v9  ;;  %v7654_v0 = vpop.f32.mrf.mxu0  ;;  %v2563_v51 = vrot.slane %v5991_v37, 5  ;;  %vm7659_vm9 = vcmp.eq.f32.partialorder %v4504_v50, 8.507059e+37 }
 0x264   : > { %v4488_v57 = vsel %vm4487_vm8, %v5854_v7, %v4484_v8  ;;  %v4497_v45 = vsub.f32 1.0, %v4496_v43  ;;  %v2566_v40 = vrot.slane %v5992_v30, 5  ;;  %v3494_v58 = vshrl.u32 %v5533_v44, 16  ;;  %v7664_v7 = vpop.f32.mrf.mxu3  ;;  %v7673_v3 = vpop.f32.mrf.mxu1 }
 0x265   : > { %v4493_v60 = vsel %vm7603_vm4, %v4492_v20, %v4488_v57  ;;  %5861 = vpow2.f32 %v5624_v10  ;;  %v4162_v15 = vmul.f32 %v7625_v39, %v4126_v6  ;;  %v2564_v17 = vsel %vm6252_vm6, %v5347_v42, %v2563_v51  ;;  %v5573_v10 = vld [vmem:[%s6057_s30 + $0xcc] sm:$0xe] }
 0x266   : > { %v4834_v33 = vmul.f32 %v4493_v60, %v7501_v12  ;;  %v4498_v52 = vmul.f32 %v7634_v25, %v4497_v45  ;;  %vm4501_vm10 = vweird.f32 %v7634_v25  ;;  %v2565_v24 = vrot.slane %v2563_v51, 4 }
 0x267   : > { %v5860_v36 = vpop.eup %5859  ;;  %v2601_v22 = vunpack.c.l.b16 %v2564_v17  ;;  %v7677_v61 = vadd.f32 %v7640_v53, %v4162_v15  ;;  %v3496_v20 = vrot.slane %v3494_v58, 4  ;;  %v7679_v11 = vpop.f32.mrf.mxu2  ;;  %v3497_v62 = vshll.u32 %v5533_v44, 16  ;;  %vm7690_vm11 = vmor %vm4500_vm7, %vm4501_vm10 }
 0x268   : > { %v5727_v27 = vpack.c.bf16 %v4834_v33, %v4833_v1  ;;  %v4511_v12 = vmul.f32 %v5860_v36, %v7616_v21  ;;  %v4499_v23 = vadd.f32 %v7634_v25, %v4498_v52  ;;  %v2567_v16 = vsel %vm6252_vm6, %v2565_v24, %v2566_v40 }
 0x269   : > { %v3503_v48 = vshll.u32 %v5534_v5, 16  ;;  %v5625_v8 = vmul.f32 -1.442695, %v7677_v61  ;;  %v2602_v9 = vunpack.c.l.b16 %v2567_v16  ;;  %v3507_v42 = vshrl.u32 %v5534_v5, 16 }
 0x26a   : > { %5787 = vst [vmem:[%s7325_s21 + $0x20] sm:$0xff] %v5727_v27   ;;  %v4512_v50 = vsub.f32 1.0, %v4511_v12  ;;  %v4503_v43 = vsel %vm7690_vm11, %v7634_v25, %v4499_v23  ;;  %vm4516_vm12 = vweird.f32 %v5860_v36  ;;  %v3499_v44 = vrot.slane %v3497_v62, 5 }
 0x26b   : > { %v3505_v57 = vrot.slane %v3503_v48, 5  ;;  %v5862_v6 = vpop.eup %5861  ;;  %5863 = vpow2.f32 %v5625_v8  ;;  %v2618_v46 = vpack.c.b16 %v2602_v9, %v2601_v22  ;;  %v3513_v51 = vshll.u32 %v5535_v56, 16  ;;  %v7699_v60 = vpop.f32.mrf.mxu0 }
 0x26c   : > { %v4513_v37 = vmul.f32 %v5860_v36, %v4512_v50  ;;  %vm4515_vm13 = vweird.f32 %v7616_v21  ;;  %v7702_v45 = vadd.f32 1.0, %v5862_v6  ;;  %v3500_v30 = vor.u32 %v3499_v44, %v3496_v20  ;;  %v3668_v58 = vpop.f32.mrf.mxu3  ;;  %v2724_v29 = vpop.f32.mrf.mxu1 }
 0x26d   : > { %v3509_v40 = vrot.slane %v3507_v42, 4  ;;  %v4508_v25 = vsel %vm7659_vm9, %v4507_v55, %v4503_v43  ;;  %5369 = vmatmul.msk.bf16.gmra.mxu1 %vm693_vm3, %v2618_v46  ;;  %v5589_v15 = vrot.slane %v5573_v10, 9  ;;  %v3914_v17 = vrot.slane %v5534_v5, 5  ;;  %vm4517_vm14 = vmor %vm4515_vm13, %vm4516_vm12 }
 0x26e   : > { %v4514_v33 = vadd.f32 %v5860_v36, %v4513_v37  ;;  %vm4520_vm15 = vcmp.eq.f32.partialorder %v4519_v41, 8.507059e+37  ;;  %v4522_v52 = vor.u32 1.1754944e-38, %v4521_v2  ;;  %5865 = vrcp.f32 %v7702_v45 }
 0x26f   : > { %v2776_v24 = vadd.f32 %v7568_v18, %v6722_v63  ;;  %v3501_v22 = vrot.slane %v3500_v30, 4  ;;  %v3510_v27 = vor.u32 %v3509_v40, %v3505_v57  ;;  %v3515_v12 = vrot.slane %v3513_v51, 5  ;;  %v3013_v20 = vpop.f32.mrf.mxu2 }
 0x270   : > { %v4518_v55 = vsel %vm4517_vm14, %v5860_v36, %v4514_v33  ;;  %v4835_v5 = vmul.f32 %v4508_v25, %v7544_v35  ;;  %v3915_v41 = vsel %vm6252_vm6, %v5589_v15, %v3914_v17  ;;  %v3916_v16 = vrot.slane %v3914_v17, 4 }
 0x271   : > { %v4523_v23 = vsel %vm4520_vm15, %v4522_v52, %v4518_v55  ;;  %v5864_v21 = vpop.eup %5863  ;;  %v3506_v63 = vsel %vm6069_vm2, %v3501_v22, %v3505_v57  ;;  %v3511_v18 = vrot.slane %v3510_v27, 4  ;;  %v3917_v36 = vrot.slane %v5535_v56, 5 }
 0x272   : > { %v4836_v2 = vmul.f32 %v4523_v23, %v7561_v49  ;;  %v7721_v62 = vadd.f32 1.0, %v5864_v21  ;;  %v3550_v48 = vunpack.c.l.b16 %v3506_v63  ;;  %v3067_v1 = vadd.f32 %v7628_v34, %v2776_v24 }
 0x273   : > { %v3516_v50 = vsel %vm6069_vm2, %v3511_v18, %v3515_v12  ;;  %v3918_v8 = vsel %vm6252_vm6, %v3916_v16, %v3917_v36  ;;  %v3952_v9 = vunpack.c.l.b16 %v3915_v41  ;;  %v4073_v49 = vpop.f32.mrf.mxu0  ;;  %v2777_v56 = vadd.f32 %v7620_v32, %v6741_v28 }
 0x274   : > { %v5732_v35 = vpack.c.bf16 %v4836_v2, %v4835_v5  ;;  %v5866_v42 = vpop.eup %5865  ;;  %5867 = vrcp.f32 %v7721_v62  ;;  %v3671_v43 = vpop.f32.mrf.mxu3  ;;  %v3551_v34 = vunpack.c.l.b16 %v3516_v50  ;;  %v3953_v57 = vunpack.c.l.b16 %v3918_v8 }
 0x275   : > { %v4526_v44 = vmul.f32 %v5866_v42, %v7702_v45  ;;  %v4534_v31 = vand.u32 2147483647, %v7702_v45  ;;  %v3725_v10 = vadd.f32 %v7664_v7, %v3067_v1  ;;  %v3068_v19 = vadd.f32 %v7679_v11, %v2777_v56  ;;  %v2727_v6 = vpop.f32.mrf.mxu1 }
 0x276   : > { %5788 = vst [vmem:[%s7325_s21 + $0x28] sm:$0xff] %v5732_v35   ;;  %v3567_v46 = vpack.c.b16 %v3551_v34, %v3550_v48  ;;  %v3969_v51 = vpack.c.b16 %v3953_v57, %v3952_v9  ;;  %v2778_v30 = vadd.f32 %v7673_v3, %v6761_v38  ;;  %v4536_v32 = vand.u32 2147483648, %v7702_v45 }
 0x277   : > { %v4527_v37 = vsub.f32 1.0, %v4526_v44  ;;  %v3015_v28 = vpop.f32.mrf.mxu2  ;;  %v4127_v40 = vadd.f32 %v7654_v0, %v3725_v10  ;;  %v3726_v25 = vadd.f32 %v3668_v58, %v3068_v19  ;;  %v2779_v33 = vadd.f32 %v2724_v29, %v6780_v13 }
 0x278   : > { %vm4531_vm2 = vweird.f32 %v5866_v42  ;;  %5557 = vmatmul.msk.bf16.gmra.mxu3 %vm693_vm3, %v3567_v46  ;;  %5611 = vmatmul.msk.bf16.gmra.mxu0 %vm693_vm3, %v3969_v51  ;;  %v3069_v7 = vadd.f32 %v3013_v20, %v2778_v30  ;;  %vm4530_vm6 = vweird.f32 %v7702_v45  ;;  %vm7746_vm0 = vcmp.eq.f32.partialorder %v4534_v31, 8.507059e+37 }
 0x279   : > { %v4528_v15 = vmul.f32 %v5866_v42, %v4527_v37  ;;  %v4163_v38 = vmul.f32 %v7625_v39, %v4127_v40  ;;  %v4128_v3 = vadd.f32 %v7699_v60, %v3726_v25  ;;  %v3070_v17 = vadd.f32 %v3015_v28, %v2779_v33  ;;  %vm7751_vm1 = vmor %vm4530_vm6, %vm4531_vm2 }
 0x27a   : > { %v5868_v11 = vpop.eup %5867  ;;  %v3727_v58 = vadd.f32 %v3671_v43, %v3069_v7  ;;  %v4537_v55 = vor.u32 1.1754944e-38, %v4536_v32  ;;  %v4549_v45 = vand.u32 2147483647, %v7721_v62  ;;  %v4551_v41 = vand.u32 2147483648, %v7721_v62 }
 0x27b   : > { %v4529_v52 = vadd.f32 %v5866_v42, %v4528_v15  ;;  %v4541_v13 = vmul.f32 %v5868_v11, %v7721_v62  ;;  %v4075_v24 = vpop.f32.mrf.mxu0  ;;  %v7757_v22 = vadd.f32 %v7640_v53, %v4163_v38  ;;  %v4164_v60 = vmul.f32 %v7625_v39, %v4128_v3 }
 0x27c   : > { %v3673_v27 = vpop.f32.mrf.mxu3  ;;  %v4129_v5 = vadd.f32 %v4073_v49, %v3727_v58  ;;  %v2780_v2 = vadd.f32 %v2727_v6, %v6800_v4  ;;  %vm4546_vm3 = vweird.f32 %v5868_v11  ;;  %vm4545_vm4 = vweird.f32 %v7721_v62 }
 0x27d   : > { %v4533_v12 = vsel %vm7751_vm1, %v5866_v42, %v4529_v52  ;;  %v4542_v20 = vsub.f32 1.0, %v4541_v13  ;;  %v3728_v23 = vadd.f32 %v3673_v27, %v3070_v17  ;;  %v5626_v16 = vmul.f32 -1.442695, %v7757_v22  ;;  %v2729_v63 = vpop.f32.mrf.mxu1  ;;  %vm4547_vm5 = vmor %vm4545_vm4, %vm4546_vm3 }
 0x27e   : > { %v7765_v21 = vadd.f32 %v7640_v53, %v4164_v60  ;;  %v4165_v36 = vmul.f32 %v7625_v39, %v4129_v5  ;;  %v4538_v35 = vsel %vm7746_vm0, %v4537_v55, %v4533_v12  ;;  %v4552_v42 = vor.u32 1.1754944e-38, %v4551_v41 }
 0x27f   : > { %v4543_v18 = vmul.f32 %v5868_v11, %v4542_v20  ;;  %v4130_v48 = vadd.f32 %v4075_v24, %v3728_v23  ;;  %v3018_v1 = vpop.f32.mrf.mxu2  ;;  %5869 = vpow2.f32 %v5626_v16  ;;  %vm4550_vm7 = vcmp.eq.f32.partialorder %v4549_v45, 8.507059e+37 }
 0x280   : > { %v5627_v50 = vmul.f32 -1.442695, %v7765_v21  ;;  %v7774_v9 = vadd.f32 %v7640_v53, %v4165_v36  ;;  %v3071_v49 = vadd.f32 %v3018_v1, %v2780_v2  ;;  %v4837_v34 = vmul.f32 %v4538_v35, %v7643_v47 }
 0x281   : > { %v4544_v8 = vadd.f32 %v5868_v11, %v4543_v18  ;;  %v4166_v4 = vmul.f32 %v7625_v39, %v4130_v48  ;;  %v2781_v47 = vadd.f32 %v2729_v63, %v6819_v14 }
 0x282   : > { %5871 = vpow2.f32 %v5627_v50  ;;  %v5628_v43 = vmul.f32 -1.442695, %v7774_v9 }
 0x283   : > { %v4548_v56 = vsel %vm4547_vm5, %v5868_v11, %v4544_v8  ;;  %v7779_v44 = vadd.f32 %v7640_v53, %v4166_v4  ;;  %v4078_v62 = vpop.f32.mrf.mxu0 }
 0x284   : > { %v4553_v57 = vsel %vm4550_vm7, %v4552_v42, %v4548_v56  ;;  %v3676_v31 = vpop.f32.mrf.mxu3  ;;  %5873 = vpow2.f32 %v5628_v43 }
 0x285   : > { %v4838_v10 = vmul.f32 %v4553_v57, %v7677_v61  ;;  %v5629_v19 = vmul.f32 -1.442695, %v7779_v44  ;;  %v3729_v6 = vadd.f32 %v3676_v31, %v3071_v49  ;;  %v5870_v37 = vpop.eup %5869  ;;  %v2732_v46 = vpop.f32.mrf.mxu1 }
 0x286   : > { %v7784_v30 = vadd.f32 1.0, %v5870_v37  ;;  %v2782_v27 = vadd.f32 %v2732_v46, %v6839_v59 }
 0x287   : > { %v5737_v51 = vpack.c.bf16 %v4838_v10, %v4837_v34  ;;  %5875 = vpow2.f32 %v5629_v19  ;;  %v4131_v28 = vadd.f32 %v4078_v62, %v3729_v6  ;;  %v3020_v32 = vpop.f32.mrf.mxu2 }
 0x288   : > { %v5872_v40 = vpop.eup %5871  ;;  %5877 = vrcp.f32 %v7784_v30  ;;  %v3072_v33 = vadd.f32 %v3020_v32, %v2781_v47  ;;  %v4564_v3 = vand.u32 2147483647, %v7784_v30  ;;  %v4566_v17 = vand.u32 2147483648, %v7784_v30 }
 0x289   : > { %5789 = vst [vmem:[%s7325_s21 + $0x30] sm:$0xff] %v5737_v51   ;;  %v7789_v25 = vadd.f32 1.0, %v5872_v40  ;;  %v4167_v61 = vmul.f32 %v7625_v39, %v4131_v28  ;;  %vm4560_vm8 = vweird.f32 %v7784_v30 }
 0x28a   : > { %v5874_v15 = vpop.eup %5873  ;;  %vm7809_vm9 = vcmp.eq.f32.partialorder %v4564_v3, 8.507059e+37  ;;  %v4567_v20 = vor.u32 1.1754944e-38, %v4566_v17 }
 0x28b   : > { %v4080_v7 = vpop.f32.mrf.mxu0  ;;  %5879 = vrcp.f32 %v7789_v25  ;;  %v7795_v52 = vadd.f32 1.0, %v5874_v15  ;;  %v7800_v0 = vadd.f32 %v7640_v53, %v4167_v61  ;;  %v4579_v29 = vand.u32 2147483647, %v7789_v25 }
 0x28c   : > { %v3678_v11 = vpop.f32.mrf.mxu3  ;;  %v4581_v55 = vand.u32 2147483648, %v7789_v25  ;;  %vm4575_vm10 = vweird.f32 %v7789_v25 }
 0x28d   : > { %v5876_v38 = vpop.eup %5875  ;;  %v3730_v13 = vadd.f32 %v3678_v11, %v3072_v33  ;;  %v2734_v58 = vpop.f32.mrf.mxu1  ;;  %5881 = vrcp.f32 %v7795_v52  ;;  %v5630_v41 = vmul.f32 -1.442695, %v7800_v0  ;;  %vm7816_vm11 = vcmp.eq.f32.partialorder %v4579_v29, 8.507059e+37 }
 0x28e   : > { %v7797_v14 = vadd.f32 1.0, %v5876_v38  ;;  %v5878_v24 = vpop.eup %5877  ;;  %v4582_v59 = vor.u32 1.1754944e-38, %v4581_v55  ;;  %v4594_v36 = vand.u32 2147483647, %v7795_v52  ;;  %v4596_v48 = vand.u32 2147483648, %v7795_v52 }
 0x28f   : > { %v3023_v45 = vpop.f32.mrf.mxu2  ;;  %v4556_v60 = vmul.f32 %v5878_v24, %v7784_v30  ;;  %v4132_v16 = vadd.f32 %v4080_v7, %v3730_v13  ;;  %vm4561_vm12 = vweird.f32 %v5878_v24  ;;  %vm4590_vm13 = vweird.f32 %v7795_v52 }
 0x290   : > { %5883 = vrcp.f32 %v7797_v14  ;;  %v3073_v2 = vadd.f32 %v3023_v45, %v2782_v27  ;;  %vm4605_vm14 = vweird.f32 %v7797_v14  ;;  %v4609_v42 = vand.u32 2147483647, %v7797_v14  ;;  %vm7834_vm2 = vmor %vm4560_vm8, %vm4561_vm12 }
 0x291   : > { %v5880_v5 = vpop.eup %5879  ;;  %v4557_v23 = vsub.f32 1.0, %v4556_v60  ;;  %5885 = vpow2.f32 %v5630_v41  ;;  %v4168_v50 = vmul.f32 %v7625_v39, %v4132_v16  ;;  %v4611_v56 = vand.u32 2147483648, %v7797_v14 }
 0x292   : > { %v4571_v63 = vmul.f32 %v5880_v5, %v7789_v25  ;;  %vm4576_vm15 = vweird.f32 %v5880_v5  ;;  %v2783_v51 = vadd.f32 %v2734_v58, %v6858_v26  ;;  %vm4595_vm3 = vcmp.eq.f32.partialorder %v4594_v36, 8.507059e+37 }
 0x293   : > { %v4083_v1 = vpop.f32.mrf.mxu0  ;;  %v4558_v35 = vmul.f32 %v5878_v24, %v4557_v23  ;;  %v5882_v4 = vpop.eup %5881  ;;  %v7829_v31 = vadd.f32 %v7640_v53, %v4168_v50  ;;  %vm4577_vm1 = vmor %vm4575_vm10, %vm4576_vm15  ;;  %v4597_v55 = vor.u32 1.1754944e-38, %v4596_v48  ;;  %vm4610_vm7 = vcmp.eq.f32.partialorder %v4609_v42, 8.507059e+37 }
 0x294   : > { %v3681_v8 = vpop.f32.mrf.mxu3  ;;  %v4572_v49 = vsub.f32 1.0, %v4571_v63  ;;  %v4586_v57 = vmul.f32 %v5882_v4, %v7795_v52  ;;  %vm4591_vm6 = vweird.f32 %v5882_v4 }
 0x295   : > { %v3731_v43 = vadd.f32 %v3681_v8, %v3073_v2  ;;  %v4559_v34 = vadd.f32 %v5878_v24, %v4558_v35  ;;  %v2737_v10 = vpop.f32.mrf.mxu1  ;;  %v5631_v47 = vmul.f32 -1.442695, %v7829_v31  ;;  %vm4592_vm4 = vmor %vm4590_vm13, %vm4591_vm6 }
 0x296   : > { %v5884_v62 = vpop.eup %5883  ;;  %v4573_v6 = vmul.f32 %v5880_v5, %v4572_v49  ;;  %v4587_v40 = vsub.f32 1.0, %v4586_v57 }
 0x297   : > { %v4601_v37 = vmul.f32 %v5884_v62, %v7797_v14  ;;  %v4133_v46 = vadd.f32 %v4083_v1, %v3731_v43  ;;  %v3025_v28 = vpop.f32.mrf.mxu2  ;;  %v4563_v32 = vsel %vm7834_vm2, %v5878_v24, %v4559_v34  ;;  %vm4606_vm0 = vweird.f32 %v5884_v62  ;;  %v5886_v15 = vpop.eup %5885 }
 0x298   : > { %v4574_v61 = vadd.f32 %v5880_v5, %v4573_v6  ;;  %v4568_v7 = vsel %vm7809_vm9, %v4567_v20, %v4563_v32  ;;  %v4588_v26 = vmul.f32 %v5882_v4, %v4587_v40  ;;  %5887 = vpow2.f32 %v5631_v47  ;;  %vm4607_vm5 = vmor %vm4605_vm14, %vm4606_vm0 }
 0x299   : > { %v4602_v30 = vsub.f32 1.0, %v4601_v37  ;;  %v4169_v33 = vmul.f32 %v7625_v39, %v4133_v46  ;;  %v3074_v11 = vadd.f32 %v3025_v28, %v2783_v51  ;;  %v7849_v17 = vadd.f32 1.0, %v5886_v15 }
 0x29a   : > { %v4578_v38 = vsel %vm4577_vm1, %v5880_v5, %v4574_v61  ;;  %v4589_v29 = vadd.f32 %v5882_v4, %v4588_v26  ;;  %v4839_v25 = vmul.f32 %v4568_v7, %v7757_v22  ;;  %v4612_v20 = vor.u32 1.1754944e-38, %v4611_v56 }
 0x29b   : > { %v4603_v3 = vmul.f32 %v5884_v62, %v4602_v30  ;;  %v7852_v13 = vadd.f32 %v7640_v53, %v4169_v33  ;;  %v4085_v58 = vpop.f32.mrf.mxu0  ;;  %v4583_v24 = vsel %vm7816_vm11, %v4582_v59, %v4578_v38  ;;  %5889 = vrcp.f32 %v7849_v17  ;;  %v8119_v59 = vld [vmem:[#allocation4_spill] sm:$0xff] }
 0x29c   : > { %v3683_v45 = vpop.f32.mrf.mxu3  ;;  %v4840_v60 = vmul.f32 %v4583_v24, %v7765_v21  ;;  %v4593_v12 = vsel %vm4592_vm4, %v5882_v4, %v4589_v29  ;;  %v2784_v36 = vadd.f32 %v2737_v10, %v8119_v59  ;;  %v4624_v61 = vand.u32 2147483647, %v7849_v17 }
 0x29d   : > { %v4604_v27 = vadd.f32 %v5884_v62, %v4603_v3  ;;  %v5632_v5 = vmul.f32 -1.442695, %v7852_v13  ;;  %v2739_v22 = vpop.f32.mrf.mxu1  ;;  %v4598_v21 = vsel %vm4595_vm3, %v4597_v55, %v4593_v12  ;;  %v3732_v16 = vadd.f32 %v3683_v45, %v3074_v11  ;;  %v8122_v45 = vld [vmem:[#allocation5_spill] sm:$0xff] }
 0x29e   : > { %v5742_v23 = vpack.c.bf16 %v4840_v60, %v4839_v25  ;;  %v5888_v2 = vpop.eup %5887  ;;  %v4841_v63 = vmul.f32 %v4598_v21, %v7774_v9  ;;  %v2785_v57 = vadd.f32 %v2739_v22, %v6901_v54  ;;  %v4626_v54 = vand.u32 2147483648, %v7849_v17 }
 0x29f   : > { %v4608_v41 = vsel %vm4607_vm5, %v5884_v62, %v4604_v27  ;;  %v3028_v52 = vpop.f32.mrf.mxu2  ;;  %v7870_v48 = vadd.f32 1.0, %v5888_v2  ;;  %5891 = vpow2.f32 %v5632_v5  ;;  %v4134_v1 = vadd.f32 %v4085_v58, %v3732_v16 }
 0x2a0   : > { %v4613_v18 = vsel %vm4610_vm7, %v4612_v20, %v4608_v41  ;;  %5790 = vst [vmem:[%s7325_s21 + $0x38] sm:$0xff] %v5742_v23   ;;  %v3075_v35 = vadd.f32 %v3028_v52, %v2784_v36  ;;  %vm4620_vm9 = vweird.f32 %v7849_v17  ;;  %vm4625_vm12 = vcmp.eq.f32.partialorder %v4624_v61, 8.507059e+37 }
 0x2a1   : > { %v4842_v14 = vmul.f32 %v4613_v18, %v7779_v44  ;;  %v5890_v50 = vpop.eup %5889  ;;  %5893 = vrcp.f32 %v7870_v48  ;;  %v4170_v9 = vmul.f32 %v7625_v39, %v4134_v1  ;;  %v4641_v15 = vand.u32 2147483648, %v7870_v48 }
 0x2a2   : > { %v4616_v49 = vmul.f32 %v5890_v50, %v7849_v17  ;;  %vm4621_vm8 = vweird.f32 %v5890_v50  ;;  %v4639_v38 = vand.u32 2147483647, %v7870_v48  ;;  %v4627_v29 = vor.u32 1.1754944e-38, %v4626_v54 }
 0x2a3   : > { %v5747_v8 = vpack.c.bf16 %v4842_v14, %v4841_v63  ;;  %v4088_v4 = vpop.f32.mrf.mxu0  ;;  %v7877_v44 = vadd.f32 %v7640_v53, %v4170_v9  ;;  %vm7893_vm10 = vmor %vm4620_vm9, %vm4621_vm8  ;;  %vm4635_vm13 = vweird.f32 %v7870_v48  ;;  %v4642_v20 = vor.u32 1.1754944e-38, %v4641_v15 }
 0x2a4   : > { %v3686_v42 = vpop.f32.mrf.mxu3  ;;  %v4617_v43 = vsub.f32 1.0, %v4616_v49  ;;  %vm4640_vm15 = vcmp.eq.f32.partialorder %v4639_v38, 8.507059e+37 }
 0x2a5   : > { %5791 = vst [vmem:[%s7325_s21 + $0x40] sm:$0xff] %v5747_v8   ;;  %v3733_v56 = vadd.f32 %v3686_v42, %v3075_v35  ;;  %v5892_v62 = vpop.eup %5891  ;;  %v5633_v37 = vmul.f32 -1.442695, %v7877_v44  ;;  %v2742_v46 = vpop.f32.mrf.mxu1  ;;  %v8123_v42 = vld [vmem:[#allocation6_spill] sm:$0xff] }
 0x2a6   : > { %v4618_v19 = vmul.f32 %v5890_v50, %v4617_v43  ;;  %v7880_v6 = vadd.f32 1.0, %v5892_v62  ;;  %v2786_v25 = vadd.f32 %v2742_v46, %v8122_v45 }
 0x2a7   : > { %v4135_v34 = vadd.f32 %v4088_v4, %v3733_v56  ;;  %v3030_v10 = vpop.f32.mrf.mxu2  ;;  %v5894_v51 = vpop.eup %5893 }
 0x2a8   : > { %v3076_v32 = vadd.f32 %v3030_v10, %v2785_v57  ;;  %v4619_v40 = vadd.f32 %v5890_v50, %v4618_v19  ;;  %v4631_v47 = vmul.f32 %v5894_v51, %v7870_v48  ;;  %5895 = vrcp.f32 %v7880_v6 }
 0x2a9   : > { %v4171_v28 = vmul.f32 %v7625_v39, %v4135_v34  ;;  %5897 = vpow2.f32 %v5633_v37  ;;  %vm4636_vm11 = vweird.f32 %v5894_v51  ;;  %v4654_v19 = vand.u32 2147483647, %v7880_v6 }
 0x2aa   : > { %v4632_v33 = vsub.f32 1.0, %v4631_v47  ;;  %v4623_v58 = vsel %vm7893_vm10, %v5890_v50, %v4619_v40  ;;  %vm4637_vm14 = vmor %vm4635_vm13, %vm4636_vm11  ;;  %v4656_v37 = vand.u32 2147483648, %v7880_v6  ;;  %vm4650_vm6 = vweird.f32 %v7880_v6 }
 0x2ab   : > { %v4090_v30 = vpop.f32.mrf.mxu0  ;;  %v7891_v7 = vadd.f32 %v7640_v53, %v4171_v28  ;;  %v4628_v22 = vsel %vm4625_vm12, %v4627_v29, %v4623_v58  ;;  %vm4655_vm3 = vcmp.eq.f32.partialorder %v4654_v19, 8.507059e+37 }
 0x2ac   : > { %v3688_v26 = vpop.f32.mrf.mxu3  ;;  %v4633_v24 = vmul.f32 %v5894_v51, %v4632_v33  ;;  %v4843_v36 = vmul.f32 %v4628_v22, %v7800_v0 }
 0x2ad   : > { %v3734_v3 = vadd.f32 %v3688_v26, %v3076_v32  ;;  %v5634_v17 = vmul.f32 -1.442695, %v7891_v7  ;;  %v2744_v2 = vpop.f32.mrf.mxu1 }
 0x2ae   : > { %v7902_v27 = vpop.eup %5895  ;;  %v4634_v12 = vadd.f32 %v5894_v51, %v4633_v24  ;;  %v2787_v56 = vadd.f32 %v2744_v2, %v8123_v42  ;;  %v4657_v24 = vor.u32 1.1754944e-38, %v4656_v37 }
 0x2af   : > { %v4136_v55 = vadd.f32 %v4090_v30, %v3734_v3  ;;  %v3033_v60 = vpop.f32.mrf.mxu2  ;;  %5899 = vpow2.f32 %v5634_v17  ;;  %v5898_v5 = vpop.eup %5897  ;;  %v4646_v23 = vmul.f32 %v7902_v27, %v7880_v6  ;;  %vm4651_vm2 = vweird.f32 %v7902_v27 }
 0x2b0   : > { %v3077_v41 = vadd.f32 %v3033_v60, %v2786_v25  ;;  %v4638_v16 = vsel %vm4637_vm14, %v5894_v51, %v4634_v12  ;;  %v7908_v52 = vadd.f32 1.0, %v5898_v5  ;;  %vm7933_vm0 = vmor %vm4650_vm6, %vm4651_vm2 }
 0x2b1   : > { %v4172_v21 = vmul.f32 %v7625_v39, %v4136_v55  ;;  %v4643_v63 = vsel %vm4640_vm15, %v4642_v20, %v4638_v16  ;;  %v4647_v18 = vsub.f32 1.0, %v4646_v23  ;;  %v8126_v55 = vld [vmem:[#allocation7_spill] sm:$0xff] }
 0x2b2   : > { %v4844_v14 = vmul.f32 %v4643_v63, %v7829_v31  ;;  %5901 = vrcp.f32 %v7908_v52  ;;  %v4669_v54 = vand.u32 2147483647, %v7908_v52  ;;  %v4671_v30 = vand.u32 2147483648, %v7908_v52 }
 0x2b3   : > { %v7911_v59 = vadd.f32 %v7640_v53, %v4172_v21  ;;  %v4093_v48 = vpop.f32.mrf.mxu0  ;;  %v4648_v49 = vmul.f32 %v7902_v27, %v4647_v18  ;;  %vm4665_vm4 = vweird.f32 %v7908_v52 }
 0x2b4   : > { %v3691_v1 = vpop.f32.mrf.mxu3  ;;  %v5752_v4 = vpack.c.bf16 %v4844_v14, %v4843_v36  ;;  %v4672_v60 = vor.u32 1.1754944e-38, %v4671_v30  ;;  %vm4670_vm7 = vcmp.eq.f32.partialorder %v4669_v54, 8.507059e+37 }
 0x2b5   : > { %v5635_v35 = vmul.f32 -1.442695, %v7911_v59  ;;  %v3735_v50 = vadd.f32 %v3691_v1, %v3077_v41  ;;  %v5900_v8 = vpop.eup %5899  ;;  %v4649_v57 = vadd.f32 %v7902_v27, %v4648_v49  ;;  %v2747_v28 = vpop.f32.mrf.mxu1 }
 0x2b6   : > { %v7918_v9 = vadd.f32 1.0, %v5900_v8  ;;  %5792 = vst [vmem:[%s7325_s21 + $0x48] sm:$0xff] %v5752_v4   ;;  %v2788_v45 = vadd.f32 %v2747_v28, %v8126_v55 }
 0x2b7   : > { %5903 = vpow2.f32 %v5635_v35  ;;  %v3035_v43 = vpop.f32.mrf.mxu2  ;;  %v4137_v0 = vadd.f32 %v4093_v48, %v3735_v50  ;;  %v4653_v6 = vsel %vm7933_vm0, %v7902_v27, %v4649_v57 }
 0x2b8   : > { %5905 = vrcp.f32 %v7918_v9  ;;  %v3078_v31 = vadd.f32 %v3035_v43, %v2787_v56  ;;  %v5902_v62 = vpop.eup %5901  ;;  %v4658_v25 = vsel %vm4655_vm3, %v4657_v24, %v4653_v6  ;;  %vm4680_vm9 = vweird.f32 %v7918_v9  ;;  %v8127_v56 = vld [vmem:[#allocation8_spill] sm:$0xff] }
 0x2b9   : > { %v4173_v34 = vmul.f32 %v7625_v39, %v4137_v0  ;;  %v4661_v10 = vmul.f32 %v5902_v62, %v7908_v52  ;;  %vm4666_vm1 = vweird.f32 %v5902_v62  ;;  %v4845_v41 = vmul.f32 %v4658_v25, %v7852_v13 }
 0x2ba   : > { %vm4667_vm5 = vmor %vm4665_vm4, %vm4666_vm1  ;;  %v4686_v13 = vand.u32 2147483648, %v7918_v9  ;;  %v4684_v4 = vand.u32 2147483647, %v7918_v9 }
 0x2bb   : > { %v7930_v46 = vadd.f32 %v7640_v53, %v4173_v34  ;;  %v4662_v40 = vsub.f32 1.0, %v4661_v10  ;;  %v4095_v26 = vpop.f32.mrf.mxu0 }
 0x2bc   : > { %v3693_v51 = vpop.f32.mrf.mxu3  ;;  %v4687_v19 = vor.u32 1.1754944e-38, %v4686_v13  ;;  %vm4685_vm12 = vcmp.eq.f32.partialorder %v4684_v4, 8.507059e+37 }
 0x2bd   : > { %v5904_v32 = vpop.eup %5903  ;;  %v3736_v47 = vadd.f32 %v3693_v51, %v3078_v31  ;;  %v5636_v15 = vmul.f32 -1.442695, %v7930_v46  ;;  %v4663_v38 = vmul.f32 %v5902_v62, %v4662_v40  ;;  %v2749_v18 = vpop.f32.mrf.mxu1 }
 0x2be   : > { %v7939_v33 = vadd.f32 1.0, %v5904_v32  ;;  %v7942_v11 = vpop.eup %5905  ;;  %v2789_v43 = vadd.f32 %v2749_v18, %v8127_v56 }
 0x2bf   : > { %v4138_v3 = vadd.f32 %v4095_v26, %v3736_v47  ;;  %v3038_v58 = vpop.f32.mrf.mxu2  ;;  %v4676_v17 = vmul.f32 %v7942_v11, %v7918_v9  ;;  %v4664_v29 = vadd.f32 %v5902_v62, %v4663_v38  ;;  %vm4681_vm8 = vweird.f32 %v7942_v11 }
 0x2c0   : > { %5907 = vrcp.f32 %v7939_v33  ;;  %v3079_v5 = vadd.f32 %v3038_v58, %v2788_v45  ;;  %vm7972_vm10 = vmor %vm4680_vm9, %vm4681_vm8  ;;  %v4699_v31 = vand.u32 2147483647, %v7939_v33  ;;  %vm4695_vm13 = vweird.f32 %v7939_v33 }
 0x2c1   : > { %5909 = vpow2.f32 %v5636_v15  ;;  %v4677_v27 = vsub.f32 1.0, %v4676_v17  ;;  %v4174_v12 = vmul.f32 %v7625_v39, %v4138_v3  ;;  %v4668_v20 = vsel %vm4667_vm5, %v5902_v62, %v4664_v29 }
 0x2c2   : > { %v4673_v22 = vsel %vm4670_vm7, %v4672_v60, %v4668_v20  ;;  %v4701_v62 = vand.u32 2147483648, %v7939_v33  ;;  %vm4700_vm15 = vcmp.eq.f32.partialorder %v4699_v31, 8.507059e+37 }
 0x2c3   : > { %v4678_v23 = vmul.f32 %v7942_v11, %v4677_v27  ;;  %v7955_v21 = vadd.f32 %v7640_v53, %v4174_v12  ;;  %v4846_v16 = vmul.f32 %v4673_v22, %v7877_v44 }
 0x2c4   : > { %v4702_v40 = vor.u32 1.1754944e-38, %v4701_v62 }
 0x2c5   : > { %v5637_v2 = vmul.f32 -1.442695, %v7955_v21  ;;  %v5757_v14 = vpack.c.bf16 %v4846_v16, %v4845_v41  ;;  %v4679_v48 = vadd.f32 %v7942_v11, %v4678_v23  ;;  %v4098_v50 = vpop.f32.mrf.mxu0  ;;  %v8130_v16 = vld [vmem:[#allocation9_spill] sm:$0xff] }
 0x2c6   : > { %v5908_v52 = vpop.eup %5907 }
 0x2c7   : > { %v3696_v63 = vpop.f32.mrf.mxu3  ;;  %v5910_v36 = vpop.eup %5909  ;;  %v4691_v1 = vmul.f32 %v5908_v52, %v7939_v33  ;;  %5911 = vpow2.f32 %v5637_v2  ;;  %5793 = vst [vmem:[%s7325_s21 + $0x50] sm:$0xff] %v5757_v14   ;;  %vm4696_vm11 = vweird.f32 %v5908_v52  ;;  %v4683_v9 = vsel %vm7972_vm10, %v7942_v11, %v4679_v48 }
 0x2c8   : > { %v3737_v35 = vadd.f32 %v3696_v63, %v3079_v5  ;;  %v7965_v44 = vadd.f32 1.0, %v5910_v36  ;;  %v3040_v8 = vpop.f32.mrf.mxu2  ;;  %v4688_v32 = vsel %vm4685_vm12, %v4687_v19, %v4683_v9  ;;  %vm4697_vm14 = vmor %vm4695_vm13, %vm4696_vm11 }
 0x2c9   : > { %v4692_v49 = vsub.f32 1.0, %v4691_v1  ;;  %v3080_v10 = vadd.f32 %v3040_v8, %v2789_v43  ;;  %v4847_v33 = vmul.f32 %v4688_v32, %v7891_v7  ;;  %v8019_v32 = vld [vmem:[%s8056_s3] ss:$0 sm:$0xff] }
 0x2ca   : > { %v4139_v42 = vadd.f32 %v4098_v50, %v3737_v35  ;;  %5913 = vrcp.f32 %v7965_v44  ;;  %v4716_v12 = vand.u32 2147483648, %v7965_v44  ;;  %vm4710_vm6 = vweird.f32 %v7965_v44 }
 0x2cb   : > { %v4693_v34 = vmul.f32 %v5908_v52, %v4692_v49 }
 0x2cc   : > { %v4175_v57 = vmul.f32 %v7625_v39, %v4139_v42  ;;  %v4717_v18 = vor.u32 1.1754944e-38, %v4716_v12 }
 0x2cd   : > { %v4694_v37 = vadd.f32 %v5908_v52, %v4693_v34  ;;  %v5912_v28 = vpop.eup %5911  ;;  %v4100_v3 = vpop.f32.mrf.mxu0 }
 0x2ce   : > { %v7985_v51 = vadd.f32 %v7640_v53, %v4175_v57  ;;  %v4338_v54 = vadd.f32 1.0, %v5912_v28 }
 0x2cf   : > { %v3698_v47 = vpop.f32.mrf.mxu3  ;;  %v4698_v61 = vsel %vm4697_vm14, %v5908_v52, %v4694_v37  ;;  %v2752_v60 = vpop.f32.mrf.mxu1  ;;  %v8013_v37 = vld [vmem:[%s8055_s2] ss:$0 sm:$0xff] }
 0x2d0   : > { %v5638_v30 = vmul.f32 -1.442695, %v7985_v51  ;;  %v3738_v15 = vadd.f32 %v3698_v47, %v3080_v10  ;;  %v5914_v26 = vpop.eup %5913  ;;  %v4703_v11 = vsel %vm4700_vm15, %v4702_v40, %v4698_v61  ;;  %5915 = vrcp.f32 %v4338_v54  ;;  %v3043_v22 = vpop.f32.mrf.mxu2  ;;  %v8131_v10 = vld [vmem:[#allocation10_spill] sm:$0xff] }
 0x2d1   : > { %v4848_v6 = vmul.f32 %v4703_v11, %v7911_v59  ;;  %v4706_v38 = vmul.f32 %v5914_v26, %v7965_v44  ;;  %vm4711_vm2 = vweird.f32 %v5914_v26  ;;  %v4731_v41 = vand.u32 2147483648, %v4338_v54 }
 0x2d2   : > { %5917 = vpow2.f32 %v5638_v30  ;;  %v4140_v17 = vadd.f32 %v4100_v3, %v3738_v15  ;;  %vm4712_vm0 = vmor %vm4710_vm6, %vm4711_vm2  ;;  %v2790_v52 = vadd.f32 %v2752_v60, %v8130_v16  ;;  %vm4725_vm4 = vweird.f32 %v4338_v54 }
 0x2d3   : > { %v5762_v58 = vpack.c.bf16 %v4848_v6, %v4847_v33  ;;  %v4707_v24 = vsub.f32 1.0, %v4706_v38  ;;  %v4732_v1 = vor.u32 1.1754944e-38, %v4731_v41 }
 0x2d4   : > { %v4176_v55 = vmul.f32 %v7625_v39, %v4140_v17  ;;  %v4714_v39 = vand.u32 2147483647, %v7965_v44  ;;  %v3081_v14 = vadd.f32 %v3043_v22, %v2790_v52  ;;  %v8132_v52 = vld [vmem:[#allocation11_spill] sm:$0xff] }
 0x2d5   : > { %5794 = vst [vmem:[%s7325_s21 + $0x58] sm:$0xff] %v5762_v58   ;;  %v4708_v29 = vmul.f32 %v5914_v26, %v4707_v24 }
 0x2d6   : > { %v5916_v45 = vpop.eup %5915  ;;  %v7995_v25 = vadd.f32 %v7640_v53, %v4176_v55  ;;  %v4729_v53 = vand.u32 2147483647, %v4338_v54  ;;  %vm4715_vm3 = vcmp.eq.f32.partialorder %v4714_v39, 8.507059e+37 }
 0x2d7   : > { %v4709_v27 = vadd.f32 %v5914_v26, %v4708_v29  ;;  %v4721_v59 = vmul.f32 %v5916_v45, %v4338_v54  ;;  %vm4726_vm1 = vweird.f32 %v5916_v45  ;;  %v2754_v8 = vpop.f32.mrf.mxu1 }
 0x2d8   : > { %v5918_v7 = vpop.eup %5917  ;;  %v5639_v5 = vmul.f32 -1.442695, %v7995_v25  ;;  %vm4727_vm5 = vmor %vm4725_vm4, %vm4726_vm1  ;;  %vm4730_vm7 = vcmp.eq.f32.partialorder %v4729_v53, 8.507059e+37  ;;  %v3045_v62 = vpop.f32.mrf.mxu2  ;;  %v2791_v19 = vadd.f32 %v2754_v8, %v8131_v10 }
 0x2d9   : > { %v7998_v20 = vadd.f32 1.0, %v5918_v7  ;;  %v4722_v23 = vsub.f32 1.0, %v4721_v59  ;;  %v4713_v2 = vsel %vm4712_vm0, %v5914_v26, %v4709_v27 }
 0x2da   : > { %v4718_v48 = vsel %vm4715_vm3, %v4717_v18, %v4713_v2 }
 0x2db   : > { %5919 = vrcp.f32 %v7998_v20  ;;  %v4723_v63 = vmul.f32 %v5916_v45, %v4722_v23  ;;  %v4849_v49 = vmul.f32 %v4718_v48, %v7930_v46  ;;  %v4746_v33 = vand.u32 2147483648, %v7998_v20 }
 0x2dc   : > { %5921 = vpow2.f32 %v5639_v5  ;;  %vm4740_vm9 = vweird.f32 %v7998_v20  ;;  %v4744_v38 = vand.u32 2147483647, %v7998_v20 }
 0x2dd   : > { %v4724_v36 = vadd.f32 %v5916_v45, %v4723_v63 }
 0x2de   : > { %v4103_v43 = vpop.f32.mrf.mxu0  ;;  %vm4745_vm12 = vcmp.eq.f32.partialorder %v4744_v38, 8.507059e+37 }
 0x2df   : > { %v4728_v35 = vsel %vm4727_vm5, %v5916_v45, %v4724_v36  ;;  %v4747_v45 = vor.u32 1.1754944e-38, %v4746_v33 }
 0x2e0   : > { %v4733_v44 = vsel %vm4730_vm7, %v4732_v1, %v4728_v35  ;;  %v3048_v23 = vpop.f32.mrf.mxu2 }
 0x2e1   : > { %v5920_v13 = vpop.eup %5919  ;;  %v3701_v50 = vpop.f32.mrf.mxu3  ;;  %v4850_v42 = vmul.f32 %v4733_v44, %v7955_v21  ;;  %v3082_v21 = vadd.f32 %v3045_v62, %v2791_v19 }
 0x2e2   : > { %v5922_v4 = vpop.eup %5921  ;;  %v4736_v56 = vmul.f32 %v5920_v13, %v7998_v20  ;;  %v3739_v0 = vadd.f32 %v3701_v50, %v3081_v14  ;;  %vm4741_vm8 = vweird.f32 %v5920_v13 }
 0x2e3   : > { %v4340_v31 = vadd.f32 1.0, %v5922_v4  ;;  %v5767_v9 = vpack.c.bf16 %v4850_v42, %v4849_v49  ;;  %vm4742_vm10 = vmor %vm4740_vm9, %vm4741_vm8 }
 0x2e4   : > { %v4737_v34 = vsub.f32 1.0, %v4736_v56  ;;  %v4141_v57 = vadd.f32 %v4103_v43, %v3739_v0 }
 0x2e5   : > { %5923 = vrcp.f32 %v4340_v31  ;;  %5795 = vst [vmem:[%s7325_s21 + $0x60] sm:$0xff] %v5767_v9   ;;  %v4761_v58 = vand.u32 2147483648, %v4340_v31  ;;  %v4759_v55 = vand.u32 2147483647, %v4340_v31  ;;  %vm4755_vm13 = vweird.f32 %v4340_v31 }
 0x2e6   : > { %v4177_v46 = vmul.f32 %v8013_v37, %v4141_v57  ;;  %v4738_v28 = vmul.f32 %v5920_v13, %v4737_v34  ;;  %v4105_v11 = vpop.f32.mrf.mxu0 }
 0x2e7   : > { %v4762_v20 = vor.u32 1.1754944e-38, %v4761_v58  ;;  %vm4760_vm15 = vcmp.eq.f32.partialorder %v4759_v55, 8.507059e+37 }
 0x2e8   : > { %v8022_v40 = vadd.f32 %v8019_v32, %v4177_v46  ;;  %v4739_v15 = vadd.f32 %v5920_v13, %v4738_v28  ;;  %v3050_v4 = vpop.f32.mrf.mxu2 }
 0x2e9   : > { %v3703_v47 = vpop.f32.mrf.mxu3 }
 0x2ea   : > { %v5640_v61 = vmul.f32 -1.442695, %v8022_v40  ;;  %v3740_v54 = vadd.f32 %v3703_v47, %v3082_v21  ;;  %v4743_v17 = vsel %vm4742_vm10, %v5920_v13, %v4739_v15  ;;  %v2757_v7 = vpop.f32.mrf.mxu1 }
 0x2eb   : > { %v5924_v30 = vpop.eup %5923  ;;  %v4748_v12 = vsel %vm4745_vm12, %v4747_v45, %v4743_v17  ;;  %v2792_v2 = vadd.f32 %v2757_v7, %v8132_v52 }
 0x2ec   : > { %v4751_v26 = vmul.f32 %v5924_v30, %v4340_v31  ;;  %5925 = vpow2.f32 %v5640_v61  ;;  %v4142_v6 = vadd.f32 %v4105_v11, %v3740_v54  ;;  %vm4756_vm11 = vweird.f32 %v5924_v30 }
 0x2ed   : > { %vm4757_vm14 = vmor %vm4755_vm13, %vm4756_vm11  ;;  %v4851_v41 = vmul.f32 %v4748_v12, %v7985_v51  ;;  %v3083_v18 = vadd.f32 %v3048_v23, %v2792_v2  ;;  %v8133_v51 = vld [vmem:[#allocation12_spill] sm:$0xff] }
 0x2ee   : > { %v4752_v3 = vsub.f32 1.0, %v4751_v26  ;;  %v4178_v24 = vmul.f32 %v8013_v37, %v4142_v6 }
 0x2f0   : > { %v4753_v29 = vmul.f32 %v5924_v30, %v4752_v3  ;;  %v8030_v60 = vadd.f32 %v8019_v32, %v4178_v24 }
 0x2f2   : > { %v5926_v27 = vpop.eup %5925  ;;  %v4754_v59 = vadd.f32 %v5924_v30, %v4753_v29  ;;  %v5641_v22 = vmul.f32 -1.442695, %v8030_v60  ;;  %v2759_v14 = vpop.f32.mrf.mxu1 }
 0x2f3   : > { %v4341_v5 = vadd.f32 1.0, %v5926_v27  ;;  %v2793_v49 = vadd.f32 %v2759_v14, %v8133_v51 }
 0x2f4   : > { %v4758_v39 = vsel %vm4757_vm14, %v5924_v30, %v4754_v59 }
 0x2f5   : > { %v4763_v53 = vsel %vm4760_vm15, %v4762_v20, %v4758_v39  ;;  %5927 = vrcp.f32 %v4341_v5  ;;  %v4108_v35 = vpop.f32.mrf.mxu0  ;;  %v3084_v42 = vadd.f32 %v3050_v4, %v2793_v49  ;;  %v4776_v46 = vand.u32 2147483648, %v4341_v5 }
 0x2f6   : > { %v4852_v16 = vmul.f32 %v4763_v53, %v7995_v25  ;;  %5929 = vpow2.f32 %v5641_v22  ;;  %vm4770_vm6 = vweird.f32 %v4341_v5  ;;  %v4774_v28 = vand.u32 2147483647, %v4341_v5 }
 0x2f7   : > { %v4777_v11 = vor.u32 1.1754944e-38, %v4776_v46 }
 0x2f8   : > { %v5772_v63 = vpack.c.bf16 %v4852_v16, %v4851_v41  ;;  %vm4775_vm3 = vcmp.eq.f32.partialorder %v4774_v28, 8.507059e+37 }
 0x2fa   : > { %5796 = vst [vmem:[%s7325_s21 + $0x68] sm:$0xff] %v5772_v63  }
 0x2fb   : > { %v5928_v36 = vpop.eup %5927  ;;  %v3706_v13 = vpop.f32.mrf.mxu3 }
 0x2fc   : > { %v5930_v48 = vpop.eup %5929  ;;  %v4766_v1 = vmul.f32 %v5928_v36, %v4341_v5  ;;  %v3741_v50 = vadd.f32 %v3706_v13, %v3083_v18  ;;  %vm4771_vm2 = vweird.f32 %v5928_v36 }
 0x2fd   : > { %v4342_v44 = vadd.f32 1.0, %v5930_v48  ;;  %v4110_v19 = vpop.f32.mrf.mxu0  ;;  %vm4772_vm0 = vmor %vm4770_vm6, %vm4771_vm2 }
 0x2fe   : > { %v4767_v8 = vsub.f32 1.0, %v4766_v1  ;;  %v4143_v25 = vadd.f32 %v4108_v35, %v3741_v50 }
 0x2ff   : > { %5931 = vrcp.f32 %v4342_v44  ;;  %v4791_v61 = vand.u32 2147483648, %v4342_v44  ;;  %v4789_v26 = vand.u32 2147483647, %v4342_v44  ;;  %vm4785_vm4 = vweird.f32 %v4342_v44 }
 0x300   : > { %v4768_v56 = vmul.f32 %v5928_v36, %v4767_v8  ;;  %v4179_v43 = vmul.f32 %v8013_v37, %v4143_v25 }
 0x301   : > { %v4792_v3 = vor.u32 1.1754944e-38, %v4791_v61  ;;  %vm4790_vm7 = vcmp.eq.f32.partialorder %v4789_v26, 8.507059e+37 }
 0x302   : > { %v8040_v0 = vadd.f32 %v8019_v32, %v4179_v43  ;;  %v4769_v34 = vadd.f32 %v5928_v36, %v4768_v56 }
 0x303   : > { %v3708_v31 = vpop.f32.mrf.mxu3 }
 0x304   : > { %v3742_v9 = vadd.f32 %v3708_v31, %v3084_v42  ;;  %v5642_v10 = vmul.f32 -1.442695, %v8040_v0  ;;  %v4773_v30 = vsel %vm4772_vm0, %v5928_v36, %v4769_v34 }
 0x305   : > { %v5932_v62 = vpop.eup %5931  ;;  %v4778_v38 = vsel %vm4775_vm3, %v4777_v11, %v4773_v30 }
 0x306   : > { %v4781_v57 = vmul.f32 %v5932_v62, %v4342_v44  ;;  %v4144_v21 = vadd.f32 %v4110_v19, %v3742_v9  ;;  %5933 = vpow2.f32 %v5642_v10  ;;  %vm4786_vm1 = vweird.f32 %v5932_v62 }
 0x307   : > { %vm4787_vm5 = vmor %vm4785_vm4, %vm4786_vm1  ;;  %v4853_v55 = vmul.f32 %v4778_v38, %v8022_v40 }
 0x308   : > { %v4782_v47 = vsub.f32 1.0, %v4781_v57  ;;  %v4180_v54 = vmul.f32 %v8013_v37, %v4144_v21 }
 0x30a   : > { %v4783_v15 = vmul.f32 %v5932_v62, %v4782_v47  ;;  %v4216_v33 = vadd.f32 %v8019_v32, %v4180_v54 }
 0x30c   : > { %v4784_v6 = vadd.f32 %v5932_v62, %v4783_v15  ;;  %v5643_v58 = vmul.f32 -1.442695, %v4216_v33  ;;  %v5934_v24 = vpop.eup %5933 }
 0x30d   : > { %v4343_v37 = vadd.f32 1.0, %v5934_v24 }
 0x30e   : > { %v4788_v17 = vsel %vm4787_vm5, %v5932_v62, %v4784_v6  ;;  %5935 = vpow2.f32 %v5643_v58 }
 0x30f   : > { %v4793_v29 = vsel %vm4790_vm7, %v4792_v3, %v4788_v17  ;;  %5937 = vrcp.f32 %v4343_v37  ;;  %v4806_v53 = vand.u32 2147483648, %v4343_v37  ;;  %vm4800_vm9 = vweird.f32 %v4343_v37 }
 0x310   : > { %v4854_v45 = vmul.f32 %v4793_v29, %v8030_v60  ;;  %v4804_v41 = vand.u32 2147483647, %v4343_v37 }
 0x311   : > { %v4807_v63 = vor.u32 1.1754944e-38, %v4806_v53 }
 0x312   : > { %v5777_v32 = vpack.c.bf16 %v4854_v45, %v4853_v55  ;;  %vm4805_vm12 = vcmp.eq.f32.partialorder %v4804_v41, 8.507059e+37 }
 0x314   : > { %5797 = vst [vmem:[%s7325_s21 + $0x70] sm:$0xff] %v5777_v32   ;;  %v5936_v7 = vpop.eup %5935 }
 0x315   : > { %v4344_v27 = vadd.f32 1.0, %v5936_v7  ;;  %v5938_v59 = vpop.eup %5937 }
 0x316   : > { %v4796_v12 = vmul.f32 %v5938_v59, %v4343_v37  ;;  %vm4801_vm8 = vweird.f32 %v5938_v59 }
 0x317   : > { %5939 = vrcp.f32 %v4344_v27  ;;  %vm4802_vm10 = vmor %vm4800_vm9, %vm4801_vm8  ;;  %v4821_v60 = vand.u32 2147483648, %v4344_v27  ;;  %v4819_v2 = vand.u32 2147483647, %v4344_v27  ;;  %vm4815_vm13 = vweird.f32 %v4344_v27 }
 0x318   : > { %v4797_v20 = vsub.f32 1.0, %v4796_v12 }
 0x319   : > { %v4822_v14 = vor.u32 1.1754944e-38, %v4821_v60  ;;  %vm4820_vm15 = vcmp.eq.f32.partialorder %v4819_v2, 8.507059e+37 }
 0x31a   : > { %v4798_v5 = vmul.f32 %v5938_v59, %v4797_v20 }
 0x31c   : > { %v4799_v39 = vadd.f32 %v5938_v59, %v4798_v5 }
 0x31d   : > { %v5940_v22 = vpop.eup %5939 }
 0x31e   : > { %v4811_v23 = vmul.f32 %v5940_v22, %v4344_v27  ;;  %v4803_v16 = vsel %vm4802_vm10, %v5938_v59, %v4799_v39  ;;  %vm4816_vm11 = vweird.f32 %v5940_v22 }
 0x31f   : > { %v4808_v36 = vsel %vm4805_vm12, %v4807_v63, %v4803_v16  ;;  %vm4817_vm14 = vmor %vm4815_vm13, %vm4816_vm11 }
 0x320   : > { %v4812_v40 = vsub.f32 1.0, %v4811_v23  ;;  %v4855_v35 = vmul.f32 %v4808_v36, %v8040_v0 }
 0x322   : > { %v4813_v52 = vmul.f32 %v5940_v22, %v4812_v40 }
 0x324   : > { %v4814_v18 = vadd.f32 %v5940_v22, %v4813_v52 }
 0x326   : > { %v4818_v48 = vsel %vm4817_vm14, %v5940_v22, %v4814_v18 }
 0x327   : > { %v4823_v1 = vsel %vm4820_vm15, %v4822_v14, %v4818_v48 }
 0x328   : > { %v4856_v13 = vmul.f32 %v4823_v1, %v4216_v33 }
 0x32a   : > { %v5782_v44 = vpack.c.bf16 %v4856_v13, %v4855_v35 }
 0x32c   : > { %5798 = vst [vmem:[%s7325_s21 + $0x78] sm:$0xff] %v5782_v44  }
 0x32d PF: > { %s14_s15 = sadd.s32 1, %s6001_s15  }
 0x32e   : > { %p11_p4 = scmp.ge.s32.totalorder %s14_s15, 4  }
 0x330   :  { %13 = sbr.rel (!%p11_p4) target bundleno = 1 (0x1), region = 76 }

</bundles_post_ra>
